<compile_context>
chip_gen: v7x
topology: tpu7x:2x2x1
jax: 0.10.0
libtpu: 0.0.40
codegen_flags: <defaults>
</compile_context>

<pallas_src>
import math

import jax
import jax.numpy as jnp
from jax import lax
from jax.experimental import pallas as pl
from jax.experimental.pallas import tpu as pltpu

# ----------------------------- model hyper-params ---------------------------
HIDDEN = 32                     # hidden_size (must be divisible by NHEAD)
CONTEXT = 64                    # context_size (small, instead of default 512)
METRIC = 4                      # metric_size
NHEAD = 2                       # nn.TransformerEncoderLayer(nhead=2)
HEAD_DIM = HIDDEN // NHEAD
NLAYERS = 3                     # nn.TransformerEncoder(num_layers=3)
FFN = 2048                      # PyTorch default dim_feedforward
SEARCH_SPACE = [4] * 30         # synthetic SEARCH_SPACE (30 knobs)
NUM_TOKENS = sum(SEARCH_SPACE)  # embedding table size
SEQ = 1 + len(SEARCH_SPACE)     # 1 context token + 30 config tokens = 31
SEQ_PAD = 32                    # sublane-aligned padded sequence length
LN_EPS = 1e-5
NEG_INF = -1e30


# ------------------------------ Pallas kernel --------------------------------
def fused_kernel(ctx_ref, emb_ref,
                 hwcw_ref, hwcb_ref, hw2w_ref, hw2b_ref, hw3w_ref, hw3b_ref,
                 wq_ref, bq_ref, wk_ref, bk_ref, wv_ref, bv_ref,
                 opw_ref, opb_ref, n1w_ref, n1b_ref,
                 l1w_ref, l1b_ref, l2w_ref, l2b_ref,
                 n2w_ref, n2b_ref, pw_ref, pb_ref,
                 out_ref):
    """Highway + (concat/add embeddings) + 3-layer encoder + predictor.

    Processes one batch block of BB samples per grid step.
    """
    BB = ctx_ref.shape[0]
    M = BB * SEQ_PAD
    scale = 1.0 / math.sqrt(HEAD_DIM)

    def sigmoid(z):
        return pl.reciprocal(1.0 + jnp.exp(-z), approx=True)

    def layernorm(y, w, b):
        mu = jnp.mean(y, axis=-1, keepdims=True)
        var = jnp.mean((y - mu) ** 2, axis=-1, keepdims=True)
        return (y - mu) * lax.rsqrt(var + LN_EPS) * w + b

    # ---- HighWayNetwork on the context vectors (w1 | wg | wt fused) --------
    xc = ctx_ref[...]                                                  # [BB, C]
    z = jnp.dot(xc, hwcw_ref[...], preferred_element_type=jnp.float32) + hwcb_ref[...]
    h = jnp.maximum(z[:, 0:HIDDEN], 0.0)
    h = jnp.maximum(jnp.dot(h, hw2w_ref[...], preferred_element_type=jnp.float32)
                    + hw2b_ref[...], 0.0)
    h = jnp.maximum(jnp.dot(h, hw3w_ref[...], preferred_element_type=jnp.float32)
                    + hw3b_ref[...], 0.0)
    g = sigmoid(z[:, HIDDEN:2 * HIDDEN])
    t = z[:, 2 * HIDDEN:3 * HIDDEN]
    hw = h * g + t * (1.0 - g)                                         # [BB, H]

    # ---- build padded states [BB, SEQ_PAD, H]: row 0 gets the highway vector
    row_idx = lax.broadcasted_iota(jnp.int32, (SEQ_PAD, HIDDEN), 0)
    row0 = jnp.where(row_idx == 0, 1.0, 0.0)                           # [SP, H]
    states = emb_ref[...] + row0[None, :, :] * hw[:, None, :]          # [BB, SP, H]
    x2 = states.reshape(M, HIDDEN)                                     # token slab

    # key-pad mask: pad key column(s) get -inf-ish score
    col_idx = lax.broadcasted_iota(jnp.int32, (SEQ_PAD, SEQ_PAD), 1)
    key_mask = jnp.where(col_idx < SEQ, 0.0, NEG_INF)                  # [SP, SP]

    for l in range(NLAYERS):
        # ------------------- multi-head self-attention -------------------
        attn = jnp.zeros((M, HIDDEN), jnp.float32)
        for hh in range(NHEAD):                                        # static loop
            q = jnp.dot(x2, wq_ref[l, hh], preferred_element_type=jnp.float32) + bq_ref[l, hh]
            k = jnp.dot(x2, wk_ref[l, hh], preferred_element_type=jnp.float32) + bk_ref[l, hh]
            v = jnp.dot(x2, wv_ref[l, hh], preferred_element_type=jnp.float32) + bv_ref[l, hh]
            q3 = q.reshape(BB, SEQ_PAD, HEAD_DIM)
            k3 = k.reshape(BB, SEQ_PAD, HEAD_DIM)
            v3 = v.reshape(BB, SEQ_PAD, HEAD_DIM)
            s = jnp.einsum('bqd,bkd->bqk', q3, k3,
                           preferred_element_type=jnp.float32) * scale
            s = s + key_mask[None, :, :]
            s = s - jnp.max(s, axis=-1, keepdims=True)
            p = jnp.exp(s)
            p = p * pl.reciprocal(jnp.sum(p, axis=-1, keepdims=True), approx=True)
            c3 = jnp.einsum('bqk,bkd->bqd', p, v3,
                            preferred_element_type=jnp.float32)        # [BB, SP, hd]
            attn = attn + jnp.dot(c3.reshape(M, HEAD_DIM), opw_ref[l, hh],
                                  preferred_element_type=jnp.float32)  # [M, H]
        attn = attn + opb_ref[l]
        x2 = layernorm(x2 + attn, n1w_ref[l], n1b_ref[l])

        # ------------- feed-forward (bf16 MXU inputs, f32 acc) ------------
        ff = jnp.dot(x2.astype(jnp.bfloat16), l1w_ref[l],
                     preferred_element_type=jnp.float32) + l1b_ref[l]
        ff = jnp.maximum(ff, 0.0)
        y = jnp.dot(ff.astype(jnp.bfloat16), l2w_ref[l],
                    preferred_element_type=jnp.float32) + l2b_ref[l]
        x2 = layernorm(x2 + y, n2w_ref[l], n2b_ref[l])

    # -------------------- predictor on the CLS rows -----------------------
    cls = x2.reshape(BB, SEQ_PAD, HIDDEN)[:, 0, :]                     # [BB, H]
    logit = jnp.dot(cls, pw_ref[...], preferred_element_type=jnp.float32) + pb_ref[...]
    out_ref[...] = sigmoid(logit)                                      # [BB, METRIC]


# ------------------------------- wrappers ------------------------------------
def _const_spec(arr):
    nd = arr.ndim
    return pl.BlockSpec(arr.shape, lambda i, _nd=nd: (0,) * _nd)


def fused_forward(contexts, emb, params, block_b):
    b_pad = contexts.shape[0]
    assert b_pad % block_b == 0
    weights = (
        params['hw_cat_w'], params['hw_cat_b'],
        params['hw_w2'], params['hw_b2'], params['hw_w3'], params['hw_b3'],
        params['wq'], params['bq'], params['wk'], params['bk'],
        params['wv'], params['bv'],
        params['opw'], params['opb'], params['n1w'], params['n1b'],
        params['l1w'], params['l1b'], params['l2w'], params['l2b'],
        params['n2w'], params['n2b'], params['pred_w'], params['pred_b'],
    )
    in_specs = [
        pl.BlockSpec((block_b, CONTEXT), lambda i: (i, 0)),
        pl.BlockSpec((block_b, SEQ_PAD, HIDDEN), lambda i: (i, 0, 0)),
    ] + [_const_spec(w) for w in weights]
    out_specs = pl.BlockSpec((block_b, METRIC), lambda i: (i, 0))

    return pl.pallas_call(
        fused_kernel,
        grid=(b_pad // block_b,),
        in_specs=in_specs,
        out_specs=out_specs,
        out_shape=jax.ShapeDtypeStruct((b_pad, METRIC), jnp.float32),
        compiler_params=pltpu.CompilerParams(
            dimension_semantics=("parallel",),
            vmem_limit_bytes=32 * 1024 * 1024,
        ),
    )(contexts, emb, *weights)


def trans_watcher_forward(params, contexts, actions, knob_vector, pos_vector):
    B = contexts.shape[0]
    # Embedding gathers (glue, tiny tables — plain XLA), pre-combined into one
    # padded additive tensor so the kernel only adds the highway row.
    cfg = params['embedding'][actions]                                        # [B, 30, H]
    addemb = params['knob_embedding'][knob_vector] + params['pe'][pos_vector]  # [B, 31, H]
    emb = jnp.zeros((B, SEQ_PAD, HIDDEN), jnp.float32)
    emb = emb.at[:, :SEQ, :].set(addemb)
    emb = emb.at[:, 1:SEQ, :].add(cfg)

    # batch blocking: BB samples per grid step (sublane-friendly sizes)
    if B <= 8:
        block_b, b_pad = B, B
    else:
        block_b = 16 if B >= 16 else 8
        b_pad = ((B + block_b - 1) // block_b) * block_b
    if b_pad != B:
        contexts = jnp.pad(contexts, ((0, b_pad - B), (0, 0)))
        emb = jnp.pad(emb, ((0, b_pad - B), (0, 0), (0, 0)))

    out = fused_forward(contexts, emb, params, block_b)
    return out[:B]                                                            # [B, METRIC]


# --------------------------- deterministic params ----------------------------
def make_pe(d_model, max_len):
    position = jnp.arange(max_len, dtype=jnp.float32)[:, None]
    div_term = jnp.exp(jnp.arange(0, d_model, 2, dtype=jnp.float32)
                       * (-math.log(10000.0) / d_model))
    pe = jnp.zeros((max_len, d_model), jnp.float32)
    pe = pe.at[:, 0::2].set(jnp.sin(position * div_term))
    pe = pe.at[:, 1::2].set(jnp.cos(position * div_term))
    return pe


def init_params(key):
    keys = iter(jax.random.split(key, 64))

    def lin(in_f, out_f):
        w = jax.random.normal(next(keys), (in_f, out_f), jnp.float32) / math.sqrt(in_f)
        b = jax.random.normal(next(keys), (1, out_f), jnp.float32) * 0.01
        return w, b

    p = {}
    # HighWayNetwork: w1 / wg / wt share the same input -> concatenate.
    w1, b1 = lin(CONTEXT, HIDDEN)
    wg, bg = lin(CONTEXT, HIDDEN)
    wt, bt = lin(CONTEXT, HIDDEN)
    p['hw_cat_w'] = jnp.concatenate([w1, wg, wt], axis=1)      # [C, 3H]
    p['hw_cat_b'] = jnp.concatenate([b1, bg, bt], axis=1)      # [1, 3H]
    p['hw_w2'], p['hw_b2'] = lin(HIDDEN, HIDDEN)
    p['hw_w3'], p['hw_b3'] = lin(HIDDEN, HIDDEN)

    # Embedding tables + positional encoding
    p['embedding'] = jax.random.normal(next(keys), (NUM_TOKENS, HIDDEN), jnp.float32) * 0.1
    p['knob_embedding'] = jax.random.normal(next(keys), (6, HIDDEN), jnp.float32) * 0.1
    p['pe'] = make_pe(HIDDEN, SEQ)

    # Transformer encoder layers (head-major pre-split QKV / out-proj)
    wq, bq, wk, bk, wv, bv = [], [], [], [], [], []
    opw, opb = [], []
    l1w, l1b, l2w, l2b = [], [], [], []
    n1w, n1b, n2w, n2b = [], [], [], []

    def head_major(w, b):
        wh = w.reshape(HIDDEN, NHEAD, HEAD_DIM).transpose(1, 0, 2)   # [NHEAD, H, hd]
        bh = b.reshape(1, NHEAD, HEAD_DIM).transpose(1, 0, 2)        # [NHEAD, 1, hd]
        return wh, bh

    for _ in range(NLAYERS):
        w, b = lin(HIDDEN, HIDDEN); w, b = head_major(w, b); wq.append(w); bq.append(b)
        w, b = lin(HIDDEN, HIDDEN); w, b = head_major(w, b); wk.append(w); bk.append(b)
        w, b = lin(HIDDEN, HIDDEN); w, b = head_major(w, b); wv.append(w); bv.append(b)
        w, b = lin(HIDDEN, HIDDEN)
        opw.append(w.reshape(NHEAD, HEAD_DIM, HIDDEN)); opb.append(b)   # [NHEAD, hd, H]
        w, b = lin(HIDDEN, FFN); l1w.append(w); l1b.append(b)
        w, b = lin(FFN, HIDDEN); l2w.append(w); l2b.append(b)
        n1w.append(jnp.ones((1, HIDDEN), jnp.float32)); n1b.append(jnp.zeros((1, HIDDEN), jnp.float32))
        n2w.append(jnp.ones((1, HIDDEN), jnp.float32)); n2b.append(jnp.zeros((1, HIDDEN), jnp.float32))

    p['wq'], p['bq'] = jnp.stack(wq), jnp.stack(bq)
    p['wk'], p['bk'] = jnp.stack(wk), jnp.stack(bk)
    p['wv'], p['bv'] = jnp.stack(wv), jnp.stack(bv)
    p['opw'], p['opb'] = jnp.stack(opw), jnp.stack(opb)
    # FFN GEMM weights stored as bf16 (MXU inputs); biases stay f32.
    p['l1w'], p['l1b'] = jnp.stack(l1w).astype(jnp.bfloat16), jnp.stack(l1b)
    p['l2w'], p['l2b'] = jnp.stack(l2w).astype(jnp.bfloat16), jnp.stack(l2b)
    p['n1w'], p['n1b'] = jnp.stack(n1w), jnp.stack(n1b)
    p['n2w'], p['n2b'] = jnp.stack(n2w), jnp.stack(n2b)
    # Predictor
    p['pred_w'], p['pred_b'] = lin(HIDDEN, METRIC)
    return p


# ----------------------------------- main ------------------------------------
if __name__ == "__main__":
    key = jax.random.PRNGKey(0)
    pkey, ck, ak, kk = jax.random.split(key, 4)
    params = init_params(pkey)

    B = 2
    contexts = jax.random.normal(ck, (B, CONTEXT), jnp.float32)
    actions = jax.random.randint(ak, (B, len(SEARCH_SPACE)), 0, NUM_TOKENS, dtype=jnp.int32)
    knob_vector = jax.random.randint(kk, (B, SEQ), 0, 6, dtype=jnp.int32)
    pos_vector = jnp.broadcast_to(jnp.arange(SEQ, dtype=jnp.int32), (B, SEQ))

    metric = trans_watcher_forward(params, contexts, actions, knob_vector, pos_vector)
    metric = jax.block_until_ready(metric)
    assert metric.shape == (B, METRIC)
    assert bool(jnp.all(jnp.isfinite(metric)))
    print("KERNEL_OK")
</pallas_src>

<mosaic_0001>
module attributes {stable_mosaic.version = 11 : i64} {
  func.func @fused_kernel(%arg0: i32, %arg1: memref<2x64xf32, #tpu.memory_space<vmem>>, %arg2: memref<2x32x32xf32, #tpu.memory_space<vmem>>, %arg3: memref<64x96xf32, #tpu.memory_space<vmem>>, %arg4: memref<1x96xf32, #tpu.memory_space<vmem>>, %arg5: memref<32x32xf32, #tpu.memory_space<vmem>>, %arg6: memref<1x32xf32, #tpu.memory_space<vmem>>, %arg7: memref<32x32xf32, #tpu.memory_space<vmem>>, %arg8: memref<1x32xf32, #tpu.memory_space<vmem>>, %arg9: memref<3x2x32x16xf32, #tpu.memory_space<vmem>>, %arg10: memref<3x2x1x16xf32, #tpu.memory_space<vmem>>, %arg11: memref<3x2x32x16xf32, #tpu.memory_space<vmem>>, %arg12: memref<3x2x1x16xf32, #tpu.memory_space<vmem>>, %arg13: memref<3x2x32x16xf32, #tpu.memory_space<vmem>>, %arg14: memref<3x2x1x16xf32, #tpu.memory_space<vmem>>, %arg15: memref<3x2x16x32xf32, #tpu.memory_space<vmem>>, %arg16: memref<3x1x32xf32, #tpu.memory_space<vmem>>, %arg17: memref<3x1x32xf32, #tpu.memory_space<vmem>>, %arg18: memref<3x1x32xf32, #tpu.memory_space<vmem>>, %arg19: memref<3x32x2048xbf16, #tpu.memory_space<vmem>>, %arg20: memref<3x1x2048xf32, #tpu.memory_space<vmem>>, %arg21: memref<3x2048x32xbf16, #tpu.memory_space<vmem>>, %arg22: memref<3x1x32xf32, #tpu.memory_space<vmem>>, %arg23: memref<3x1x32xf32, #tpu.memory_space<vmem>>, %arg24: memref<3x1x32xf32, #tpu.memory_space<vmem>>, %arg25: memref<32x4xf32, #tpu.memory_space<vmem>>, %arg26: memref<1x4xf32, #tpu.memory_space<vmem>>, %arg27: memref<2x4xf32, #tpu.memory_space<vmem>>) attributes {dimension_semantics = [#tpu.dimension_semantics<parallel>], iteration_bounds = array<i64: 1>, scalar_prefetch = 0 : i64, scratch_operands = 0 : i64, tpu.core_type = #tpu.core_type<tc>, window_params = [{transform_indices = @transform_0, window_bounds = array<i64: 2, 64>}, {transform_indices = @transform_1, window_bounds = array<i64: 2, 32, 32>}, {pipeline_mode = #tpu.pipeline_mode<synchronous>, transform_indices = @transform_2, window_bounds = array<i64: 64, 96>}, {pipeline_mode = #tpu.pipeline_mode<synchronous>, transform_indices = @transform_3, window_bounds = array<i64: 1, 96>}, {pipeline_mode = #tpu.pipeline_mode<synchronous>, transform_indices = @transform_4, window_bounds = array<i64: 32, 32>}, {pipeline_mode = #tpu.pipeline_mode<synchronous>, transform_indices = @transform_5, window_bounds = array<i64: 1, 32>}, {pipeline_mode = #tpu.pipeline_mode<synchronous>, transform_indices = @transform_6, window_bounds = array<i64: 32, 32>}, {pipeline_mode = #tpu.pipeline_mode<synchronous>, transform_indices = @transform_7, window_bounds = array<i64: 1, 32>}, {pipeline_mode = #tpu.pipeline_mode<synchronous>, transform_indices = @transform_8, window_bounds = array<i64: 3, 2, 32, 16>}, {pipeline_mode = #tpu.pipeline_mode<synchronous>, transform_indices = @transform_9, window_bounds = array<i64: 3, 2, 1, 16>}, {pipeline_mode = #tpu.pipeline_mode<synchronous>, transform_indices = @transform_10, window_bounds = array<i64: 3, 2, 32, 16>}, {pipeline_mode = #tpu.pipeline_mode<synchronous>, transform_indices = @transform_11, window_bounds = array<i64: 3, 2, 1, 16>}, {pipeline_mode = #tpu.pipeline_mode<synchronous>, transform_indices = @transform_12, window_bounds = array<i64: 3, 2, 32, 16>}, {pipeline_mode = #tpu.pipeline_mode<synchronous>, transform_indices = @transform_13, window_bounds = array<i64: 3, 2, 1, 16>}, {pipeline_mode = #tpu.pipeline_mode<synchronous>, transform_indices = @transform_14, window_bounds = array<i64: 3, 2, 16, 32>}, {pipeline_mode = #tpu.pipeline_mode<synchronous>, transform_indices = @transform_15, window_bounds = array<i64: 3, 1, 32>}, {pipeline_mode = #tpu.pipeline_mode<synchronous>, transform_indices = @transform_16, window_bounds = array<i64: 3, 1, 32>}, {pipeline_mode = #tpu.pipeline_mode<synchronous>, transform_indices = @transform_17, window_bounds = array<i64: 3, 1, 32>}, {pipeline_mode = #tpu.pipeline_mode<synchronous>, transform_indices = @transform_18, window_bounds = array<i64: 3, 32, 2048>}, {pipeline_mode = #tpu.pipeline_mode<synchronous>, transform_indices = @transform_19, window_bounds = array<i64: 3, 1, 2048>}, {pipeline_mode = #tpu.pipeline_mode<synchronous>, transform_indices = @transform_20, window_bounds = array<i64: 3, 2048, 32>}, {pipeline_mode = #tpu.pipeline_mode<synchronous>, transform_indices = @transform_21, window_bounds = array<i64: 3, 1, 32>}, {pipeline_mode = #tpu.pipeline_mode<synchronous>, transform_indices = @transform_22, window_bounds = array<i64: 3, 1, 32>}, {pipeline_mode = #tpu.pipeline_mode<synchronous>, transform_indices = @transform_23, window_bounds = array<i64: 3, 1, 32>}, {pipeline_mode = #tpu.pipeline_mode<synchronous>, transform_indices = @transform_24, window_bounds = array<i64: 32, 4>}, {pipeline_mode = #tpu.pipeline_mode<synchronous>, transform_indices = @transform_25, window_bounds = array<i64: 1, 4>}, {transform_indices = @transform_26, window_bounds = array<i64: 2, 4>}]} {
    %c0 = arith.constant 0 : index
    %c0_0 = arith.constant 0 : index
    %0 = vector.load %arg1[%c0, %c0_0] : memref<2x64xf32, #tpu.memory_space<vmem>>, vector<2x64xf32>
    %c0_1 = arith.constant 0 : index
    %c0_2 = arith.constant 0 : index
    %1 = vector.load %arg3[%c0_1, %c0_2] : memref<64x96xf32, #tpu.memory_space<vmem>>, vector<64x96xf32>
    %cst = arith.constant dense<0.000000e+00> : vector<2x96xf32>
    %2 = tpu.matmul %0, %1, %cst {dimension_numbers = #tpu.dot_dimension_numbers<[1], [0], [0], [1], [0, 0, 1, 1], [], []>} : vector<2x64xf32>, vector<64x96xf32>, vector<2x96xf32> -> vector<2x96xf32>
    %c0_3 = arith.constant 0 : index
    %c0_4 = arith.constant 0 : index
    %3 = vector.load %arg4[%c0_3, %c0_4] : memref<1x96xf32, #tpu.memory_space<vmem>>, vector<1x96xf32>
    %4 = vector.broadcast %3 : vector<1x96xf32> to vector<2x96xf32>
    %5 = arith.addf %2, %4 : vector<2x96xf32>
    %6 = vector.extract_strided_slice %5 {offsets = [0, 0], sizes = [2, 32], strides = [1, 1]} : vector<2x96xf32> to vector<2x32xf32>
    %cst_5 = arith.constant 0.000000e+00 : f32
    %7 = vector.broadcast %cst_5 : f32 to vector<2x32xf32>
    %8 = arith.maximumf %6, %7 : vector<2x32xf32>
    %c0_6 = arith.constant 0 : index
    %c0_7 = arith.constant 0 : index
    %9 = vector.load %arg5[%c0_6, %c0_7] : memref<32x32xf32, #tpu.memory_space<vmem>>, vector<32x32xf32>
    %cst_8 = arith.constant dense<0.000000e+00> : vector<2x32xf32>
    %10 = tpu.matmul %8, %9, %cst_8 {dimension_numbers = #tpu.dot_dimension_numbers<[1], [0], [0], [1], [0, 0, 1, 1], [], []>} : vector<2x32xf32>, vector<32x32xf32>, vector<2x32xf32> -> vector<2x32xf32>
    %c0_9 = arith.constant 0 : index
    %c0_10 = arith.constant 0 : index
    %11 = vector.load %arg6[%c0_9, %c0_10] : memref<1x32xf32, #tpu.memory_space<vmem>>, vector<1x32xf32>
    %12 = vector.broadcast %11 : vector<1x32xf32> to vector<2x32xf32>
    %13 = arith.addf %10, %12 : vector<2x32xf32>
    %cst_11 = arith.constant 0.000000e+00 : f32
    %14 = vector.broadcast %cst_11 : f32 to vector<2x32xf32>
    %15 = arith.maximumf %13, %14 : vector<2x32xf32>
    %c0_12 = arith.constant 0 : index
    %c0_13 = arith.constant 0 : index
    %16 = vector.load %arg7[%c0_12, %c0_13] : memref<32x32xf32, #tpu.memory_space<vmem>>, vector<32x32xf32>
    %cst_14 = arith.constant dense<0.000000e+00> : vector<2x32xf32>
    %17 = tpu.matmul %15, %16, %cst_14 {dimension_numbers = #tpu.dot_dimension_numbers<[1], [0], [0], [1], [0, 0, 1, 1], [], []>} : vector<2x32xf32>, vector<32x32xf32>, vector<2x32xf32> -> vector<2x32xf32>
    %c0_15 = arith.constant 0 : index
    %c0_16 = arith.constant 0 : index
    %18 = vector.load %arg8[%c0_15, %c0_16] : memref<1x32xf32, #tpu.memory_space<vmem>>, vector<1x32xf32>
    %19 = vector.broadcast %18 : vector<1x32xf32> to vector<2x32xf32>
    %20 = arith.addf %17, %19 : vector<2x32xf32>
    %cst_17 = arith.constant 0.000000e+00 : f32
    %21 = vector.broadcast %cst_17 : f32 to vector<2x32xf32>
    %22 = arith.maximumf %20, %21 : vector<2x32xf32>
    %23 = vector.extract_strided_slice %5 {offsets = [0, 32], sizes = [2, 32], strides = [1, 1]} : vector<2x96xf32> to vector<2x32xf32>
    %cst_18 = arith.constant 0.000000e+00 : f32
    %24 = vector.broadcast %cst_18 : f32 to vector<2x32xf32>
    %25 = arith.subf %24, %23 : vector<2x32xf32>
    %26 = math.exp %25 : vector<2x32xf32>
    %cst_19 = arith.constant 1.000000e+00 : f32
    %27 = vector.broadcast %cst_19 : f32 to vector<2x32xf32>
    %28 = arith.addf %27, %26 : vector<2x32xf32>
    %29 = tpu.reciprocal %28 {approx = true} : vector<2x32xf32> -> vector<2x32xf32>
    %30 = vector.extract_strided_slice %5 {offsets = [0, 64], sizes = [2, 32], strides = [1, 1]} : vector<2x96xf32> to vector<2x32xf32>
    %31 = arith.mulf %22, %29 : vector<2x32xf32>
    %cst_20 = arith.constant 1.000000e+00 : f32
    %32 = vector.broadcast %cst_20 : f32 to vector<2x32xf32>
    %33 = arith.subf %32, %29 : vector<2x32xf32>
    %34 = arith.mulf %30, %33 : vector<2x32xf32>
    %35 = arith.addf %31, %34 : vector<2x32xf32>
    %36 = tpu.iota {dimensions = array<i32: 0>} : vector<32x32xi32>
    %c0_i32 = arith.constant 0 : i32
    %37 = vector.broadcast %c0_i32 : i32 to vector<32x32xi32>
    %38 = arith.cmpi eq, %36, %37 : vector<32x32xi32>
    %cst_21 = arith.constant 1.000000e+00 : f32
    %cst_22 = arith.constant 0.000000e+00 : f32
    %39 = vector.broadcast %cst_21 : f32 to vector<32x32xf32>
    %40 = vector.broadcast %cst_22 : f32 to vector<32x32xf32>
    %41 = arith.select %38, %39, %40 : vector<32x32xi1>, vector<32x32xf32>
    %c0_23 = arith.constant 0 : index
    %c0_24 = arith.constant 0 : index
    %c0_25 = arith.constant 0 : index
    %42 = vector.load %arg2[%c0_23, %c0_24, %c0_25] : memref<2x32x32xf32, #tpu.memory_space<vmem>>, vector<2x32x32xf32>
    %43 = vector.shape_cast %41 : vector<32x32xf32> to vector<1x32x32xf32>
    %44 = vector.shape_cast %35 : vector<2x32xf32> to vector<2x1x32xf32>
    %45 = vector.broadcast %43 : vector<1x32x32xf32> to vector<2x32x32xf32>
    %46 = vector.broadcast %44 : vector<2x1x32xf32> to vector<2x32x32xf32>
    %47 = arith.mulf %45, %46 : vector<2x32x32xf32>
    %48 = arith.addf %42, %47 : vector<2x32x32xf32>
    %49 = vector.shape_cast %48 : vector<2x32x32xf32> to vector<64x32xf32>
    %50 = tpu.iota {dimensions = array<i32: 1>} : vector<32x32xi32>
    %c31_i32 = arith.constant 31 : i32
    %51 = vector.broadcast %c31_i32 : i32 to vector<32x32xi32>
    %52 = arith.cmpi slt, %50, %51 : vector<32x32xi32>
    %cst_26 = arith.constant 0.000000e+00 : f32
    %cst_27 = arith.constant -1.000000e+30 : f32
    %53 = vector.broadcast %cst_26 : f32 to vector<32x32xf32>
    %54 = vector.broadcast %cst_27 : f32 to vector<32x32xf32>
    %55 = arith.select %52, %53, %54 : vector<32x32xi1>, vector<32x32xf32>
    %cst_28 = arith.constant 0.000000e+00 : f32
    %56 = vector.broadcast %cst_28 : f32 to vector<64x32xf32>
    %c0_29 = arith.constant 0 : index
    %c0_30 = arith.constant 0 : index
    %c0_31 = arith.constant 0 : index
    %c0_32 = arith.constant 0 : index
    %57 = vector.load %arg9[%c0_29, %c0_30, %c0_31, %c0_32] : memref<3x2x32x16xf32, #tpu.memory_space<vmem>>, vector<1x1x32x16xf32>
    %58 = vector.shape_cast %57 : vector<1x1x32x16xf32> to vector<32x16xf32>
    %cst_33 = arith.constant dense<0.000000e+00> : vector<64x16xf32>
    %59 = tpu.matmul %49, %58, %cst_33 {dimension_numbers = #tpu.dot_dimension_numbers<[1], [0], [0], [1], [0, 0, 1, 1], [], []>} : vector<64x32xf32>, vector<32x16xf32>, vector<64x16xf32> -> vector<64x16xf32>
    %c0_34 = arith.constant 0 : index
    %c0_35 = arith.constant 0 : index
    %c0_36 = arith.constant 0 : index
    %c0_37 = arith.constant 0 : index
    %60 = vector.load %arg10[%c0_34, %c0_35, %c0_36, %c0_37] : memref<3x2x1x16xf32, #tpu.memory_space<vmem>>, vector<1x1x1x16xf32>
    %61 = vector.shape_cast %60 : vector<1x1x1x16xf32> to vector<1x16xf32>
    %62 = vector.broadcast %61 : vector<1x16xf32> to vector<64x16xf32>
    %63 = arith.addf %59, %62 : vector<64x16xf32>
    %c0_38 = arith.constant 0 : index
    %c0_39 = arith.constant 0 : index
    %c0_40 = arith.constant 0 : index
    %c0_41 = arith.constant 0 : index
    %64 = vector.load %arg11[%c0_38, %c0_39, %c0_40, %c0_41] : memref<3x2x32x16xf32, #tpu.memory_space<vmem>>, vector<1x1x32x16xf32>
    %65 = vector.shape_cast %64 : vector<1x1x32x16xf32> to vector<32x16xf32>
    %cst_42 = arith.constant dense<0.000000e+00> : vector<64x16xf32>
    %66 = tpu.matmul %49, %65, %cst_42 {dimension_numbers = #tpu.dot_dimension_numbers<[1], [0], [0], [1], [0, 0, 1, 1], [], []>} : vector<64x32xf32>, vector<32x16xf32>, vector<64x16xf32> -> vector<64x16xf32>
    %c0_43 = arith.constant 0 : index
    %c0_44 = arith.constant 0 : index
    %c0_45 = arith.constant 0 : index
    %c0_46 = arith.constant 0 : index
    %67 = vector.load %arg12[%c0_43, %c0_44, %c0_45, %c0_46] : memref<3x2x1x16xf32, #tpu.memory_space<vmem>>, vector<1x1x1x16xf32>
    %68 = vector.shape_cast %67 : vector<1x1x1x16xf32> to vector<1x16xf32>
    %69 = vector.broadcast %68 : vector<1x16xf32> to vector<64x16xf32>
    %70 = arith.addf %66, %69 : vector<64x16xf32>
    %c0_47 = arith.constant 0 : index
    %c0_48 = arith.constant 0 : index
    %c0_49 = arith.constant 0 : index
    %c0_50 = arith.constant 0 : index
    %71 = vector.load %arg13[%c0_47, %c0_48, %c0_49, %c0_50] : memref<3x2x32x16xf32, #tpu.memory_space<vmem>>, vector<1x1x32x16xf32>
    %72 = vector.shape_cast %71 : vector<1x1x32x16xf32> to vector<32x16xf32>
    %cst_51 = arith.constant dense<0.000000e+00> : vector<64x16xf32>
    %73 = tpu.matmul %49, %72, %cst_51 {dimension_numbers = #tpu.dot_dimension_numbers<[1], [0], [0], [1], [0, 0, 1, 1], [], []>} : vector<64x32xf32>, vector<32x16xf32>, vector<64x16xf32> -> vector<64x16xf32>
    %c0_52 = arith.constant 0 : index
    %c0_53 = arith.constant 0 : index
    %c0_54 = arith.constant 0 : index
    %c0_55 = arith.constant 0 : index
    %74 = vector.load %arg14[%c0_52, %c0_53, %c0_54, %c0_55] : memref<3x2x1x16xf32, #tpu.memory_space<vmem>>, vector<1x1x1x16xf32>
    %75 = vector.shape_cast %74 : vector<1x1x1x16xf32> to vector<1x16xf32>
    %76 = vector.broadcast %75 : vector<1x16xf32> to vector<64x16xf32>
    %77 = arith.addf %73, %76 : vector<64x16xf32>
    %78 = vector.shape_cast %63 : vector<64x16xf32> to vector<2x32x16xf32>
    %79 = vector.shape_cast %70 : vector<64x16xf32> to vector<2x32x16xf32>
    %80 = vector.shape_cast %77 : vector<64x16xf32> to vector<2x32x16xf32>
    "tpu.trace_start"() <{level = 10 : i32, message = "bqd,bkd->bqk"}> : () -> ()
    %cst_56 = arith.constant dense<0.000000e+00> : vector<2x32x32xf32>
    %81 = tpu.matmul %78, %79, %cst_56 {dimension_numbers = #tpu.dot_dimension_numbers<[2], [2], [1], [1], [0, 0, 0, 1, 1, 1], [0], [0]>} : vector<2x32x16xf32>, vector<2x32x16xf32>, vector<2x32x32xf32> -> vector<2x32x32xf32>
    "tpu.trace_stop"() : () -> ()
    %cst_57 = arith.constant 2.500000e-01 : f32
    %82 = vector.broadcast %cst_57 : f32 to vector<2x32x32xf32>
    %83 = arith.mulf %81, %82 : vector<2x32x32xf32>
    %84 = vector.shape_cast %55 : vector<32x32xf32> to vector<1x32x32xf32>
    %85 = vector.broadcast %84 : vector<1x32x32xf32> to vector<2x32x32xf32>
    %86 = arith.addf %83, %85 : vector<2x32x32xf32>
    %cst_58 = arith.constant dense<0xFF800000> : vector<2x32xf32>
    %87 = vector.multi_reduction <maximumf>, %86, %cst_58 [2] : vector<2x32x32xf32> to vector<2x32xf32>
    %88 = vector.shape_cast %87 : vector<2x32xf32> to vector<2x32x1xf32>
    %89 = vector.broadcast %88 : vector<2x32x1xf32> to vector<2x32x32xf32>
    %90 = arith.subf %86, %89 : vector<2x32x32xf32>
    %91 = math.exp %90 : vector<2x32x32xf32>
    %cst_59 = arith.constant dense<0.000000e+00> : vector<2x32xf32>
    %92 = vector.multi_reduction <add>, %91, %cst_59 [2] : vector<2x32x32xf32> to vector<2x32xf32>
    %93 = vector.shape_cast %92 : vector<2x32xf32> to vector<2x32x1xf32>
    %94 = tpu.reciprocal %93 {approx = true} : vector<2x32x1xf32> -> vector<2x32x1xf32>
    %95 = vector.broadcast %94 : vector<2x32x1xf32> to vector<2x32x32xf32>
    %96 = arith.mulf %91, %95 : vector<2x32x32xf32>
    "tpu.trace_start"() <{level = 10 : i32, message = "bqk,bkd->bqd"}> : () -> ()
    %cst_60 = arith.constant dense<0.000000e+00> : vector<2x32x16xf32>
    %97 = tpu.matmul %96, %80, %cst_60 {dimension_numbers = #tpu.dot_dimension_numbers<[2], [1], [1], [2], [0, 0, 0, 1, 1, 2], [0], [0]>} : vector<2x32x32xf32>, vector<2x32x16xf32>, vector<2x32x16xf32> -> vector<2x32x16xf32>
    "tpu.trace_stop"() : () -> ()
    %98 = vector.shape_cast %97 : vector<2x32x16xf32> to vector<64x16xf32>
    %c0_61 = arith.constant 0 : index
    %c0_62 = arith.constant 0 : index
    %c0_63 = arith.constant 0 : index
    %c0_64 = arith.constant 0 : index
    %99 = vector.load %arg15[%c0_61, %c0_62, %c0_63, %c0_64] : memref<3x2x16x32xf32, #tpu.memory_space<vmem>>, vector<1x1x16x32xf32>
    %100 = vector.shape_cast %99 : vector<1x1x16x32xf32> to vector<16x32xf32>
    %cst_65 = arith.constant dense<0.000000e+00> : vector<64x32xf32>
    %101 = tpu.matmul %98, %100, %cst_65 {dimension_numbers = #tpu.dot_dimension_numbers<[1], [0], [0], [1], [0, 0, 1, 1], [], []>} : vector<64x16xf32>, vector<16x32xf32>, vector<64x32xf32> -> vector<64x32xf32>
    %102 = arith.addf %56, %101 : vector<64x32xf32>
    %c0_66 = arith.constant 0 : index
    %c1 = arith.constant 1 : index
    %c0_67 = arith.constant 0 : index
    %c0_68 = arith.constant 0 : index
    %103 = vector.load %arg9[%c0_66, %c1, %c0_67, %c0_68] : memref<3x2x32x16xf32, #tpu.memory_space<vmem>>, vector<1x1x32x16xf32>
    %104 = vector.shape_cast %103 : vector<1x1x32x16xf32> to vector<32x16xf32>
    %cst_69 = arith.constant dense<0.000000e+00> : vector<64x16xf32>
    %105 = tpu.matmul %49, %104, %cst_69 {dimension_numbers = #tpu.dot_dimension_numbers<[1], [0], [0], [1], [0, 0, 1, 1], [], []>} : vector<64x32xf32>, vector<32x16xf32>, vector<64x16xf32> -> vector<64x16xf32>
    %c0_70 = arith.constant 0 : index
    %c1_71 = arith.constant 1 : index
    %c0_72 = arith.constant 0 : index
    %c0_73 = arith.constant 0 : index
    %106 = vector.load %arg10[%c0_70, %c1_71, %c0_72, %c0_73] : memref<3x2x1x16xf32, #tpu.memory_space<vmem>>, vector<1x1x1x16xf32>
    %107 = vector.shape_cast %106 : vector<1x1x1x16xf32> to vector<1x16xf32>
    %108 = vector.broadcast %107 : vector<1x16xf32> to vector<64x16xf32>
    %109 = arith.addf %105, %108 : vector<64x16xf32>
    %c0_74 = arith.constant 0 : index
    %c1_75 = arith.constant 1 : index
    %c0_76 = arith.constant 0 : index
    %c0_77 = arith.constant 0 : index
    %110 = vector.load %arg11[%c0_74, %c1_75, %c0_76, %c0_77] : memref<3x2x32x16xf32, #tpu.memory_space<vmem>>, vector<1x1x32x16xf32>
    %111 = vector.shape_cast %110 : vector<1x1x32x16xf32> to vector<32x16xf32>
    %cst_78 = arith.constant dense<0.000000e+00> : vector<64x16xf32>
    %112 = tpu.matmul %49, %111, %cst_78 {dimension_numbers = #tpu.dot_dimension_numbers<[1], [0], [0], [1], [0, 0, 1, 1], [], []>} : vector<64x32xf32>, vector<32x16xf32>, vector<64x16xf32> -> vector<64x16xf32>
    %c0_79 = arith.constant 0 : index
    %c1_80 = arith.constant 1 : index
    %c0_81 = arith.constant 0 : index
    %c0_82 = arith.constant 0 : index
    %113 = vector.load %arg12[%c0_79, %c1_80, %c0_81, %c0_82] : memref<3x2x1x16xf32, #tpu.memory_space<vmem>>, vector<1x1x1x16xf32>
    %114 = vector.shape_cast %113 : vector<1x1x1x16xf32> to vector<1x16xf32>
    %115 = vector.broadcast %114 : vector<1x16xf32> to vector<64x16xf32>
    %116 = arith.addf %112, %115 : vector<64x16xf32>
    %c0_83 = arith.constant 0 : index
    %c1_84 = arith.constant 1 : index
    %c0_85 = arith.constant 0 : index
    %c0_86 = arith.constant 0 : index
    %117 = vector.load %arg13[%c0_83, %c1_84, %c0_85, %c0_86] : memref<3x2x32x16xf32, #tpu.memory_space<vmem>>, vector<1x1x32x16xf32>
    %118 = vector.shape_cast %117 : vector<1x1x32x16xf32> to vector<32x16xf32>
    %cst_87 = arith.constant dense<0.000000e+00> : vector<64x16xf32>
    %119 = tpu.matmul %49, %118, %cst_87 {dimension_numbers = #tpu.dot_dimension_numbers<[1], [0], [0], [1], [0, 0, 1, 1], [], []>} : vector<64x32xf32>, vector<32x16xf32>, vector<64x16xf32> -> vector<64x16xf32>
    %c0_88 = arith.constant 0 : index
    %c1_89 = arith.constant 1 : index
    %c0_90 = arith.constant 0 : index
    %c0_91 = arith.constant 0 : index
    %120 = vector.load %arg14[%c0_88, %c1_89, %c0_90, %c0_91] : memref<3x2x1x16xf32, #tpu.memory_space<vmem>>, vector<1x1x1x16xf32>
    %121 = vector.shape_cast %120 : vector<1x1x1x16xf32> to vector<1x16xf32>
    %122 = vector.broadcast %121 : vector<1x16xf32> to vector<64x16xf32>
    %123 = arith.addf %119, %122 : vector<64x16xf32>
    %124 = vector.shape_cast %109 : vector<64x16xf32> to vector<2x32x16xf32>
    %125 = vector.shape_cast %116 : vector<64x16xf32> to vector<2x32x16xf32>
    %126 = vector.shape_cast %123 : vector<64x16xf32> to vector<2x32x16xf32>
    "tpu.trace_start"() <{level = 10 : i32, message = "bqd,bkd->bqk"}> : () -> ()
    %cst_92 = arith.constant dense<0.000000e+00> : vector<2x32x32xf32>
    %127 = tpu.matmul %124, %125, %cst_92 {dimension_numbers = #tpu.dot_dimension_numbers<[2], [2], [1], [1], [0, 0, 0, 1, 1, 1], [0], [0]>} : vector<2x32x16xf32>, vector<2x32x16xf32>, vector<2x32x32xf32> -> vector<2x32x32xf32>
    "tpu.trace_stop"() : () -> ()
    %cst_93 = arith.constant 2.500000e-01 : f32
    %128 = vector.broadcast %cst_93 : f32 to vector<2x32x32xf32>
    %129 = arith.mulf %127, %128 : vector<2x32x32xf32>
    %130 = vector.shape_cast %55 : vector<32x32xf32> to vector<1x32x32xf32>
    %131 = vector.broadcast %130 : vector<1x32x32xf32> to vector<2x32x32xf32>
    %132 = arith.addf %129, %131 : vector<2x32x32xf32>
    %cst_94 = arith.constant dense<0xFF800000> : vector<2x32xf32>
    %133 = vector.multi_reduction <maximumf>, %132, %cst_94 [2] : vector<2x32x32xf32> to vector<2x32xf32>
    %134 = vector.shape_cast %133 : vector<2x32xf32> to vector<2x32x1xf32>
    %135 = vector.broadcast %134 : vector<2x32x1xf32> to vector<2x32x32xf32>
    %136 = arith.subf %132, %135 : vector<2x32x32xf32>
    %137 = math.exp %136 : vector<2x32x32xf32>
    %cst_95 = arith.constant dense<0.000000e+00> : vector<2x32xf32>
    %138 = vector.multi_reduction <add>, %137, %cst_95 [2] : vector<2x32x32xf32> to vector<2x32xf32>
    %139 = vector.shape_cast %138 : vector<2x32xf32> to vector<2x32x1xf32>
    %140 = tpu.reciprocal %139 {approx = true} : vector<2x32x1xf32> -> vector<2x32x1xf32>
    %141 = vector.broadcast %140 : vector<2x32x1xf32> to vector<2x32x32xf32>
    %142 = arith.mulf %137, %141 : vector<2x32x32xf32>
    "tpu.trace_start"() <{level = 10 : i32, message = "bqk,bkd->bqd"}> : () -> ()
    %cst_96 = arith.constant dense<0.000000e+00> : vector<2x32x16xf32>
    %143 = tpu.matmul %142, %126, %cst_96 {dimension_numbers = #tpu.dot_dimension_numbers<[2], [1], [1], [2], [0, 0, 0, 1, 1, 2], [0], [0]>} : vector<2x32x32xf32>, vector<2x32x16xf32>, vector<2x32x16xf32> -> vector<2x32x16xf32>
    "tpu.trace_stop"() : () -> ()
    %144 = vector.shape_cast %143 : vector<2x32x16xf32> to vector<64x16xf32>
    %c0_97 = arith.constant 0 : index
    %c1_98 = arith.constant 1 : index
    %c0_99 = arith.constant 0 : index
    %c0_100 = arith.constant 0 : index
    %145 = vector.load %arg15[%c0_97, %c1_98, %c0_99, %c0_100] : memref<3x2x16x32xf32, #tpu.memory_space<vmem>>, vector<1x1x16x32xf32>
    %146 = vector.shape_cast %145 : vector<1x1x16x32xf32> to vector<16x32xf32>
    %cst_101 = arith.constant dense<0.000000e+00> : vector<64x32xf32>
    %147 = tpu.matmul %144, %146, %cst_101 {dimension_numbers = #tpu.dot_dimension_numbers<[1], [0], [0], [1], [0, 0, 1, 1], [], []>} : vector<64x16xf32>, vector<16x32xf32>, vector<64x32xf32> -> vector<64x32xf32>
    %148 = arith.addf %102, %147 : vector<64x32xf32>
    %c0_102 = arith.constant 0 : index
    %c0_103 = arith.constant 0 : index
    %c0_104 = arith.constant 0 : index
    %149 = vector.load %arg16[%c0_102, %c0_103, %c0_104] : memref<3x1x32xf32, #tpu.memory_space<vmem>>, vector<1x1x32xf32>
    %150 = vector.shape_cast %149 : vector<1x1x32xf32> to vector<1x32xf32>
    %151 = vector.broadcast %150 : vector<1x32xf32> to vector<64x32xf32>
    %152 = arith.addf %148, %151 : vector<64x32xf32>
    %153 = arith.addf %49, %152 : vector<64x32xf32>
    %c0_105 = arith.constant 0 : index
    %c0_106 = arith.constant 0 : index
    %c0_107 = arith.constant 0 : index
    %154 = vector.load %arg17[%c0_105, %c0_106, %c0_107] : memref<3x1x32xf32, #tpu.memory_space<vmem>>, vector<1x1x32xf32>
    %155 = vector.shape_cast %154 : vector<1x1x32xf32> to vector<1x32xf32>
    %c0_108 = arith.constant 0 : index
    %c0_109 = arith.constant 0 : index
    %c0_110 = arith.constant 0 : index
    %156 = vector.load %arg18[%c0_108, %c0_109, %c0_110] : memref<3x1x32xf32, #tpu.memory_space<vmem>>, vector<1x1x32xf32>
    %157 = vector.shape_cast %156 : vector<1x1x32xf32> to vector<1x32xf32>
    %cst_111 = arith.constant dense<0.000000e+00> : vector<64xf32>
    %158 = vector.multi_reduction <add>, %153, %cst_111 [1] : vector<64x32xf32> to vector<64xf32>
    %159 = vector.shape_cast %158 : vector<64xf32> to vector<64x1xf32>
    %cst_112 = arith.constant 3.200000e+01 : f32
    %160 = vector.broadcast %cst_112 : f32 to vector<64x1xf32>
    %161 = arith.divf %159, %160 : vector<64x1xf32>
    %162 = vector.broadcast %161 : vector<64x1xf32> to vector<64x32xf32>
    %163 = arith.subf %153, %162 : vector<64x32xf32>
    %164 = arith.mulf %163, %163 : vector<64x32xf32>
    %cst_113 = arith.constant dense<0.000000e+00> : vector<64xf32>
    %165 = vector.multi_reduction <add>, %164, %cst_113 [1] : vector<64x32xf32> to vector<64xf32>
    %166 = vector.shape_cast %165 : vector<64xf32> to vector<64x1xf32>
    %cst_114 = arith.constant 3.200000e+01 : f32
    %167 = vector.broadcast %cst_114 : f32 to vector<64x1xf32>
    %168 = arith.divf %166, %167 : vector<64x1xf32>
    %169 = vector.broadcast %161 : vector<64x1xf32> to vector<64x32xf32>
    %170 = arith.subf %153, %169 : vector<64x32xf32>
    %cst_115 = arith.constant 9.99999974E-6 : f32
    %171 = vector.broadcast %cst_115 : f32 to vector<64x1xf32>
    %172 = arith.addf %168, %171 : vector<64x1xf32>
    %173 = math.rsqrt %172 : vector<64x1xf32>
    %174 = vector.broadcast %173 : vector<64x1xf32> to vector<64x32xf32>
    %175 = arith.mulf %170, %174 : vector<64x32xf32>
    %176 = vector.broadcast %155 : vector<1x32xf32> to vector<64x32xf32>
    %177 = arith.mulf %175, %176 : vector<64x32xf32>
    %178 = vector.broadcast %157 : vector<1x32xf32> to vector<64x32xf32>
    %179 = arith.addf %177, %178 : vector<64x32xf32>
    %180 = arith.truncf %179 : vector<64x32xf32> to vector<64x32xbf16>
    %c0_116 = arith.constant 0 : index
    %c0_117 = arith.constant 0 : index
    %c0_118 = arith.constant 0 : index
    %181 = vector.load %arg19[%c0_116, %c0_117, %c0_118] : memref<3x32x2048xbf16, #tpu.memory_space<vmem>>, vector<1x32x2048xbf16>
    %182 = vector.shape_cast %181 : vector<1x32x2048xbf16> to vector<32x2048xbf16>
    %cst_119 = arith.constant dense<0.000000e+00> : vector<64x2048xf32>
    %183 = tpu.matmul %180, %182, %cst_119 {dimension_numbers = #tpu.dot_dimension_numbers<[1], [0], [0], [1], [0, 0, 1, 1], [], []>} : vector<64x32xbf16>, vector<32x2048xbf16>, vector<64x2048xf32> -> vector<64x2048xf32>
    %c0_120 = arith.constant 0 : index
    %c0_121 = arith.constant 0 : index
    %c0_122 = arith.constant 0 : index
    %184 = vector.load %arg20[%c0_120, %c0_121, %c0_122] : memref<3x1x2048xf32, #tpu.memory_space<vmem>>, vector<1x1x2048xf32>
    %185 = vector.shape_cast %184 : vector<1x1x2048xf32> to vector<1x2048xf32>
    %186 = vector.broadcast %185 : vector<1x2048xf32> to vector<64x2048xf32>
    %187 = arith.addf %183, %186 : vector<64x2048xf32>
    %cst_123 = arith.constant 0.000000e+00 : f32
    %188 = vector.broadcast %cst_123 : f32 to vector<64x2048xf32>
    %189 = arith.maximumf %187, %188 : vector<64x2048xf32>
    %190 = arith.truncf %189 : vector<64x2048xf32> to vector<64x2048xbf16>
    %c0_124 = arith.constant 0 : index
    %c0_125 = arith.constant 0 : index
    %c0_126 = arith.constant 0 : index
    %191 = vector.load %arg21[%c0_124, %c0_125, %c0_126] : memref<3x2048x32xbf16, #tpu.memory_space<vmem>>, vector<1x2048x32xbf16>
    %192 = vector.shape_cast %191 : vector<1x2048x32xbf16> to vector<2048x32xbf16>
    %cst_127 = arith.constant dense<0.000000e+00> : vector<64x32xf32>
    %193 = tpu.matmul %190, %192, %cst_127 {dimension_numbers = #tpu.dot_dimension_numbers<[1], [0], [0], [1], [0, 0, 1, 1], [], []>} : vector<64x2048xbf16>, vector<2048x32xbf16>, vector<64x32xf32> -> vector<64x32xf32>
    %c0_128 = arith.constant 0 : index
    %c0_129 = arith.constant 0 : index
    %c0_130 = arith.constant 0 : index
    %194 = vector.load %arg22[%c0_128, %c0_129, %c0_130] : memref<3x1x32xf32, #tpu.memory_space<vmem>>, vector<1x1x32xf32>
    %195 = vector.shape_cast %194 : vector<1x1x32xf32> to vector<1x32xf32>
    %196 = vector.broadcast %195 : vector<1x32xf32> to vector<64x32xf32>
    %197 = arith.addf %193, %196 : vector<64x32xf32>
    %198 = arith.addf %179, %197 : vector<64x32xf32>
    %c0_131 = arith.constant 0 : index
    %c0_132 = arith.constant 0 : index
    %c0_133 = arith.constant 0 : index
    %199 = vector.load %arg23[%c0_131, %c0_132, %c0_133] : memref<3x1x32xf32, #tpu.memory_space<vmem>>, vector<1x1x32xf32>
    %200 = vector.shape_cast %199 : vector<1x1x32xf32> to vector<1x32xf32>
    %c0_134 = arith.constant 0 : index
    %c0_135 = arith.constant 0 : index
    %c0_136 = arith.constant 0 : index
    %201 = vector.load %arg24[%c0_134, %c0_135, %c0_136] : memref<3x1x32xf32, #tpu.memory_space<vmem>>, vector<1x1x32xf32>
    %202 = vector.shape_cast %201 : vector<1x1x32xf32> to vector<1x32xf32>
    %cst_137 = arith.constant dense<0.000000e+00> : vector<64xf32>
    %203 = vector.multi_reduction <add>, %198, %cst_137 [1] : vector<64x32xf32> to vector<64xf32>
    %204 = vector.shape_cast %203 : vector<64xf32> to vector<64x1xf32>
    %cst_138 = arith.constant 3.200000e+01 : f32
    %205 = vector.broadcast %cst_138 : f32 to vector<64x1xf32>
    %206 = arith.divf %204, %205 : vector<64x1xf32>
    %207 = vector.broadcast %206 : vector<64x1xf32> to vector<64x32xf32>
    %208 = arith.subf %198, %207 : vector<64x32xf32>
    %209 = arith.mulf %208, %208 : vector<64x32xf32>
    %cst_139 = arith.constant dense<0.000000e+00> : vector<64xf32>
    %210 = vector.multi_reduction <add>, %209, %cst_139 [1] : vector<64x32xf32> to vector<64xf32>
    %211 = vector.shape_cast %210 : vector<64xf32> to vector<64x1xf32>
    %cst_140 = arith.constant 3.200000e+01 : f32
    %212 = vector.broadcast %cst_140 : f32 to vector<64x1xf32>
    %213 = arith.divf %211, %212 : vector<64x1xf32>
    %214 = vector.broadcast %206 : vector<64x1xf32> to vector<64x32xf32>
    %215 = arith.subf %198, %214 : vector<64x32xf32>
    %cst_141 = arith.constant 9.99999974E-6 : f32
    %216 = vector.broadcast %cst_141 : f32 to vector<64x1xf32>
    %217 = arith.addf %213, %216 : vector<64x1xf32>
    %218 = math.rsqrt %217 : vector<64x1xf32>
    %219 = vector.broadcast %218 : vector<64x1xf32> to vector<64x32xf32>
    %220 = arith.mulf %215, %219 : vector<64x32xf32>
    %221 = vector.broadcast %200 : vector<1x32xf32> to vector<64x32xf32>
    %222 = arith.mulf %220, %221 : vector<64x32xf32>
    %223 = vector.broadcast %202 : vector<1x32xf32> to vector<64x32xf32>
    %224 = arith.addf %222, %223 : vector<64x32xf32>
    %cst_142 = arith.constant 0.000000e+00 : f32
    %225 = vector.broadcast %cst_142 : f32 to vector<64x32xf32>
    %c1_143 = arith.constant 1 : index
    %c0_144 = arith.constant 0 : index
    %c0_145 = arith.constant 0 : index
    %c0_146 = arith.constant 0 : index
    %226 = vector.load %arg9[%c1_143, %c0_144, %c0_145, %c0_146] : memref<3x2x32x16xf32, #tpu.memory_space<vmem>>, vector<1x1x32x16xf32>
    %227 = vector.shape_cast %226 : vector<1x1x32x16xf32> to vector<32x16xf32>
    %cst_147 = arith.constant dense<0.000000e+00> : vector<64x16xf32>
    %228 = tpu.matmul %224, %227, %cst_147 {dimension_numbers = #tpu.dot_dimension_numbers<[1], [0], [0], [1], [0, 0, 1, 1], [], []>} : vector<64x32xf32>, vector<32x16xf32>, vector<64x16xf32> -> vector<64x16xf32>
    %c1_148 = arith.constant 1 : index
    %c0_149 = arith.constant 0 : index
    %c0_150 = arith.constant 0 : index
    %c0_151 = arith.constant 0 : index
    %229 = vector.load %arg10[%c1_148, %c0_149, %c0_150, %c0_151] : memref<3x2x1x16xf32, #tpu.memory_space<vmem>>, vector<1x1x1x16xf32>
    %230 = vector.shape_cast %229 : vector<1x1x1x16xf32> to vector<1x16xf32>
    %231 = vector.broadcast %230 : vector<1x16xf32> to vector<64x16xf32>
    %232 = arith.addf %228, %231 : vector<64x16xf32>
    %c1_152 = arith.constant 1 : index
    %c0_153 = arith.constant 0 : index
    %c0_154 = arith.constant 0 : index
    %c0_155 = arith.constant 0 : index
    %233 = vector.load %arg11[%c1_152, %c0_153, %c0_154, %c0_155] : memref<3x2x32x16xf32, #tpu.memory_space<vmem>>, vector<1x1x32x16xf32>
    %234 = vector.shape_cast %233 : vector<1x1x32x16xf32> to vector<32x16xf32>
    %cst_156 = arith.constant dense<0.000000e+00> : vector<64x16xf32>
    %235 = tpu.matmul %224, %234, %cst_156 {dimension_numbers = #tpu.dot_dimension_numbers<[1], [0], [0], [1], [0, 0, 1, 1], [], []>} : vector<64x32xf32>, vector<32x16xf32>, vector<64x16xf32> -> vector<64x16xf32>
    %c1_157 = arith.constant 1 : index
    %c0_158 = arith.constant 0 : index
    %c0_159 = arith.constant 0 : index
    %c0_160 = arith.constant 0 : index
    %236 = vector.load %arg12[%c1_157, %c0_158, %c0_159, %c0_160] : memref<3x2x1x16xf32, #tpu.memory_space<vmem>>, vector<1x1x1x16xf32>
    %237 = vector.shape_cast %236 : vector<1x1x1x16xf32> to vector<1x16xf32>
    %238 = vector.broadcast %237 : vector<1x16xf32> to vector<64x16xf32>
    %239 = arith.addf %235, %238 : vector<64x16xf32>
    %c1_161 = arith.constant 1 : index
    %c0_162 = arith.constant 0 : index
    %c0_163 = arith.constant 0 : index
    %c0_164 = arith.constant 0 : index
    %240 = vector.load %arg13[%c1_161, %c0_162, %c0_163, %c0_164] : memref<3x2x32x16xf32, #tpu.memory_space<vmem>>, vector<1x1x32x16xf32>
    %241 = vector.shape_cast %240 : vector<1x1x32x16xf32> to vector<32x16xf32>
    %cst_165 = arith.constant dense<0.000000e+00> : vector<64x16xf32>
    %242 = tpu.matmul %224, %241, %cst_165 {dimension_numbers = #tpu.dot_dimension_numbers<[1], [0], [0], [1], [0, 0, 1, 1], [], []>} : vector<64x32xf32>, vector<32x16xf32>, vector<64x16xf32> -> vector<64x16xf32>
    %c1_166 = arith.constant 1 : index
    %c0_167 = arith.constant 0 : index
    %c0_168 = arith.constant 0 : index
    %c0_169 = arith.constant 0 : index
    %243 = vector.load %arg14[%c1_166, %c0_167, %c0_168, %c0_169] : memref<3x2x1x16xf32, #tpu.memory_space<vmem>>, vector<1x1x1x16xf32>
    %244 = vector.shape_cast %243 : vector<1x1x1x16xf32> to vector<1x16xf32>
    %245 = vector.broadcast %244 : vector<1x16xf32> to vector<64x16xf32>
    %246 = arith.addf %242, %245 : vector<64x16xf32>
    %247 = vector.shape_cast %232 : vector<64x16xf32> to vector<2x32x16xf32>
    %248 = vector.shape_cast %239 : vector<64x16xf32> to vector<2x32x16xf32>
    %249 = vector.shape_cast %246 : vector<64x16xf32> to vector<2x32x16xf32>
    "tpu.trace_start"() <{level = 10 : i32, message = "bqd,bkd->bqk"}> : () -> ()
    %cst_170 = arith.constant dense<0.000000e+00> : vector<2x32x32xf32>
    %250 = tpu.matmul %247, %248, %cst_170 {dimension_numbers = #tpu.dot_dimension_numbers<[2], [2], [1], [1], [0, 0, 0, 1, 1, 1], [0], [0]>} : vector<2x32x16xf32>, vector<2x32x16xf32>, vector<2x32x32xf32> -> vector<2x32x32xf32>
    "tpu.trace_stop"() : () -> ()
    %cst_171 = arith.constant 2.500000e-01 : f32
    %251 = vector.broadcast %cst_171 : f32 to vector<2x32x32xf32>
    %252 = arith.mulf %250, %251 : vector<2x32x32xf32>
    %253 = vector.shape_cast %55 : vector<32x32xf32> to vector<1x32x32xf32>
    %254 = vector.broadcast %253 : vector<1x32x32xf32> to vector<2x32x32xf32>
    %255 = arith.addf %252, %254 : vector<2x32x32xf32>
    %cst_172 = arith.constant dense<0xFF800000> : vector<2x32xf32>
    %256 = vector.multi_reduction <maximumf>, %255, %cst_172 [2] : vector<2x32x32xf32> to vector<2x32xf32>
    %257 = vector.shape_cast %256 : vector<2x32xf32> to vector<2x32x1xf32>
    %258 = vector.broadcast %257 : vector<2x32x1xf32> to vector<2x32x32xf32>
    %259 = arith.subf %255, %258 : vector<2x32x32xf32>
    %260 = math.exp %259 : vector<2x32x32xf32>
    %cst_173 = arith.constant dense<0.000000e+00> : vector<2x32xf32>
    %261 = vector.multi_reduction <add>, %260, %cst_173 [2] : vector<2x32x32xf32> to vector<2x32xf32>
    %262 = vector.shape_cast %261 : vector<2x32xf32> to vector<2x32x1xf32>
    %263 = tpu.reciprocal %262 {approx = true} : vector<2x32x1xf32> -> vector<2x32x1xf32>
    %264 = vector.broadcast %263 : vector<2x32x1xf32> to vector<2x32x32xf32>
    %265 = arith.mulf %260, %264 : vector<2x32x32xf32>
    "tpu.trace_start"() <{level = 10 : i32, message = "bqk,bkd->bqd"}> : () -> ()
    %cst_174 = arith.constant dense<0.000000e+00> : vector<2x32x16xf32>
    %266 = tpu.matmul %265, %249, %cst_174 {dimension_numbers = #tpu.dot_dimension_numbers<[2], [1], [1], [2], [0, 0, 0, 1, 1, 2], [0], [0]>} : vector<2x32x32xf32>, vector<2x32x16xf32>, vector<2x32x16xf32> -> vector<2x32x16xf32>
    "tpu.trace_stop"() : () -> ()
    %267 = vector.shape_cast %266 : vector<2x32x16xf32> to vector<64x16xf32>
    %c1_175 = arith.constant 1 : index
    %c0_176 = arith.constant 0 : index
    %c0_177 = arith.constant 0 : index
    %c0_178 = arith.constant 0 : index
    %268 = vector.load %arg15[%c1_175, %c0_176, %c0_177, %c0_178] : memref<3x2x16x32xf32, #tpu.memory_space<vmem>>, vector<1x1x16x32xf32>
    %269 = vector.shape_cast %268 : vector<1x1x16x32xf32> to vector<16x32xf32>
    %cst_179 = arith.constant dense<0.000000e+00> : vector<64x32xf32>
    %270 = tpu.matmul %267, %269, %cst_179 {dimension_numbers = #tpu.dot_dimension_numbers<[1], [0], [0], [1], [0, 0, 1, 1], [], []>} : vector<64x16xf32>, vector<16x32xf32>, vector<64x32xf32> -> vector<64x32xf32>
    %271 = arith.addf %225, %270 : vector<64x32xf32>
    %c1_180 = arith.constant 1 : index
    %c1_181 = arith.constant 1 : index
    %c0_182 = arith.constant 0 : index
    %c0_183 = arith.constant 0 : index
    %272 = vector.load %arg9[%c1_180, %c1_181, %c0_182, %c0_183] : memref<3x2x32x16xf32, #tpu.memory_space<vmem>>, vector<1x1x32x16xf32>
    %273 = vector.shape_cast %272 : vector<1x1x32x16xf32> to vector<32x16xf32>
    %cst_184 = arith.constant dense<0.000000e+00> : vector<64x16xf32>
    %274 = tpu.matmul %224, %273, %cst_184 {dimension_numbers = #tpu.dot_dimension_numbers<[1], [0], [0], [1], [0, 0, 1, 1], [], []>} : vector<64x32xf32>, vector<32x16xf32>, vector<64x16xf32> -> vector<64x16xf32>
    %c1_185 = arith.constant 1 : index
    %c1_186 = arith.constant 1 : index
    %c0_187 = arith.constant 0 : index
    %c0_188 = arith.constant 0 : index
    %275 = vector.load %arg10[%c1_185, %c1_186, %c0_187, %c0_188] : memref<3x2x1x16xf32, #tpu.memory_space<vmem>>, vector<1x1x1x16xf32>
    %276 = vector.shape_cast %275 : vector<1x1x1x16xf32> to vector<1x16xf32>
    %277 = vector.broadcast %276 : vector<1x16xf32> to vector<64x16xf32>
    %278 = arith.addf %274, %277 : vector<64x16xf32>
    %c1_189 = arith.constant 1 : index
    %c1_190 = arith.constant 1 : index
    %c0_191 = arith.constant 0 : index
    %c0_192 = arith.constant 0 : index
    %279 = vector.load %arg11[%c1_189, %c1_190, %c0_191, %c0_192] : memref<3x2x32x16xf32, #tpu.memory_space<vmem>>, vector<1x1x32x16xf32>
    %280 = vector.shape_cast %279 : vector<1x1x32x16xf32> to vector<32x16xf32>
    %cst_193 = arith.constant dense<0.000000e+00> : vector<64x16xf32>
    %281 = tpu.matmul %224, %280, %cst_193 {dimension_numbers = #tpu.dot_dimension_numbers<[1], [0], [0], [1], [0, 0, 1, 1], [], []>} : vector<64x32xf32>, vector<32x16xf32>, vector<64x16xf32> -> vector<64x16xf32>
    %c1_194 = arith.constant 1 : index
    %c1_195 = arith.constant 1 : index
    %c0_196 = arith.constant 0 : index
    %c0_197 = arith.constant 0 : index
    %282 = vector.load %arg12[%c1_194, %c1_195, %c0_196, %c0_197] : memref<3x2x1x16xf32, #tpu.memory_space<vmem>>, vector<1x1x1x16xf32>
    %283 = vector.shape_cast %282 : vector<1x1x1x16xf32> to vector<1x16xf32>
    %284 = vector.broadcast %283 : vector<1x16xf32> to vector<64x16xf32>
    %285 = arith.addf %281, %284 : vector<64x16xf32>
    %c1_198 = arith.constant 1 : index
    %c1_199 = arith.constant 1 : index
    %c0_200 = arith.constant 0 : index
    %c0_201 = arith.constant 0 : index
    %286 = vector.load %arg13[%c1_198, %c1_199, %c0_200, %c0_201] : memref<3x2x32x16xf32, #tpu.memory_space<vmem>>, vector<1x1x32x16xf32>
    %287 = vector.shape_cast %286 : vector<1x1x32x16xf32> to vector<32x16xf32>
    %cst_202 = arith.constant dense<0.000000e+00> : vector<64x16xf32>
    %288 = tpu.matmul %224, %287, %cst_202 {dimension_numbers = #tpu.dot_dimension_numbers<[1], [0], [0], [1], [0, 0, 1, 1], [], []>} : vector<64x32xf32>, vector<32x16xf32>, vector<64x16xf32> -> vector<64x16xf32>
    %c1_203 = arith.constant 1 : index
    %c1_204 = arith.constant 1 : index
    %c0_205 = arith.constant 0 : index
    %c0_206 = arith.constant 0 : index
    %289 = vector.load %arg14[%c1_203, %c1_204, %c0_205, %c0_206] : memref<3x2x1x16xf32, #tpu.memory_space<vmem>>, vector<1x1x1x16xf32>
    %290 = vector.shape_cast %289 : vector<1x1x1x16xf32> to vector<1x16xf32>
    %291 = vector.broadcast %290 : vector<1x16xf32> to vector<64x16xf32>
    %292 = arith.addf %288, %291 : vector<64x16xf32>
    %293 = vector.shape_cast %278 : vector<64x16xf32> to vector<2x32x16xf32>
    %294 = vector.shape_cast %285 : vector<64x16xf32> to vector<2x32x16xf32>
    %295 = vector.shape_cast %292 : vector<64x16xf32> to vector<2x32x16xf32>
    "tpu.trace_start"() <{level = 10 : i32, message = "bqd,bkd->bqk"}> : () -> ()
    %cst_207 = arith.constant dense<0.000000e+00> : vector<2x32x32xf32>
    %296 = tpu.matmul %293, %294, %cst_207 {dimension_numbers = #tpu.dot_dimension_numbers<[2], [2], [1], [1], [0, 0, 0, 1, 1, 1], [0], [0]>} : vector<2x32x16xf32>, vector<2x32x16xf32>, vector<2x32x32xf32> -> vector<2x32x32xf32>
    "tpu.trace_stop"() : () -> ()
    %cst_208 = arith.constant 2.500000e-01 : f32
    %297 = vector.broadcast %cst_208 : f32 to vector<2x32x32xf32>
    %298 = arith.mulf %296, %297 : vector<2x32x32xf32>
    %299 = vector.shape_cast %55 : vector<32x32xf32> to vector<1x32x32xf32>
    %300 = vector.broadcast %299 : vector<1x32x32xf32> to vector<2x32x32xf32>
    %301 = arith.addf %298, %300 : vector<2x32x32xf32>
    %cst_209 = arith.constant dense<0xFF800000> : vector<2x32xf32>
    %302 = vector.multi_reduction <maximumf>, %301, %cst_209 [2] : vector<2x32x32xf32> to vector<2x32xf32>
    %303 = vector.shape_cast %302 : vector<2x32xf32> to vector<2x32x1xf32>
    %304 = vector.broadcast %303 : vector<2x32x1xf32> to vector<2x32x32xf32>
    %305 = arith.subf %301, %304 : vector<2x32x32xf32>
    %306 = math.exp %305 : vector<2x32x32xf32>
    %cst_210 = arith.constant dense<0.000000e+00> : vector<2x32xf32>
    %307 = vector.multi_reduction <add>, %306, %cst_210 [2] : vector<2x32x32xf32> to vector<2x32xf32>
    %308 = vector.shape_cast %307 : vector<2x32xf32> to vector<2x32x1xf32>
    %309 = tpu.reciprocal %308 {approx = true} : vector<2x32x1xf32> -> vector<2x32x1xf32>
    %310 = vector.broadcast %309 : vector<2x32x1xf32> to vector<2x32x32xf32>
    %311 = arith.mulf %306, %310 : vector<2x32x32xf32>
    "tpu.trace_start"() <{level = 10 : i32, message = "bqk,bkd->bqd"}> : () -> ()
    %cst_211 = arith.constant dense<0.000000e+00> : vector<2x32x16xf32>
    %312 = tpu.matmul %311, %295, %cst_211 {dimension_numbers = #tpu.dot_dimension_numbers<[2], [1], [1], [2], [0, 0, 0, 1, 1, 2], [0], [0]>} : vector<2x32x32xf32>, vector<2x32x16xf32>, vector<2x32x16xf32> -> vector<2x32x16xf32>
    "tpu.trace_stop"() : () -> ()
    %313 = vector.shape_cast %312 : vector<2x32x16xf32> to vector<64x16xf32>
    %c1_212 = arith.constant 1 : index
    %c1_213 = arith.constant 1 : index
    %c0_214 = arith.constant 0 : index
    %c0_215 = arith.constant 0 : index
    %314 = vector.load %arg15[%c1_212, %c1_213, %c0_214, %c0_215] : memref<3x2x16x32xf32, #tpu.memory_space<vmem>>, vector<1x1x16x32xf32>
    %315 = vector.shape_cast %314 : vector<1x1x16x32xf32> to vector<16x32xf32>
    %cst_216 = arith.constant dense<0.000000e+00> : vector<64x32xf32>
    %316 = tpu.matmul %313, %315, %cst_216 {dimension_numbers = #tpu.dot_dimension_numbers<[1], [0], [0], [1], [0, 0, 1, 1], [], []>} : vector<64x16xf32>, vector<16x32xf32>, vector<64x32xf32> -> vector<64x32xf32>
    %317 = arith.addf %271, %316 : vector<64x32xf32>
    %c1_217 = arith.constant 1 : index
    %c0_218 = arith.constant 0 : index
    %c0_219 = arith.constant 0 : index
    %318 = vector.load %arg16[%c1_217, %c0_218, %c0_219] : memref<3x1x32xf32, #tpu.memory_space<vmem>>, vector<1x1x32xf32>
    %319 = vector.shape_cast %318 : vector<1x1x32xf32> to vector<1x32xf32>
    %320 = vector.broadcast %319 : vector<1x32xf32> to vector<64x32xf32>
    %321 = arith.addf %317, %320 : vector<64x32xf32>
    %322 = arith.addf %224, %321 : vector<64x32xf32>
    %c1_220 = arith.constant 1 : index
    %c0_221 = arith.constant 0 : index
    %c0_222 = arith.constant 0 : index
    %323 = vector.load %arg17[%c1_220, %c0_221, %c0_222] : memref<3x1x32xf32, #tpu.memory_space<vmem>>, vector<1x1x32xf32>
    %324 = vector.shape_cast %323 : vector<1x1x32xf32> to vector<1x32xf32>
    %c1_223 = arith.constant 1 : index
    %c0_224 = arith.constant 0 : index
    %c0_225 = arith.constant 0 : index
    %325 = vector.load %arg18[%c1_223, %c0_224, %c0_225] : memref<3x1x32xf32, #tpu.memory_space<vmem>>, vector<1x1x32xf32>
    %326 = vector.shape_cast %325 : vector<1x1x32xf32> to vector<1x32xf32>
    %cst_226 = arith.constant dense<0.000000e+00> : vector<64xf32>
    %327 = vector.multi_reduction <add>, %322, %cst_226 [1] : vector<64x32xf32> to vector<64xf32>
    %328 = vector.shape_cast %327 : vector<64xf32> to vector<64x1xf32>
    %cst_227 = arith.constant 3.200000e+01 : f32
    %329 = vector.broadcast %cst_227 : f32 to vector<64x1xf32>
    %330 = arith.divf %328, %329 : vector<64x1xf32>
    %331 = vector.broadcast %330 : vector<64x1xf32> to vector<64x32xf32>
    %332 = arith.subf %322, %331 : vector<64x32xf32>
    %333 = arith.mulf %332, %332 : vector<64x32xf32>
    %cst_228 = arith.constant dense<0.000000e+00> : vector<64xf32>
    %334 = vector.multi_reduction <add>, %333, %cst_228 [1] : vector<64x32xf32> to vector<64xf32>
    %335 = vector.shape_cast %334 : vector<64xf32> to vector<64x1xf32>
    %cst_229 = arith.constant 3.200000e+01 : f32
    %336 = vector.broadcast %cst_229 : f32 to vector<64x1xf32>
    %337 = arith.divf %335, %336 : vector<64x1xf32>
    %338 = vector.broadcast %330 : vector<64x1xf32> to vector<64x32xf32>
    %339 = arith.subf %322, %338 : vector<64x32xf32>
    %cst_230 = arith.constant 9.99999974E-6 : f32
    %340 = vector.broadcast %cst_230 : f32 to vector<64x1xf32>
    %341 = arith.addf %337, %340 : vector<64x1xf32>
    %342 = math.rsqrt %341 : vector<64x1xf32>
    %343 = vector.broadcast %342 : vector<64x1xf32> to vector<64x32xf32>
    %344 = arith.mulf %339, %343 : vector<64x32xf32>
    %345 = vector.broadcast %324 : vector<1x32xf32> to vector<64x32xf32>
    %346 = arith.mulf %344, %345 : vector<64x32xf32>
    %347 = vector.broadcast %326 : vector<1x32xf32> to vector<64x32xf32>
    %348 = arith.addf %346, %347 : vector<64x32xf32>
    %349 = arith.truncf %348 : vector<64x32xf32> to vector<64x32xbf16>
    %c1_231 = arith.constant 1 : index
    %c0_232 = arith.constant 0 : index
    %c0_233 = arith.constant 0 : index
    %350 = vector.load %arg19[%c1_231, %c0_232, %c0_233] : memref<3x32x2048xbf16, #tpu.memory_space<vmem>>, vector<1x32x2048xbf16>
    %351 = vector.shape_cast %350 : vector<1x32x2048xbf16> to vector<32x2048xbf16>
    %cst_234 = arith.constant dense<0.000000e+00> : vector<64x2048xf32>
    %352 = tpu.matmul %349, %351, %cst_234 {dimension_numbers = #tpu.dot_dimension_numbers<[1], [0], [0], [1], [0, 0, 1, 1], [], []>} : vector<64x32xbf16>, vector<32x2048xbf16>, vector<64x2048xf32> -> vector<64x2048xf32>
    %c1_235 = arith.constant 1 : index
    %c0_236 = arith.constant 0 : index
    %c0_237 = arith.constant 0 : index
    %353 = vector.load %arg20[%c1_235, %c0_236, %c0_237] : memref<3x1x2048xf32, #tpu.memory_space<vmem>>, vector<1x1x2048xf32>
    %354 = vector.shape_cast %353 : vector<1x1x2048xf32> to vector<1x2048xf32>
    %355 = vector.broadcast %354 : vector<1x2048xf32> to vector<64x2048xf32>
    %356 = arith.addf %352, %355 : vector<64x2048xf32>
    %cst_238 = arith.constant 0.000000e+00 : f32
    %357 = vector.broadcast %cst_238 : f32 to vector<64x2048xf32>
    %358 = arith.maximumf %356, %357 : vector<64x2048xf32>
    %359 = arith.truncf %358 : vector<64x2048xf32> to vector<64x2048xbf16>
    %c1_239 = arith.constant 1 : index
    %c0_240 = arith.constant 0 : index
    %c0_241 = arith.constant 0 : index
    %360 = vector.load %arg21[%c1_239, %c0_240, %c0_241] : memref<3x2048x32xbf16, #tpu.memory_space<vmem>>, vector<1x2048x32xbf16>
    %361 = vector.shape_cast %360 : vector<1x2048x32xbf16> to vector<2048x32xbf16>
    %cst_242 = arith.constant dense<0.000000e+00> : vector<64x32xf32>
    %362 = tpu.matmul %359, %361, %cst_242 {dimension_numbers = #tpu.dot_dimension_numbers<[1], [0], [0], [1], [0, 0, 1, 1], [], []>} : vector<64x2048xbf16>, vector<2048x32xbf16>, vector<64x32xf32> -> vector<64x32xf32>
    %c1_243 = arith.constant 1 : index
    %c0_244 = arith.constant 0 : index
    %c0_245 = arith.constant 0 : index
    %363 = vector.load %arg22[%c1_243, %c0_244, %c0_245] : memref<3x1x32xf32, #tpu.memory_space<vmem>>, vector<1x1x32xf32>
    %364 = vector.shape_cast %363 : vector<1x1x32xf32> to vector<1x32xf32>
    %365 = vector.broadcast %364 : vector<1x32xf32> to vector<64x32xf32>
    %366 = arith.addf %362, %365 : vector<64x32xf32>
    %367 = arith.addf %348, %366 : vector<64x32xf32>
    %c1_246 = arith.constant 1 : index
    %c0_247 = arith.constant 0 : index
    %c0_248 = arith.constant 0 : index
    %368 = vector.load %arg23[%c1_246, %c0_247, %c0_248] : memref<3x1x32xf32, #tpu.memory_space<vmem>>, vector<1x1x32xf32>
    %369 = vector.shape_cast %368 : vector<1x1x32xf32> to vector<1x32xf32>
    %c1_249 = arith.constant 1 : index
    %c0_250 = arith.constant 0 : index
    %c0_251 = arith.constant 0 : index
    %370 = vector.load %arg24[%c1_249, %c0_250, %c0_251] : memref<3x1x32xf32, #tpu.memory_space<vmem>>, vector<1x1x32xf32>
    %371 = vector.shape_cast %370 : vector<1x1x32xf32> to vector<1x32xf32>
    %cst_252 = arith.constant dense<0.000000e+00> : vector<64xf32>
    %372 = vector.multi_reduction <add>, %367, %cst_252 [1] : vector<64x32xf32> to vector<64xf32>
    %373 = vector.shape_cast %372 : vector<64xf32> to vector<64x1xf32>
    %cst_253 = arith.constant 3.200000e+01 : f32
    %374 = vector.broadcast %cst_253 : f32 to vector<64x1xf32>
    %375 = arith.divf %373, %374 : vector<64x1xf32>
    %376 = vector.broadcast %375 : vector<64x1xf32> to vector<64x32xf32>
    %377 = arith.subf %367, %376 : vector<64x32xf32>
    %378 = arith.mulf %377, %377 : vector<64x32xf32>
    %cst_254 = arith.constant dense<0.000000e+00> : vector<64xf32>
    %379 = vector.multi_reduction <add>, %378, %cst_254 [1] : vector<64x32xf32> to vector<64xf32>
    %380 = vector.shape_cast %379 : vector<64xf32> to vector<64x1xf32>
    %cst_255 = arith.constant 3.200000e+01 : f32
    %381 = vector.broadcast %cst_255 : f32 to vector<64x1xf32>
    %382 = arith.divf %380, %381 : vector<64x1xf32>
    %383 = vector.broadcast %375 : vector<64x1xf32> to vector<64x32xf32>
    %384 = arith.subf %367, %383 : vector<64x32xf32>
    %cst_256 = arith.constant 9.99999974E-6 : f32
    %385 = vector.broadcast %cst_256 : f32 to vector<64x1xf32>
    %386 = arith.addf %382, %385 : vector<64x1xf32>
    %387 = math.rsqrt %386 : vector<64x1xf32>
    %388 = vector.broadcast %387 : vector<64x1xf32> to vector<64x32xf32>
    %389 = arith.mulf %384, %388 : vector<64x32xf32>
    %390 = vector.broadcast %369 : vector<1x32xf32> to vector<64x32xf32>
    %391 = arith.mulf %389, %390 : vector<64x32xf32>
    %392 = vector.broadcast %371 : vector<1x32xf32> to vector<64x32xf32>
    %393 = arith.addf %391, %392 : vector<64x32xf32>
    %cst_257 = arith.constant 0.000000e+00 : f32
    %394 = vector.broadcast %cst_257 : f32 to vector<64x32xf32>
    %c2 = arith.constant 2 : index
    %c0_258 = arith.constant 0 : index
    %c0_259 = arith.constant 0 : index
    %c0_260 = arith.constant 0 : index
    %395 = vector.load %arg9[%c2, %c0_258, %c0_259, %c0_260] : memref<3x2x32x16xf32, #tpu.memory_space<vmem>>, vector<1x1x32x16xf32>
    %396 = vector.shape_cast %395 : vector<1x1x32x16xf32> to vector<32x16xf32>
    %cst_261 = arith.constant dense<0.000000e+00> : vector<64x16xf32>
    %397 = tpu.matmul %393, %396, %cst_261 {dimension_numbers = #tpu.dot_dimension_numbers<[1], [0], [0], [1], [0, 0, 1, 1], [], []>} : vector<64x32xf32>, vector<32x16xf32>, vector<64x16xf32> -> vector<64x16xf32>
    %c2_262 = arith.constant 2 : index
    %c0_263 = arith.constant 0 : index
    %c0_264 = arith.constant 0 : index
    %c0_265 = arith.constant 0 : index
    %398 = vector.load %arg10[%c2_262, %c0_263, %c0_264, %c0_265] : memref<3x2x1x16xf32, #tpu.memory_space<vmem>>, vector<1x1x1x16xf32>
    %399 = vector.shape_cast %398 : vector<1x1x1x16xf32> to vector<1x16xf32>
    %400 = vector.broadcast %399 : vector<1x16xf32> to vector<64x16xf32>
    %401 = arith.addf %397, %400 : vector<64x16xf32>
    %c2_266 = arith.constant 2 : index
    %c0_267 = arith.constant 0 : index
    %c0_268 = arith.constant 0 : index
    %c0_269 = arith.constant 0 : index
    %402 = vector.load %arg11[%c2_266, %c0_267, %c0_268, %c0_269] : memref<3x2x32x16xf32, #tpu.memory_space<vmem>>, vector<1x1x32x16xf32>
    %403 = vector.shape_cast %402 : vector<1x1x32x16xf32> to vector<32x16xf32>
    %cst_270 = arith.constant dense<0.000000e+00> : vector<64x16xf32>
    %404 = tpu.matmul %393, %403, %cst_270 {dimension_numbers = #tpu.dot_dimension_numbers<[1], [0], [0], [1], [0, 0, 1, 1], [], []>} : vector<64x32xf32>, vector<32x16xf32>, vector<64x16xf32> -> vector<64x16xf32>
    %c2_271 = arith.constant 2 : index
    %c0_272 = arith.constant 0 : index
    %c0_273 = arith.constant 0 : index
    %c0_274 = arith.constant 0 : index
    %405 = vector.load %arg12[%c2_271, %c0_272, %c0_273, %c0_274] : memref<3x2x1x16xf32, #tpu.memory_space<vmem>>, vector<1x1x1x16xf32>
    %406 = vector.shape_cast %405 : vector<1x1x1x16xf32> to vector<1x16xf32>
    %407 = vector.broadcast %406 : vector<1x16xf32> to vector<64x16xf32>
    %408 = arith.addf %404, %407 : vector<64x16xf32>
    %c2_275 = arith.constant 2 : index
    %c0_276 = arith.constant 0 : index
    %c0_277 = arith.constant 0 : index
    %c0_278 = arith.constant 0 : index
    %409 = vector.load %arg13[%c2_275, %c0_276, %c0_277, %c0_278] : memref<3x2x32x16xf32, #tpu.memory_space<vmem>>, vector<1x1x32x16xf32>
    %410 = vector.shape_cast %409 : vector<1x1x32x16xf32> to vector<32x16xf32>
    %cst_279 = arith.constant dense<0.000000e+00> : vector<64x16xf32>
    %411 = tpu.matmul %393, %410, %cst_279 {dimension_numbers = #tpu.dot_dimension_numbers<[1], [0], [0], [1], [0, 0, 1, 1], [], []>} : vector<64x32xf32>, vector<32x16xf32>, vector<64x16xf32> -> vector<64x16xf32>
    %c2_280 = arith.constant 2 : index
    %c0_281 = arith.constant 0 : index
    %c0_282 = arith.constant 0 : index
    %c0_283 = arith.constant 0 : index
    %412 = vector.load %arg14[%c2_280, %c0_281, %c0_282, %c0_283] : memref<3x2x1x16xf32, #tpu.memory_space<vmem>>, vector<1x1x1x16xf32>
    %413 = vector.shape_cast %412 : vector<1x1x1x16xf32> to vector<1x16xf32>
    %414 = vector.broadcast %413 : vector<1x16xf32> to vector<64x16xf32>
    %415 = arith.addf %411, %414 : vector<64x16xf32>
    %416 = vector.shape_cast %401 : vector<64x16xf32> to vector<2x32x16xf32>
    %417 = vector.shape_cast %408 : vector<64x16xf32> to vector<2x32x16xf32>
    %418 = vector.shape_cast %415 : vector<64x16xf32> to vector<2x32x16xf32>
    "tpu.trace_start"() <{level = 10 : i32, message = "bqd,bkd->bqk"}> : () -> ()
    %cst_284 = arith.constant dense<0.000000e+00> : vector<2x32x32xf32>
    %419 = tpu.matmul %416, %417, %cst_284 {dimension_numbers = #tpu.dot_dimension_numbers<[2], [2], [1], [1], [0, 0, 0, 1, 1, 1], [0], [0]>} : vector<2x32x16xf32>, vector<2x32x16xf32>, vector<2x32x32xf32> -> vector<2x32x32xf32>
    "tpu.trace_stop"() : () -> ()
    %cst_285 = arith.constant 2.500000e-01 : f32
    %420 = vector.broadcast %cst_285 : f32 to vector<2x32x32xf32>
    %421 = arith.mulf %419, %420 : vector<2x32x32xf32>
    %422 = vector.shape_cast %55 : vector<32x32xf32> to vector<1x32x32xf32>
    %423 = vector.broadcast %422 : vector<1x32x32xf32> to vector<2x32x32xf32>
    %424 = arith.addf %421, %423 : vector<2x32x32xf32>
    %cst_286 = arith.constant dense<0xFF800000> : vector<2x32xf32>
    %425 = vector.multi_reduction <maximumf>, %424, %cst_286 [2] : vector<2x32x32xf32> to vector<2x32xf32>
    %426 = vector.shape_cast %425 : vector<2x32xf32> to vector<2x32x1xf32>
    %427 = vector.broadcast %426 : vector<2x32x1xf32> to vector<2x32x32xf32>
    %428 = arith.subf %424, %427 : vector<2x32x32xf32>
    %429 = math.exp %428 : vector<2x32x32xf32>
    %cst_287 = arith.constant dense<0.000000e+00> : vector<2x32xf32>
    %430 = vector.multi_reduction <add>, %429, %cst_287 [2] : vector<2x32x32xf32> to vector<2x32xf32>
    %431 = vector.shape_cast %430 : vector<2x32xf32> to vector<2x32x1xf32>
    %432 = tpu.reciprocal %431 {approx = true} : vector<2x32x1xf32> -> vector<2x32x1xf32>
    %433 = vector.broadcast %432 : vector<2x32x1xf32> to vector<2x32x32xf32>
    %434 = arith.mulf %429, %433 : vector<2x32x32xf32>
    "tpu.trace_start"() <{level = 10 : i32, message = "bqk,bkd->bqd"}> : () -> ()
    %cst_288 = arith.constant dense<0.000000e+00> : vector<2x32x16xf32>
    %435 = tpu.matmul %434, %418, %cst_288 {dimension_numbers = #tpu.dot_dimension_numbers<[2], [1], [1], [2], [0, 0, 0, 1, 1, 2], [0], [0]>} : vector<2x32x32xf32>, vector<2x32x16xf32>, vector<2x32x16xf32> -> vector<2x32x16xf32>
    "tpu.trace_stop"() : () -> ()
    %436 = vector.shape_cast %435 : vector<2x32x16xf32> to vector<64x16xf32>
    %c2_289 = arith.constant 2 : index
    %c0_290 = arith.constant 0 : index
    %c0_291 = arith.constant 0 : index
    %c0_292 = arith.constant 0 : index
    %437 = vector.load %arg15[%c2_289, %c0_290, %c0_291, %c0_292] : memref<3x2x16x32xf32, #tpu.memory_space<vmem>>, vector<1x1x16x32xf32>
    %438 = vector.shape_cast %437 : vector<1x1x16x32xf32> to vector<16x32xf32>
    %cst_293 = arith.constant dense<0.000000e+00> : vector<64x32xf32>
    %439 = tpu.matmul %436, %438, %cst_293 {dimension_numbers = #tpu.dot_dimension_numbers<[1], [0], [0], [1], [0, 0, 1, 1], [], []>} : vector<64x16xf32>, vector<16x32xf32>, vector<64x32xf32> -> vector<64x32xf32>
    %440 = arith.addf %394, %439 : vector<64x32xf32>
    %c2_294 = arith.constant 2 : index
    %c1_295 = arith.constant 1 : index
    %c0_296 = arith.constant 0 : index
    %c0_297 = arith.constant 0 : index
    %441 = vector.load %arg9[%c2_294, %c1_295, %c0_296, %c0_297] : memref<3x2x32x16xf32, #tpu.memory_space<vmem>>, vector<1x1x32x16xf32>
    %442 = vector.shape_cast %441 : vector<1x1x32x16xf32> to vector<32x16xf32>
    %cst_298 = arith.constant dense<0.000000e+00> : vector<64x16xf32>
    %443 = tpu.matmul %393, %442, %cst_298 {dimension_numbers = #tpu.dot_dimension_numbers<[1], [0], [0], [1], [0, 0, 1, 1], [], []>} : vector<64x32xf32>, vector<32x16xf32>, vector<64x16xf32> -> vector<64x16xf32>
    %c2_299 = arith.constant 2 : index
    %c1_300 = arith.constant 1 : index
    %c0_301 = arith.constant 0 : index
    %c0_302 = arith.constant 0 : index
    %444 = vector.load %arg10[%c2_299, %c1_300, %c0_301, %c0_302] : memref<3x2x1x16xf32, #tpu.memory_space<vmem>>, vector<1x1x1x16xf32>
    %445 = vector.shape_cast %444 : vector<1x1x1x16xf32> to vector<1x16xf32>
    %446 = vector.broadcast %445 : vector<1x16xf32> to vector<64x16xf32>
    %447 = arith.addf %443, %446 : vector<64x16xf32>
    %c2_303 = arith.constant 2 : index
    %c1_304 = arith.constant 1 : index
    %c0_305 = arith.constant 0 : index
    %c0_306 = arith.constant 0 : index
    %448 = vector.load %arg11[%c2_303, %c1_304, %c0_305, %c0_306] : memref<3x2x32x16xf32, #tpu.memory_space<vmem>>, vector<1x1x32x16xf32>
    %449 = vector.shape_cast %448 : vector<1x1x32x16xf32> to vector<32x16xf32>
    %cst_307 = arith.constant dense<0.000000e+00> : vector<64x16xf32>
    %450 = tpu.matmul %393, %449, %cst_307 {dimension_numbers = #tpu.dot_dimension_numbers<[1], [0], [0], [1], [0, 0, 1, 1], [], []>} : vector<64x32xf32>, vector<32x16xf32>, vector<64x16xf32> -> vector<64x16xf32>
    %c2_308 = arith.constant 2 : index
    %c1_309 = arith.constant 1 : index
    %c0_310 = arith.constant 0 : index
    %c0_311 = arith.constant 0 : index
    %451 = vector.load %arg12[%c2_308, %c1_309, %c0_310, %c0_311] : memref<3x2x1x16xf32, #tpu.memory_space<vmem>>, vector<1x1x1x16xf32>
    %452 = vector.shape_cast %451 : vector<1x1x1x16xf32> to vector<1x16xf32>
    %453 = vector.broadcast %452 : vector<1x16xf32> to vector<64x16xf32>
    %454 = arith.addf %450, %453 : vector<64x16xf32>
    %c2_312 = arith.constant 2 : index
    %c1_313 = arith.constant 1 : index
    %c0_314 = arith.constant 0 : index
    %c0_315 = arith.constant 0 : index
    %455 = vector.load %arg13[%c2_312, %c1_313, %c0_314, %c0_315] : memref<3x2x32x16xf32, #tpu.memory_space<vmem>>, vector<1x1x32x16xf32>
    %456 = vector.shape_cast %455 : vector<1x1x32x16xf32> to vector<32x16xf32>
    %cst_316 = arith.constant dense<0.000000e+00> : vector<64x16xf32>
    %457 = tpu.matmul %393, %456, %cst_316 {dimension_numbers = #tpu.dot_dimension_numbers<[1], [0], [0], [1], [0, 0, 1, 1], [], []>} : vector<64x32xf32>, vector<32x16xf32>, vector<64x16xf32> -> vector<64x16xf32>
    %c2_317 = arith.constant 2 : index
    %c1_318 = arith.constant 1 : index
    %c0_319 = arith.constant 0 : index
    %c0_320 = arith.constant 0 : index
    %458 = vector.load %arg14[%c2_317, %c1_318, %c0_319, %c0_320] : memref<3x2x1x16xf32, #tpu.memory_space<vmem>>, vector<1x1x1x16xf32>
    %459 = vector.shape_cast %458 : vector<1x1x1x16xf32> to vector<1x16xf32>
    %460 = vector.broadcast %459 : vector<1x16xf32> to vector<64x16xf32>
    %461 = arith.addf %457, %460 : vector<64x16xf32>
    %462 = vector.shape_cast %447 : vector<64x16xf32> to vector<2x32x16xf32>
    %463 = vector.shape_cast %454 : vector<64x16xf32> to vector<2x32x16xf32>
    %464 = vector.shape_cast %461 : vector<64x16xf32> to vector<2x32x16xf32>
    "tpu.trace_start"() <{level = 10 : i32, message = "bqd,bkd->bqk"}> : () -> ()
    %cst_321 = arith.constant dense<0.000000e+00> : vector<2x32x32xf32>
    %465 = tpu.matmul %462, %463, %cst_321 {dimension_numbers = #tpu.dot_dimension_numbers<[2], [2], [1], [1], [0, 0, 0, 1, 1, 1], [0], [0]>} : vector<2x32x16xf32>, vector<2x32x16xf32>, vector<2x32x32xf32> -> vector<2x32x32xf32>
    "tpu.trace_stop"() : () -> ()
    %cst_322 = arith.constant 2.500000e-01 : f32
    %466 = vector.broadcast %cst_322 : f32 to vector<2x32x32xf32>
    %467 = arith.mulf %465, %466 : vector<2x32x32xf32>
    %468 = vector.shape_cast %55 : vector<32x32xf32> to vector<1x32x32xf32>
    %469 = vector.broadcast %468 : vector<1x32x32xf32> to vector<2x32x32xf32>
    %470 = arith.addf %467, %469 : vector<2x32x32xf32>
    %cst_323 = arith.constant dense<0xFF800000> : vector<2x32xf32>
    %471 = vector.multi_reduction <maximumf>, %470, %cst_323 [2] : vector<2x32x32xf32> to vector<2x32xf32>
    %472 = vector.shape_cast %471 : vector<2x32xf32> to vector<2x32x1xf32>
    %473 = vector.broadcast %472 : vector<2x32x1xf32> to vector<2x32x32xf32>
    %474 = arith.subf %470, %473 : vector<2x32x32xf32>
    %475 = math.exp %474 : vector<2x32x32xf32>
    %cst_324 = arith.constant dense<0.000000e+00> : vector<2x32xf32>
    %476 = vector.multi_reduction <add>, %475, %cst_324 [2] : vector<2x32x32xf32> to vector<2x32xf32>
    %477 = vector.shape_cast %476 : vector<2x32xf32> to vector<2x32x1xf32>
    %478 = tpu.reciprocal %477 {approx = true} : vector<2x32x1xf32> -> vector<2x32x1xf32>
    %479 = vector.broadcast %478 : vector<2x32x1xf32> to vector<2x32x32xf32>
    %480 = arith.mulf %475, %479 : vector<2x32x32xf32>
    "tpu.trace_start"() <{level = 10 : i32, message = "bqk,bkd->bqd"}> : () -> ()
    %cst_325 = arith.constant dense<0.000000e+00> : vector<2x32x16xf32>
    %481 = tpu.matmul %480, %464, %cst_325 {dimension_numbers = #tpu.dot_dimension_numbers<[2], [1], [1], [2], [0, 0, 0, 1, 1, 2], [0], [0]>} : vector<2x32x32xf32>, vector<2x32x16xf32>, vector<2x32x16xf32> -> vector<2x32x16xf32>
    "tpu.trace_stop"() : () -> ()
    %482 = vector.shape_cast %481 : vector<2x32x16xf32> to vector<64x16xf32>
    %c2_326 = arith.constant 2 : index
    %c1_327 = arith.constant 1 : index
    %c0_328 = arith.constant 0 : index
    %c0_329 = arith.constant 0 : index
    %483 = vector.load %arg15[%c2_326, %c1_327, %c0_328, %c0_329] : memref<3x2x16x32xf32, #tpu.memory_space<vmem>>, vector<1x1x16x32xf32>
    %484 = vector.shape_cast %483 : vector<1x1x16x32xf32> to vector<16x32xf32>
    %cst_330 = arith.constant dense<0.000000e+00> : vector<64x32xf32>
    %485 = tpu.matmul %482, %484, %cst_330 {dimension_numbers = #tpu.dot_dimension_numbers<[1], [0], [0], [1], [0, 0, 1, 1], [], []>} : vector<64x16xf32>, vector<16x32xf32>, vector<64x32xf32> -> vector<64x32xf32>
    %486 = arith.addf %440, %485 : vector<64x32xf32>
    %c2_331 = arith.constant 2 : index
    %c0_332 = arith.constant 0 : index
    %c0_333 = arith.constant 0 : index
    %487 = vector.load %arg16[%c2_331, %c0_332, %c0_333] : memref<3x1x32xf32, #tpu.memory_space<vmem>>, vector<1x1x32xf32>
    %488 = vector.shape_cast %487 : vector<1x1x32xf32> to vector<1x32xf32>
    %489 = vector.broadcast %488 : vector<1x32xf32> to vector<64x32xf32>
    %490 = arith.addf %486, %489 : vector<64x32xf32>
    %491 = arith.addf %393, %490 : vector<64x32xf32>
    %c2_334 = arith.constant 2 : index
    %c0_335 = arith.constant 0 : index
    %c0_336 = arith.constant 0 : index
    %492 = vector.load %arg17[%c2_334, %c0_335, %c0_336] : memref<3x1x32xf32, #tpu.memory_space<vmem>>, vector<1x1x32xf32>
    %493 = vector.shape_cast %492 : vector<1x1x32xf32> to vector<1x32xf32>
    %c2_337 = arith.constant 2 : index
    %c0_338 = arith.constant 0 : index
    %c0_339 = arith.constant 0 : index
    %494 = vector.load %arg18[%c2_337, %c0_338, %c0_339] : memref<3x1x32xf32, #tpu.memory_space<vmem>>, vector<1x1x32xf32>
    %495 = vector.shape_cast %494 : vector<1x1x32xf32> to vector<1x32xf32>
    %cst_340 = arith.constant dense<0.000000e+00> : vector<64xf32>
    %496 = vector.multi_reduction <add>, %491, %cst_340 [1] : vector<64x32xf32> to vector<64xf32>
    %497 = vector.shape_cast %496 : vector<64xf32> to vector<64x1xf32>
    %cst_341 = arith.constant 3.200000e+01 : f32
    %498 = vector.broadcast %cst_341 : f32 to vector<64x1xf32>
    %499 = arith.divf %497, %498 : vector<64x1xf32>
    %500 = vector.broadcast %499 : vector<64x1xf32> to vector<64x32xf32>
    %501 = arith.subf %491, %500 : vector<64x32xf32>
    %502 = arith.mulf %501, %501 : vector<64x32xf32>
    %cst_342 = arith.constant dense<0.000000e+00> : vector<64xf32>
    %503 = vector.multi_reduction <add>, %502, %cst_342 [1] : vector<64x32xf32> to vector<64xf32>
    %504 = vector.shape_cast %503 : vector<64xf32> to vector<64x1xf32>
    %cst_343 = arith.constant 3.200000e+01 : f32
    %505 = vector.broadcast %cst_343 : f32 to vector<64x1xf32>
    %506 = arith.divf %504, %505 : vector<64x1xf32>
    %507 = vector.broadcast %499 : vector<64x1xf32> to vector<64x32xf32>
    %508 = arith.subf %491, %507 : vector<64x32xf32>
    %cst_344 = arith.constant 9.99999974E-6 : f32
    %509 = vector.broadcast %cst_344 : f32 to vector<64x1xf32>
    %510 = arith.addf %506, %509 : vector<64x1xf32>
    %511 = math.rsqrt %510 : vector<64x1xf32>
    %512 = vector.broadcast %511 : vector<64x1xf32> to vector<64x32xf32>
    %513 = arith.mulf %508, %512 : vector<64x32xf32>
    %514 = vector.broadcast %493 : vector<1x32xf32> to vector<64x32xf32>
    %515 = arith.mulf %513, %514 : vector<64x32xf32>
    %516 = vector.broadcast %495 : vector<1x32xf32> to vector<64x32xf32>
    %517 = arith.addf %515, %516 : vector<64x32xf32>
    %518 = arith.truncf %517 : vector<64x32xf32> to vector<64x32xbf16>
    %c2_345 = arith.constant 2 : index
    %c0_346 = arith.constant 0 : index
    %c0_347 = arith.constant 0 : index
    %519 = vector.load %arg19[%c2_345, %c0_346, %c0_347] : memref<3x32x2048xbf16, #tpu.memory_space<vmem>>, vector<1x32x2048xbf16>
    %520 = vector.shape_cast %519 : vector<1x32x2048xbf16> to vector<32x2048xbf16>
    %cst_348 = arith.constant dense<0.000000e+00> : vector<64x2048xf32>
    %521 = tpu.matmul %518, %520, %cst_348 {dimension_numbers = #tpu.dot_dimension_numbers<[1], [0], [0], [1], [0, 0, 1, 1], [], []>} : vector<64x32xbf16>, vector<32x2048xbf16>, vector<64x2048xf32> -> vector<64x2048xf32>
    %c2_349 = arith.constant 2 : index
    %c0_350 = arith.constant 0 : index
    %c0_351 = arith.constant 0 : index
    %522 = vector.load %arg20[%c2_349, %c0_350, %c0_351] : memref<3x1x2048xf32, #tpu.memory_space<vmem>>, vector<1x1x2048xf32>
    %523 = vector.shape_cast %522 : vector<1x1x2048xf32> to vector<1x2048xf32>
    %524 = vector.broadcast %523 : vector<1x2048xf32> to vector<64x2048xf32>
    %525 = arith.addf %521, %524 : vector<64x2048xf32>
    %cst_352 = arith.constant 0.000000e+00 : f32
    %526 = vector.broadcast %cst_352 : f32 to vector<64x2048xf32>
    %527 = arith.maximumf %525, %526 : vector<64x2048xf32>
    %528 = arith.truncf %527 : vector<64x2048xf32> to vector<64x2048xbf16>
    %c2_353 = arith.constant 2 : index
    %c0_354 = arith.constant 0 : index
    %c0_355 = arith.constant 0 : index
    %529 = vector.load %arg21[%c2_353, %c0_354, %c0_355] : memref<3x2048x32xbf16, #tpu.memory_space<vmem>>, vector<1x2048x32xbf16>
    %530 = vector.shape_cast %529 : vector<1x2048x32xbf16> to vector<2048x32xbf16>
    %cst_356 = arith.constant dense<0.000000e+00> : vector<64x32xf32>
    %531 = tpu.matmul %528, %530, %cst_356 {dimension_numbers = #tpu.dot_dimension_numbers<[1], [0], [0], [1], [0, 0, 1, 1], [], []>} : vector<64x2048xbf16>, vector<2048x32xbf16>, vector<64x32xf32> -> vector<64x32xf32>
    %c2_357 = arith.constant 2 : index
    %c0_358 = arith.constant 0 : index
    %c0_359 = arith.constant 0 : index
    %532 = vector.load %arg22[%c2_357, %c0_358, %c0_359] : memref<3x1x32xf32, #tpu.memory_space<vmem>>, vector<1x1x32xf32>
    %533 = vector.shape_cast %532 : vector<1x1x32xf32> to vector<1x32xf32>
    %534 = vector.broadcast %533 : vector<1x32xf32> to vector<64x32xf32>
    %535 = arith.addf %531, %534 : vector<64x32xf32>
    %536 = arith.addf %517, %535 : vector<64x32xf32>
    %c2_360 = arith.constant 2 : index
    %c0_361 = arith.constant 0 : index
    %c0_362 = arith.constant 0 : index
    %537 = vector.load %arg23[%c2_360, %c0_361, %c0_362] : memref<3x1x32xf32, #tpu.memory_space<vmem>>, vector<1x1x32xf32>
    %538 = vector.shape_cast %537 : vector<1x1x32xf32> to vector<1x32xf32>
    %c2_363 = arith.constant 2 : index
    %c0_364 = arith.constant 0 : index
    %c0_365 = arith.constant 0 : index
    %539 = vector.load %arg24[%c2_363, %c0_364, %c0_365] : memref<3x1x32xf32, #tpu.memory_space<vmem>>, vector<1x1x32xf32>
    %540 = vector.shape_cast %539 : vector<1x1x32xf32> to vector<1x32xf32>
    %cst_366 = arith.constant dense<0.000000e+00> : vector<64xf32>
    %541 = vector.multi_reduction <add>, %536, %cst_366 [1] : vector<64x32xf32> to vector<64xf32>
    %542 = vector.shape_cast %541 : vector<64xf32> to vector<64x1xf32>
    %cst_367 = arith.constant 3.200000e+01 : f32
    %543 = vector.broadcast %cst_367 : f32 to vector<64x1xf32>
    %544 = arith.divf %542, %543 : vector<64x1xf32>
    %545 = vector.broadcast %544 : vector<64x1xf32> to vector<64x32xf32>
    %546 = arith.subf %536, %545 : vector<64x32xf32>
    %547 = arith.mulf %546, %546 : vector<64x32xf32>
    %cst_368 = arith.constant dense<0.000000e+00> : vector<64xf32>
    %548 = vector.multi_reduction <add>, %547, %cst_368 [1] : vector<64x32xf32> to vector<64xf32>
    %549 = vector.shape_cast %548 : vector<64xf32> to vector<64x1xf32>
    %cst_369 = arith.constant 3.200000e+01 : f32
    %550 = vector.broadcast %cst_369 : f32 to vector<64x1xf32>
    %551 = arith.divf %549, %550 : vector<64x1xf32>
    %552 = vector.broadcast %544 : vector<64x1xf32> to vector<64x32xf32>
    %553 = arith.subf %536, %552 : vector<64x32xf32>
    %cst_370 = arith.constant 9.99999974E-6 : f32
    %554 = vector.broadcast %cst_370 : f32 to vector<64x1xf32>
    %555 = arith.addf %551, %554 : vector<64x1xf32>
    %556 = math.rsqrt %555 : vector<64x1xf32>
    %557 = vector.broadcast %556 : vector<64x1xf32> to vector<64x32xf32>
    %558 = arith.mulf %553, %557 : vector<64x32xf32>
    %559 = vector.broadcast %538 : vector<1x32xf32> to vector<64x32xf32>
    %560 = arith.mulf %558, %559 : vector<64x32xf32>
    %561 = vector.broadcast %540 : vector<1x32xf32> to vector<64x32xf32>
    %562 = arith.addf %560, %561 : vector<64x32xf32>
    %563 = vector.shape_cast %562 : vector<64x32xf32> to vector<2x32x32xf32>
    %564 = vector.extract_strided_slice %563 {offsets = [0, 0, 0], sizes = [2, 1, 32], strides = [1, 1, 1]} : vector<2x32x32xf32> to vector<2x1x32xf32>
    %565 = vector.shape_cast %564 : vector<2x1x32xf32> to vector<2x32xf32>
    %c0_371 = arith.constant 0 : index
    %c0_372 = arith.constant 0 : index
    %566 = vector.load %arg25[%c0_371, %c0_372] : memref<32x4xf32, #tpu.memory_space<vmem>>, vector<32x4xf32>
    %cst_373 = arith.constant dense<0.000000e+00> : vector<2x4xf32>
    %567 = tpu.matmul %565, %566, %cst_373 {dimension_numbers = #tpu.dot_dimension_numbers<[1], [0], [0], [1], [0, 0, 1, 1], [], []>} : vector<2x32xf32>, vector<32x4xf32>, vector<2x4xf32> -> vector<2x4xf32>
    %c0_374 = arith.constant 0 : index
    %c0_375 = arith.constant 0 : index
    %568 = vector.load %arg26[%c0_374, %c0_375] : memref<1x4xf32, #tpu.memory_space<vmem>>, vector<1x4xf32>
    %569 = vector.broadcast %568 : vector<1x4xf32> to vector<2x4xf32>
    %570 = arith.addf %567, %569 : vector<2x4xf32>
    %cst_376 = arith.constant 0.000000e+00 : f32
    %571 = vector.broadcast %cst_376 : f32 to vector<2x4xf32>
    %572 = arith.subf %571, %570 : vector<2x4xf32>
    %573 = math.exp %572 : vector<2x4xf32>
    %cst_377 = arith.constant 1.000000e+00 : f32
    %574 = vector.broadcast %cst_377 : f32 to vector<2x4xf32>
    %575 = arith.addf %574, %573 : vector<2x4xf32>
    %576 = tpu.reciprocal %575 {approx = true} : vector<2x4xf32> -> vector<2x4xf32>
    %c0_378 = arith.constant 0 : index
    %c0_379 = arith.constant 0 : index
    %577 = vector.load %arg27[%c0_378, %c0_379] : memref<2x4xf32, #tpu.memory_space<vmem>>, vector<2x4xf32>
    tpu.vector_store %arg27[%c0_378, %c0_379], %576 {strides = array<i32>} : memref<2x4xf32, #tpu.memory_space<vmem>>, vector<2x4xf32>,
    return
  }
  func.func @transform_0(%arg0: i32) -> (i32, i32) {
    %c0_i32 = arith.constant 0 : i32
    %c0_i32_0 = arith.constant 0 : i32
    return %arg0, %c0_i32 : i32, i32
  }
  func.func @transform_1(%arg0: i32) -> (i32, i32, i32) {
    %c0_i32 = arith.constant 0 : i32
    %c0_i32_0 = arith.constant 0 : i32
    %c0_i32_1 = arith.constant 0 : i32
    return %arg0, %c0_i32, %c0_i32_0 : i32, i32, i32
  }
  func.func @transform_2(%arg0: i32) -> (i32, i32) {
    %c0_i32 = arith.constant 0 : i32
    %c0_i32_0 = arith.constant 0 : i32
    %c0_i32_1 = arith.constant 0 : i32
    return %c0_i32, %c0_i32_0 : i32, i32
  }
  func.func @transform_3(%arg0: i32) -> (i32, i32) {
    %c0_i32 = arith.constant 0 : i32
    %c0_i32_0 = arith.constant 0 : i32
    %c0_i32_1 = arith.constant 0 : i32
    return %c0_i32, %c0_i32_0 : i32, i32
  }
  func.func @transform_4(%arg0: i32) -> (i32, i32) {
    %c0_i32 = arith.constant 0 : i32
    %c0_i32_0 = arith.constant 0 : i32
    %c0_i32_1 = arith.constant 0 : i32
    return %c0_i32, %c0_i32_0 : i32, i32
  }
  func.func @transform_5(%arg0: i32) -> (i32, i32) {
    %c0_i32 = arith.constant 0 : i32
    %c0_i32_0 = arith.constant 0 : i32
    %c0_i32_1 = arith.constant 0 : i32
    return %c0_i32, %c0_i32_0 : i32, i32
  }
  func.func @transform_6(%arg0: i32) -> (i32, i32) {
    %c0_i32 = arith.constant 0 : i32
    %c0_i32_0 = arith.constant 0 : i32
    %c0_i32_1 = arith.constant 0 : i32
    return %c0_i32, %c0_i32_0 : i32, i32
  }
  func.func @transform_7(%arg0: i32) -> (i32, i32) {
    %c0_i32 = arith.constant 0 : i32
    %c0_i32_0 = arith.constant 0 : i32
    %c0_i32_1 = arith.constant 0 : i32
    return %c0_i32, %c0_i32_0 : i32, i32
  }
  func.func @transform_8(%arg0: i32) -> (i32, i32, i32, i32) {
    %c0_i32 = arith.constant 0 : i32
    %c0_i32_0 = arith.constant 0 : i32
    %c0_i32_1 = arith.constant 0 : i32
    %c0_i32_2 = arith.constant 0 : i32
    %c0_i32_3 = arith.constant 0 : i32
    return %c0_i32, %c0_i32_0, %c0_i32_1, %c0_i32_2 : i32, i32, i32, i32
  }
  func.func @transform_9(%arg0: i32) -> (i32, i32, i32, i32) {
    %c0_i32 = arith.constant 0 : i32
    %c0_i32_0 = arith.constant 0 : i32
    %c0_i32_1 = arith.constant 0 : i32
    %c0_i32_2 = arith.constant 0 : i32
    %c0_i32_3 = arith.constant 0 : i32
    return %c0_i32, %c0_i32_0, %c0_i32_1, %c0_i32_2 : i32, i32, i32, i32
  }
  func.func @transform_10(%arg0: i32) -> (i32, i32, i32, i32) {
    %c0_i32 = arith.constant 0 : i32
    %c0_i32_0 = arith.constant 0 : i32
    %c0_i32_1 = arith.constant 0 : i32
    %c0_i32_2 = arith.constant 0 : i32
    %c0_i32_3 = arith.constant 0 : i32
    return %c0_i32, %c0_i32_0, %c0_i32_1, %c0_i32_2 : i32, i32, i32, i32
  }
  func.func @transform_11(%arg0: i32) -> (i32, i32, i32, i32) {
    %c0_i32 = arith.constant 0 : i32
    %c0_i32_0 = arith.constant 0 : i32
    %c0_i32_1 = arith.constant 0 : i32
    %c0_i32_2 = arith.constant 0 : i32
    %c0_i32_3 = arith.constant 0 : i32
    return %c0_i32, %c0_i32_0, %c0_i32_1, %c0_i32_2 : i32, i32, i32, i32
  }
  func.func @transform_12(%arg0: i32) -> (i32, i32, i32, i32) {
    %c0_i32 = arith.constant 0 : i32
    %c0_i32_0 = arith.constant 0 : i32
    %c0_i32_1 = arith.constant 0 : i32
    %c0_i32_2 = arith.constant 0 : i32
    %c0_i32_3 = arith.constant 0 : i32
    return %c0_i32, %c0_i32_0, %c0_i32_1, %c0_i32_2 : i32, i32, i32, i32
  }
  func.func @transform_13(%arg0: i32) -> (i32, i32, i32, i32) {
    %c0_i32 = arith.constant 0 : i32
    %c0_i32_0 = arith.constant 0 : i32
    %c0_i32_1 = arith.constant 0 : i32
    %c0_i32_2 = arith.constant 0 : i32
    %c0_i32_3 = arith.constant 0 : i32
    return %c0_i32, %c0_i32_0, %c0_i32_1, %c0_i32_2 : i32, i32, i32, i32
  }
  func.func @transform_14(%arg0: i32) -> (i32, i32, i32, i32) {
    %c0_i32 = arith.constant 0 : i32
    %c0_i32_0 = arith.constant 0 : i32
    %c0_i32_1 = arith.constant 0 : i32
    %c0_i32_2 = arith.constant 0 : i32
    %c0_i32_3 = arith.constant 0 : i32
    return %c0_i32, %c0_i32_0, %c0_i32_1, %c0_i32_2 : i32, i32, i32, i32
  }
  func.func @transform_15(%arg0: i32) -> (i32, i32, i32) {
    %c0_i32 = arith.constant 0 : i32
    %c0_i32_0 = arith.constant 0 : i32
    %c0_i32_1 = arith.constant 0 : i32
    %c0_i32_2 = arith.constant 0 : i32
    return %c0_i32, %c0_i32_0, %c0_i32_1 : i32, i32, i32
  }
  func.func @transform_16(%arg0: i32) -> (i32, i32, i32) {
    %c0_i32 = arith.constant 0 : i32
    %c0_i32_0 = arith.constant 0 : i32
    %c0_i32_1 = arith.constant 0 : i32
    %c0_i32_2 = arith.constant 0 : i32
    return %c0_i32, %c0_i32_0, %c0_i32_1 : i32, i32, i32
  }
  func.func @transform_17(%arg0: i32) -> (i32, i32, i32) {
    %c0_i32 = arith.constant 0 : i32
    %c0_i32_0 = arith.constant 0 : i32
    %c0_i32_1 = arith.constant 0 : i32
    %c0_i32_2 = arith.constant 0 : i32
    return %c0_i32, %c0_i32_0, %c0_i32_1 : i32, i32, i32
  }
  func.func @transform_18(%arg0: i32) -> (i32, i32, i32) {
    %c0_i32 = arith.constant 0 : i32
    %c0_i32_0 = arith.constant 0 : i32
    %c0_i32_1 = arith.constant 0 : i32
    %c0_i32_2 = arith.constant 0 : i32
    return %c0_i32, %c0_i32_0, %c0_i32_1 : i32, i32, i32
  }
  func.func @transform_19(%arg0: i32) -> (i32, i32, i32) {
    %c0_i32 = arith.constant 0 : i32
    %c0_i32_0 = arith.constant 0 : i32
    %c0_i32_1 = arith.constant 0 : i32
    %c0_i32_2 = arith.constant 0 : i32
    return %c0_i32, %c0_i32_0, %c0_i32_1 : i32, i32, i32
  }
  func.func @transform_20(%arg0: i32) -> (i32, i32, i32) {
    %c0_i32 = arith.constant 0 : i32
    %c0_i32_0 = arith.constant 0 : i32
    %c0_i32_1 = arith.constant 0 : i32
    %c0_i32_2 = arith.constant 0 : i32
    return %c0_i32, %c0_i32_0, %c0_i32_1 : i32, i32, i32
  }
  func.func @transform_21(%arg0: i32) -> (i32, i32, i32) {
    %c0_i32 = arith.constant 0 : i32
    %c0_i32_0 = arith.constant 0 : i32
    %c0_i32_1 = arith.constant 0 : i32
    %c0_i32_2 = arith.constant 0 : i32
    return %c0_i32, %c0_i32_0, %c0_i32_1 : i32, i32, i32
  }
  func.func @transform_22(%arg0: i32) -> (i32, i32, i32) {
    %c0_i32 = arith.constant 0 : i32
    %c0_i32_0 = arith.constant 0 : i32
    %c0_i32_1 = arith.constant 0 : i32
    %c0_i32_2 = arith.constant 0 : i32
    return %c0_i32, %c0_i32_0, %c0_i32_1 : i32, i32, i32
  }
  func.func @transform_23(%arg0: i32) -> (i32, i32, i32) {
    %c0_i32 = arith.constant 0 : i32
    %c0_i32_0 = arith.constant 0 : i32
    %c0_i32_1 = arith.constant 0 : i32
    %c0_i32_2 = arith.constant 0 : i32
    return %c0_i32, %c0_i32_0, %c0_i32_1 : i32, i32, i32
  }
  func.func @transform_24(%arg0: i32) -> (i32, i32) {
    %c0_i32 = arith.constant 0 : i32
    %c0_i32_0 = arith.constant 0 : i32
    %c0_i32_1 = arith.constant 0 : i32
    return %c0_i32, %c0_i32_0 : i32, i32
  }
  func.func @transform_25(%arg0: i32) -> (i32, i32) {
    %c0_i32 = arith.constant 0 : i32
    %c0_i32_0 = arith.constant 0 : i32
    %c0_i32_1 = arith.constant 0 : i32
    return %c0_i32, %c0_i32_0 : i32, i32
  }
  func.func @transform_26(%arg0: i32) -> (i32, i32) {
    %c0_i32 = arith.constant 0 : i32
    %c0_i32_0 = arith.constant 0 : i32
    return %arg0, %c0_i32 : i32, i32
  }
}

</mosaic_0001>

<bundles_post_ra>
// kernel: tpu_custom_call.1
= control target key start
LH: loop header
LB: loop body
LE: loop exit
PB: predicated region body
PF: predicated region fallthrough
CT: control target
= control target key end

     0   :  { %s25129_s0 = inlined_call_operand.vmem [shape: f32[2,64], index: 0, kind: input, shape index: {}]   ;;  %s25130_s1 = inlined_call_operand.vmem [shape: f32[2,32,32], index: 1, kind: input, shape index: {}]   ;;  %s25131_s2 = inlined_call_operand.vmem [shape: f32[64,96], index: 2, kind: input, shape index: {}]   ;;  %s25132_s3 = inlined_call_operand.vmem [shape: f32[1,96], index: 3, kind: input, shape index: {}]   ;;  %s25133_s4 = inlined_call_operand.vmem [shape: f32[32,32], index: 4, kind: input, shape index: {}]   ;;  %s25134_s5 = inlined_call_operand.vmem [shape: f32[1,32], index: 5, kind: input, shape index: {}]   ;;  %s25135_s6 = inlined_call_operand.vmem [shape: f32[32,32], index: 6, kind: input, shape index: {}]   ;;  %s25136_s7 = inlined_call_operand.vmem [shape: f32[1,32], index: 7, kind: input, shape index: {}]   ;;  %s25137_s8 = inlined_call_operand.vmem [shape: f32[3,2,32,16], index: 8, kind: input, shape index: {}]   ;;  %s25138_s9 = inlined_call_operand.vmem [shape: f32[3,2,1,16], index: 9, kind: input, shape index: {}]   ;;  %s25139_s10 = inlined_call_operand.vmem [shape: f32[3,2,32,16], index: 10, kind: input, shape index: {}]   ;;  %s25140_s11 = inlined_call_operand.vmem [shape: f32[3,2,1,16], index: 11, kind: input, shape index: {}]   ;;  %s25141_s12 = inlined_call_operand.vmem [shape: f32[3,2,32,16], index: 12, kind: input, shape index: {}]   ;;  %s25142_s13 = inlined_call_operand.vmem [shape: f32[3,2,1,16], index: 13, kind: input, shape index: {}]   ;;  %s25143_s14 = inlined_call_operand.vmem [shape: f32[3,2,16,32], index: 14, kind: input, shape index: {}]   ;;  %s25144_s15 = inlined_call_operand.vmem [shape: f32[3,1,32], index: 15, kind: input, shape index: {}]   ;;  %s25145_s16 = inlined_call_operand.vmem [shape: f32[3,1,32], index: 16, kind: input, shape index: {}]   ;;  %s25146_s17 = inlined_call_operand.vmem [shape: f32[3,1,32], index: 17, kind: input, shape index: {}]   ;;  %s25147_s18 = inlined_call_operand.vmem [shape: bf16[3,32,2048], index: 18, kind: input, shape index: {}]   ;;  %s25148_s19 = inlined_call_operand.vmem [shape: f32[3,1,2048], index: 19, kind: input, shape index: {}]   ;;  %s25149_s20 = inlined_call_operand.vmem [shape: bf16[3,2048,32], index: 20, kind: input, shape index: {}]   ;;  %s25150_s21 = inlined_call_operand.vmem [shape: f32[3,1,32], index: 21, kind: input, shape index: {}]   ;;  %s25151_s22 = inlined_call_operand.vmem [shape: f32[3,1,32], index: 22, kind: input, shape index: {}]   ;;  %s25152_s23 = inlined_call_operand.vmem [shape: f32[3,1,32], index: 23, kind: input, shape index: {}]   ;;  %s25153_s24 = inlined_call_operand.vmem [shape: f32[32,4], index: 24, kind: input, shape index: {}]   ;;  %s25154_s25 = inlined_call_operand.vmem [shape: f32[1,4], index: 25, kind: input, shape index: {}]   ;;  %s25155_s26 = inlined_call_operand.hbm [shape: f32[2,4], index: 26, kind: output, shape index: {}]  }
   0x1   :  { %25163 = sst [smem:[#allocation5_spill]] %s25129_s0 }
   0x2   :  { %25164 = sst [smem:[#allocation6_spill]] %s25130_s1 }
   0x3   :  { %25165 = sst [smem:[#allocation7_spill]] %s25131_s2 }
   0x4   :  { %25166 = sst [smem:[#allocation8_spill]] %s25132_s3 }
   0x5   :  { %25167 = sst [smem:[#allocation9_spill]] %s25133_s4 }
   0x6   :  { %25168 = sst [smem:[#allocation10_spill]] %s25134_s5 }
   0x7   :  { %25169 = sst [smem:[#allocation11_spill]] %s25135_s6 }
   0x8   :  { %25170 = sst [smem:[#allocation12_spill]] %s25136_s7 }
   0x9   :  { %25171 = sst [smem:[#allocation13_spill]] %s25137_s8 }
   0xa   :  { %25172 = sst [smem:[#allocation14_spill]] %s25138_s9 }
   0xb   :  { %25173 = sst [smem:[#allocation15_spill]] %s25139_s10 }
   0xc   :  { %s25174_s7 = sld [smem:[#allocation7_spill]]  ;;  %v20351_v3 = vmov 0.0|0.0   ;;  %vm20352_vm0 = vmmov 0   ;;  %v20353_v6 = vmov 0.0   ;;  %vm101_vm1 = vcmask 523264   ;;  %s25175_s4 = sld [smem:[#allocation9_spill]] }
   0xd   :  { %19187 = vmatprep.subr.bf16.mxu1 %v20351_v3  ;;  %18359 = vmatprep.mubr.msk.f32.mxu1 %vm20352_vm0, %v20353_v6  ;;  %s25177_s3 = sld [smem:[#allocation8_spill]]  ;;  %vm187_vm2 = vcmask 261120   ;;  %s20354_s9 = smov 32  }
  0x12   :  { %v86_v0 = vld [vmem:[%s25174_s7] sm:$0xff]  ;;  %v87_v1 = vld [vmem:[%s25174_s7 + $0x8] sm:$0xff]  ;;  %v88_v2 = vld [vmem:[%s25174_s7 + $0x10] sm:$0xff] }
  0x13   :  { %v19188_v4 = vpack.c.bf16 %v87_v1, %v86_v0  ;;  %v89_v5 = vld [vmem:[%s25174_s7 + $0x18] sm:$0xff]  ;;  %v90_v8 = vld [vmem:[%s25174_s7 + $0x20] sm:$0xff]  ;;  %v91_v9 = vld [vmem:[%s25174_s7 + $0x28] sm:$0xff] }
  0x14   :  { %v19191_v7 = vpack.c.bf16 %v89_v5, %v88_v2  ;;  %v92_v10 = vld [vmem:[%s25174_s7 + $0x30] sm:$0xff]  ;;  %v93_v11 = vld [vmem:[%s25174_s7 + $0x38] sm:$0xff]  ;;  %v19194_v12 = vpack.c.bf16 %v91_v9, %v90_v8  ;;  %v176_v13 = vld [vmem:[%s25175_s4] sm:$0xff]  ;;  %s25176_s7 = sld [smem:[#allocation5_spill]] }
  0x15   :  { %19189 = vmatpush3.bf16.msra.mxu1 %v19188_v4  ;;  %v177_v14 = vld [vmem:[%s25175_s4 + $0x8] sm:$0xff]  ;;  %v19197_v15 = vpack.c.bf16 %v93_v11, %v92_v10  ;;  %v178_v18 = vld [vmem:[%s25175_s4 + $0x10] sm:$0xff]  ;;  %v179_v19 = vld [vmem:[%s25175_s4 + $0x18] sm:$0xff]  ;;  %s25178_s4 = sld [smem:[#allocation11_spill]] }
  0x16   :  { %19190 = vmatprep.subr.bf16.mxu1 %v20351_v3  ;;  %v19200_v17 = vpack.c.bf16 %v177_v14, %v176_v13  ;;  %v19203_v20 = vpack.c.bf16 %v179_v19, %v178_v18  ;;  %v15258_v21 = vld [vmem:[%s25177_s3] ss:$0 sm:$0xff] }
  0x19   :  { %19192 = vmatpush3.bf16.msra.mxu1 %v19191_v7 }
  0x1a   :  { %19193 = vmatprep.subr.bf16.mxu1 %v20351_v3  ;;  %v85_v16 = vld [vmem:[%s25176_s7] sm:$0x3] }
  0x1b   :  { %v262_v30 = vld [vmem:[%s25178_s4] sm:$0xff]  ;;  %v263_v31 = vld [vmem:[%s25178_s4 + $0x8] sm:$0xff] }
  0x1c   :  { %v19206_v32 = vpack.c.bf16 %v263_v31, %v262_v30 }
  0x1d   :  { %19195 = vmatpush3.bf16.msra.mxu1 %v19194_v12 }
  0x1e   :  { %19196 = vmatprep.subr.bf16.mxu1 %v20351_v3 }
  0x21   :  { %19198 = vmatpush3.bf16.msra.mxu1 %v19197_v15 }
  0x22   :  { %19199 = vmatprep.subr.bf16.mxu1 %v20351_v3 }
  0x24   :  { %18360 = vmatmul.mubr.msk.f32.vlgmr.msra.gmra.mrb[0].mxu1 %vm101_vm1, %v85_v16 }
  0x25   :  { %19201 = vmatpush3.bf16.msra.mxu1 %v19200_v17  ;;  %18370 = vmatprep.mubr.msk.f32.mxu1 %vm20352_vm0, %v20353_v6 }
  0x26   :  { %19202 = vmatprep.subr.bf16.mxu1 %v20351_v3 }
  0x29   :  { %19204 = vmatpush3.bf16.msra.mxu1 %v19203_v20 }
  0x2a   :  { %19205 = vmatprep.subr.bf16.mxu1 %v20351_v3 }
  0xf7   :  { %v171_v22 = vpop.f32.mrb[0].mxu1 }
  0xf8   :  { %v172_v23 = vadd.f32 %v15258_v21, %v171_v22  ;;  %v18361_v24 = vpop.f32.mrb[1].mxu1 }
  0xfa   :  { %v175_v25 = vmax.f32 %v172_v23, 0.0  ;;  %v347_v26 = vsub.f32 0.0, %v172_v23 }
  0xfc   :  { %v348_v27 = vmul.f32 1.442695, %v347_v26  ;;  %18371 = vmatmul.mubr.msk.f32.vlgmr.msra.gmra.mrb[2].mxu1 %vm187_vm2, %v175_v25 }
  0xfd   :  { %18381 = vmatprep.mubr.msk.f32.mxu1 %vm20352_vm0, %v20353_v6  ;;  %19207 = vmatpush3.bf16.msra.mxu1 %v19206_v32 }
  0xfe   :  { %20043 = vpow2.f32 %v348_v27  ;;  %19208 = vmatprep.subr.bf16.mxu1 %v20351_v3 }
 0x108   :  { %v20044_v28 = vpop.eup %20043 }
 0x109   :  { %v350_v29 = vadd.f32 1.0, %v20044_v28 }
 0x10b   :  { %20045 = vrcp.f32 %v350_v29 }
 0x115   :  { %v20046_v33 = vpop.eup %20045 }
 0x116   :  { %v357_v34 = vsub.f32 1.0, %v20046_v33 }
 0x118   :  { %359 = vrot.lane.b32.xlu0 %v357_v34, %s20354_s9 }
 0x119   :  { %31 = vsyncpa [#allocation3], 0  ;;  %s20355_s30 = smov 96   ;;  %v264_v35 = vld [vmem:[%s25178_s4 + $0x10] sm:$0xff]  ;;  %v265_v36 = vld [vmem:[%s25178_s4 + $0x18] sm:$0xff]  ;;  %s20356_s6 = smov 64   ;;  %v368_v60 = vlaneseq }
 0x11a   :  { %v19209_v37 = vpack.c.bf16 %v265_v36, %v264_v35  ;;  %s25179_s3 = sld [smem:[#allocation10_spill]]  ;;  %s25180_s29 = sld [smem:[#allocation13_spill]]  ;;  %v698_v57 = vld [vmem:[%s25141_s12] sm:$0xff]  ;;  %v699_v58 = vld [vmem:[%s25141_s12 + $0x8] sm:$0xff]  ;;  %v20357_v61 = vmov 1966171168  }
 0x11b   :  { %s25181_s7 = sld [smem:[#allocation15_spill]]  ;;  %v19227_v59 = vpack.c.bf16 %v699_v58, %v698_v57  ;;  %v391_v62 = vunpack.c.l.s4 %v20357_v61  ;;  %v20603_v1 = vshrl.u32 %v368_v60, 7  ;;  %v700_v26 = vld [vmem:[%s25141_s12 + $0x10] sm:$0xff]  ;;  %v701_v27 = vld [vmem:[%s25141_s12 + $0x18] sm:$0xff]  ;;  %s25184_s5 = sld [smem:[#allocation14_spill]]  ;;  %vm814_vm4 = vcmask 130048  }
 0x11c   :  { %353 = vrot.lane.b32.xlu0 %v20046_v33, %s20355_s30  ;;  %19210 = vmatpush3.bf16.msra.mxu1 %v19209_v37  ;;  %v19231_v33 = vpack.c.bf16 %v701_v27, %v700_v26  ;;  %vm20719_vm5 = vmpackc.low %vm814_vm4, %vm814_vm4  ;;  %vm15163_vm7 = vcmask 1041409   ;;  %vm15242_vm8 = vcmask 25600  }
 0x11d   :  { %v392_v4 = vunpack.c.0.s8 %v391_v62  ;;  %vm373_vm3 = vcmp.eq.s32.totalorder %v20603_v1, 0  ;;  %v20608_v14 = vsub.s32 0, %v20603_v1 }
 0x11e   :  { %v377_v17 = vsel %vm373_vm3, 1.0, %v20353_v6 }
 0x11f   :  { %v395_v10 = vsub.s32 %v392_v4, %v20603_v1 }
 0x120   :  { %v15260_v40 = vld [vmem:[%s25179_s3] ss:$0 sm:$0xff]  ;;  %v443_v46 = vld [vmem:[%s25180_s29 + $0x8] sm:$0xff]  ;;  %v444_v51 = vld [vmem:[%s25180_s29 + $0x10] sm:$0xff]  ;;  %s25183_s3 = sld [smem:[#allocation6_spill]] }
 0x121   :  { %v442_v45 = vld [vmem:[%s25180_s29] sm:$0xff]  ;;  %v583_v49 = vld [vmem:[%s25181_s7 + $0x8] sm:$0xff]  ;;  %v445_v52 = vld [vmem:[%s25180_s29 + $0x18] sm:$0xff] }
 0x122   :  { %v582_v47 = vld [vmem:[%s25181_s7] sm:$0xff]  ;;  %v19211_v48 = vpack.c.bf16 %v443_v46, %v442_v45  ;;  %v584_v53 = vld [vmem:[%s25181_s7 + $0x10] sm:$0xff]  ;;  %v19215_v54 = vpack.c.bf16 %v445_v52, %v444_v51  ;;  %v585_v55 = vld [vmem:[%s25181_s7 + $0x18] sm:$0xff] }
 0x123   :  { %v19219_v50 = vpack.c.bf16 %v583_v49, %v582_v47  ;;  %v19223_v56 = vpack.c.bf16 %v585_v55, %v584_v53  ;;  %v15273_v45 = vld [vmem:[%s25140_s11] ss:$0 sm:$0xff] }
 0x124   :  { %19212 = vmatprep.subr.bf16.mxu0 %v19211_v48 }
 0x125   :  { %19220 = vmatprep.subr.bf16.mxu1 %v19219_v50  ;;  %19214 = vmatpush3.bf16.msra.mxu0 %v19211_v48 }
 0x126   :  { %19216 = vmatprep.subr.bf16.mxu0 %v19215_v54  ;;  %v381_v20 = vld [vmem:[%s25183_s3] sm:$0xff]  ;;  %v382_v21 = vld [vmem:[%s25183_s3 + $0x8] sm:$0xff]  ;;  %v383_v25 = vld [vmem:[%s25183_s3 + $0x10] sm:$0xff] }
 0x127   :  { %v384_v30 = vld [vmem:[%s25183_s3 + $0x18] sm:$0xff]  ;;  %v385_v34 = vld [vmem:[%s25183_s3 + $0x20] sm:$0xff]  ;;  %v386_v37 = vld [vmem:[%s25183_s3 + $0x28] sm:$0xff] }
 0x129   :  { %19218 = vmatpush3.bf16.msra.mxu0 %v19215_v54 }
 0x12a   :  { %19228 = vmatprep.subr.bf16.mxu0 %v19227_v59 }
 0x18a   :  { %v360_v38 = vpop.permute.xlu0 %359 }
 0x18b   :  { %v362_v39 = vmul.f32 %v360_v38, %v172_v23 }
 0x18d   :  { %364 = vrot.lane.b32.xlu1 %v362_v39, %s20356_s6  ;;  %s25182_s6 = sld [smem:[#allocation12_spill]]  ;;  %v387_v39 = vld [vmem:[%s25183_s3 + $0x30] sm:$0xff] }
 0x18e   :  { %v354_v8 = vpop.permute.xlu0 %353 }
 0x193   :  { %v15262_v63 = vld [vmem:[%s25182_s6] ss:$0 sm:$0xff] }
 0x1cf   :  { %v257_v41 = vpop.f32.mrb[2].mxu1 }
 0x1d0   :  { %v258_v42 = vadd.f32 %v15260_v40, %v257_v41  ;;  %v18372_v43 = vpop.f32.mrb[3].mxu1  ;;  %v388_v41 = vld [vmem:[%s25183_s3 + $0x38] sm:$0xff] }
 0x1d2   :  { %v261_v44 = vmax.f32 %v258_v42, 0.0 }
 0x1d4   :  { %18382 = vmatmul.mubr.msk.f32.vlgmr.msra.gmra.mrb[4].mxu1 %vm187_vm2, %v261_v44  ;;  %v20710_v44 = vld [vmem:[%s25184_s5] ss:$0 sm:$0xff] }
 0x1d5   :  { %19222 = vmatpush3.bf16.msra.mxu1 %v19219_v50 }
 0x1d6   :  { %19224 = vmatprep.subr.bf16.mxu1 %v19223_v56 }
 0x1d9   :  { %19226 = vmatpush3.bf16.msra.mxu1 %v19223_v56 }
 0x1ff   :  { %v365_v11 = vpop.permute.xlu1 %364 }
 0x2a7   :  { %v342_v0 = vpop.f32.mrb[4].mxu1 }
 0x2a8   :  { %v343_v2 = vadd.f32 %v15262_v63, %v342_v0  ;;  %v18383_v5 = vpop.f32.mrb[5].mxu1 }
 0x2aa   :  { %v346_v7 = vmax.f32 %v343_v2, 0.0 }
 0x2ac   :  { %v356_v9 = vmul.f32 %v354_v8, %v346_v7 }
 0x2ae   :  { %v367_v12 = vadd.f32 %v365_v11, %v356_v9 }
 0x2b0   :  { %v396_v13 = vrot.slane %v367_v12, %v395_v10 }
 0x2b2   :  { %v397_v15 = vcombine.high %v396_v13, %v396_v13  ;;  %v404_v16 = vrot.slane %v396_v13, %v395_v10 }
 0x2b4   :  { %v411_v18 = vrot.slane %v397_v15, %v395_v10  ;;  %v415_v19 = vrot.slane %v404_v16, %v20608_v14  ;;  %v15282_v16 = vld [vmem:[%s25142_s13] ss:$0 sm:$0xff] }
 0x2b6   :  { %v419_v22 = vrot.slane %v411_v18, %v20608_v14  ;;  %v422_v23 = vmul.f32 %v415_v19, %v377_v17  ;;  %v423_v24 = vmul.f32 0.0, %v415_v19 }
 0x2b8   :  { %v20628_v28 = vadd.f32 %v422_v23, %v381_v20  ;;  %v20630_v29 = vadd.f32 %v423_v24, %v382_v21  ;;  %v426_v31 = vmul.f32 %v419_v22, %v377_v17  ;;  %v20635_v32 = vadd.f32 %v423_v24, %v383_v25  ;;  %v15315_v23 = vld [vmem:[%s25180_s29 + $0x20] sm:$0xff] }
 0x2b9   :  { %v427_v35 = vmul.f32 0.0, %v419_v22  ;;  %v20650_v36 = vadd.f32 %v423_v24, %v384_v30  ;;  %v15316_v24 = vld [vmem:[%s25180_s29 + $0x28] sm:$0xff] }
 0x2ba   :  { %18392 = vmatprep.mubr.msk.f32.mxu0 %vm187_vm2, %v20628_v28  ;;  %18412 = vmatprep.mubr.msk.f32.mxu1 %vm187_vm2, %v20628_v28  ;;  %v20657_v38 = vadd.f32 %v426_v31, %v385_v34 }
 0x2bb   :  { %18393 = vmatmul.mubr.msk.f32.vlgmr.msra.gmra.mrb[0].mxu0 %vm187_vm2, %v20630_v29  ;;  %18413 = vmatmul.mubr.msk.f32.vlgmr.msra.gmra.mrb[6].mxu1 %vm187_vm2, %v20630_v29  ;;  %v20668_v40 = vadd.f32 %v427_v35, %v386_v37  ;;  %v20675_v42 = vadd.f32 %v427_v35, %v387_v39  ;;  %v20683_v43 = vadd.f32 %v427_v35, %v388_v41 }
 0x2bc   :  { %18395 = vmatprep.mubr.msk.f32.mxu0 %vm187_vm2, %v20635_v32  ;;  %18415 = vmatprep.mubr.msk.f32.mxu1 %vm187_vm2, %v20635_v32 }
 0x2bd   :  { %19230 = vmatpush3.bf16.msra.mxu0 %v19227_v59 }
 0x2be   :  { %19232 = vmatprep.subr.bf16.mxu0 %v19231_v33 }
 0x2bf   :  { %18396 = vmatmul.mubr.msk.f32.gmra.mrb[2].mxu0 %vm187_vm2, %v20650_v36  ;;  %18416 = vmatmul.mubr.msk.f32.gmra.mrb[8].mxu1 %vm187_vm2, %v20650_v36 }
 0x2c0   :  { %18398 = vmatprep.mubr.msk.f32.mxu0 %vm187_vm2, %v20657_v38  ;;  %18418 = vmatprep.mubr.msk.f32.mxu1 %vm187_vm2, %v20657_v38 }
 0x2c1   :  { %19234 = vmatpush3.bf16.msra.mxu0 %v19231_v33  ;;  %v19275_v33 = vpack.c.bf16 %v15316_v24, %v15315_v23 }
 0x2c3   :  { %18399 = vmatmul.mubr.msk.f32.gmra.mrb[4].mxu0 %vm187_vm2, %v20668_v40  ;;  %18419 = vmatmul.mubr.msk.f32.gmra.mrb[10].mxu1 %vm187_vm2, %v20668_v40 }
 0x2c4   :  { %18401 = vmatprep.mubr.msk.f32.mxu0 %vm187_vm2, %v20675_v42  ;;  %18421 = vmatprep.mubr.msk.f32.mxu1 %vm187_vm2, %v20675_v42 }
 0x2c7   :  { %18402 = vmatmul.mubr.msk.f32.gmra.mrb[6].mxu0 %vm187_vm2, %v20683_v43  ;;  %18422 = vmatmul.mubr.msk.f32.gmra.mrb[12].mxu1 %vm187_vm2, %v20683_v43 }
 0x2c8   :  { %18432 = vmatprep.mubr.msk.f32.mxu0 %vm187_vm2, %v20628_v28 }
 0x2cb   :  { %18433 = vmatmul.mubr.msk.f32.vlgmr.msra.gmra.mrb[8].mxu0 %vm187_vm2, %v20630_v29 }
 0x2cc   :  { %18435 = vmatprep.mubr.msk.f32.mxu0 %vm187_vm2, %v20635_v32 }
 0x2cf   :  { %18436 = vmatmul.mubr.msk.f32.gmra.mrb[10].mxu0 %vm187_vm2, %v20650_v36 }
 0x2d0   :  { %18438 = vmatprep.mubr.msk.f32.mxu0 %vm187_vm2, %v20657_v38 }
 0x2d3   :  { %18439 = vmatmul.mubr.msk.f32.gmra.mrb[12].mxu0 %vm187_vm2, %v20668_v40 }
 0x2d4   :  { %18441 = vmatprep.mubr.msk.f32.mxu0 %vm187_vm2, %v20675_v42 }
 0x2d7   :  { %18442 = vmatmul.mubr.msk.f32.gmra.mrb[14].mxu0 %vm187_vm2, %v20683_v43 }
 0x38e   :  { %v18394_v46 = vpop.f32.mrb[0].mxu0  ;;  %v18414_v47 = vpop.f32.mrb[6].mxu1 }
 0x38f   :  { %v543_v48 = vpop.f32.mrb[1].mxu0  ;;  %v665_v49 = vadd.f32 %v18414_v47, %v15273_v45  ;;  %v659_v51 = vpop.f32.mrb[7].mxu1  ;;  %v549_v27 = vadd.f32 %v18394_v46, %v20710_v44 }
 0x390   :  { %v544_v50 = vadd.f32 %v20710_v44, %v543_v48  ;;  %v660_v52 = vadd.f32 %v15273_v45, %v659_v51  ;;  %v15317_v48 = vld [vmem:[%s25180_s29 + $0x30] sm:$0xff] }
 0x392   :  { %v18397_v53 = vpop.f32.mrb[2].mxu0  ;;  %18452 = vmatprep.mubr.msk.f32.mxu1 %vm814_vm4, %v544_v50  ;;  %v19235_v55 = vpack.c.bf16 %v665_v49, %v660_v52  ;;  %v18417_v56 = vpop.f32.mrb[8].mxu1  ;;  %v15318_v49 = vld [vmem:[%s25180_s29 + $0x38] sm:$0xff] }
 0x393   :  { %v553_v57 = vpop.f32.mrb[3].mxu0  ;;  %v675_v58 = vadd.f32 %v18417_v56, %v15273_v45  ;;  %v669_v59 = vpop.f32.mrb[9].mxu1  ;;  %v559_v41 = vadd.f32 %v18397_v53, %v20710_v44  ;;  %v19279_v56 = vpack.c.bf16 %v15318_v49, %v15317_v48 }
 0x394   :  { %v670_v61 = vadd.f32 %v15273_v45, %v669_v59  ;;  %19237 = vmatprep.subr.msk.bf16.mxu1 %vm20719_vm5, %v19235_v55  ;;  %v554_v34 = vadd.f32 %v20710_v44, %v553_v57  ;;  %v15343_v59 = vld [vmem:[%s25141_s12 + $0x20] sm:$0xff] }
 0x395   :  { %19240 = vmatpush3.bf16.xpose.msk.msra.mxu1 %vm20719_vm5, %v19235_v55 }
 0x396   :  { %v18400_v62 = vpop.f32.mrb[4].mxu0  ;;  %v19241_v63 = vpack.c.bf16 %v675_v58, %v670_v61  ;;  %v18420_v0 = vpop.f32.mrb[10].mxu1  ;;  %v15344_v61 = vld [vmem:[%s25141_s12 + $0x28] sm:$0xff] }
 0x397   :  { %v563_v2 = vpop.f32.mrb[5].mxu0  ;;  %v685_v4 = vadd.f32 %v18420_v0, %v15273_v45  ;;  %v679_v7 = vpop.f32.mrb[11].mxu1  ;;  %v569_v52 = vadd.f32 %v18400_v62, %v20710_v44  ;;  %v19291_v0 = vpack.c.bf16 %v15344_v61, %v15343_v59 }
 0x398   :  { %v564_v5 = vadd.f32 %v20710_v44, %v563_v2  ;;  %v680_v8 = vadd.f32 %v15273_v45, %v679_v7  ;;  %19243 = vmatprep.subr.msk.bf16.mxu1 %vm20719_vm5, %v19241_v63  ;;  %v15345_v2 = vld [vmem:[%s25141_s12 + $0x30] sm:$0xff]  ;;  %v20358_v7 = vmov -1e+30  }
 0x39a   :  { %v18403_v9 = vpop.f32.mrb[6].mxu0  ;;  %18466 = vmatprep.mubr.msk.f32.mxu0 %vm814_vm4, %v564_v5  ;;  %v19247_v10 = vpack.c.bf16 %v685_v4, %v680_v8  ;;  %v18423_v11 = vpop.f32.mrb[12].mxu1  ;;  %v15346_v4 = vld [vmem:[%s25141_s12 + $0x38] sm:$0xff] }
 0x39b   :  { %v573_v12 = vpop.f32.mrb[7].mxu0  ;;  %v695_v13 = vadd.f32 %v18423_v11, %v15273_v45  ;;  %v689_v15 = vpop.f32.mrb[13].mxu1  ;;  %v19295_v5 = vpack.c.bf16 %v15346_v4, %v15345_v2 }
 0x39c   :  { %v690_v17 = vadd.f32 %v15273_v45, %v689_v15  ;;  %19249 = vmatprep.subr.msk.bf16.mxu0 %vm20719_vm5, %v19247_v10  ;;  %v574_v57 = vadd.f32 %v20710_v44, %v573_v12 }
 0x39d   :  { %19246 = vmatpush3.bf16.xpose.msk.msra.mxu1 %vm20719_vm5, %v19241_v63  ;;  %19252 = vmatpush3.bf16.xpose.msk.msra.mxu0 %vm20719_vm5, %v19247_v10  ;;  %v579_v63 = vadd.f32 %v18403_v9, %v20710_v44  ;;  %v439_v44 = vand.u32 127, %v368_v60 }
 0x39e   :  { %v18434_v18 = vpop.f32.mrb[8].mxu0  ;;  %v19253_v19 = vpack.c.bf16 %v695_v13, %v690_v17 }
 0x39f   :  { %v781_v20 = vadd.f32 %v18434_v18, %v15282_v16  ;;  %v775_v21 = vpop.f32.mrb[9].mxu0  ;;  %vm440_vm6 = vcmp.lt.s32.totalorder %v439_v44, 31 }
 0x3a0   :  { %v776_v22 = vadd.f32 %v15282_v16, %v775_v21  ;;  %19255 = vmatprep.subr.msk.bf16.mxu0 %vm20719_vm5, %v19253_v19  ;;  %v20818_v8 = vsel %vm440_vm6, 0.0, %v20358_v7 }
 0x3a2   :  { %v18437_v25 = vpop.f32.mrb[10].mxu0  ;;  %v19259_v26 = vpack.c.bf16 %v781_v20, %v776_v22 }
 0x3a3   :  { %v791_v30 = vadd.f32 %v18437_v25, %v15282_v16  ;;  %v785_v31 = vpop.f32.mrb[11].mxu0 }
 0x3a4   :  { %v786_v35 = vadd.f32 %v15282_v16, %v785_v31  ;;  %19260 = vmatprep.subr.bf16.mxu1 %v19259_v26  ;;  %18453 = vmatmul.mubr.msk.f32.vlgmr.msra.gmra.mrb[14].mxu1 %vm814_vm4, %v549_v27 }
 0x3a5   :  { %18455 = vmatprep.mubr.msk.f32.mxu1 %vm814_vm4, %v554_v34  ;;  %19258 = vmatpush3.bf16.xpose.msk.msra.mxu0 %vm20719_vm5, %v19253_v19 }
 0x3a6   :  { %v18440_v37 = vpop.f32.mrb[12].mxu0  ;;  %v19263_v39 = vpack.c.bf16 %v791_v30, %v786_v35  ;;  %19262 = vmatpush3.bf16.msra.mxu1 %v19259_v26  ;;  %19276 = vmatprep.subr.bf16.mxu0 %v19275_v33 }
 0x3a7   :  { %v801_v45 = vadd.f32 %v18440_v37, %v15282_v16  ;;  %v795_v46 = vpop.f32.mrb[13].mxu0 }
 0x3a8   :  { %v796_v47 = vadd.f32 %v15282_v16, %v795_v46  ;;  %19264 = vmatprep.subr.bf16.mxu1 %v19263_v39  ;;  %18456 = vmatmul.mubr.msk.f32.gmra.mrb[16].mxu1 %vm814_vm4, %v559_v41  ;;  %v15320_v46 = vld [vmem:[%s25184_s5 + $0x1] ss:$0 sm:$0xff] }
 0x3aa   :  { %v18443_v50 = vpop.f32.mrb[14].mxu0  ;;  %v20762_v51 = vpack.c.bf16 %v801_v45, %v796_v47  ;;  %19266 = vmatpush3.bf16.msra.mxu1 %v19263_v39 }
 0x3ab   :  { %v811_v53 = vadd.f32 %v18443_v50, %v15282_v16  ;;  %v805_v55 = vpop.f32.mrb[15].mxu0 }
 0x3ac   :  { %v806_v58 = vadd.f32 %v15282_v16, %v805_v55  ;;  %19268 = vmatprep.subr.bf16.mxu1 %v20762_v51  ;;  %18467 = vmatmul.mubr.msk.f32.vlgmr.msra.gmra.mrb[16].mxu0 %vm814_vm4, %v569_v52 }
 0x3ad   :  { %18469 = vmatprep.mubr.msk.f32.mxu0 %vm814_vm4, %v574_v57  ;;  %19278 = vmatpush3.bf16.msra.mxu0 %v19275_v33 }
 0x3ae   :  { %v20775_v62 = vpack.c.bf16 %v811_v53, %v806_v58  ;;  %19280 = vmatprep.subr.bf16.mxu0 %v19279_v56 }
 0x3b0   :  { %18470 = vmatmul.mubr.msk.f32.gmra.mrb[18].mxu0 %vm814_vm4, %v579_v63 }
 0x3b1   :  { %19282 = vmatpush3.bf16.msra.mxu0 %v19279_v56  ;;  %18508 = vmatprep.mubr.msk.f32.mxu0 %vm187_vm2, %v20628_v28 }
 0x3b2   :  { %19292 = vmatprep.subr.bf16.mxu0 %v19291_v0 }
 0x3b4   :  { %18509 = vmatmul.mubr.msk.f32.vlgmr.msra.gmra.mrb[20].mxu0 %vm187_vm2, %v20630_v29 }
 0x3b5   :  { %18511 = vmatprep.mubr.msk.f32.mxu0 %vm187_vm2, %v20635_v32  ;;  %19294 = vmatpush3.bf16.msra.mxu0 %v19291_v0 }
 0x3b6   :  { %19296 = vmatprep.subr.bf16.mxu0 %v19295_v5 }
 0x3b8   :  { %18512 = vmatmul.mubr.msk.f32.gmra.mrb[22].mxu0 %vm187_vm2, %v20650_v36 }
 0x3b9   :  { %18514 = vmatprep.mubr.msk.f32.mxu0 %vm187_vm2, %v20657_v38  ;;  %19298 = vmatpush3.bf16.msra.mxu0 %v19295_v5 }
 0x3bc   :  { %18515 = vmatmul.mubr.msk.f32.gmra.mrb[24].mxu0 %vm187_vm2, %v20668_v40 }
 0x3bd   :  { %18517 = vmatprep.mubr.msk.f32.mxu0 %vm187_vm2, %v20675_v42 }
 0x3c0   :  { %18518 = vmatmul.mubr.msk.f32.gmra.mrb[26].mxu0 %vm187_vm2, %v20683_v43 }
 0x3c1   :  { %18548 = vmatprep.mubr.msk.f32.mxu0 %vm187_vm2, %v20628_v28 }
 0x3c4   :  { %18549 = vmatmul.mubr.msk.f32.vlgmr.msra.gmra.mrb[28].mxu0 %vm187_vm2, %v20630_v29 }
 0x3c5   :  { %18551 = vmatprep.mubr.msk.f32.mxu0 %vm187_vm2, %v20635_v32 }
 0x3c8   :  { %18552 = vmatmul.mubr.msk.f32.gmra.mrb[30].mxu0 %vm187_vm2, %v20650_v36 }
 0x3c9   :  { %18554 = vmatprep.mubr.msk.f32.mxu0 %vm187_vm2, %v20657_v38 }
 0x3cc   :  { %18555 = vmatmul.mubr.msk.f32.gmra.mrb[32].mxu0 %vm187_vm2, %v20668_v40 }
 0x3cd   :  { %18557 = vmatprep.mubr.msk.f32.mxu0 %vm187_vm2, %v20675_v42 }
 0x3d0   :  { %18558 = vmatmul.mubr.msk.f32.gmra.mrb[34].mxu0 %vm187_vm2, %v20683_v43 }
 0x477   :  { %v18454_v9 = vpop.f32.mrb[14].mxu1 }
 0x478   :  { %v1034_v10 = vmul.f32 0.25, %v18454_v9  ;;  %v905_v11 = vpop.f32.mrb[15].mxu1 }
 0x479   :  { %v1033_v12 = vmul.f32 0.25, %v905_v11 }
 0x47a   :  { %v20821_v13 = vadd.f32 %v1034_v10, %v20818_v8  ;;  %v15348_v10 = vld [vmem:[%s25142_s13 + $0x1] ss:$0 sm:$0xff] }
 0x47b   :  { %v18457_v15 = vpop.f32.mrb[16].mxu1  ;;  %v20824_v16 = vadd.f32 %v1033_v12, %v20818_v8 }
 0x47c   :  { %v1036_v17 = vmul.f32 0.25, %v18457_v15  ;;  %v915_v18 = vpop.f32.mrb[17].mxu1  ;;  %v1052_v60 = vsel %vm187_vm2, %v20821_v13, -inf }
 0x47d   :  { %v1035_v19 = vmul.f32 0.25, %v915_v18  ;;  %1053 = vmax.xlane.f32.xlu0 %v1052_v60  ;;  %v1049_v20 = vsel %vm187_vm2, %v20824_v16, -inf }
 0x47e   :  { %1050 = vmax.xlane.f32.xlu1 %v1049_v20  ;;  %v20831_v21 = vadd.f32 %v1036_v17, %v20818_v8 }
 0x47f   :  { %v18468_v22 = vpop.f32.mrb[16].mxu0  ;;  %v20834_v23 = vadd.f32 %v1035_v19, %v20818_v8 }
 0x480   :  { %v1038_v24 = vmul.f32 0.25, %v18468_v22  ;;  %v1014_v25 = vpop.f32.mrb[17].mxu0  ;;  %v1058_v26 = vsel %vm187_vm2, %v20831_v21, -inf }
 0x481   :  { %v1037_v27 = vmul.f32 0.25, %v1014_v25  ;;  %v1055_v30 = vsel %vm187_vm2, %v20834_v23, -inf }
 0x482   :  { %1059 = vmax.xlane.f32.xlu1 %v1058_v26  ;;  %1056 = vmax.xlane.f32.xlu0 %v1055_v30  ;;  %v20841_v31 = vadd.f32 %v1038_v24, %v20818_v8 }
 0x483   :  { %v18471_v33 = vpop.f32.mrb[18].mxu0  ;;  %v20844_v34 = vadd.f32 %v1037_v27, %v20818_v8 }
 0x484   :  { %v1040_v35 = vmul.f32 0.25, %v18471_v33  ;;  %v1024_v37 = vpop.f32.mrb[19].mxu0  ;;  %v1064_v39 = vsel %vm187_vm2, %v20841_v31, -inf }
 0x485   :  { %v1039_v41 = vmul.f32 0.25, %v1024_v37  ;;  %v1061_v45 = vsel %vm187_vm2, %v20844_v34, -inf }
 0x486   :  { %1065 = vmax.xlane.f32.xlu1 %v1064_v39  ;;  %1062 = vmax.xlane.f32.xlu0 %v1061_v45  ;;  %v20854_v47 = vadd.f32 %v1040_v35, %v20818_v8 }
 0x487   :  { %v18510_v48 = vpop.f32.mrb[20].mxu0  ;;  %v20857_v49 = vadd.f32 %v1039_v41, %v20818_v8 }
 0x488   :  { %v20859_v50 = vadd.f32 %v18510_v48, %v15320_v46  ;;  %v1412_v52 = vpop.f32.mrb[21].mxu0  ;;  %v1070_v53 = vsel %vm187_vm2, %v20854_v47, -inf }
 0x489   :  { %v20863_v55 = vadd.f32 %v15320_v46, %v1412_v52  ;;  %v1067_v56 = vsel %vm187_vm2, %v20857_v49, -inf }
 0x48a   :  { %1071 = vmax.xlane.f32.xlu1 %v1070_v53  ;;  %1068 = vmax.xlane.f32.xlu0 %v1067_v56 }
 0x48b   :  { %v18513_v57 = vpop.f32.mrb[22].mxu0 }
 0x48c   :  { %v20867_v58 = vadd.f32 %v18513_v57, %v15320_v46  ;;  %v1422_v59 = vpop.f32.mrb[23].mxu0 }
 0x48d   :  { %v20869_v61 = vadd.f32 %v15320_v46, %v1422_v59 }
 0x48f   :  { %v18516_v63 = vpop.f32.mrb[24].mxu0 }
 0x490   :  { %v20871_v0 = vadd.f32 %v18516_v63, %v15320_v46  ;;  %v1432_v2 = vpop.f32.mrb[25].mxu0 }
 0x491   :  { %v1433_v4 = vadd.f32 %v15320_v46, %v1432_v2 }
 0x493   :  { %v18519_v5 = vpop.f32.mrb[26].mxu0  ;;  %18582 = vmatprep.mubr.msk.f32.mxu0 %vm814_vm4, %v1433_v4 }
 0x494   :  { %v20874_v44 = vadd.f32 %v18519_v5, %v15320_v46  ;;  %v1442_v7 = vpop.f32.mrb[27].mxu0 }
 0x495   :  { %v20876_v9 = vadd.f32 %v15320_v46, %v1442_v7 }
 0x497   :  { %v18550_v11 = vpop.f32.mrb[28].mxu0 }
 0x498   :  { %v1654_v12 = vadd.f32 %v18550_v11, %v15348_v10  ;;  %v1648_v15 = vpop.f32.mrb[29].mxu0 }
 0x499   :  { %v1649_v17 = vadd.f32 %v15348_v10, %v1648_v15 }
 0x49b   :  { %v18553_v18 = vpop.f32.mrb[30].mxu0  ;;  %v20881_v60 = vpack.c.bf16 %v1654_v12, %v1649_v17 }
 0x49c   :  { %v1664_v19 = vadd.f32 %v18553_v18, %v15348_v10  ;;  %v1658_v20 = vpop.f32.mrb[31].mxu0 }
 0x49d   :  { %v1659_v22 = vadd.f32 %v15348_v10, %v1658_v20 }
 0x49f   :  { %v18556_v24 = vpop.f32.mrb[32].mxu0  ;;  %v20883_v25 = vpack.c.bf16 %v1664_v19, %v1659_v22 }
 0x4a0   :  { %v1674_v26 = vadd.f32 %v18556_v24, %v15348_v10  ;;  %v1668_v27 = vpop.f32.mrb[33].mxu0 }
 0x4a1   :  { %v1669_v30 = vadd.f32 %v15348_v10, %v1668_v27 }
 0x4a3   :  { %v18559_v33 = vpop.f32.mrb[34].mxu0  ;;  %v20885_v35 = vpack.c.bf16 %v1674_v26, %v1669_v30 }
 0x4a4   :  { %v1684_v37 = vadd.f32 %v18559_v33, %v15348_v10  ;;  %v1678_v39 = vpop.f32.mrb[35].mxu0 }
 0x4a5   :  { %v1679_v41 = vadd.f32 %v15348_v10, %v1678_v39 }
 0x4a7   :  { %v20887_v45 = vpack.c.bf16 %v1684_v37, %v1679_v41 }
 0x50a   :  { %v1054_v46 = vpop.xlane.xlu0 %1053 }
 0x50b   :  { %v1074_v48 = vsub.f32 %v20821_v13, %v1054_v46  ;;  %v1051_v52 = vpop.xlane.xlu1 %1050 }
 0x50c   :  { %v1073_v53 = vsub.f32 %v20824_v16, %v1051_v52 }
 0x50d   :  { %v1083_v56 = vmul.f32 1.442695, %v1074_v48 }
 0x50e   :  { %v1081_v57 = vmul.f32 1.442695, %v1073_v53 }
 0x50f   :  { %20047 = vpow2.f32 %v1083_v56  ;;  %v1060_v59 = vpop.xlane.xlu1 %1059  ;;  %v1057_v63 = vpop.xlane.xlu0 %1056 }
 0x510   :  { %20049 = vpow2.f32 %v1081_v57  ;;  %v1076_v2 = vsub.f32 %v20831_v21, %v1060_v59  ;;  %v1075_v4 = vsub.f32 %v20834_v23, %v1057_v63 }
 0x512   :  { %v1087_v5 = vmul.f32 1.442695, %v1076_v2  ;;  %v1085_v7 = vmul.f32 1.442695, %v1075_v4 }
 0x513   :  { %v1066_v10 = vpop.xlane.xlu1 %1065  ;;  %v1063_v11 = vpop.xlane.xlu0 %1062 }
 0x514   :  { %20051 = vpow2.f32 %v1087_v5  ;;  %v1078_v13 = vsub.f32 %v20841_v31, %v1066_v10  ;;  %v1077_v12 = vsub.f32 %v20844_v34, %v1063_v11 }
 0x515   :  { %20053 = vpow2.f32 %v1085_v7 }
 0x516   :  { %v1091_v16 = vmul.f32 1.442695, %v1078_v13  ;;  %v1089_v15 = vmul.f32 1.442695, %v1077_v12 }
 0x517   :  { %v1072_v17 = vpop.xlane.xlu1 %1071  ;;  %v1069_v18 = vpop.xlane.xlu0 %1068 }
 0x518   :  { %20055 = vpow2.f32 %v1091_v16  ;;  %v1080_v19 = vsub.f32 %v20854_v47, %v1072_v17  ;;  %v1079_v21 = vsub.f32 %v20857_v49, %v1069_v18  ;;  %v15329_v16 = vld [vmem:[%s25181_s7 + $0x20] sm:$0xff] }
 0x519   :  { %v20048_v23 = vpop.eup %20047  ;;  %20057 = vpow2.f32 %v1089_v15  ;;  %v15330_v15 = vld [vmem:[%s25181_s7 + $0x28] sm:$0xff] }
 0x51a   :  { %v20050_v20 = vpop.eup %20049  ;;  %v1095_v22 = vmul.f32 1.442695, %v1080_v19  ;;  %v1093_v24 = vmul.f32 1.442695, %v1079_v21  ;;  %v1100_v26 = vsel %vm187_vm2, %v20048_v23, 0.0  ;;  %v19283_v21 = vpack.c.bf16 %v15330_v15, %v15329_v16 }
 0x51b   :  { %1101 = vadd.xlane.f32.xlu1 %v1100_v26  ;;  %v1097_v31 = vsel %vm187_vm2, %v20050_v20, 0.0 }
 0x51c   :  { %20059 = vpow2.f32 %v1095_v22  ;;  %1098 = vadd.xlane.f32.xlu0 %v1097_v31  ;;  %v15332_v22 = vld [vmem:[%s25181_s7 + $0x38] sm:$0xff] }
 0x51d   :  { %20061 = vpow2.f32 %v1093_v24 }
 0x51e   :  { %v20052_v34 = vpop.eup %20051 }
 0x51f   :  { %v20054_v27 = vpop.eup %20053  ;;  %v1106_v30 = vsel %vm187_vm2, %v20052_v34, 0.0 }
 0x520   :  { %1107 = vadd.xlane.f32.xlu1 %v1106_v30  ;;  %v1103_v47 = vsel %vm187_vm2, %v20054_v27, 0.0 }
 0x521   :  { %1104 = vadd.xlane.f32.xlu0 %v1103_v47 }
 0x522   :  { %v20056_v49 = vpop.eup %20055 }
 0x523   :  { %v20058_v33 = vpop.eup %20057  ;;  %v1112_v37 = vsel %vm187_vm2, %v20056_v49, 0.0 }
 0x524   :  { %1113 = vadd.xlane.f32.xlu1 %v1112_v37  ;;  %v1109_v39 = vsel %vm187_vm2, %v20058_v33, 0.0 }
 0x525   :  { %1110 = vadd.xlane.f32.xlu0 %v1109_v39 }
 0x526   :  { %v20060_v41 = vpop.eup %20059 }
 0x527   :  { %v20062_v46 = vpop.eup %20061  ;;  %v1118_v48 = vsel %vm187_vm2, %v20060_v41, 0.0 }
 0x528   :  { %1119 = vadd.xlane.f32.xlu1 %v1118_v48  ;;  %v1115_v52 = vsel %vm187_vm2, %v20062_v46, 0.0 }
 0x529   :  { %1116 = vadd.xlane.f32.xlu0 %v1115_v52 }
 0x5a8   :  { %v1102_v53 = vpop.xlane.xlu1 %1101 }
 0x5a9   :  { %20063 = vrcp.f32 %v1102_v53  ;;  %v1099_v56 = vpop.xlane.xlu0 %1098 }
 0x5aa   :  { %20065 = vrcp.f32 %v1099_v56 }
 0x5ad   :  { %v1108_v57 = vpop.xlane.xlu1 %1107 }
 0x5ae   :  { %20067 = vrcp.f32 %v1108_v57  ;;  %v1105_v59 = vpop.xlane.xlu0 %1104 }
 0x5af   :  { %20069 = vrcp.f32 %v1105_v59 }
 0x5b1   :  { %v1114_v63 = vpop.xlane.xlu1 %1113 }
 0x5b2   :  { %20071 = vrcp.f32 %v1114_v63  ;;  %v1111_v2 = vpop.xlane.xlu0 %1110 }
 0x5b3   :  { %v20064_v4 = vpop.eup %20063  ;;  %20073 = vrcp.f32 %v1111_v2 }
 0x5b4   :  { %v20066_v5 = vpop.eup %20065  ;;  %v1130_v11 = vmul.f32 %v20064_v4, %v20048_v23 }
 0x5b5   :  { %v1120_v7 = vpop.xlane.xlu1 %1119  ;;  %v1129_v10 = vmul.f32 %v20066_v5, %v20050_v20  ;;  %v15331_v20 = vld [vmem:[%s25181_s7 + $0x30] sm:$0xff] }
 0x5b6   :  { %20075 = vrcp.f32 %v1120_v7  ;;  %v1117_v13 = vpop.xlane.xlu0 %1116  ;;  %v19287_v31 = vpack.c.bf16 %v15332_v22, %v15331_v20 }
 0x5b7   :  { %20077 = vrcp.f32 %v1117_v13  ;;  %18480 = vmatprep.mubr.msk.f32.mxu1 %vm187_vm2, %v1129_v10 }
 0x5b8   :  { %v20068_v12 = vpop.eup %20067  ;;  %18481 = vmatmul.mubr.msk.f32.vlgmr.msra.gmra.mrb[18].mxu1 %vm187_vm2, %v1130_v11 }
 0x5b9   :  { %v20070_v17 = vpop.eup %20069  ;;  %19270 = vmatpush3.bf16.msra.mxu1 %v20762_v51  ;;  %v1132_v18 = vmul.f32 %v20068_v12, %v20052_v34 }
 0x5ba   :  { %19272 = vmatprep.subr.bf16.mxu1 %v20775_v62  ;;  %v1131_v19 = vmul.f32 %v20070_v17, %v20054_v27 }
 0x5bc   :  { %v20072_v23 = vpop.eup %20071  ;;  %18483 = vmatprep.mubr.msk.f32.mxu1 %vm187_vm2, %v1131_v19 }
 0x5bd   :  { %v20074_v24 = vpop.eup %20073  ;;  %v1134_v26 = vmul.f32 %v20072_v23, %v20056_v49  ;;  %18484 = vmatmul.mubr.msk.f32.gmra.mrb[20].mxu1 %vm187_vm2, %v1132_v18 }
 0x5be   :  { %19274 = vmatpush3.bf16.msra.mxu1 %v20775_v62  ;;  %v1133_v51 = vmul.f32 %v20074_v24, %v20058_v33 }
 0x5bf   :  { %19284 = vmatprep.subr.bf16.mxu1 %v19283_v21 }
 0x5c0   :  { %v20076_v34 = vpop.eup %20075  ;;  %18494 = vmatprep.mubr.msk.f32.mxu1 %vm187_vm2, %v1133_v51 }
 0x5c1   :  { %v20078_v27 = vpop.eup %20077  ;;  %18495 = vmatmul.mubr.msk.f32.vlgmr.msra.gmra.mrb[22].mxu1 %vm187_vm2, %v1134_v26  ;;  %v1136_v30 = vmul.f32 %v20076_v34, %v20060_v41 }
 0x5c2   :  { %19286 = vmatpush3.bf16.msra.mxu1 %v19283_v21  ;;  %v1135_v47 = vmul.f32 %v20078_v27, %v20062_v46 }
 0x5c3   :  { %19288 = vmatprep.subr.bf16.mxu1 %v19287_v31 }
 0x5c4   :  { %18497 = vmatprep.mubr.msk.f32.mxu1 %vm187_vm2, %v1135_v47 }
 0x5c5   :  { %18498 = vmatmul.mubr.msk.f32.gmra.mrb[24].mxu1 %vm187_vm2, %v1136_v30 }
 0x5c6   :  { %19290 = vmatpush3.bf16.msra.mxu1 %v19287_v31  ;;  %18528 = vmatprep.mubr.msk.f32.mxu1 %vm187_vm2, %v20628_v28 }
 0x5c9   :  { %18529 = vmatmul.mubr.msk.f32.vlgmr.msra.gmra.mrb[26].mxu1 %vm187_vm2, %v20630_v29 }
 0x5ca   :  { %18531 = vmatprep.mubr.msk.f32.mxu1 %vm187_vm2, %v20635_v32 }
 0x5cd   :  { %18532 = vmatmul.mubr.msk.f32.gmra.mrb[28].mxu1 %vm187_vm2, %v20650_v36 }
 0x5ce   :  { %18534 = vmatprep.mubr.msk.f32.mxu1 %vm187_vm2, %v20657_v38 }
 0x5d1   :  { %18535 = vmatmul.mubr.msk.f32.gmra.mrb[30].mxu1 %vm187_vm2, %v20668_v40 }
 0x5d2   :  { %18537 = vmatprep.mubr.msk.f32.mxu1 %vm187_vm2, %v20675_v42 }
 0x5d5   :  { %18538 = vmatmul.mubr.msk.f32.gmra.mrb[32].mxu1 %vm187_vm2, %v20683_v43 }
 0x5d6   :  { %18568 = vmatprep.mubr.msk.f32.mxu1 %vm814_vm4, %v20863_v55  ;;  %v15334_v55 = vld [vmem:[%s25140_s11 + $0x1] ss:$0 sm:$0xff] }
 0x68b   :  { %v20946_v62 = vpop.f32.mrb[18].mxu1 }
 0x68c   :  { %v20948_v49 = vpop.f32.mrb[19].mxu1 }
 0x690   :  { %v20950_v33 = vpop.f32.mrb[20].mxu1 }
 0x691   :  { %v20952_v37 = vpop.f32.mrb[21].mxu1 }
 0x694   :  { %v20954_v39 = vpop.f32.mrb[22].mxu1 }
 0x695   :  { %v20956_v41 = vpop.f32.mrb[23].mxu1 }
 0x698   :  { %v20958_v46 = vpop.f32.mrb[24].mxu1 }
 0x699   :  { %v20960_v48 = vpop.f32.mrb[25].mxu1 }
 0x69c   :  { %v18530_v52 = vpop.f32.mrb[26].mxu1 }
 0x69d   :  { %v1536_v53 = vadd.f32 %v18530_v52, %v15334_v55  ;;  %v1530_v56 = vpop.f32.mrb[27].mxu1 }
 0x69e   :  { %v1531_v57 = vadd.f32 %v15334_v55, %v1530_v56 }
 0x6a0   :  { %v19299_v59 = vpack.c.bf16 %v1536_v53, %v1531_v57  ;;  %v18533_v63 = vpop.f32.mrb[28].mxu1 }
 0x6a1   :  { %v1546_v2 = vadd.f32 %v18533_v63, %v15334_v55  ;;  %v1540_v4 = vpop.f32.mrb[29].mxu1 }
 0x6a2   :  { %v1541_v5 = vadd.f32 %v15334_v55, %v1540_v4  ;;  %19301 = vmatprep.subr.msk.bf16.mxu1 %vm20719_vm5, %v19299_v59 }
 0x6a3   :  { %19304 = vmatpush3.bf16.xpose.msk.msra.mxu1 %vm20719_vm5, %v19299_v59 }
 0x6a4   :  { %v19305_v7 = vpack.c.bf16 %v1546_v2, %v1541_v5  ;;  %v18536_v10 = vpop.f32.mrb[30].mxu1 }
 0x6a5   :  { %v1556_v11 = vadd.f32 %v18536_v10, %v15334_v55  ;;  %v1550_v13 = vpop.f32.mrb[31].mxu1 }
 0x6a6   :  { %v1551_v12 = vadd.f32 %v15334_v55, %v1550_v13  ;;  %19307 = vmatprep.subr.msk.bf16.mxu1 %vm20719_vm5, %v19305_v7 }
 0x6a8   :  { %v19311_v16 = vpack.c.bf16 %v1556_v11, %v1551_v12  ;;  %v18539_v15 = vpop.f32.mrb[32].mxu1 }
 0x6a9   :  { %v1566_v17 = vadd.f32 %v18539_v15, %v15334_v55  ;;  %v1560_v18 = vpop.f32.mrb[33].mxu1 }
 0x6aa   :  { %v1561_v19 = vadd.f32 %v15334_v55, %v1560_v18  ;;  %19313 = vmatprep.subr.msk.bf16.mxu0 %vm20719_vm5, %v19311_v16 }
 0x6ab   :  { %19310 = vmatpush3.bf16.xpose.msk.msra.mxu1 %vm20719_vm5, %v19305_v7  ;;  %19316 = vmatpush3.bf16.xpose.msk.msra.mxu0 %vm20719_vm5, %v19311_v16 }
 0x6ac   :  { %v19317_v21 = vpack.c.bf16 %v1566_v17, %v1561_v19  ;;  %19324 = vmatprep.subr.bf16.mxu1 %v20881_v60 }
 0x6ae   :  { %19319 = vmatprep.subr.msk.bf16.mxu0 %vm20719_vm5, %v19317_v21 }
 0x6b2   :  { %18569 = vmatmul.mubr.msk.f32.vlgmr.msra.gmra.mrb[34].mxu1 %vm814_vm4, %v20859_v50 }
 0x6b3   :  { %18571 = vmatprep.mubr.msk.f32.mxu1 %vm814_vm4, %v20869_v61  ;;  %19322 = vmatpush3.bf16.xpose.msk.msra.mxu0 %vm20719_vm5, %v19317_v21 }
 0x6b4   :  { %19326 = vmatpush3.bf16.msra.mxu1 %v20881_v60 }
 0x6b5   :  { %19328 = vmatprep.subr.bf16.mxu1 %v20883_v25 }
 0x6b6   :  { %18572 = vmatmul.mubr.msk.f32.gmra.mrb[36].mxu1 %vm814_vm4, %v20867_v58 }
 0x6b8   :  { %19330 = vmatpush3.bf16.msra.mxu1 %v20883_v25 }
 0x6b9   :  { %19332 = vmatprep.subr.bf16.mxu1 %v20885_v35 }
 0x6ba   :  { %18583 = vmatmul.mubr.msk.f32.vlgmr.msra.gmra.mrb[36].mxu0 %vm814_vm4, %v20871_v0 }
 0x6bb   :  { %18585 = vmatprep.mubr.msk.f32.mxu0 %vm814_vm4, %v20876_v9 }
 0x6be   :  { %18586 = vmatmul.mubr.msk.f32.gmra.mrb[38].mxu0 %vm814_vm4, %v20874_v44 }
 0x785   :  { %v18570_v50 = vpop.f32.mrb[34].mxu1 }
 0x786   :  { %v1906_v61 = vmul.f32 0.25, %v18570_v50  ;;  %v1777_v60 = vpop.f32.mrb[35].mxu1 }
 0x787   :  { %v1905_v23 = vmul.f32 0.25, %v1777_v60 }
 0x788   :  { %v1914_v20 = vadd.f32 %v1906_v61, %v20818_v8 }
 0x789   :  { %v18573_v58 = vpop.f32.mrb[36].mxu1  ;;  %v1913_v25 = vadd.f32 %v1905_v23, %v20818_v8 }
 0x78a   :  { %v1908_v22 = vmul.f32 0.25, %v18573_v58  ;;  %v1787_v24 = vpop.f32.mrb[37].mxu1  ;;  %v1924_v26 = vsel %vm187_vm2, %v1914_v20, -inf }
 0x78b   :  { %v1907_v0 = vmul.f32 0.25, %v1787_v24  ;;  %1925 = vmax.xlane.f32.xlu1 %v1924_v26  ;;  %v1921_v9 = vsel %vm187_vm2, %v1913_v25, -inf }
 0x78c   :  { %1922 = vmax.xlane.f32.xlu0 %v1921_v9  ;;  %v1916_v44 = vadd.f32 %v1908_v22, %v20818_v8 }
 0x78d   :  { %v18584_v51 = vpop.f32.mrb[36].mxu0  ;;  %v1915_v31 = vadd.f32 %v1907_v0, %v20818_v8 }
 0x78e   :  { %v1910_v34 = vmul.f32 0.25, %v18584_v51  ;;  %v1886_v27 = vpop.f32.mrb[37].mxu0  ;;  %v1930_v30 = vsel %vm187_vm2, %v1916_v44, -inf }
 0x78f   :  { %v1909_v47 = vmul.f32 0.25, %v1886_v27  ;;  %1931 = vmax.xlane.f32.xlu1 %v1930_v30  ;;  %v1927_v55 = vsel %vm187_vm2, %v1915_v31, -inf }
 0x790   :  { %1928 = vmax.xlane.f32.xlu0 %v1927_v55  ;;  %v1918_v52 = vadd.f32 %v1910_v34, %v20818_v8 }
 0x791   :  { %v18587_v53 = vpop.f32.mrb[38].mxu0  ;;  %v1917_v56 = vadd.f32 %v1909_v47, %v20818_v8 }
 0x792   :  { %v1912_v57 = vmul.f32 0.25, %v18587_v53  ;;  %v1896_v59 = vpop.f32.mrb[39].mxu0  ;;  %v1936_v63 = vsel %vm187_vm2, %v1918_v52, -inf }
 0x793   :  { %v1911_v2 = vmul.f32 0.25, %v1896_v59  ;;  %1937 = vmax.xlane.f32.xlu1 %v1936_v63  ;;  %v1933_v4 = vsel %vm187_vm2, %v1917_v56, -inf }
 0x794   :  { %1934 = vmax.xlane.f32.xlu0 %v1933_v4  ;;  %v1920_v5 = vadd.f32 %v1912_v57, %v20818_v8 }
 0x795   :  { %v1919_v7 = vadd.f32 %v1911_v2, %v20818_v8 }
 0x796   :  { %v1942_v10 = vsel %vm187_vm2, %v1920_v5, -inf }
 0x797   :  { %1943 = vmax.xlane.f32.xlu1 %v1942_v10  ;;  %v1939_v11 = vsel %vm187_vm2, %v1919_v7, -inf }
 0x798   :  { %1940 = vmax.xlane.f32.xlu0 %v1939_v11 }
 0x818   :  { %v1926_v13 = vpop.xlane.xlu1 %1925 }
 0x819   :  { %v1946_v12 = vsub.f32 %v1914_v20, %v1926_v13  ;;  %v1923_v16 = vpop.xlane.xlu0 %1922  ;;  %v15381_v13 = vld [vmem:[%s25143_s14 + $0x10] sm:$0xff] }
 0x81a   :  { %v1945_v15 = vsub.f32 %v1913_v25, %v1923_v16 }
 0x81b   :  { %v1955_v17 = vmul.f32 1.442695, %v1946_v12  ;;  %v15382_v12 = vld [vmem:[%s25143_s14 + $0x18] sm:$0xff] }
 0x81c   :  { %v1953_v18 = vmul.f32 1.442695, %v1945_v15  ;;  %v1932_v19 = vpop.xlane.xlu1 %1931  ;;  %v19339_v16 = vpack.c.bf16 %v15382_v12, %v15381_v13 }
 0x81d   :  { %20079 = vpow2.f32 %v1955_v17  ;;  %v1948_v21 = vsub.f32 %v1916_v44, %v1932_v19  ;;  %v1929_v50 = vpop.xlane.xlu0 %1928 }
 0x81e   :  { %20081 = vpow2.f32 %v1953_v18  ;;  %v1947_v61 = vsub.f32 %v1915_v31, %v1929_v50  ;;  %19340 = vmatprep.subr.bf16.mxu0 %v19339_v16 }
 0x81f   :  { %v1959_v60 = vmul.f32 1.442695, %v1948_v21  ;;  %19342 = vmatpush3.bf16.msra.mxu0 %v19339_v16 }
 0x820   :  { %v1957_v23 = vmul.f32 1.442695, %v1947_v61  ;;  %v1938_v58 = vpop.xlane.xlu1 %1937 }
 0x821   :  { %20083 = vpow2.f32 %v1959_v60  ;;  %v1950_v22 = vsub.f32 %v1918_v52, %v1938_v58  ;;  %v1935_v24 = vpop.xlane.xlu0 %1934 }
 0x822   :  { %20085 = vpow2.f32 %v1957_v23  ;;  %v1949_v26 = vsub.f32 %v1917_v56, %v1935_v24 }
 0x823   :  { %v1963_v0 = vmul.f32 1.442695, %v1950_v22 }
 0x824   :  { %v1961_v20 = vmul.f32 1.442695, %v1949_v26  ;;  %v1944_v9 = vpop.xlane.xlu1 %1943 }
 0x825   :  { %20087 = vpow2.f32 %v1963_v0  ;;  %v1952_v25 = vsub.f32 %v1920_v5, %v1944_v9  ;;  %v1941_v51 = vpop.xlane.xlu0 %1940 }
 0x826   :  { %20089 = vpow2.f32 %v1961_v20  ;;  %v1951_v34 = vsub.f32 %v1919_v7, %v1941_v51 }
 0x827   :  { %v20080_v44 = vpop.eup %20079  ;;  %v1967_v27 = vmul.f32 1.442695, %v1952_v25 }
 0x828   :  { %v20082_v30 = vpop.eup %20081  ;;  %v1965_v31 = vmul.f32 1.442695, %v1951_v34  ;;  %v1972_v47 = vsel %vm187_vm2, %v20080_v44, 0.0 }
 0x829   :  { %20091 = vpow2.f32 %v1967_v27  ;;  %1973 = vadd.xlane.f32.xlu1 %v1972_v47  ;;  %v1969_v55 = vsel %vm187_vm2, %v20082_v30, 0.0  ;;  %v1331_v47 = vld [vmem:[%s25143_s14] sm:$0xff] }
 0x82a   :  { %20093 = vpow2.f32 %v1965_v31  ;;  %1970 = vadd.xlane.f32.xlu0 %v1969_v55 }
 0x82b   :  { %v20084_v52 = vpop.eup %20083 }
 0x82c   :  { %v20086_v53 = vpop.eup %20085  ;;  %v1978_v56 = vsel %vm187_vm2, %v20084_v52, 0.0 }
 0x82d   :  { %1979 = vadd.xlane.f32.xlu1 %v1978_v56  ;;  %v1975_v57 = vsel %vm187_vm2, %v20086_v53, 0.0 }
 0x82e   :  { %1976 = vadd.xlane.f32.xlu0 %v1975_v57 }
 0x82f   :  { %v20088_v59 = vpop.eup %20087 }
 0x830   :  { %v20090_v63 = vpop.eup %20089  ;;  %v1984_v2 = vsel %vm187_vm2, %v20088_v59, 0.0 }
 0x831   :  { %1985 = vadd.xlane.f32.xlu1 %v1984_v2  ;;  %v1981_v4 = vsel %vm187_vm2, %v20090_v63, 0.0 }
 0x832   :  { %1982 = vadd.xlane.f32.xlu0 %v1981_v4 }
 0x833   :  { %v20092_v5 = vpop.eup %20091 }
 0x834   :  { %v20094_v7 = vpop.eup %20093  ;;  %v1990_v10 = vsel %vm187_vm2, %v20092_v5, 0.0 }
 0x835   :  { %1991 = vadd.xlane.f32.xlu1 %v1990_v10  ;;  %v1987_v11 = vsel %vm187_vm2, %v20094_v7, 0.0 }
 0x836   :  { %1988 = vadd.xlane.f32.xlu0 %v1987_v11 }
 0x8b6   :  { %v1974_v15 = vpop.xlane.xlu1 %1973 }
 0x8b7   :  { %20095 = vrcp.f32 %v1974_v15  ;;  %v1971_v17 = vpop.xlane.xlu0 %1970 }
 0x8b8   :  { %20097 = vrcp.f32 %v1971_v17 }
 0x8ba   :  { %v1980_v18 = vpop.xlane.xlu1 %1979 }
 0x8bb   :  { %20099 = vrcp.f32 %v1980_v18  ;;  %v1977_v19 = vpop.xlane.xlu0 %1976 }
 0x8bc   :  { %20101 = vrcp.f32 %v1977_v19 }
 0x8be   :  { %v1986_v21 = vpop.xlane.xlu1 %1985 }
 0x8bf   :  { %20103 = vrcp.f32 %v1986_v21  ;;  %v1983_v50 = vpop.xlane.xlu0 %1982 }
 0x8c0   :  { %20105 = vrcp.f32 %v1983_v50 }
 0x8c1   :  { %v20096_v61 = vpop.eup %20095 }
 0x8c2   :  { %v20098_v60 = vpop.eup %20097  ;;  %v1992_v23 = vpop.xlane.xlu1 %1991  ;;  %v2002_v24 = vmul.f32 %v20096_v61, %v20080_v44 }
 0x8c3   :  { %20107 = vrcp.f32 %v1992_v23  ;;  %v1989_v58 = vpop.xlane.xlu0 %1988  ;;  %v2001_v22 = vmul.f32 %v20098_v60, %v20082_v30 }
 0x8c4   :  { %20109 = vrcp.f32 %v1989_v58 }
 0x8c5   :  { %v20100_v26 = vpop.eup %20099  ;;  %18596 = vmatprep.mubr.msk.f32.mxu1 %vm187_vm2, %v2001_v22 }
 0x8c6   :  { %v20102_v0 = vpop.eup %20101  ;;  %18597 = vmatmul.mubr.msk.f32.vlgmr.msra.gmra.mrb[38].mxu1 %vm187_vm2, %v2002_v24  ;;  %v2004_v9 = vmul.f32 %v20100_v26, %v20084_v52 }
 0x8c7   :  { %19334 = vmatpush3.bf16.msra.mxu1 %v20885_v35  ;;  %v2003_v20 = vmul.f32 %v20102_v0, %v20086_v53 }
 0x8c8   :  { %19336 = vmatprep.subr.bf16.mxu1 %v20887_v45 }
 0x8c9   :  { %v20104_v25 = vpop.eup %20103  ;;  %18599 = vmatprep.mubr.msk.f32.mxu1 %vm187_vm2, %v2003_v20 }
 0x8ca   :  { %v20106_v51 = vpop.eup %20105  ;;  %18600 = vmatmul.mubr.msk.f32.gmra.mrb[40].mxu1 %vm187_vm2, %v2004_v9  ;;  %v2006_v44 = vmul.f32 %v20104_v25, %v20088_v59 }
 0x8cb   :  { %19338 = vmatpush3.bf16.msra.mxu1 %v20887_v45  ;;  %v2005_v34 = vmul.f32 %v20106_v51, %v20090_v63  ;;  %v1332_v45 = vld [vmem:[%s25143_s14 + $0x8] sm:$0xff] }
 0x8cc   :  { %v19343_v55 = vpack.c.bf16 %v1332_v45, %v1331_v47 }
 0x8cd   :  { %v20108_v27 = vpop.eup %20107  ;;  %18610 = vmatprep.mubr.msk.f32.mxu1 %vm187_vm2, %v2005_v34 }
 0x8ce   :  { %v20110_v30 = vpop.eup %20109  ;;  %18611 = vmatmul.mubr.msk.f32.vlgmr.msra.gmra.mrb[42].mxu1 %vm187_vm2, %v2006_v44  ;;  %v2008_v31 = vmul.f32 %v20108_v27, %v20092_v5  ;;  %19344 = vmatprep.subr.bf16.mxu0 %v19343_v55 }
 0x8cf   :  { %v2007_v35 = vmul.f32 %v20110_v30, %v20094_v7 }
 0x8d1   :  { %18613 = vmatprep.mubr.msk.f32.mxu1 %vm187_vm2, %v2007_v35 }
 0x8d2   :  { %18614 = vmatmul.mubr.msk.f32.gmra.mrb[44].mxu1 %vm187_vm2, %v2008_v31 }
 0x999   :  { %v18598_v52 = vpop.f32.mrb[38].mxu1 }
 0x99a   :  { %v2087_v53 = vpop.f32.mrb[39].mxu1 }
 0x99b   :  { %18620 = vmatprep.mubr.msk.f32.mxu0 %vm814_vm4, %v2087_v53 }
 0x99c   :  { %18621 = vmatmul.mubr.msk.f32.vlgmr.msra.gmra.mrb[40].mxu0 %vm814_vm4, %v18598_v52 }
 0x99d   :  { %v18601_v56 = vpop.f32.mrb[40].mxu1  ;;  %19346 = vmatpush3.bf16.msra.mxu0 %v19343_v55 }
 0x99e   :  { %v2097_v57 = vpop.f32.mrb[41].mxu1 }
 0x99f   :  { %18623 = vmatprep.mubr.msk.f32.mxu0 %vm814_vm4, %v2097_v57 }
 0x9a0   :  { %18624 = vmatmul.mubr.msk.f32.gmra.mrb[42].mxu0 %vm814_vm4, %v18601_v56 }
 0x9a1   :  { %v18612_v59 = vpop.f32.mrb[42].mxu1 }
 0x9a2   :  { %v2184_v63 = vpop.f32.mrb[43].mxu1 }
 0x9a3   :  { %18626 = vmatprep.mubr.msk.f32.mxu0 %vm814_vm4, %v2184_v63 }
 0x9a4   :  { %18627 = vmatmul.mubr.msk.f32.gmra.mrb[44].mxu0 %vm814_vm4, %v18612_v59 }
 0x9a5   :  { %v18615_v2 = vpop.f32.mrb[44].mxu1 }
 0x9a6   :  { %v2194_v4 = vpop.f32.mrb[45].mxu1 }
 0x9a7   :  { %18629 = vmatprep.mubr.msk.f32.mxu0 %vm814_vm4, %v2194_v4 }
 0x9a8   :  { %18630 = vmatmul.mubr.msk.f32.gmra.mrb[46].mxu0 %vm814_vm4, %v18615_v2 }
 0x9a9   :  { %18636 = vmatprep.mubr.msk.f32.mxu0 %vm814_vm4, %v20948_v49 }
 0x9ac   :  { %18637 = vmatmul.mubr.msk.f32.vlgmr.msra.gmra.mrb[40].mxu0 %vm814_vm4, %v20946_v62  ;;  %v15399_v62 = vld [vmem:[%s25144_s15] ss:$0 sm:$0xff] }
 0x9ad   :  { %18639 = vmatprep.mubr.msk.f32.mxu0 %vm814_vm4, %v20952_v37 }
 0x9b0   :  { %18640 = vmatmul.mubr.msk.f32.gmra.mrb[42].mxu0 %vm814_vm4, %v20950_v33 }
 0x9b1   :  { %18642 = vmatprep.mubr.msk.f32.mxu0 %vm814_vm4, %v20956_v41 }
 0x9b4   :  { %18643 = vmatmul.mubr.msk.f32.gmra.mrb[44].mxu0 %vm814_vm4, %v20954_v39 }
 0x9b5   :  { %18645 = vmatprep.mubr.msk.f32.mxu0 %vm814_vm4, %v20960_v48 }
 0x9b8   :  { %18646 = vmatmul.mubr.msk.f32.gmra.mrb[46].mxu0 %vm814_vm4, %v20958_v46 }
 0xa7f   :  { %v18638_v49 = vpop.f32.mrb[40].mxu0 }
 0xa80   :  { %v2472_v37 = vadd.f32 %v18638_v49, %v15399_v62  ;;  %v2425_v5 = vpop.f32.mrb[41].mxu0 }
 0xa81   :  { %v2471_v33 = vadd.f32 %v15399_v62, %v2425_v5 }
 0xa82   :  { %v2480_v7 = vadd.f32 %v2472_v37, %v20630_v29 }
 0xa83   :  { %v18641_v41 = vpop.f32.mrb[42].mxu0  ;;  %v2479_v10 = vadd.f32 %v2471_v33, %v20628_v28 }
 0xa84   :  { %v2474_v39 = vadd.f32 %v18641_v41, %v15399_v62  ;;  %v2435_v11 = vpop.f32.mrb[43].mxu0  ;;  %v2492_v48 = vsel %vm187_vm2, %v2480_v7, 0.0 }
 0xa85   :  { %v2473_v13 = vadd.f32 %v15399_v62, %v2435_v11  ;;  %2493 = vadd.xlane.f32.xlu1 %v2492_v48  ;;  %v2489_v46 = vsel %vm187_vm2, %v2479_v10, 0.0 }
 0xa86   :  { %2490 = vadd.xlane.f32.xlu0 %v2489_v46  ;;  %v2482_v12 = vadd.f32 %v2474_v39, %v20650_v36 }
 0xa87   :  { %v18644_v16 = vpop.f32.mrb[44].mxu0  ;;  %v2481_v15 = vadd.f32 %v2473_v13, %v20635_v32 }
 0xa88   :  { %v2476_v17 = vadd.f32 %v18644_v16, %v15399_v62  ;;  %v2445_v18 = vpop.f32.mrb[45].mxu0  ;;  %v2498_v29 = vsel %vm187_vm2, %v2482_v12, 0.0 }
 0xa89   :  { %v2475_v19 = vadd.f32 %v15399_v62, %v2445_v18  ;;  %2499 = vadd.xlane.f32.xlu1 %v2498_v29  ;;  %v2495_v28 = vsel %vm187_vm2, %v2481_v15, 0.0  ;;  %v2626_v18 = vld [vmem:[%s25147_s18] sm:$0xff] }
 0xa8a   :  { %2496 = vadd.xlane.f32.xlu0 %v2495_v28  ;;  %v2484_v21 = vadd.f32 %v2476_v17, %v20668_v40  ;;  %v2635_v17 = vld [vmem:[%s25147_s18 + $0x48] sm:$0xff] }
 0xa8b   :  { %v18647_v50 = vpop.f32.mrb[46].mxu0  ;;  %v2483_v61 = vadd.f32 %v2475_v19, %v20657_v38  ;;  %v2634_v19 = vld [vmem:[%s25147_s18 + $0x40] sm:$0xff] }
 0xa8c   :  { %v2478_v60 = vadd.f32 %v18647_v50, %v15399_v62  ;;  %v2455_v23 = vpop.f32.mrb[47].mxu0  ;;  %v2504_v36 = vsel %vm187_vm2, %v2484_v21, 0.0  ;;  %v15403_v50 = vcombine.high %v2626_v18, %v2634_v19 }
 0xa8d   :  { %v2477_v58 = vadd.f32 %v15399_v62, %v2455_v23  ;;  %2505 = vadd.xlane.f32.xlu1 %v2504_v36  ;;  %v2501_v32 = vsel %vm187_vm2, %v2483_v61, 0.0  ;;  %v2642_v23 = vld [vmem:[%s25147_s18 + $0x80] sm:$0xff] }
 0xa8e   :  { %2502 = vadd.xlane.f32.xlu0 %v2501_v32  ;;  %v2486_v22 = vadd.f32 %v2478_v60, %v20683_v43  ;;  %2914 = vmatprep.subr.bf16.mxu1 %v15403_v50  ;;  %v2651_v60 = vld [vmem:[%s25147_s18 + $0xc8] sm:$0xff] }
 0xa8f   :  { %v2485_v24 = vadd.f32 %v2477_v58, %v20675_v42  ;;  %v2650_v58 = vld [vmem:[%s25147_s18 + $0xc0] sm:$0xff] }
 0xa90   :  { %v2510_v26 = vsel %vm187_vm2, %v2486_v22, 0.0 }
 0xa91   :  { %2511 = vadd.xlane.f32.xlu1 %v2510_v26  ;;  %v2507_v40 = vsel %vm187_vm2, %v2485_v24, 0.0  ;;  %v20359_v26 = vmov 0  }
 0xa92   :  { %2508 = vadd.xlane.f32.xlu0 %v2507_v40  ;;  %2946 = vmatprep.mubr.bf16.mxu1 %v20359_v26  ;;  %v21157_v40 = vld [vmem:[%s25147_s18 + $0x10] sm:$0xff] }
 0xa93   :  { %3019 = vmatprep.mubr.bf16.mxu0 %v20359_v26 }
 0xb12   :  { %v2494_v38 = vpop.xlane.xlu1 %2493 }
 0xb13   :  { %v2515_v0 = vmul.f32 0.03125, %v2494_v38  ;;  %v2491_v20 = vpop.xlane.xlu0 %2490  ;;  %v21162_v38 = vld [vmem:[%s25147_s18 + $0x50] sm:$0xff] }
 0xb14   :  { %v2514_v9 = vmul.f32 0.03125, %v2491_v20  ;;  %v15406_v20 = vcombine.low %v21157_v40, %v21162_v38 }
 0xb15   :  { %v21088_v25 = vsub.f32 %v2480_v7, %v2515_v0  ;;  %v21167_v0 = vld [vmem:[%s25147_s18 + $0x18] sm:$0xff] }
 0xb16   :  { %v21090_v51 = vsub.f32 %v2479_v10, %v2514_v9  ;;  %v2500_v34 = vpop.xlane.xlu1 %2499  ;;  %v15407_v9 = vcombine.high %v21157_v40, %v21162_v38 }
 0xb17   :  { %v2517_v44 = vmul.f32 0.03125, %v2500_v34  ;;  %v2497_v27 = vpop.xlane.xlu0 %2496  ;;  %v2531_v42 = vmul.f32 %v21088_v25, %v21088_v25  ;;  %v21176_v34 = vld [vmem:[%s25147_s18 + $0x58] sm:$0xff] }
 0xb18   :  { %v2516_v43 = vmul.f32 0.03125, %v2497_v27  ;;  %v2530_v30 = vmul.f32 %v21090_v51, %v21090_v51  ;;  %v15409_v27 = vcombine.high %v21167_v0, %v21176_v34 }
 0xb19   :  { %v21096_v35 = vsub.f32 %v2482_v12, %v2517_v44  ;;  %v2541_v31 = vsel %vm187_vm2, %v2531_v42, 0.0  ;;  %v15408_v44 = vcombine.low %v21167_v0, %v21176_v34 }
 0xb1a   :  { %v21099_v47 = vsub.f32 %v2481_v15, %v2516_v43  ;;  %v2506_v45 = vpop.xlane.xlu1 %2505  ;;  %2542 = vadd.xlane.f32.xlu1 %v2541_v31  ;;  %v2538_v55 = vsel %vm187_vm2, %v2530_v30, 0.0  ;;  %v2627_v15 = vld [vmem:[%s25147_s18 + $0x8] sm:$0xff] }
 0xb1b   :  { %v2519_v52 = vmul.f32 0.03125, %v2506_v45  ;;  %v2503_v53 = vpop.xlane.xlu0 %2502  ;;  %2539 = vadd.xlane.f32.xlu0 %v2538_v55  ;;  %v2533_v56 = vmul.f32 %v21096_v35, %v21096_v35  ;;  %v15405_v29 = vcombine.high %v2627_v15, %v2635_v17  ;;  %v15404_v28 = vcombine.low %v2627_v15, %v2635_v17  ;;  %v21191_v17 = vld [vmem:[%s25146_s17] ss:$0 sm:$0xff] }
 0xb1c   :  { %v2518_v57 = vmul.f32 0.03125, %v2503_v53  ;;  %v2532_v59 = vmul.f32 %v21099_v47, %v21099_v47 }
 0xb1d   :  { %v21106_v63 = vsub.f32 %v2484_v21, %v2519_v52  ;;  %v2547_v2 = vsel %vm187_vm2, %v2533_v56, 0.0  ;;  %v15402_v21 = vcombine.low %v2626_v18, %v2634_v19  ;;  %2987 = vmatprep.subr.bf16.mxu0 %v15405_v29 }
 0xb1e   :  { %v21109_v4 = vsub.f32 %v2483_v61, %v2518_v57  ;;  %2548 = vadd.xlane.f32.xlu1 %v2547_v2  ;;  %v2512_v62 = vpop.xlane.xlu1 %2511  ;;  %v2544_v49 = vsel %vm187_vm2, %v2532_v59, 0.0  ;;  %2988 = vmatpush1.bf16.msra.mxu0 %v15404_v28  ;;  %v2643_v61 = vld [vmem:[%s25147_s18 + $0x88] sm:$0xff] }
 0xb1f   :  { %v2521_v37 = vmul.f32 0.03125, %v2512_v62  ;;  %2545 = vadd.xlane.f32.xlu0 %v2544_v49  ;;  %v2509_v5 = vpop.xlane.xlu0 %2508  ;;  %v2535_v33 = vmul.f32 %v21106_v63, %v21106_v63  ;;  %2915 = vmatpush1.bf16.msra.mxu1 %v15402_v21  ;;  %v15421_v36 = vcombine.high %v2643_v61, %v2651_v60  ;;  %v15420_v32 = vcombine.low %v2643_v61, %v2651_v60 }
 0xb20   :  { %v2520_v7 = vmul.f32 0.03125, %v2509_v5  ;;  %v2534_v41 = vmul.f32 %v21109_v4, %v21109_v4 }
 0xb21   :  { %v21116_v10 = vsub.f32 %v2486_v22, %v2521_v37  ;;  %v2553_v39 = vsel %vm187_vm2, %v2535_v33, 0.0  ;;  %v15418_v22 = vcombine.low %v2642_v23, %v2650_v58  ;;  %2989 = vmatprep.subr.bf16.mxu0 %v15421_v36 }
 0xb22   :  { %v21119_v11 = vsub.f32 %v2485_v24, %v2520_v7  ;;  %2554 = vadd.xlane.f32.xlu1 %v2553_v39  ;;  %v2550_v48 = vsel %vm187_vm2, %v2534_v41, 0.0  ;;  %v15419_v24 = vcombine.high %v2642_v23, %v2650_v58  ;;  %2990 = vmatpush1.bf16.msra.mxu0 %v15420_v32  ;;  %v2644_v23 = vld [vmem:[%s25147_s18 + $0x90] sm:$0xff]  ;;  %v2645_v32 = vld [vmem:[%s25147_s18 + $0x98] sm:$0xff] }
 0xb23   :  { %2551 = vadd.xlane.f32.xlu0 %v2550_v48  ;;  %v2537_v13 = vmul.f32 %v21116_v10, %v21116_v10  ;;  %3133 = vmatprep.subr.bf16.mxu0 %v15409_v27  ;;  %v2652_v58 = vld [vmem:[%s25147_s18 + $0xd0] sm:$0xff] }
 0xb24   :  { %v2536_v46 = vmul.f32 %v21119_v11, %v21119_v11  ;;  %2916 = vmatprep.subr.bf16.mxu1 %v15419_v24 }
 0xb25   :  { %v2559_v12 = vsel %vm187_vm2, %v2537_v13, 0.0  ;;  %2917 = vmatpush1.bf16.msra.mxu1 %v15418_v22 }
 0xb26   :  { %2560 = vadd.xlane.f32.xlu1 %v2559_v12  ;;  %v2556_v16 = vsel %vm187_vm2, %v2536_v46, 0.0  ;;  %3060 = vmatprep.subr.bf16.mxu1 %v15407_v9  ;;  %v21185_v12 = vld [vmem:[%s25145_s16] ss:$0 sm:$0xff] }
 0xb27   :  { %2557 = vadd.xlane.f32.xlu0 %v2556_v16 }
 0xba7   :  { %v2543_v42 = vpop.xlane.xlu1 %2542 }
 0xba8   :  { %v2563_v43 = vmul.f32 0.03125, %v2543_v42  ;;  %v2540_v30 = vpop.xlane.xlu0 %2539  ;;  %v21230_v42 = vld [vmem:[%s25147_s18 + $0x60] sm:$0xff] }
 0xba9   :  { %v2562_v31 = vmul.f32 0.03125, %v2540_v30  ;;  %v21240_v30 = vld [vmem:[%s25147_s18 + $0x68] sm:$0xff] }
 0xbaa   :  { %v2571_v45 = vadd.f32 1e-05, %v2563_v43  ;;  %v21235_v43 = vld [vmem:[%s25147_s18 + $0x28] sm:$0xff] }
 0xbab   :  { %v2570_v55 = vadd.f32 1e-05, %v2562_v31  ;;  %v2549_v52 = vpop.xlane.xlu1 %2548 }
 0xbac   :  { %20111 = vrsqrt.f32 %v2571_v45  ;;  %v2565_v53 = vmul.f32 0.03125, %v2549_v52  ;;  %v2546_v56 = vpop.xlane.xlu0 %2545  ;;  %v15423_v45 = vcombine.high %v2644_v23, %v2652_v58  ;;  %v15422_v52 = vcombine.low %v2644_v23, %v2652_v58  ;;  %v2648_v23 = vld [vmem:[%s25147_s18 + $0xb0] sm:$0xff]  ;;  %v2649_v58 = vld [vmem:[%s25147_s18 + $0xb8] sm:$0xff] }
 0xbad   :  { %20113 = vrsqrt.f32 %v2570_v55  ;;  %v2564_v57 = vmul.f32 0.03125, %v2546_v56 }
 0xbae   :  { %v2573_v59 = vadd.f32 1e-05, %v2565_v53 }
 0xbaf   :  { %v2572_v2 = vadd.f32 1e-05, %v2564_v57  ;;  %v2555_v62 = vpop.xlane.xlu1 %2554 }
 0xbb0   :  { %20115 = vrsqrt.f32 %v2573_v59  ;;  %v2567_v49 = vmul.f32 0.03125, %v2555_v62  ;;  %v2552_v37 = vpop.xlane.xlu0 %2551  ;;  %v15413_v59 = vcombine.high %v21235_v43, %v21240_v30 }
 0xbb1   :  { %20117 = vrsqrt.f32 %v2572_v2  ;;  %v2566_v5 = vmul.f32 0.03125, %v2552_v37 }
 0xbb2   :  { %v2575_v33 = vadd.f32 1e-05, %v2567_v49 }
 0xbb3   :  { %v2574_v7 = vadd.f32 1e-05, %v2566_v5  ;;  %v2561_v41 = vpop.xlane.xlu1 %2560 }
 0xbb4   :  { %20119 = vrsqrt.f32 %v2575_v33  ;;  %v2569_v39 = vmul.f32 0.03125, %v2561_v41  ;;  %v2558_v48 = vpop.xlane.xlu0 %2557 }
 0xbb5   :  { %20121 = vrsqrt.f32 %v2574_v7  ;;  %v2568_v13 = vmul.f32 0.03125, %v2558_v48  ;;  %v2654_v48 = vld [vmem:[%s25147_s18 + $0xe0] sm:$0xff] }
 0xbb6   :  { %v20112_v46 = vpop.eup %20111  ;;  %v2577_v29 = vadd.f32 1e-05, %v2569_v39  ;;  %v2646_v39 = vld [vmem:[%s25147_s18 + $0xa0] sm:$0xff] }
 0xbb7   :  { %v20114_v16 = vpop.eup %20113  ;;  %v2587_v15 = vmul.f32 %v20112_v46, %v21088_v25  ;;  %v2576_v28 = vadd.f32 1e-05, %v2568_v13  ;;  %v2647_v13 = vld [vmem:[%s25147_s18 + $0xa8] sm:$0xff] }
 0xbb8   :  { %v2586_v18 = vmul.f32 %v20114_v16, %v21090_v51  ;;  %20123 = vrsqrt.f32 %v2577_v29  ;;  %v2655_v46 = vld [vmem:[%s25147_s18 + $0xe8] sm:$0xff]  ;;  %v15412_v16 = vcombine.low %v21235_v43, %v21240_v30  ;;  %v2640_v29 = vld [vmem:[%s25147_s18 + $0x70] sm:$0xff]  ;;  %v19659_v43 = vld [vmem:[%s25149_s20 + $0x40] sm:$0xff]  }
 0xbb9   :  { %v2601_v19 = vmul.f32 %v21185_v12, %v2587_v15  ;;  %20125 = vrsqrt.f32 %v2576_v28  ;;  %v2632_v15 = vld [vmem:[%s25147_s18 + $0x30] sm:$0xff]  ;;  %v2641_v28 = vld [vmem:[%s25147_s18 + $0x78] sm:$0xff]  ;;  %v19660_v30 = vld [vmem:[%s25149_s20 + $0xc0] sm:$0xff]  }
 0xbba   :  { %v20116_v21 = vpop.eup %20115  ;;  %v2600_v50 = vmul.f32 %v21185_v12, %v2586_v18  ;;  %v15429_v18 = vcombine.high %v2647_v13, %v2655_v46 }
 0xbbb   :  { %v20118_v61 = vpop.eup %20117  ;;  %v21197_v60 = vadd.f32 %v21191_v17, %v2601_v19  ;;  %v2589_v25 = vmul.f32 %v20116_v21, %v21096_v35  ;;  %v2653_v35 = vld [vmem:[%s25147_s18 + $0xd8] sm:$0xff]  ;;  %v15426_v21 = vcombine.low %v2646_v39, %v2654_v48 }
 0xbbc   :  { %v21204_v36 = vadd.f32 %v21191_v17, %v2600_v50  ;;  %v2588_v51 = vmul.f32 %v20118_v61, %v21099_v47  ;;  %v21220_v47 = vld [vmem:[%s25147_s18 + $0x20] sm:$0xff]  ;;  %v15425_v55 = vcombine.high %v2645_v32, %v2653_v35  ;;  %v15424_v53 = vcombine.low %v2645_v32, %v2653_v35  ;;  %v2633_v19 = vld [vmem:[%s25147_s18 + $0x38] sm:$0xff] }
 0xbbd   :  { %v2603_v22 = vmul.f32 %v21185_v12, %v2589_v25  ;;  %v15411_v57 = vcombine.high %v21220_v47, %v21230_v42  ;;  %v15428_v50 = vcombine.low %v2647_v13, %v2655_v46  ;;  %v15415_v61 = vcombine.high %v2632_v15, %v2640_v29  ;;  %v2657_v32 = vld [vmem:[%s25147_s18 + $0xf8] sm:$0xff]  ;;  %v19682_v13 = vld [vmem:[%s25149_s20 + $0xa8] sm:$0xff]   ;;  %v19684_v46 = vld [vmem:[%s25149_s20 + $0xf0] sm:$0xff]  }
 0xbbe   :  { %v20120_v24 = vpop.eup %20119  ;;  %v21224_v9 = vpack.c.bf16 %v21197_v60, %v21204_v36  ;;  %v2602_v27 = vmul.f32 %v21185_v12, %v2588_v51  ;;  %v15417_v25 = vcombine.high %v2633_v19, %v2641_v28  ;;  %v2656_v51 = vld [vmem:[%s25147_s18 + $0xf0] sm:$0xff]  ;;  %v15414_v35 = vcombine.low %v2632_v15, %v2640_v29  ;;  %v19687_v15 = vld [vmem:[%s25149_s20 + $0x78] sm:$0xff]  }
 0xbbf   :  { %v20122_v31 = vpop.eup %20121  ;;  %v21247_v56 = vadd.f32 %v21191_v17, %v2603_v22  ;;  %v2591_v62 = vmul.f32 %v20120_v24, %v21106_v63  ;;  %v15416_v22 = vcombine.low %v2633_v19, %v2641_v28  ;;  %v15433_v24 = vcombine.high %v2649_v58, %v2657_v32  ;;  %v19690_v29 = vld [vmem:[%s25149_s20 + $0xb8] sm:$0xff]   ;;  %v19691_v19 = vld [vmem:[%s25149_s20 + $0x140] sm:$0xff]  }
 0xbc0   :  { %15434 = vmatmul.mubr.msk.bf16.vlgmr.msra.gmra.mrb[48].mxu1 %vm187_vm2, %v21224_v9  ;;  %15438 = vmatmul.mubr.msk.bf16.vlgmr.msra.gmra.mrb[48].mxu0 %vm187_vm2, %v21224_v9  ;;  %v21260_v2 = vadd.f32 %v21191_v17, %v2602_v27  ;;  %v2590_v49 = vmul.f32 %v20122_v31, %v21109_v4  ;;  %v15430_v27 = vcombine.low %v2648_v23, %v2656_v51  ;;  %v19661_v31 = vld [vmem:[%s25149_s20] sm:$0xff]   ;;  %v21527_v28 = vsub.s32 2, %v20603_v1 }
 0xbc1   :  { %3061 = vmatpush1.bf16.msra.mxu1 %v15406_v20  ;;  %3134 = vmatpush1.bf16.msra.mxu0 %v15408_v44  ;;  %v2605_v0 = vmul.f32 %v21185_v12, %v2591_v62  ;;  %v19669_v62 = vld [vmem:[%s25149_s20 + $0x10] sm:$0xff]  }
 0xbc2   :  { %2956 = vmatprep.mubr.bf16.mxu1 %v20359_v26  ;;  %3029 = vmatprep.mubr.bf16.mxu0 %v20359_v26  ;;  %v20124_v40 = vpop.eup %20123  ;;  %v21268_v38 = vpack.c.bf16 %v21247_v56, %v21260_v2  ;;  %v2604_v20 = vmul.f32 %v21185_v12, %v2590_v49  ;;  %v19670_v49 = vld [vmem:[%s25149_s20 + $0x90] sm:$0xff]  }
 0xbc3   :  { %3062 = vmatprep.subr.bf16.mxu1 %v15423_v45  ;;  %3135 = vmatprep.subr.bf16.mxu0 %v15425_v55  ;;  %v20126_v63 = vpop.eup %20125  ;;  %v21279_v4 = vadd.f32 %v21191_v17, %v2605_v0  ;;  %v2593_v44 = vmul.f32 %v20124_v40, %v21116_v10  ;;  %v19662_v45 = vld [vmem:[%s25149_s20 + $0x80] sm:$0xff]   ;;  %v19663_v55 = vld [vmem:[%s25149_s20 + $0x48] sm:$0xff]   ;;  %v19671_v40 = vld [vmem:[%s25149_s20 + $0x58] sm:$0xff]  }
 0xbc4   :  { %v21282_v34 = vadd.f32 %v21191_v17, %v2604_v20  ;;  %v2592_v37 = vmul.f32 %v20126_v63, %v21119_v11  ;;  %v19672_v0 = vld [vmem:[%s25149_s20 + $0xd8] sm:$0xff]  }
 0xbc5   :  { %3063 = vmatpush1.bf16.msra.mxu1 %v15422_v52  ;;  %3136 = vmatpush1.bf16.msra.mxu0 %v15424_v53  ;;  %v2607_v33 = vmul.f32 %v21185_v12, %v2593_v44  ;;  %v19664_v52 = vld [vmem:[%s25149_s20 + $0xc8] sm:$0xff]   ;;  %v19673_v20 = vld [vmem:[%s25149_s20 + $0x18] sm:$0xff]   ;;  %v19676_v44 = vld [vmem:[%s25149_s20 + $0xe0] sm:$0xff]  }
 0xbc6   :  { %3206 = vmatprep.subr.bf16.mxu1 %v15411_v57  ;;  %3279 = vmatprep.subr.bf16.mxu0 %v15413_v59  ;;  %v21288_v5 = vpack.c.bf16 %v21279_v4, %v21282_v34  ;;  %v2606_v7 = vmul.f32 %v21185_v12, %v2592_v37  ;;  %v15410_v12 = vcombine.low %v21220_v47, %v21230_v42  ;;  %v19665_v53 = vld [vmem:[%s25149_s20 + $0x8] sm:$0xff]   ;;  %v19668_v59 = vld [vmem:[%s25149_s20 + $0xd0] sm:$0xff]   ;;  %v19674_v63 = vld [vmem:[%s25149_s20 + $0x98] sm:$0xff]  }
 0xbc7   :  { %v21299_v10 = vadd.f32 %v21191_v17, %v2607_v33  ;;  %v15431_v47 = vcombine.high %v2648_v23, %v2656_v51  ;;  %v15432_v42 = vcombine.low %v2649_v58, %v2657_v32  ;;  %v19666_v57 = vld [vmem:[%s25149_s20 + $0x88] sm:$0xff]   ;;  %v19677_v37 = vld [vmem:[%s25149_s20 + $0x20] sm:$0xff]  }
 0xbc8   :  { %15435 = vmatmul.mubr.msk.bf16.gmra.mrb[52].mxu1 %vm187_vm2, %v21268_v38  ;;  %15439 = vmatmul.mubr.msk.bf16.gmra.mrb[52].mxu0 %vm187_vm2, %v21268_v38  ;;  %v21302_v11 = vadd.f32 %v21191_v17, %v2606_v7  ;;  %v15427_v17 = vcombine.high %v2646_v39, %v2654_v48  ;;  %v19678_v33 = vld [vmem:[%s25149_s20 + $0xa0] sm:$0xff]   ;;  %v19679_v7 = vld [vmem:[%s25149_s20 + $0x68] sm:$0xff]  }
 0xbc9   :  { %2966 = vmatprep.mubr.bf16.mxu1 %v20359_v26  ;;  %3039 = vmatprep.mubr.bf16.mxu0 %v20359_v26  ;;  %v19680_v39 = vld [vmem:[%s25149_s20 + $0xe8] sm:$0xff]  }
 0xbca   :  { %v21306_v41 = vpack.c.bf16 %v21299_v10, %v21302_v11  ;;  %v19681_v48 = vld [vmem:[%s25149_s20 + $0x28] sm:$0xff]  }
 0xbd0   :  { %15436 = vmatmul.mubr.msk.bf16.gmra.mrb[56].mxu1 %vm187_vm2, %v21288_v5  ;;  %15440 = vmatmul.mubr.msk.bf16.gmra.mrb[56].mxu0 %vm187_vm2, %v21288_v5 }
 0xbd1   :  { %2976 = vmatprep.mubr.bf16.mxu1 %v20359_v26  ;;  %3049 = vmatprep.mubr.bf16.mxu0 %v20359_v26 }
 0xbd8   :  { %15437 = vmatmul.mubr.msk.bf16.gmra.mrb[60].mxu1 %vm187_vm2, %v21306_v41  ;;  %15441 = vmatmul.mubr.msk.bf16.gmra.mrb[60].mxu0 %vm187_vm2, %v21306_v41 }
 0xbd9   :  { %3092 = vmatprep.mubr.bf16.mxu1 %v20359_v26  ;;  %3165 = vmatprep.mubr.bf16.mxu0 %v20359_v26 }
 0xbe0   :  { %15442 = vmatmul.mubr.msk.bf16.vlgmr.msra.gmra.mrb[64].mxu1 %vm187_vm2, %v21224_v9  ;;  %15446 = vmatmul.mubr.msk.bf16.vlgmr.msra.gmra.mrb[64].mxu0 %vm187_vm2, %v21224_v9 }
 0xbe1   :  { %3207 = vmatpush1.bf16.msra.mxu1 %v15410_v12  ;;  %3280 = vmatpush1.bf16.msra.mxu0 %v15412_v16  ;;  %v19685_v12 = vld [vmem:[%s25149_s20 + $0x30] sm:$0xff]  }
 0xbe2   :  { %3102 = vmatprep.mubr.bf16.mxu1 %v20359_v26  ;;  %3175 = vmatprep.mubr.bf16.mxu0 %v20359_v26  ;;  %v19686_v16 = vld [vmem:[%s25149_s20 + $0xb0] sm:$0xff]  }
 0xbe3   :  { %3208 = vmatprep.subr.bf16.mxu1 %v15427_v17  ;;  %3281 = vmatprep.subr.bf16.mxu0 %v15429_v18  ;;  %v19688_v17 = vld [vmem:[%s25149_s20 + $0xf8] sm:$0xff]  }
 0xbe4   :  { %v19689_v18 = vld [vmem:[%s25149_s20 + $0x38] sm:$0xff]  }
 0xbe5   :  { %3209 = vmatpush1.bf16.msra.mxu1 %v15426_v21  ;;  %3282 = vmatpush1.bf16.msra.mxu0 %v15428_v50  ;;  %v21532_v21 = vld [vmem:[%s25148_s19] sm:$0xff]  ;;  %v21535_v50 = vsub.s32 1, %v20603_v1 }
 0xbe6   :  { %3352 = vmatprep.subr.bf16.mxu1 %v15415_v61  ;;  %3425 = vmatprep.subr.bf16.mxu0 %v15417_v25  ;;  %v21538_v61 = vsub.s32 3, %v20603_v1  ;;  %v21542_v25 = vrot.slane %v21532_v21, %v20608_v14  ;;  %v21546_v23 = vrot.slane %v21532_v21, %v21527_v28 }
 0xbe7   :  { %v21550_v51 = vrot.slane %v21532_v21, %v21535_v50 }
 0xbe8   :  { %15443 = vmatmul.mubr.msk.bf16.gmra.mrb[68].mxu1 %vm187_vm2, %v21268_v38  ;;  %15447 = vmatmul.mubr.msk.bf16.gmra.mrb[68].mxu0 %vm187_vm2, %v21268_v38  ;;  %v21554_v58 = vrot.slane %v21532_v21, %v21538_v61 }
 0xbe9   :  { %3112 = vmatprep.mubr.bf16.mxu1 %v20359_v26  ;;  %3185 = vmatprep.mubr.bf16.mxu0 %v20359_v26 }
 0xbf0   :  { %15444 = vmatmul.mubr.msk.bf16.gmra.mrb[72].mxu1 %vm187_vm2, %v21288_v5  ;;  %15448 = vmatmul.mubr.msk.bf16.gmra.mrb[72].mxu0 %vm187_vm2, %v21288_v5 }
 0xbf1   :  { %3122 = vmatprep.mubr.bf16.mxu1 %v20359_v26  ;;  %3195 = vmatprep.mubr.bf16.mxu0 %v20359_v26 }
 0xbf8   :  { %15445 = vmatmul.mubr.msk.bf16.gmra.mrb[76].mxu1 %vm187_vm2, %v21306_v41  ;;  %15449 = vmatmul.mubr.msk.bf16.gmra.mrb[76].mxu0 %vm187_vm2, %v21306_v41 }
 0xbf9   :  { %3238 = vmatprep.mubr.bf16.mxu1 %v20359_v26  ;;  %3311 = vmatprep.mubr.bf16.mxu0 %v20359_v26 }
 0xc00   :  { %15450 = vmatmul.mubr.msk.bf16.vlgmr.msra.gmra.mrb[80].mxu1 %vm187_vm2, %v21224_v9  ;;  %15454 = vmatmul.mubr.msk.bf16.vlgmr.msra.gmra.mrb[80].mxu0 %vm187_vm2, %v21224_v9 }
 0xc01   :  { %3353 = vmatpush1.bf16.msra.mxu1 %v15414_v35  ;;  %3426 = vmatpush1.bf16.msra.mxu0 %v15416_v22 }
 0xc02   :  { %3248 = vmatprep.mubr.bf16.mxu1 %v20359_v26  ;;  %3321 = vmatprep.mubr.bf16.mxu0 %v20359_v26 }
 0xc03   :  { %3354 = vmatprep.subr.bf16.mxu1 %v15431_v47  ;;  %3427 = vmatprep.subr.bf16.mxu0 %v15433_v24 }
 0xc05   :  { %3355 = vmatpush1.bf16.msra.mxu1 %v15430_v27  ;;  %3428 = vmatpush1.bf16.msra.mxu0 %v15432_v42 }
 0xc06   :  { %17066 = vmatprep.subr.bf16.mxu1 %v19659_v43  ;;  %17106 = vmatprep.subr.bf16.mxu0 %v19660_v30 }
 0xc08   :  { %15451 = vmatmul.mubr.msk.bf16.gmra.mrb[84].mxu1 %vm187_vm2, %v21268_v38  ;;  %15455 = vmatmul.mubr.msk.bf16.gmra.mrb[84].mxu0 %vm187_vm2, %v21268_v38 }
 0xc09   :  { %3258 = vmatprep.mubr.bf16.mxu1 %v20359_v26  ;;  %3331 = vmatprep.mubr.bf16.mxu0 %v20359_v26 }
 0xc10   :  { %15452 = vmatmul.mubr.msk.bf16.gmra.mrb[88].mxu1 %vm187_vm2, %v21288_v5  ;;  %15456 = vmatmul.mubr.msk.bf16.gmra.mrb[88].mxu0 %vm187_vm2, %v21288_v5 }
 0xc11   :  { %3268 = vmatprep.mubr.bf16.mxu1 %v20359_v26  ;;  %3341 = vmatprep.mubr.bf16.mxu0 %v20359_v26 }
 0xc18   :  { %15453 = vmatmul.mubr.msk.bf16.gmra.mrb[92].mxu1 %vm187_vm2, %v21306_v41  ;;  %15457 = vmatmul.mubr.msk.bf16.gmra.mrb[92].mxu0 %vm187_vm2, %v21306_v41 }
 0xc19   :  { %3384 = vmatprep.mubr.bf16.mxu1 %v20359_v26  ;;  %3457 = vmatprep.mubr.bf16.mxu0 %v20359_v26 }
 0xc20   :  { %15458 = vmatmul.mubr.msk.bf16.vlgmr.msra.gmra.mrb[96].mxu1 %vm187_vm2, %v21224_v9  ;;  %15462 = vmatmul.mubr.msk.bf16.vlgmr.msra.gmra.mrb[96].mxu0 %vm187_vm2, %v21224_v9  ;;  %v19667_v9 = vld [vmem:[%s25149_s20 + $0x50] sm:$0xff]  }
 0xc21   :  { %3394 = vmatprep.mubr.bf16.mxu1 %v20359_v26  ;;  %3467 = vmatprep.mubr.bf16.mxu0 %v20359_v26 }
 0xc22   :  { %17067 = vmatpush3.bf16.msra.mxu1 %v19661_v31  ;;  %17107 = vmatpush3.bf16.msra.mxu0 %v19662_v45 }
 0xc23   :  { %17068 = vmatprep.subr.bf16.mxu1 %v19663_v55  ;;  %17108 = vmatprep.subr.bf16.mxu0 %v19664_v52 }
 0xc26   :  { %17069 = vmatpush3.bf16.msra.mxu1 %v19665_v53  ;;  %17109 = vmatpush3.bf16.msra.mxu0 %v19666_v57 }
 0xc27   :  { %17070 = vmatprep.subr.bf16.mxu1 %v19667_v9  ;;  %17110 = vmatprep.subr.bf16.mxu0 %v19668_v59 }
 0xc28   :  { %15459 = vmatmul.mubr.msk.bf16.gmra.mrb[100].mxu1 %vm187_vm2, %v21268_v38  ;;  %15463 = vmatmul.mubr.msk.bf16.gmra.mrb[100].mxu0 %vm187_vm2, %v21268_v38  ;;  %v19675_v38 = vld [vmem:[%s25149_s20 + $0x60] sm:$0xff]  }
 0xc29   :  { %3404 = vmatprep.mubr.bf16.mxu1 %v20359_v26  ;;  %3477 = vmatprep.mubr.bf16.mxu0 %v20359_v26 }
 0xc2a   :  { %17071 = vmatpush3.bf16.msra.mxu1 %v19669_v62  ;;  %17111 = vmatpush3.bf16.msra.mxu0 %v19670_v49 }
 0xc2b   :  { %17072 = vmatprep.subr.bf16.mxu1 %v19671_v40  ;;  %17112 = vmatprep.subr.bf16.mxu0 %v19672_v0 }
 0xc2e   :  { %17073 = vmatpush3.bf16.msra.mxu1 %v19673_v20  ;;  %17113 = vmatpush3.bf16.msra.mxu0 %v19674_v63 }
 0xc2f   :  { %17074 = vmatprep.subr.bf16.mxu1 %v19675_v38  ;;  %17114 = vmatprep.subr.bf16.mxu0 %v19676_v44 }
 0xc30   :  { %15460 = vmatmul.mubr.msk.bf16.gmra.mrb[104].mxu1 %vm187_vm2, %v21288_v5  ;;  %15464 = vmatmul.mubr.msk.bf16.gmra.mrb[104].mxu0 %vm187_vm2, %v21288_v5  ;;  %v19683_v5 = vld [vmem:[%s25149_s20 + $0x70] sm:$0xff]  }
 0xc31   :  { %3414 = vmatprep.mubr.bf16.mxu1 %v20359_v26  ;;  %3487 = vmatprep.mubr.bf16.mxu0 %v20359_v26 }
 0xc32   :  { %17075 = vmatpush3.bf16.msra.mxu1 %v19677_v37  ;;  %17115 = vmatpush3.bf16.msra.mxu0 %v19678_v33 }
 0xc33   :  { %17076 = vmatprep.subr.bf16.mxu1 %v19679_v7  ;;  %17116 = vmatprep.subr.bf16.mxu0 %v19680_v39 }
 0xc36   :  { %17077 = vmatpush3.bf16.msra.mxu1 %v19681_v48  ;;  %17117 = vmatpush3.bf16.msra.mxu0 %v19682_v13  ;;  %v19693_v13 = vld [vmem:[%s25149_s20 + $0x100] sm:$0xff]  }
 0xc37   :  { %17078 = vmatprep.subr.bf16.mxu1 %v19683_v5  ;;  %17118 = vmatprep.subr.bf16.mxu0 %v19684_v46  ;;  %v19694_v5 = vld [vmem:[%s25149_s20 + $0x180] sm:$0xff]  }
 0xc38   :  { %15461 = vmatmul.mubr.msk.bf16.gmra.mrb[108].mxu1 %vm187_vm2, %v21306_v41  ;;  %15465 = vmatmul.mubr.msk.bf16.gmra.mrb[108].mxu0 %vm187_vm2, %v21306_v41  ;;  %v19692_v41 = vld [vmem:[%s25149_s20 + $0x1c0] sm:$0xff]  }
 0xc3a   :  { %17079 = vmatpush3.bf16.msra.mxu1 %v19685_v12  ;;  %17119 = vmatpush3.bf16.msra.mxu0 %v19686_v16 }
 0xc3b   :  { %17080 = vmatprep.subr.bf16.mxu1 %v19687_v15  ;;  %17120 = vmatprep.subr.bf16.mxu0 %v19688_v17  ;;  %v19695_v17 = vld [vmem:[%s25149_s20 + $0x148] sm:$0xff]  }
 0xc3e   :  { %17081 = vmatpush3.bf16.msra.mxu1 %v19689_v18  ;;  %17121 = vmatpush3.bf16.msra.mxu0 %v19690_v29  ;;  %v19696_v18 = vld [vmem:[%s25149_s20 + $0x1c8] sm:$0xff]  }
 0xc3f   :  { %17146 = vmatprep.subr.bf16.mxu1 %v19691_v19  ;;  %17186 = vmatprep.subr.bf16.mxu0 %v19692_v41 }
 0xc93   :  { %v2948_v32 = vpop.f32.mrb[48].mxu1  ;;  %v3021_v35 = vpop.f32.mrb[48].mxu0 }
 0xc94   :  { %v2949_v22 = vadd.f32 %v2948_v32, %v21542_v25  ;;  %v3022_v47 = vadd.f32 %v3021_v35, %v21546_v23  ;;  %v2950_v24 = vpop.f32.mrb[49].mxu1  ;;  %v3023_v27 = vpop.f32.mrb[49].mxu0 }
 0xc95   :  { %v2951_v42 = vadd.f32 %v2950_v24, %v21550_v51  ;;  %v3024_v43 = vadd.f32 %v3023_v27, %v21554_v58  ;;  %v2952_v30 = vpop.f32.mrb[50].mxu1  ;;  %v3025_v31 = vpop.f32.mrb[50].mxu0 }
 0xc96   :  { %v2953_v45 = vadd.f32 %v2952_v30, %v21542_v25  ;;  %v3026_v55 = vadd.f32 %v3025_v31, %v21546_v23  ;;  %v2954_v52 = vpop.f32.mrb[51].mxu1  ;;  %v3027_v53 = vpop.f32.mrb[51].mxu0  ;;  %v3498_v59 = vmax.f32 %v2949_v22, 0.0  ;;  %v3500_v62 = vmax.f32 %v3022_v47, 0.0  ;;  %v19698_v30 = vld [vmem:[%s25149_s20 + $0x188] sm:$0xff]  }
 0xc97   :  { %v2955_v57 = vadd.f32 %v2954_v52, %v21550_v51  ;;  %v3028_v9 = vadd.f32 %v3027_v53, %v21554_v58  ;;  %v3499_v0 = vmax.f32 %v2951_v42, 0.0  ;;  %v3501_v20 = vmax.f32 %v3024_v43, 0.0  ;;  %v19697_v43 = vld [vmem:[%s25149_s20 + $0x108] sm:$0xff]   ;;  %v19699_v53 = vld [vmem:[%s25149_s20 + $0x150] sm:$0xff]  }
 0xc98   :  { %v3514_v49 = vmax.f32 %v2953_v45, 0.0  ;;  %v3516_v40 = vmax.f32 %v3026_v55, 0.0 }
 0xc99   :  { %v3515_v63 = vmax.f32 %v2955_v57, 0.0  ;;  %v3517_v38 = vmax.f32 %v3028_v9, 0.0  ;;  %v19700_v57 = vld [vmem:[%s25149_s20 + $0x1d0] sm:$0xff]  }
 0xc9a   :  { %v3626_v44 = vpack.c.bf16 %v3514_v49, %v3498_v59  ;;  %v3628_v37 = vpack.c.bf16 %v3516_v40, %v3500_v62 }
 0xc9b   :  { %v2958_v33 = vpop.f32.mrb[52].mxu1  ;;  %v3031_v7 = vpop.f32.mrb[52].mxu0  ;;  %v3627_v39 = vpack.c.bf16 %v3515_v63, %v3499_v0  ;;  %v3629_v48 = vpack.c.bf16 %v3517_v38, %v3501_v20 }
 0xc9c   :  { %v2959_v46 = vadd.f32 %v2958_v33, %v21542_v25  ;;  %v3032_v12 = vadd.f32 %v3031_v7, %v21546_v23  ;;  %v2960_v16 = vpop.f32.mrb[53].mxu1  ;;  %v3033_v15 = vpop.f32.mrb[53].mxu0  ;;  %v19702_v33 = vld [vmem:[%s25149_s20 + $0x190] sm:$0xff]  }
 0xc9d   :  { %v2961_v29 = vadd.f32 %v2960_v16, %v21550_v51  ;;  %v3034_v19 = vadd.f32 %v3033_v15, %v21554_v58  ;;  %v2962_v41 = vpop.f32.mrb[54].mxu1  ;;  %v3035_v32 = vpop.f32.mrb[54].mxu0  ;;  %4753 = vmatprep.mubr.bf16.mxu1 %v3627_v39  ;;  %4818 = vmatprep.mubr.bf16.mxu0 %v3629_v48 }
 0xc9e   :  { %v2963_v35 = vadd.f32 %v2962_v41, %v21542_v25  ;;  %v3036_v22 = vadd.f32 %v3035_v32, %v21546_v23  ;;  %v2964_v47 = vpop.f32.mrb[55].mxu1  ;;  %v3037_v24 = vpop.f32.mrb[55].mxu0  ;;  %4754 = vmatmul.mubr.bf16.vlgmr.msra.gmra.mrb[112].mxu1 %v3626_v44  ;;  %4819 = vmatmul.mubr.bf16.vlgmr.msra.gmra.mrb[112].mxu0 %v3628_v37  ;;  %v3530_v31 = vmax.f32 %v2959_v46, 0.0  ;;  %v3532_v45 = vmax.f32 %v3032_v12, 0.0  ;;  %v19701_v37 = vld [vmem:[%s25149_s20 + $0x110] sm:$0xff]   ;;  %v19704_v46 = vld [vmem:[%s25149_s20 + $0x1d8] sm:$0xff]  }
 0xc9f   :  { %v2965_v27 = vadd.f32 %v2964_v47, %v21550_v51  ;;  %v3038_v42 = vadd.f32 %v3037_v24, %v21554_v58  ;;  %17147 = vmatpush3.bf16.msra.mxu1 %v19693_v13  ;;  %17187 = vmatpush3.bf16.msra.mxu0 %v19694_v5  ;;  %v3531_v9 = vmax.f32 %v2961_v29, 0.0  ;;  %v3533_v59 = vmax.f32 %v3034_v19, 0.0  ;;  %v19703_v5 = vld [vmem:[%s25149_s20 + $0x158] sm:$0xff]  }
 0xca0   :  { %v3546_v55 = vmax.f32 %v2963_v35, 0.0  ;;  %v3548_v52 = vmax.f32 %v3036_v22, 0.0  ;;  %17148 = vmatprep.subr.bf16.mxu1 %v19695_v17  ;;  %17188 = vmatprep.subr.bf16.mxu0 %v19696_v18  ;;  %v19705_v22 = vld [vmem:[%s25149_s20 + $0x118] sm:$0xff]   ;;  %v21623_v24 = vsub.s32 4, %v20603_v1 }
 0xca1   :  { %v3547_v62 = vmax.f32 %v2965_v27, 0.0  ;;  %v3549_v49 = vmax.f32 %v3038_v42, 0.0  ;;  %v19706_v47 = vld [vmem:[%s25149_s20 + $0x198] sm:$0xff]   ;;  %v21626_v27 = vsub.s32 6, %v20603_v1 }
 0xca2   :  { %v3642_v40 = vpack.c.bf16 %v3546_v55, %v3530_v31  ;;  %v3644_v0 = vpack.c.bf16 %v3548_v52, %v3532_v45  ;;  %v19707_v45 = vld [vmem:[%s25149_s20 + $0x160] sm:$0xff]  }
 0xca3   :  { %v2968_v20 = vpop.f32.mrb[56].mxu1  ;;  %v3041_v63 = vpop.f32.mrb[56].mxu0  ;;  %17149 = vmatpush3.bf16.msra.mxu1 %v19697_v43  ;;  %17189 = vmatpush3.bf16.msra.mxu0 %v19698_v30  ;;  %v3643_v38 = vpack.c.bf16 %v3547_v62, %v3531_v9  ;;  %v3645_v44 = vpack.c.bf16 %v3549_v49, %v3533_v59  ;;  %v19708_v55 = vld [vmem:[%s25149_s20 + $0x1e0] sm:$0xff]   ;;  %v21635_v49 = vsub.s32 5, %v20603_v1 }
 0xca4   :  { %v2969_v7 = vadd.f32 %v2968_v20, %v21542_v25  ;;  %v3042_v39 = vadd.f32 %v3041_v63, %v21546_v23  ;;  %v2970_v48 = vpop.f32.mrb[57].mxu1  ;;  %v3043_v13 = vpop.f32.mrb[57].mxu0  ;;  %17150 = vmatprep.subr.bf16.mxu1 %v19699_v53  ;;  %17190 = vmatprep.subr.bf16.mxu0 %v19700_v57 }
 0xca5   :  { %v2971_v12 = vadd.f32 %v2970_v48, %v21550_v51  ;;  %v3044_v16 = vadd.f32 %v3043_v13, %v21554_v58  ;;  %v2972_v15 = vpop.f32.mrb[58].mxu1  ;;  %v3045_v17 = vpop.f32.mrb[58].mxu0  ;;  %4761 = vmatprep.mubr.bf16.mxu1 %v3643_v38  ;;  %4826 = vmatprep.mubr.bf16.mxu0 %v3645_v44  ;;  %v19709_v38 = vld [vmem:[%s25149_s20 + $0x120] sm:$0xff]   ;;  %v19711_v13 = vld [vmem:[%s25149_s20 + $0x168] sm:$0xff]  }
 0xca6   :  { %v2973_v18 = vadd.f32 %v2972_v15, %v21542_v25  ;;  %v3046_v29 = vadd.f32 %v3045_v17, %v21546_v23  ;;  %v2974_v19 = vpop.f32.mrb[59].mxu1  ;;  %v3047_v41 = vpop.f32.mrb[59].mxu0  ;;  %4762 = vmatmul.mubr.bf16.gmra.mrb[116].mxu1 %v3642_v40  ;;  %4827 = vmatmul.mubr.bf16.gmra.mrb[116].mxu0 %v3644_v0  ;;  %v3562_v42 = vmax.f32 %v2969_v7, 0.0  ;;  %v3564_v43 = vmax.f32 %v3042_v39, 0.0  ;;  %v19710_v44 = vld [vmem:[%s25149_s20 + $0x1a0] sm:$0xff]  }
 0xca7   :  { %v2975_v32 = vadd.f32 %v2974_v19, %v21550_v51  ;;  %v3048_v35 = vadd.f32 %v3047_v41, %v21554_v58  ;;  %17151 = vmatpush3.bf16.msra.mxu1 %v19701_v37  ;;  %17191 = vmatpush3.bf16.msra.mxu0 %v19702_v33  ;;  %v3563_v52 = vmax.f32 %v2971_v12, 0.0  ;;  %v3565_v53 = vmax.f32 %v3044_v16, 0.0 }
 0xca8   :  { %v3578_v30 = vmax.f32 %v2973_v18, 0.0  ;;  %v3580_v31 = vmax.f32 %v3046_v29, 0.0  ;;  %17152 = vmatprep.subr.bf16.mxu1 %v19703_v5  ;;  %17192 = vmatprep.subr.bf16.mxu0 %v19704_v46  ;;  %v21644_v37 = vsub.s32 7, %v20603_v1  ;;  %v19712_v5 = vld [vmem:[%s25149_s20 + $0x1e8] sm:$0xff]   ;;  %v21656_v1 = vrot.slane %v21532_v21, %v21623_v24 }
 0xca9   :  { %v3579_v57 = vmax.f32 %v2975_v32, 0.0  ;;  %v3581_v9 = vmax.f32 %v3048_v35, 0.0  ;;  %v21662_v17 = vrot.slane %v21532_v21, %v21626_v27  ;;  %v21668_v32 = vrot.slane %v21532_v21, %v21635_v49 }
 0xcaa   :  { %v3658_v59 = vpack.c.bf16 %v3578_v30, %v3562_v42  ;;  %v3660_v62 = vpack.c.bf16 %v3580_v31, %v3564_v43  ;;  %v19716_v31 = vld [vmem:[%s25149_s20 + $0x1f0] sm:$0xff]  }
 0xcab   :  { %v2978_v40 = vpop.f32.mrb[60].mxu1  ;;  %v3051_v0 = vpop.f32.mrb[60].mxu0  ;;  %17153 = vmatpush3.bf16.msra.mxu1 %v19705_v22  ;;  %17193 = vmatpush3.bf16.msra.mxu0 %v19706_v47  ;;  %v3659_v20 = vpack.c.bf16 %v3579_v57, %v3563_v52  ;;  %v3661_v63 = vpack.c.bf16 %v3581_v9, %v3565_v53  ;;  %v21680_v47 = vrot.slane %v21532_v21, %v21644_v37 }
 0xcac   :  { %v2979_v33 = vadd.f32 %v2978_v40, %v21542_v25  ;;  %v3052_v7 = vadd.f32 %v3051_v0, %v21546_v23  ;;  %v2980_v39 = vpop.f32.mrb[61].mxu1  ;;  %v3053_v48 = vpop.f32.mrb[61].mxu0  ;;  %17154 = vmatprep.subr.bf16.mxu1 %v19707_v45  ;;  %17194 = vmatprep.subr.bf16.mxu0 %v19708_v55  ;;  %v19717_v0 = vld [vmem:[%s25149_s20 + $0x130] sm:$0xff]  }
 0xcad   :  { %v2981_v46 = vadd.f32 %v2980_v39, %v21550_v51  ;;  %v3054_v12 = vadd.f32 %v3053_v48, %v21554_v58  ;;  %v2982_v16 = vpop.f32.mrb[62].mxu1  ;;  %v3055_v15 = vpop.f32.mrb[62].mxu0  ;;  %4769 = vmatprep.mubr.bf16.mxu1 %v3659_v20  ;;  %4834 = vmatprep.mubr.bf16.mxu0 %v3661_v63  ;;  %v19718_v20 = vld [vmem:[%s25149_s20 + $0x1b0] sm:$0xff]   ;;  %v19720_v39 = vld [vmem:[%s25149_s20 + $0x1f8] sm:$0xff]  }
 0xcae   :  { %v2983_v18 = vadd.f32 %v2982_v16, %v21542_v25  ;;  %v3056_v29 = vadd.f32 %v3055_v15, %v21546_v23  ;;  %v2984_v19 = vpop.f32.mrb[63].mxu1  ;;  %v3057_v41 = vpop.f32.mrb[63].mxu0  ;;  %4770 = vmatmul.mubr.bf16.gmra.mrb[120].mxu1 %v3658_v59  ;;  %4835 = vmatmul.mubr.bf16.gmra.mrb[120].mxu0 %v3660_v62  ;;  %v19713_v25 = vld [vmem:[%s25149_s20 + $0x128] sm:$0xff]   ;;  %v3594_v42 = vmax.f32 %v2979_v33, 0.0  ;;  %v3596_v43 = vmax.f32 %v3052_v7, 0.0  ;;  %v19719_v7 = vld [vmem:[%s25149_s20 + $0x178] sm:$0xff]  }
 0xcaf   :  { %v2985_v35 = vadd.f32 %v2984_v19, %v21550_v51  ;;  %v3058_v22 = vadd.f32 %v3057_v41, %v21554_v58  ;;  %17155 = vmatpush3.bf16.msra.mxu1 %v19709_v38  ;;  %17195 = vmatpush3.bf16.msra.mxu0 %v19710_v44  ;;  %v19714_v23 = vld [vmem:[%s25149_s20 + $0x1a8] sm:$0xff]   ;;  %v19715_v58 = vld [vmem:[%s25149_s20 + $0x170] sm:$0xff]   ;;  %v3595_v45 = vmax.f32 %v2981_v46, 0.0  ;;  %v3597_v55 = vmax.f32 %v3054_v12, 0.0  ;;  %v19721_v41 = vld [vmem:[%s25149_s20 + $0x138] sm:$0xff]  }
 0xcb0   :  { %v3610_v30 = vmax.f32 %v2983_v18, 0.0  ;;  %v3612_v51 = vmax.f32 %v3056_v29, 0.0  ;;  %17156 = vmatprep.subr.bf16.mxu1 %v19711_v13  ;;  %17196 = vmatprep.subr.bf16.mxu0 %v19712_v5 }
 0xcb1   :  { %v3611_v52 = vmax.f32 %v2985_v35, 0.0  ;;  %v3613_v53 = vmax.f32 %v3058_v22, 0.0  ;;  %v19722_v35 = vld [vmem:[%s25149_s20 + $0x1b8] sm:$0xff]  }
 0xcb2   :  { %v3674_v21 = vpack.c.bf16 %v3610_v30, %v3594_v42  ;;  %v3676_v57 = vpack.c.bf16 %v3612_v51, %v3596_v43  ;;  %v19723_v43 = vld [vmem:[%s25149_s20 + $0x240] sm:$0xff]  }
 0xcb3   :  { %v3094_v9 = vpop.f32.mrb[64].mxu1  ;;  %v3167_v59 = vpop.f32.mrb[64].mxu0  ;;  %17157 = vmatpush3.bf16.msra.mxu1 %v19713_v25  ;;  %17197 = vmatpush3.bf16.msra.mxu0 %v19714_v23  ;;  %v3675_v62 = vpack.c.bf16 %v3611_v52, %v3595_v45  ;;  %v3677_v40 = vpack.c.bf16 %v3613_v53, %v3597_v55  ;;  %v19724_v30 = vld [vmem:[%s25149_s20 + $0x2c0] sm:$0xff]  }
 0xcb4   :  { %v3095_v63 = vadd.f32 %v3094_v9, %v21656_v1  ;;  %v3168_v38 = vadd.f32 %v3167_v59, %v21662_v17  ;;  %v3096_v44 = vpop.f32.mrb[65].mxu1  ;;  %v3169_v33 = vpop.f32.mrb[65].mxu0  ;;  %17158 = vmatprep.subr.bf16.mxu1 %v19715_v58  ;;  %17198 = vmatprep.subr.bf16.mxu0 %v19716_v31  ;;  %v19725_v59 = vld [vmem:[%s25149_s20 + $0x200] sm:$0xff]  }
 0xcb5   :  { %v3097_v48 = vadd.f32 %v3096_v44, %v21668_v32  ;;  %v3170_v13 = vadd.f32 %v3169_v33, %v21680_v47  ;;  %v3098_v5 = vpop.f32.mrb[66].mxu1  ;;  %v3171_v46 = vpop.f32.mrb[66].mxu0  ;;  %4777 = vmatprep.mubr.bf16.mxu1 %v3675_v62  ;;  %4842 = vmatprep.mubr.bf16.mxu0 %v3677_v40  ;;  %v19726_v62 = vld [vmem:[%s25149_s20 + $0x280] sm:$0xff]   ;;  %v19728_v44 = vld [vmem:[%s25149_s20 + $0x2c8] sm:$0xff]  }
 0xcb6   :  { %v3099_v12 = vadd.f32 %v3098_v5, %v21656_v1  ;;  %v3172_v16 = vadd.f32 %v3171_v46, %v21662_v17  ;;  %v3100_v15 = vpop.f32.mrb[67].mxu1  ;;  %v3173_v18 = vpop.f32.mrb[67].mxu0  ;;  %4778 = vmatmul.mubr.bf16.gmra.mrb[124].mxu1 %v3674_v21  ;;  %4843 = vmatmul.mubr.bf16.gmra.mrb[124].mxu0 %v3676_v57  ;;  %v3502_v22 = vmax.f32 %v3095_v63, 0.0  ;;  %v3504_v25 = vmax.f32 %v3168_v38, 0.0  ;;  %v19727_v38 = vld [vmem:[%s25149_s20 + $0x248] sm:$0xff]  }
 0xcb7   :  { %v3101_v29 = vadd.f32 %v3100_v15, %v21668_v32  ;;  %v3174_v19 = vadd.f32 %v3173_v18, %v21680_v47  ;;  %17159 = vmatpush3.bf16.msra.mxu1 %v19717_v0  ;;  %17199 = vmatpush3.bf16.msra.mxu0 %v19718_v20  ;;  %v3503_v51 = vmax.f32 %v3097_v48, 0.0  ;;  %v3505_v58 = vmax.f32 %v3170_v13, 0.0  ;;  %v19729_v18 = vld [vmem:[%s25149_s20 + $0x208] sm:$0xff]  }
 0xcb8   :  { %v3518_v23 = vmax.f32 %v3099_v12, 0.0  ;;  %v3520_v42 = vmax.f32 %v3172_v16, 0.0  ;;  %17160 = vmatprep.subr.bf16.mxu1 %v19719_v7  ;;  %17200 = vmatprep.subr.bf16.mxu0 %v19720_v39 }
 0xcb9   :  { %v3519_v31 = vmax.f32 %v3101_v29, 0.0  ;;  %v3521_v45 = vmax.f32 %v3174_v19, 0.0  ;;  %v19730_v29 = vld [vmem:[%s25149_s20 + $0x288] sm:$0xff]  }
 0xcba   :  { %v3630_v55 = vpack.c.bf16 %v3518_v23, %v3502_v22  ;;  %v3632_v52 = vpack.c.bf16 %v3520_v42, %v3504_v25  ;;  %v19731_v25 = vld [vmem:[%s25149_s20 + $0x250] sm:$0xff]  }
 0xcbb   :  { %v3104_v53 = vpop.f32.mrb[68].mxu1  ;;  %v3177_v21 = vpop.f32.mrb[68].mxu0  ;;  %17161 = vmatpush3.bf16.msra.mxu1 %v19721_v41  ;;  %17201 = vmatpush3.bf16.msra.mxu0 %v19722_v35  ;;  %v3631_v57 = vpack.c.bf16 %v3519_v31, %v3503_v51  ;;  %v3633_v9 = vpack.c.bf16 %v3521_v45, %v3505_v58  ;;  %v19732_v23 = vld [vmem:[%s25149_s20 + $0x2d0] sm:$0xff]  }
 0xcbc   :  { %v3105_v40 = vadd.f32 %v3104_v53, %v21656_v1  ;;  %v3178_v0 = vadd.f32 %v3177_v21, %v21662_v17  ;;  %v3106_v20 = vpop.f32.mrb[69].mxu1  ;;  %v3179_v63 = vpop.f32.mrb[69].mxu0  ;;  %17226 = vmatprep.subr.bf16.mxu1 %v19723_v43  ;;  %17266 = vmatprep.subr.bf16.mxu0 %v19724_v30  ;;  %v19733_v21 = vld [vmem:[%s25149_s20 + $0x210] sm:$0xff]  }
 0xcbd   :  { %v3107_v33 = vadd.f32 %v3106_v20, %v21668_v32  ;;  %v3180_v7 = vadd.f32 %v3179_v63, %v21680_v47  ;;  %v3108_v39 = vpop.f32.mrb[70].mxu1  ;;  %v3181_v48 = vpop.f32.mrb[70].mxu0  ;;  %4883 = vmatprep.mubr.bf16.mxu1 %v3631_v57  ;;  %4948 = vmatprep.mubr.bf16.mxu0 %v3633_v9  ;;  %v19734_v57 = vld [vmem:[%s25149_s20 + $0x290] sm:$0xff]   ;;  %v19736_v20 = vld [vmem:[%s25149_s20 + $0x2d8] sm:$0xff]  }
 0xcbe   :  { %v3109_v13 = vadd.f32 %v3108_v39, %v21656_v1  ;;  %v3182_v5 = vadd.f32 %v3181_v48, %v21662_v17  ;;  %v3110_v46 = vpop.f32.mrb[71].mxu1  ;;  %v3183_v12 = vpop.f32.mrb[71].mxu0  ;;  %4884 = vmatmul.mubr.bf16.vlgmr.msra.gmra.mrb[128].mxu1 %v3630_v55  ;;  %4949 = vmatmul.mubr.bf16.vlgmr.msra.gmra.mrb[128].mxu0 %v3632_v52  ;;  %v3534_v19 = vmax.f32 %v3105_v40, 0.0  ;;  %v3536_v41 = vmax.f32 %v3178_v0, 0.0  ;;  %v19735_v0 = vld [vmem:[%s25149_s20 + $0x258] sm:$0xff]  }
 0xcbf   :  { %v3111_v16 = vadd.f32 %v3110_v46, %v21668_v32  ;;  %v3184_v15 = vadd.f32 %v3183_v12, %v21680_v47  ;;  %17227 = vmatpush3.bf16.msra.mxu1 %v19725_v59  ;;  %17267 = vmatpush3.bf16.msra.mxu0 %v19726_v62  ;;  %v3535_v42 = vmax.f32 %v3107_v33, 0.0  ;;  %v3537_v43 = vmax.f32 %v3180_v7, 0.0  ;;  %v19737_v12 = vld [vmem:[%s25149_s20 + $0x218] sm:$0xff]  }
 0xcc0   :  { %v3550_v35 = vmax.f32 %v3109_v13, 0.0  ;;  %v3552_v22 = vmax.f32 %v3182_v5, 0.0  ;;  %17228 = vmatprep.subr.bf16.mxu1 %v19727_v38  ;;  %17268 = vmatprep.subr.bf16.mxu0 %v19728_v44 }
 0xcc1   :  { %v3551_v30 = vmax.f32 %v3111_v16, 0.0  ;;  %v3553_v51 = vmax.f32 %v3184_v15, 0.0  ;;  %v19738_v16 = vld [vmem:[%s25149_s20 + $0x298] sm:$0xff]  }
 0xcc2   :  { %v3646_v58 = vpack.c.bf16 %v3550_v35, %v3534_v19  ;;  %v3648_v31 = vpack.c.bf16 %v3552_v22, %v3536_v41  ;;  %v19739_v41 = vld [vmem:[%s25149_s20 + $0x260] sm:$0xff]  }
 0xcc3   :  { %v3114_v45 = vpop.f32.mrb[72].mxu1  ;;  %v3187_v55 = vpop.f32.mrb[72].mxu0  ;;  %17229 = vmatpush3.bf16.msra.mxu1 %v19729_v18  ;;  %17269 = vmatpush3.bf16.msra.mxu0 %v19730_v29  ;;  %v3647_v52 = vpack.c.bf16 %v3551_v30, %v3535_v42  ;;  %v3649_v53 = vpack.c.bf16 %v3553_v51, %v3537_v43  ;;  %v19740_v35 = vld [vmem:[%s25149_s20 + $0x2e0] sm:$0xff]   ;;  %v21787_v43 = vld [vmem:[%s25148_s19 + $0x8] sm:$0xff] }
 0xcc4   :  { %v3115_v9 = vadd.f32 %v3114_v45, %v21656_v1  ;;  %v3188_v59 = vadd.f32 %v3187_v55, %v21662_v17  ;;  %v3116_v62 = vpop.f32.mrb[73].mxu1  ;;  %v3189_v40 = vpop.f32.mrb[73].mxu0  ;;  %17230 = vmatprep.subr.bf16.mxu1 %v19731_v25  ;;  %17270 = vmatprep.subr.bf16.mxu0 %v19732_v23 }
 0xcc5   :  { %v3117_v63 = vadd.f32 %v3116_v62, %v21668_v32  ;;  %v3190_v38 = vadd.f32 %v3189_v40, %v21680_v47  ;;  %v3118_v44 = vpop.f32.mrb[74].mxu1  ;;  %v3191_v33 = vpop.f32.mrb[74].mxu0  ;;  %4891 = vmatprep.mubr.bf16.mxu1 %v3647_v52  ;;  %4956 = vmatprep.mubr.bf16.mxu0 %v3649_v53  ;;  %v19741_v52 = vld [vmem:[%s25149_s20 + $0x220] sm:$0xff]   ;;  %v19743_v62 = vld [vmem:[%s25149_s20 + $0x268] sm:$0xff]  }
 0xcc6   :  { %v3119_v7 = vadd.f32 %v3118_v44, %v21656_v1  ;;  %v3192_v39 = vadd.f32 %v3191_v33, %v21662_v17  ;;  %v3120_v48 = vpop.f32.mrb[75].mxu1  ;;  %v3193_v13 = vpop.f32.mrb[75].mxu0  ;;  %4892 = vmatmul.mubr.bf16.gmra.mrb[132].mxu1 %v3646_v58  ;;  %4957 = vmatmul.mubr.bf16.gmra.mrb[132].mxu0 %v3648_v31  ;;  %v3566_v15 = vmax.f32 %v3115_v9, 0.0  ;;  %v3568_v18 = vmax.f32 %v3188_v59, 0.0  ;;  %v19742_v53 = vld [vmem:[%s25149_s20 + $0x2a0] sm:$0xff]   ;;  %v19744_v40 = vld [vmem:[%s25149_s20 + $0x2e8] sm:$0xff]  }
 0xcc7   :  { %v3121_v5 = vadd.f32 %v3120_v48, %v21668_v32  ;;  %v3194_v46 = vadd.f32 %v3193_v13, %v21680_v47  ;;  %17231 = vmatpush3.bf16.msra.mxu1 %v19733_v21  ;;  %17271 = vmatpush3.bf16.msra.mxu0 %v19734_v57  ;;  %v3567_v22 = vmax.f32 %v3117_v63, 0.0  ;;  %v3569_v25 = vmax.f32 %v3190_v38, 0.0 }
 0xcc8   :  { %v3582_v29 = vmax.f32 %v3119_v7, 0.0  ;;  %v3584_v19 = vmax.f32 %v3192_v39, 0.0  ;;  %17232 = vmatprep.subr.bf16.mxu1 %v19735_v0  ;;  %17272 = vmatprep.subr.bf16.mxu0 %v19736_v20  ;;  %v21805_v0 = vrot.slane %v21787_v43, %v20608_v14  ;;  %v21811_v33 = vrot.slane %v21787_v43, %v21527_v28 }
 0xcc9   :  { %v3583_v23 = vmax.f32 %v3121_v5, 0.0  ;;  %v3585_v42 = vmax.f32 %v3194_v46, 0.0  ;;  %v21817_v5 = vrot.slane %v21787_v43, %v21535_v50 }
 0xcca   :  { %v3662_v30 = vpack.c.bf16 %v3582_v29, %v3566_v15  ;;  %v3664_v51 = vpack.c.bf16 %v3584_v19, %v3568_v18  ;;  %v19748_v19 = vld [vmem:[%s25149_s20 + $0x2f0] sm:$0xff]  }
 0xccb   :  { %v3124_v58 = vpop.f32.mrb[76].mxu1  ;;  %v3197_v31 = vpop.f32.mrb[76].mxu0  ;;  %17233 = vmatpush3.bf16.msra.mxu1 %v19737_v12  ;;  %17273 = vmatpush3.bf16.msra.mxu0 %v19738_v16  ;;  %v3663_v45 = vpack.c.bf16 %v3583_v23, %v3567_v22  ;;  %v3665_v55 = vpack.c.bf16 %v3585_v42, %v3569_v25  ;;  %v21829_v16 = vrot.slane %v21787_v43, %v21538_v61 }
 0xccc   :  { %v3125_v21 = vadd.f32 %v3124_v58, %v21656_v1  ;;  %v3198_v57 = vadd.f32 %v3197_v31, %v21662_v17  ;;  %v3126_v9 = vpop.f32.mrb[77].mxu1  ;;  %v3199_v59 = vpop.f32.mrb[77].mxu0  ;;  %17234 = vmatprep.subr.bf16.mxu1 %v19739_v41  ;;  %17274 = vmatprep.subr.bf16.mxu0 %v19740_v35 }
 0xccd   :  { %v3127_v20 = vadd.f32 %v3126_v9, %v21668_v32  ;;  %v3200_v63 = vadd.f32 %v3199_v59, %v21680_v47  ;;  %v3128_v38 = vpop.f32.mrb[78].mxu1  ;;  %v3201_v44 = vpop.f32.mrb[78].mxu0  ;;  %4899 = vmatprep.mubr.bf16.mxu1 %v3663_v45  ;;  %4964 = vmatprep.mubr.bf16.mxu0 %v3665_v55  ;;  %v19749_v45 = vld [vmem:[%s25149_s20 + $0x230] sm:$0xff]   ;;  %v19751_v9 = vld [vmem:[%s25149_s20 + $0x278] sm:$0xff]  }
 0xcce   :  { %v3129_v7 = vadd.f32 %v3128_v38, %v21656_v1  ;;  %v3202_v39 = vadd.f32 %v3201_v44, %v21662_v17  ;;  %v3130_v48 = vpop.f32.mrb[79].mxu1  ;;  %v3203_v13 = vpop.f32.mrb[79].mxu0  ;;  %4900 = vmatmul.mubr.bf16.gmra.mrb[136].mxu1 %v3662_v30  ;;  %4965 = vmatmul.mubr.bf16.gmra.mrb[136].mxu0 %v3664_v51  ;;  %v19745_v1 = vld [vmem:[%s25149_s20 + $0x228] sm:$0xff]   ;;  %v3598_v15 = vmax.f32 %v3125_v21, 0.0  ;;  %v3600_v18 = vmax.f32 %v3198_v57, 0.0  ;;  %v19750_v55 = vld [vmem:[%s25149_s20 + $0x2b0] sm:$0xff]  }
 0xccf   :  { %v3131_v46 = vadd.f32 %v3130_v48, %v21668_v32  ;;  %v3204_v12 = vadd.f32 %v3203_v13, %v21680_v47  ;;  %17235 = vmatpush3.bf16.msra.mxu1 %v19741_v52  ;;  %17275 = vmatpush3.bf16.msra.mxu0 %v19742_v53  ;;  %v19746_v17 = vld [vmem:[%s25149_s20 + $0x2a8] sm:$0xff]   ;;  %v19747_v47 = vld [vmem:[%s25149_s20 + $0x270] sm:$0xff]   ;;  %v3599_v41 = vmax.f32 %v3127_v20, 0.0  ;;  %v3601_v35 = vmax.f32 %v3200_v63, 0.0  ;;  %v19752_v59 = vld [vmem:[%s25149_s20 + $0x2f8] sm:$0xff]  }
 0xcd0   :  { %v3614_v29 = vmax.f32 %v3129_v7, 0.0  ;;  %v3616_v32 = vmax.f32 %v3202_v39, 0.0  ;;  %17236 = vmatprep.subr.bf16.mxu1 %v19743_v62  ;;  %17276 = vmatprep.subr.bf16.mxu0 %v19744_v40 }
 0xcd1   :  { %v3615_v22 = vmax.f32 %v3131_v46, 0.0  ;;  %v3617_v25 = vmax.f32 %v3204_v12, 0.0  ;;  %v19753_v46 = vld [vmem:[%s25149_s20 + $0x238] sm:$0xff]  }
 0xcd2   :  { %v3678_v23 = vpack.c.bf16 %v3614_v29, %v3598_v15  ;;  %v3680_v42 = vpack.c.bf16 %v3616_v32, %v3600_v18  ;;  %v19754_v12 = vld [vmem:[%s25149_s20 + $0x2b8] sm:$0xff]   ;;  %v19755_v29 = vld [vmem:[%s25149_s20 + $0x340] sm:$0xff]  }
 0xcd3   :  { %v3240_v30 = vpop.f32.mrb[80].mxu1  ;;  %v3313_v51 = vpop.f32.mrb[80].mxu0  ;;  %17237 = vmatpush3.bf16.msra.mxu1 %v19745_v1  ;;  %17277 = vmatpush3.bf16.msra.mxu0 %v19746_v17  ;;  %v3679_v58 = vpack.c.bf16 %v3615_v22, %v3599_v41  ;;  %v3681_v31 = vpack.c.bf16 %v3617_v25, %v3601_v35  ;;  %v19756_v32 = vld [vmem:[%s25149_s20 + $0x3c0] sm:$0xff]  }
 0xcd4   :  { %v3241_v52 = vadd.f32 %v3240_v30, %v21805_v0  ;;  %v3314_v53 = vadd.f32 %v3313_v51, %v21811_v33  ;;  %v3242_v21 = vpop.f32.mrb[81].mxu1  ;;  %v3315_v57 = vpop.f32.mrb[81].mxu0  ;;  %17238 = vmatprep.subr.bf16.mxu1 %v19747_v47  ;;  %17278 = vmatprep.subr.bf16.mxu0 %v19748_v19 }
 0xcd5   :  { %v3243_v62 = vadd.f32 %v3242_v21, %v21817_v5  ;;  %v3316_v40 = vadd.f32 %v3315_v57, %v21829_v16  ;;  %v3244_v20 = vpop.f32.mrb[82].mxu1  ;;  %v3317_v63 = vpop.f32.mrb[82].mxu0  ;;  %4907 = vmatprep.mubr.bf16.mxu1 %v3679_v58  ;;  %4972 = vmatprep.mubr.bf16.mxu0 %v3681_v31  ;;  %v19757_v58 = vld [vmem:[%s25149_s20 + $0x300] sm:$0xff]   ;;  %v19759_v21 = vld [vmem:[%s25149_s20 + $0x348] sm:$0xff]  }
 0xcd6   :  { %v3245_v38 = vadd.f32 %v3244_v20, %v21805_v0  ;;  %v3318_v44 = vadd.f32 %v3317_v63, %v21811_v33  ;;  %v3246_v7 = vpop.f32.mrb[83].mxu1  ;;  %v3319_v39 = vpop.f32.mrb[83].mxu0  ;;  %4908 = vmatmul.mubr.bf16.gmra.mrb[140].mxu1 %v3678_v23  ;;  %4973 = vmatmul.mubr.bf16.gmra.mrb[140].mxu0 %v3680_v42  ;;  %v3506_v1 = vmax.f32 %v3241_v52, 0.0  ;;  %v3508_v17 = vmax.f32 %v3314_v53, 0.0  ;;  %v19758_v31 = vld [vmem:[%s25149_s20 + $0x380] sm:$0xff]   ;;  %v19760_v57 = vld [vmem:[%s25149_s20 + $0x3c8] sm:$0xff]  }
 0xcd7   :  { %v3247_v48 = vadd.f32 %v3246_v7, %v21817_v5  ;;  %v3320_v13 = vadd.f32 %v3319_v39, %v21829_v16  ;;  %17239 = vmatpush3.bf16.msra.mxu1 %v19749_v45  ;;  %17279 = vmatpush3.bf16.msra.mxu0 %v19750_v55  ;;  %v3507_v47 = vmax.f32 %v3243_v62, 0.0  ;;  %v3509_v19 = vmax.f32 %v3316_v40, 0.0 }
 0xcd8   :  { %v3522_v15 = vmax.f32 %v3245_v38, 0.0  ;;  %v3524_v18 = vmax.f32 %v3318_v44, 0.0  ;;  %17240 = vmatprep.subr.bf16.mxu1 %v19751_v9  ;;  %17280 = vmatprep.subr.bf16.mxu0 %v19752_v59 }
 0xcd9   :  { %v3523_v41 = vmax.f32 %v3247_v48, 0.0  ;;  %v3525_v35 = vmax.f32 %v3320_v13, 0.0  ;;  %v19761_v48 = vld [vmem:[%s25149_s20 + $0x308] sm:$0xff]  }
 0xcda   :  { %v3634_v22 = vpack.c.bf16 %v3522_v15, %v3506_v1  ;;  %v3636_v25 = vpack.c.bf16 %v3524_v18, %v3508_v17  ;;  %v19762_v13 = vld [vmem:[%s25149_s20 + $0x388] sm:$0xff]   ;;  %v19763_v15 = vld [vmem:[%s25149_s20 + $0x350] sm:$0xff]  }
 0xcdb   :  { %v3250_v23 = vpop.f32.mrb[84].mxu1  ;;  %v3323_v42 = vpop.f32.mrb[84].mxu0  ;;  %17241 = vmatpush3.bf16.msra.mxu1 %v19753_v46  ;;  %17281 = vmatpush3.bf16.msra.mxu0 %v19754_v12  ;;  %v3635_v30 = vpack.c.bf16 %v3523_v41, %v3507_v47  ;;  %v3637_v51 = vpack.c.bf16 %v3525_v35, %v3509_v19  ;;  %v19764_v18 = vld [vmem:[%s25149_s20 + $0x3d0] sm:$0xff]  }
 0xcdc   :  { %v3251_v45 = vadd.f32 %v3250_v23, %v21805_v0  ;;  %v3324_v55 = vadd.f32 %v3323_v42, %v21811_v33  ;;  %v3252_v52 = vpop.f32.mrb[85].mxu1  ;;  %v3325_v53 = vpop.f32.mrb[85].mxu0  ;;  %17306 = vmatprep.subr.bf16.mxu1 %v19755_v29  ;;  %17346 = vmatprep.subr.bf16.mxu0 %v19756_v32 }
 0xcdd   :  { %v3253_v9 = vadd.f32 %v3252_v52, %v21817_v5  ;;  %v3326_v59 = vadd.f32 %v3325_v53, %v21829_v16  ;;  %v3254_v62 = vpop.f32.mrb[86].mxu1  ;;  %v3327_v40 = vpop.f32.mrb[86].mxu0  ;;  %5013 = vmatprep.mubr.bf16.mxu1 %v3635_v30  ;;  %5078 = vmatprep.mubr.bf16.mxu0 %v3637_v51  ;;  %v19765_v30 = vld [vmem:[%s25149_s20 + $0x310] sm:$0xff]   ;;  %v19767_v52 = vld [vmem:[%s25149_s20 + $0x358] sm:$0xff]  }
 0xcde   :  { %v3255_v20 = vadd.f32 %v3254_v62, %v21805_v0  ;;  %v3328_v63 = vadd.f32 %v3327_v40, %v21811_v33  ;;  %v3256_v38 = vpop.f32.mrb[87].mxu1  ;;  %v3329_v44 = vpop.f32.mrb[87].mxu0  ;;  %5014 = vmatmul.mubr.bf16.vlgmr.msra.gmra.mrb[144].mxu1 %v3634_v22  ;;  %5079 = vmatmul.mubr.bf16.vlgmr.msra.gmra.mrb[144].mxu0 %v3636_v25  ;;  %v3538_v46 = vmax.f32 %v3251_v45, 0.0  ;;  %v3540_v12 = vmax.f32 %v3324_v55, 0.0  ;;  %v19766_v51 = vld [vmem:[%s25149_s20 + $0x390] sm:$0xff]   ;;  %v19768_v53 = vld [vmem:[%s25149_s20 + $0x3d8] sm:$0xff]  }
 0xcdf   :  { %v3257_v7 = vadd.f32 %v3256_v38, %v21817_v5  ;;  %v3330_v39 = vadd.f32 %v3329_v44, %v21829_v16  ;;  %17307 = vmatpush3.bf16.msra.mxu1 %v19757_v58  ;;  %17347 = vmatpush3.bf16.msra.mxu0 %v19758_v31  ;;  %v3539_v29 = vmax.f32 %v3253_v9, 0.0  ;;  %v3541_v32 = vmax.f32 %v3326_v59, 0.0 }
 0xce0   :  { %v3554_v1 = vmax.f32 %v3255_v20, 0.0  ;;  %v3556_v17 = vmax.f32 %v3328_v63, 0.0  ;;  %17308 = vmatprep.subr.bf16.mxu1 %v19759_v21  ;;  %17348 = vmatprep.subr.bf16.mxu0 %v19760_v57 }
 0xce1   :  { %v3555_v47 = vmax.f32 %v3257_v7, 0.0  ;;  %v3557_v19 = vmax.f32 %v3330_v39, 0.0  ;;  %v19769_v7 = vld [vmem:[%s25149_s20 + $0x318] sm:$0xff]  }
 0xce2   :  { %v3650_v41 = vpack.c.bf16 %v3554_v1, %v3538_v46  ;;  %v3652_v35 = vpack.c.bf16 %v3556_v17, %v3540_v12  ;;  %v19770_v39 = vld [vmem:[%s25149_s20 + $0x398] sm:$0xff]   ;;  %v19771_v1 = vld [vmem:[%s25149_s20 + $0x360] sm:$0xff]  }
 0xce3   :  { %v3260_v22 = vpop.f32.mrb[88].mxu1  ;;  %v3333_v25 = vpop.f32.mrb[88].mxu0  ;;  %17309 = vmatpush3.bf16.msra.mxu1 %v19761_v48  ;;  %17349 = vmatpush3.bf16.msra.mxu0 %v19762_v13  ;;  %v3651_v23 = vpack.c.bf16 %v3555_v47, %v3539_v29  ;;  %v3653_v42 = vpack.c.bf16 %v3557_v19, %v3541_v32  ;;  %v19772_v17 = vld [vmem:[%s25149_s20 + $0x3e0] sm:$0xff]  }
 0xce4   :  { %v3261_v58 = vadd.f32 %v3260_v22, %v21805_v0  ;;  %v3334_v31 = vadd.f32 %v3333_v25, %v21811_v33  ;;  %v3262_v45 = vpop.f32.mrb[89].mxu1  ;;  %v3335_v55 = vpop.f32.mrb[89].mxu0  ;;  %17310 = vmatprep.subr.bf16.mxu1 %v19763_v15  ;;  %17350 = vmatprep.subr.bf16.mxu0 %v19764_v18 }
 0xce5   :  { %v3263_v21 = vadd.f32 %v3262_v45, %v21817_v5  ;;  %v3336_v57 = vadd.f32 %v3335_v55, %v21829_v16  ;;  %v3264_v9 = vpop.f32.mrb[90].mxu1  ;;  %v3337_v59 = vpop.f32.mrb[90].mxu0  ;;  %5021 = vmatprep.mubr.bf16.mxu1 %v3651_v23  ;;  %5086 = vmatprep.mubr.bf16.mxu0 %v3653_v42  ;;  %v19773_v23 = vld [vmem:[%s25149_s20 + $0x320] sm:$0xff]   ;;  %v19775_v45 = vld [vmem:[%s25149_s20 + $0x368] sm:$0xff]  }
 0xce6   :  { %v3265_v62 = vadd.f32 %v3264_v9, %v21805_v0  ;;  %v3338_v40 = vadd.f32 %v3337_v59, %v21811_v33  ;;  %v3266_v20 = vpop.f32.mrb[91].mxu1  ;;  %v3339_v63 = vpop.f32.mrb[91].mxu0  ;;  %5022 = vmatmul.mubr.bf16.gmra.mrb[148].mxu1 %v3650_v41  ;;  %5087 = vmatmul.mubr.bf16.gmra.mrb[148].mxu0 %v3652_v35  ;;  %v3570_v48 = vmax.f32 %v3261_v58, 0.0  ;;  %v3572_v13 = vmax.f32 %v3334_v31, 0.0  ;;  %v19774_v42 = vld [vmem:[%s25149_s20 + $0x3a0] sm:$0xff]   ;;  %v19776_v55 = vld [vmem:[%s25149_s20 + $0x3e8] sm:$0xff]  }
 0xce7   :  { %v3267_v38 = vadd.f32 %v3266_v20, %v21817_v5  ;;  %v3340_v44 = vadd.f32 %v3339_v63, %v21829_v16  ;;  %17311 = vmatpush3.bf16.msra.mxu1 %v19765_v30  ;;  %17351 = vmatpush3.bf16.msra.mxu0 %v19766_v51  ;;  %v3571_v15 = vmax.f32 %v3263_v21, 0.0  ;;  %v3573_v18 = vmax.f32 %v3336_v57, 0.0 }
 0xce8   :  { %v3586_v46 = vmax.f32 %v3265_v62, 0.0  ;;  %v3588_v12 = vmax.f32 %v3338_v40, 0.0  ;;  %17312 = vmatprep.subr.bf16.mxu1 %v19767_v52  ;;  %17352 = vmatprep.subr.bf16.mxu0 %v19768_v53  ;;  %v21949_v52 = vrot.slane %v21787_v43, %v21623_v24  ;;  %v21955_v59 = vrot.slane %v21787_v43, %v21626_v27 }
 0xce9   :  { %v3587_v29 = vmax.f32 %v3267_v38, 0.0  ;;  %v3589_v32 = vmax.f32 %v3340_v44, 0.0  ;;  %v21961_v38 = vrot.slane %v21787_v43, %v21635_v49 }
 0xcea   :  { %v3666_v47 = vpack.c.bf16 %v3586_v46, %v3570_v48  ;;  %v3668_v19 = vpack.c.bf16 %v3588_v12, %v3572_v13  ;;  %v19780_v12 = vld [vmem:[%s25149_s20 + $0x3f0] sm:$0xff]  }
 0xceb   :  { %v3270_v41 = vpop.f32.mrb[92].mxu1  ;;  %v3343_v35 = vpop.f32.mrb[92].mxu0  ;;  %17313 = vmatpush3.bf16.msra.mxu1 %v19769_v7  ;;  %17353 = vmatpush3.bf16.msra.mxu0 %v19770_v39  ;;  %v3667_v22 = vpack.c.bf16 %v3587_v29, %v3571_v15  ;;  %v3669_v25 = vpack.c.bf16 %v3589_v32, %v3573_v18  ;;  %v21973_v39 = vrot.slane %v21787_v43, %v21644_v37 }
 0xcec   :  { %v3271_v30 = vadd.f32 %v3270_v41, %v21805_v0  ;;  %v3344_v51 = vadd.f32 %v3343_v35, %v21811_v33  ;;  %v3272_v58 = vpop.f32.mrb[93].mxu1  ;;  %v3345_v31 = vpop.f32.mrb[93].mxu0  ;;  %17314 = vmatprep.subr.bf16.mxu1 %v19771_v1  ;;  %17354 = vmatprep.subr.bf16.mxu0 %v19772_v17  ;;  %v19781_v35 = vld [vmem:[%s25149_s20 + $0x330] sm:$0xff]  }
 0xced   :  { %v3273_v53 = vadd.f32 %v3272_v58, %v21817_v5  ;;  %v3346_v21 = vadd.f32 %v3345_v31, %v21829_v16  ;;  %v3274_v57 = vpop.f32.mrb[94].mxu1  ;;  %v3347_v9 = vpop.f32.mrb[94].mxu0  ;;  %5029 = vmatprep.mubr.bf16.mxu1 %v3667_v22  ;;  %5094 = vmatprep.mubr.bf16.mxu0 %v3669_v25  ;;  %v19782_v22 = vld [vmem:[%s25149_s20 + $0x3b0] sm:$0xff]   ;;  %v19784_v58 = vld [vmem:[%s25149_s20 + $0x3f8] sm:$0xff]  }
 0xcee   :  { %v3275_v62 = vadd.f32 %v3274_v57, %v21805_v0  ;;  %v3348_v40 = vadd.f32 %v3347_v9, %v21811_v33  ;;  %v3276_v20 = vpop.f32.mrb[95].mxu1  ;;  %v3349_v63 = vpop.f32.mrb[95].mxu0  ;;  %5030 = vmatmul.mubr.bf16.gmra.mrb[152].mxu1 %v3666_v47  ;;  %5095 = vmatmul.mubr.bf16.gmra.mrb[152].mxu0 %v3668_v19  ;;  %v19777_v0 = vld [vmem:[%s25149_s20 + $0x328] sm:$0xff]   ;;  %v3602_v48 = vmax.f32 %v3271_v30, 0.0  ;;  %v3604_v13 = vmax.f32 %v3344_v51, 0.0  ;;  %v19783_v51 = vld [vmem:[%s25149_s20 + $0x378] sm:$0xff]  }
 0xcef   :  { %v3277_v44 = vadd.f32 %v3276_v20, %v21817_v5  ;;  %v3350_v7 = vadd.f32 %v3349_v63, %v21829_v16  ;;  %17315 = vmatpush3.bf16.msra.mxu1 %v19773_v23  ;;  %17355 = vmatpush3.bf16.msra.mxu0 %v19774_v42  ;;  %v19778_v33 = vld [vmem:[%s25149_s20 + $0x3a8] sm:$0xff]   ;;  %v19779_v16 = vld [vmem:[%s25149_s20 + $0x370] sm:$0xff]   ;;  %v3603_v1 = vmax.f32 %v3273_v53, 0.0  ;;  %v3605_v17 = vmax.f32 %v3346_v21, 0.0  ;;  %v19785_v63 = vld [vmem:[%s25149_s20 + $0x338] sm:$0xff]  }
 0xcf0   :  { %v3618_v46 = vmax.f32 %v3275_v62, 0.0  ;;  %v3620_v5 = vmax.f32 %v3348_v40, 0.0  ;;  %17316 = vmatprep.subr.bf16.mxu1 %v19775_v45  ;;  %17356 = vmatprep.subr.bf16.mxu0 %v19776_v55 }
 0xcf1   :  { %v3619_v15 = vmax.f32 %v3277_v44, 0.0  ;;  %v3621_v18 = vmax.f32 %v3350_v7, 0.0  ;;  %v19786_v44 = vld [vmem:[%s25149_s20 + $0x3b8] sm:$0xff]  }
 0xcf2   :  { %v3682_v43 = vpack.c.bf16 %v3618_v46, %v3602_v48  ;;  %v3684_v29 = vpack.c.bf16 %v3620_v5, %v3604_v13 }
 0xcf3   :  { %v3386_v32 = vpop.f32.mrb[96].mxu1  ;;  %v3459_v47 = vpop.f32.mrb[96].mxu0  ;;  %17317 = vmatpush3.bf16.msra.mxu1 %v19777_v0  ;;  %17357 = vmatpush3.bf16.msra.mxu0 %v19778_v33  ;;  %v3683_v19 = vpack.c.bf16 %v3619_v15, %v3603_v1  ;;  %v3685_v41 = vpack.c.bf16 %v3621_v18, %v3605_v17 }
 0xcf4   :  { %v3387_v25 = vadd.f32 %v3386_v32, %v21949_v52  ;;  %v3460_v23 = vadd.f32 %v3459_v47, %v21955_v59  ;;  %v3388_v42 = vpop.f32.mrb[97].mxu1  ;;  %v3461_v30 = vpop.f32.mrb[97].mxu0  ;;  %17318 = vmatprep.subr.bf16.mxu1 %v19779_v16  ;;  %17358 = vmatprep.subr.bf16.mxu0 %v19780_v12 }
 0xcf5   :  { %v3389_v31 = vadd.f32 %v3388_v42, %v21961_v38  ;;  %v3462_v45 = vadd.f32 %v3461_v30, %v21973_v39  ;;  %v3390_v55 = vpop.f32.mrb[98].mxu1  ;;  %v3463_v53 = vpop.f32.mrb[98].mxu0  ;;  %5037 = vmatprep.mubr.bf16.mxu1 %v3683_v19  ;;  %5102 = vmatprep.mubr.bf16.mxu0 %v3685_v41 }
 0xcf6   :  { %v3391_v21 = vadd.f32 %v3390_v55, %v21949_v52  ;;  %v3464_v57 = vadd.f32 %v3463_v53, %v21955_v59  ;;  %v3392_v9 = vpop.f32.mrb[99].mxu1  ;;  %v3465_v62 = vpop.f32.mrb[99].mxu0  ;;  %5038 = vmatmul.mubr.bf16.gmra.mrb[156].mxu1 %v3682_v43  ;;  %5103 = vmatmul.mubr.bf16.gmra.mrb[156].mxu0 %v3684_v29  ;;  %v3510_v7 = vmax.f32 %v3387_v25, 0.0  ;;  %v3512_v0 = vmax.f32 %v3460_v23, 0.0 }
 0xcf7   :  { %v3393_v40 = vadd.f32 %v3392_v9, %v21961_v38  ;;  %v3466_v20 = vadd.f32 %v3465_v62, %v21973_v39  ;;  %17319 = vmatpush3.bf16.msra.mxu1 %v19781_v35  ;;  %17359 = vmatpush3.bf16.msra.mxu0 %v19782_v22  ;;  %v3511_v13 = vmax.f32 %v3389_v31, 0.0  ;;  %v3513_v46 = vmax.f32 %v3462_v45, 0.0 }
 0xcf8   :  { %v3526_v33 = vmax.f32 %v3391_v21, 0.0  ;;  %v3528_v48 = vmax.f32 %v3464_v57, 0.0  ;;  %17320 = vmatprep.subr.bf16.mxu1 %v19783_v51  ;;  %17360 = vmatprep.subr.bf16.mxu0 %v19784_v58 }
 0xcf9   :  { %v3527_v5 = vmax.f32 %v3393_v40, 0.0  ;;  %v3529_v16 = vmax.f32 %v3466_v20, 0.0 }
 0xcfa   :  { %v3638_v12 = vpack.c.bf16 %v3526_v33, %v3510_v7  ;;  %v3640_v1 = vpack.c.bf16 %v3528_v48, %v3512_v0 }
 0xcfb   :  { %v3396_v17 = vpop.f32.mrb[100].mxu1  ;;  %v3469_v15 = vpop.f32.mrb[100].mxu0  ;;  %17321 = vmatpush3.bf16.msra.mxu1 %v19785_v63  ;;  %17361 = vmatpush3.bf16.msra.mxu0 %v19786_v44  ;;  %v3639_v18 = vpack.c.bf16 %v3527_v5, %v3511_v13  ;;  %v3641_v43 = vpack.c.bf16 %v3529_v16, %v3513_v46 }
 0xcfc   :  { %v3397_v29 = vadd.f32 %v3396_v17, %v21949_v52  ;;  %v3470_v32 = vadd.f32 %v3469_v15, %v21955_v59  ;;  %v3398_v47 = vpop.f32.mrb[101].mxu1  ;;  %v3471_v19 = vpop.f32.mrb[101].mxu0 }
 0xcfd   :  { %v3399_v41 = vadd.f32 %v3398_v47, %v21961_v38  ;;  %v3472_v35 = vadd.f32 %v3471_v19, %v21973_v39  ;;  %v3400_v22 = vpop.f32.mrb[102].mxu1  ;;  %v3473_v25 = vpop.f32.mrb[102].mxu0  ;;  %5143 = vmatprep.mubr.bf16.mxu1 %v3639_v18  ;;  %5208 = vmatprep.mubr.bf16.mxu0 %v3641_v43 }
 0xcfe   :  { %v3401_v23 = vadd.f32 %v3400_v22, %v21949_v52  ;;  %v3474_v42 = vadd.f32 %v3473_v25, %v21955_v59  ;;  %v3402_v30 = vpop.f32.mrb[103].mxu1  ;;  %v3475_v51 = vpop.f32.mrb[103].mxu0  ;;  %5144 = vmatmul.mubr.bf16.vlgmr.msra.gmra.mrb[160].mxu1 %v3638_v12  ;;  %5209 = vmatmul.mubr.bf16.vlgmr.msra.gmra.mrb[160].mxu0 %v3640_v1  ;;  %v3542_v45 = vmax.f32 %v3397_v29, 0.0  ;;  %v3544_v55 = vmax.f32 %v3470_v32, 0.0 }
 0xcff   :  { %v3403_v58 = vadd.f32 %v3402_v30, %v21961_v38  ;;  %v3476_v31 = vadd.f32 %v3475_v51, %v21973_v39  ;;  %v3543_v57 = vmax.f32 %v3399_v41, 0.0  ;;  %v3545_v9 = vmax.f32 %v3472_v35, 0.0 }
 0xd00   :  { %v3558_v53 = vmax.f32 %v3401_v23, 0.0  ;;  %v3560_v21 = vmax.f32 %v3474_v42, 0.0 }
 0xd01   :  { %v3559_v62 = vmax.f32 %v3403_v58, 0.0  ;;  %v3561_v40 = vmax.f32 %v3476_v31, 0.0 }
 0xd02   :  { %v3654_v20 = vpack.c.bf16 %v3558_v53, %v3542_v45  ;;  %v3656_v63 = vpack.c.bf16 %v3560_v21, %v3544_v55 }
 0xd03   :  { %v3406_v44 = vpop.f32.mrb[104].mxu1  ;;  %v3479_v7 = vpop.f32.mrb[104].mxu0  ;;  %v3655_v0 = vpack.c.bf16 %v3559_v62, %v3543_v57  ;;  %v3657_v33 = vpack.c.bf16 %v3561_v40, %v3545_v9 }
 0xd04   :  { %v3407_v48 = vadd.f32 %v3406_v44, %v21949_v52  ;;  %v3480_v13 = vadd.f32 %v3479_v7, %v21955_v59  ;;  %v3408_v46 = vpop.f32.mrb[105].mxu1  ;;  %v3481_v5 = vpop.f32.mrb[105].mxu0 }
 0xd05   :  { %v3409_v16 = vadd.f32 %v3408_v46, %v21961_v38  ;;  %v3482_v12 = vadd.f32 %v3481_v5, %v21973_v39  ;;  %v3410_v1 = vpop.f32.mrb[106].mxu1  ;;  %v3483_v17 = vpop.f32.mrb[106].mxu0  ;;  %5151 = vmatprep.mubr.bf16.mxu1 %v3655_v0  ;;  %5216 = vmatprep.mubr.bf16.mxu0 %v3657_v33 }
 0xd06   :  { %v3411_v15 = vadd.f32 %v3410_v1, %v21949_v52  ;;  %v3484_v18 = vadd.f32 %v3483_v17, %v21955_v59  ;;  %v3412_v43 = vpop.f32.mrb[107].mxu1  ;;  %v3485_v29 = vpop.f32.mrb[107].mxu0  ;;  %5152 = vmatmul.mubr.bf16.gmra.mrb[164].mxu1 %v3654_v20  ;;  %5217 = vmatmul.mubr.bf16.gmra.mrb[164].mxu0 %v3656_v63  ;;  %v3574_v19 = vmax.f32 %v3407_v48, 0.0  ;;  %v3576_v41 = vmax.f32 %v3480_v13, 0.0 }
 0xd07   :  { %v3413_v32 = vadd.f32 %v3412_v43, %v21961_v38  ;;  %v3486_v47 = vadd.f32 %v3485_v29, %v21973_v39  ;;  %v3575_v25 = vmax.f32 %v3409_v16, 0.0  ;;  %v3577_v23 = vmax.f32 %v3482_v12, 0.0 }
 0xd08   :  { %v3590_v35 = vmax.f32 %v3411_v15, 0.0  ;;  %v3592_v22 = vmax.f32 %v3484_v18, 0.0 }
 0xd09   :  { %v3591_v42 = vmax.f32 %v3413_v32, 0.0  ;;  %v3593_v30 = vmax.f32 %v3486_v47, 0.0 }
 0xd0a   :  { %v3670_v51 = vpack.c.bf16 %v3590_v35, %v3574_v19  ;;  %v3672_v58 = vpack.c.bf16 %v3592_v22, %v3576_v41 }
 0xd0b   :  { %v3416_v31 = vpop.f32.mrb[108].mxu1  ;;  %v3489_v45 = vpop.f32.mrb[108].mxu0  ;;  %v3671_v55 = vpack.c.bf16 %v3591_v42, %v3575_v25  ;;  %v3673_v53 = vpack.c.bf16 %v3593_v30, %v3577_v23 }
 0xd0c   :  { %v3417_v21 = vadd.f32 %v3416_v31, %v21949_v52  ;;  %v3490_v57 = vadd.f32 %v3489_v45, %v21955_v59  ;;  %v3418_v9 = vpop.f32.mrb[109].mxu1  ;;  %v3491_v62 = vpop.f32.mrb[109].mxu0 }
 0xd0d   :  { %v3419_v40 = vadd.f32 %v3418_v9, %v21961_v38  ;;  %v3492_v20 = vadd.f32 %v3491_v62, %v21973_v39  ;;  %v3420_v63 = vpop.f32.mrb[110].mxu1  ;;  %v3493_v44 = vpop.f32.mrb[110].mxu0  ;;  %5159 = vmatprep.mubr.bf16.mxu1 %v3671_v55  ;;  %5224 = vmatprep.mubr.bf16.mxu0 %v3673_v53 }
 0xd0e   :  { %v3421_v7 = vadd.f32 %v3420_v63, %v21949_v52  ;;  %v3494_v0 = vadd.f32 %v3493_v44, %v21955_v59  ;;  %v3422_v33 = vpop.f32.mrb[111].mxu1  ;;  %v3495_v48 = vpop.f32.mrb[111].mxu0  ;;  %5160 = vmatmul.mubr.bf16.gmra.mrb[168].mxu1 %v3670_v51  ;;  %5225 = vmatmul.mubr.bf16.gmra.mrb[168].mxu0 %v3672_v58  ;;  %v3606_v5 = vmax.f32 %v3417_v21, 0.0  ;;  %v3608_v16 = vmax.f32 %v3490_v57, 0.0 }
 0xd0f   :  { %v3423_v13 = vadd.f32 %v3422_v33, %v21961_v38  ;;  %v3496_v46 = vadd.f32 %v3495_v48, %v21973_v39  ;;  %v3607_v17 = vmax.f32 %v3419_v40, 0.0  ;;  %v3609_v15 = vmax.f32 %v3492_v20, 0.0  ;;  %v15466_v39 = vld [vmem:[%s25150_s21] ss:$0 sm:$0xff] }
 0xd10   :  { %v3622_v12 = vmax.f32 %v3421_v7, 0.0  ;;  %v3624_v1 = vmax.f32 %v3494_v0, 0.0 }
 0xd11   :  { %v3623_v18 = vmax.f32 %v3423_v13, 0.0  ;;  %v3625_v43 = vmax.f32 %v3496_v46, 0.0 }
 0xd12   :  { %v3686_v29 = vpack.c.bf16 %v3622_v12, %v3606_v5  ;;  %v3688_v52 = vpack.c.bf16 %v3624_v1, %v3608_v16 }
 0xd13   :  { %v3687_v32 = vpack.c.bf16 %v3623_v18, %v3607_v17  ;;  %v3689_v59 = vpack.c.bf16 %v3625_v43, %v3609_v15 }
 0xd15   :  { %5167 = vmatprep.mubr.bf16.mxu1 %v3687_v32  ;;  %5232 = vmatprep.mubr.bf16.mxu0 %v3689_v59 }
 0xd16   :  { %5168 = vmatmul.mubr.bf16.gmra.mrb[172].mxu1 %v3686_v29  ;;  %5233 = vmatmul.mubr.bf16.gmra.mrb[172].mxu0 %v3688_v52 }
 0xd71   :  { %v17082_v47 = vpop.f32.mrb[112].mxu1  ;;  %v17122_v38 = vpop.f32.mrb[112].mxu0 }
 0xd72   :  { %v17083_v19 = vpop.f32.mrb[113].mxu1  ;;  %v17123_v41 = vpop.f32.mrb[113].mxu0 }
 0xd73   :  { %v17084_v35 = vadd.f32 %v17083_v19, %v17082_v47  ;;  %v17124_v22 = vadd.f32 %v17123_v41, %v17122_v38  ;;  %v17085_v25 = vpop.f32.mrb[114].mxu1  ;;  %v17125_v23 = vpop.f32.mrb[114].mxu0 }
 0xd74   :  { %v17086_v42 = vpop.f32.mrb[115].mxu1  ;;  %v17126_v30 = vpop.f32.mrb[115].mxu0 }
 0xd75   :  { %v4756_v51 = vadd.f32 %v17084_v35, %v15466_v39  ;;  %v17087_v58 = vadd.f32 %v17086_v42, %v17085_v25  ;;  %v17127_v31 = vadd.f32 %v17126_v30, %v17125_v23 }
 0xd77   :  { %v4821_v45 = vadd.f32 %v17124_v22, %v4756_v51  ;;  %v4759_v55 = vadd.f32 %v17087_v58, %v15466_v39 }
 0xd79   :  { %v22034_v53 = vadd.f32 %v17127_v31, %v4759_v55  ;;  %v17088_v21 = vpop.f32.mrb[116].mxu1  ;;  %v17128_v57 = vpop.f32.mrb[116].mxu0 }
 0xd7a   :  { %v17089_v9 = vpop.f32.mrb[117].mxu1  ;;  %v17129_v62 = vpop.f32.mrb[117].mxu0 }
 0xd7b   :  { %v17090_v40 = vadd.f32 %v17089_v9, %v17088_v21  ;;  %v17130_v20 = vadd.f32 %v17129_v62, %v17128_v57  ;;  %v17091_v63 = vpop.f32.mrb[118].mxu1  ;;  %v17131_v44 = vpop.f32.mrb[118].mxu0 }
 0xd7c   :  { %v17092_v7 = vpop.f32.mrb[119].mxu1  ;;  %v17132_v0 = vpop.f32.mrb[119].mxu0 }
 0xd7d   :  { %v4764_v33 = vadd.f32 %v17090_v40, %v15466_v39  ;;  %v17093_v48 = vadd.f32 %v17092_v7, %v17091_v63  ;;  %v17133_v13 = vadd.f32 %v17132_v0, %v17131_v44 }
 0xd7f   :  { %v4829_v46 = vadd.f32 %v17130_v20, %v4764_v33  ;;  %v4767_v5 = vadd.f32 %v17093_v48, %v15466_v39 }
 0xd81   :  { %v22036_v16 = vadd.f32 %v17133_v13, %v4767_v5  ;;  %v17094_v12 = vpop.f32.mrb[120].mxu1  ;;  %v17134_v1 = vpop.f32.mrb[120].mxu0 }
 0xd82   :  { %v17095_v17 = vpop.f32.mrb[121].mxu1  ;;  %v17135_v15 = vpop.f32.mrb[121].mxu0 }
 0xd83   :  { %v17096_v18 = vadd.f32 %v17095_v17, %v17094_v12  ;;  %v17136_v43 = vadd.f32 %v17135_v15, %v17134_v1  ;;  %v17097_v29 = vpop.f32.mrb[122].mxu1  ;;  %v17137_v52 = vpop.f32.mrb[122].mxu0 }
 0xd84   :  { %v17098_v32 = vpop.f32.mrb[123].mxu1  ;;  %v17138_v59 = vpop.f32.mrb[123].mxu0 }
 0xd85   :  { %v4772_v47 = vadd.f32 %v17096_v18, %v15466_v39  ;;  %v17099_v38 = vadd.f32 %v17098_v32, %v17097_v29  ;;  %v17139_v19 = vadd.f32 %v17138_v59, %v17137_v52 }
 0xd87   :  { %v4775_v41 = vadd.f32 %v17099_v38, %v15466_v39  ;;  %v4837_v35 = vadd.f32 %v17136_v43, %v4772_v47 }
 0xd89   :  { %v17100_v22 = vpop.f32.mrb[124].mxu1  ;;  %v17140_v25 = vpop.f32.mrb[124].mxu0  ;;  %v4840_v23 = vadd.f32 %v17139_v19, %v4775_v41 }
 0xd8a   :  { %v17101_v42 = vpop.f32.mrb[125].mxu1  ;;  %v17141_v30 = vpop.f32.mrb[125].mxu0 }
 0xd8b   :  { %v17102_v51 = vadd.f32 %v17101_v42, %v17100_v22  ;;  %v17142_v58 = vadd.f32 %v17141_v30, %v17140_v25  ;;  %v17103_v31 = vpop.f32.mrb[126].mxu1  ;;  %v17143_v55 = vpop.f32.mrb[126].mxu0 }
 0xd8c   :  { %v17104_v21 = vpop.f32.mrb[127].mxu1  ;;  %v17144_v57 = vpop.f32.mrb[127].mxu0 }
 0xd8d   :  { %v4780_v9 = vadd.f32 %v17102_v51, %v15466_v39  ;;  %v17105_v62 = vadd.f32 %v17104_v21, %v17103_v31  ;;  %v17145_v40 = vadd.f32 %v17144_v57, %v17143_v55 }
 0xd8f   :  { %v4783_v20 = vadd.f32 %v17105_v62, %v15466_v39  ;;  %v4845_v63 = vadd.f32 %v17142_v58, %v4780_v9 }
 0xd91   :  { %v17162_v44 = vpop.f32.mrb[128].mxu1  ;;  %v17202_v7 = vpop.f32.mrb[128].mxu0  ;;  %v4848_v0 = vadd.f32 %v17145_v40, %v4783_v20 }
 0xd92   :  { %v17163_v33 = vpop.f32.mrb[129].mxu1  ;;  %v17203_v48 = vpop.f32.mrb[129].mxu0 }
 0xd93   :  { %v17164_v13 = vadd.f32 %v17163_v33, %v17162_v44  ;;  %v17204_v5 = vadd.f32 %v17203_v48, %v17202_v7  ;;  %v17165_v12 = vpop.f32.mrb[130].mxu1  ;;  %v17205_v1 = vpop.f32.mrb[130].mxu0 }
 0xd94   :  { %v17166_v17 = vpop.f32.mrb[131].mxu1  ;;  %v17206_v15 = vpop.f32.mrb[131].mxu0 }
 0xd95   :  { %v4886_v18 = vadd.f32 %v17164_v13, %v4821_v45  ;;  %v17167_v43 = vadd.f32 %v17166_v17, %v17165_v12  ;;  %v17207_v29 = vadd.f32 %v17206_v15, %v17205_v1 }
 0xd97   :  { %v4951_v52 = vadd.f32 %v17204_v5, %v4886_v18  ;;  %v4889_v32 = vadd.f32 %v17167_v43, %v22034_v53 }
 0xd99   :  { %v22039_v59 = vadd.f32 %v17207_v29, %v4889_v32  ;;  %v17168_v39 = vpop.f32.mrb[132].mxu1  ;;  %v17208_v47 = vpop.f32.mrb[132].mxu0 }
 0xd9a   :  { %v17169_v38 = vpop.f32.mrb[133].mxu1  ;;  %v17209_v19 = vpop.f32.mrb[133].mxu0 }
 0xd9b   :  { %v17170_v41 = vadd.f32 %v17169_v38, %v17168_v39  ;;  %v17210_v22 = vadd.f32 %v17209_v19, %v17208_v47  ;;  %v17171_v25 = vpop.f32.mrb[134].mxu1  ;;  %v17211_v42 = vpop.f32.mrb[134].mxu0 }
 0xd9c   :  { %v17172_v30 = vpop.f32.mrb[135].mxu1  ;;  %v17212_v51 = vpop.f32.mrb[135].mxu0 }
 0xd9d   :  { %v4894_v58 = vadd.f32 %v17170_v41, %v4829_v46  ;;  %v17173_v31 = vadd.f32 %v17172_v30, %v17171_v25  ;;  %v17213_v45 = vadd.f32 %v17212_v51, %v17211_v42 }
 0xd9f   :  { %v4959_v55 = vadd.f32 %v17210_v22, %v4894_v58  ;;  %v4897_v21 = vadd.f32 %v17173_v31, %v22036_v16 }
 0xda1   :  { %v22042_v57 = vadd.f32 %v17213_v45, %v4897_v21  ;;  %v17174_v53 = vpop.f32.mrb[136].mxu1  ;;  %v17214_v9 = vpop.f32.mrb[136].mxu0 }
 0xda2   :  { %v17175_v62 = vpop.f32.mrb[137].mxu1  ;;  %v17215_v40 = vpop.f32.mrb[137].mxu0 }
 0xda3   :  { %v17176_v20 = vadd.f32 %v17175_v62, %v17174_v53  ;;  %v17216_v44 = vadd.f32 %v17215_v40, %v17214_v9  ;;  %v17177_v7 = vpop.f32.mrb[138].mxu1  ;;  %v17217_v33 = vpop.f32.mrb[138].mxu0 }
 0xda4   :  { %v17178_v48 = vpop.f32.mrb[139].mxu1  ;;  %v17218_v13 = vpop.f32.mrb[139].mxu0 }
 0xda5   :  { %v4902_v5 = vadd.f32 %v17176_v20, %v4837_v35  ;;  %v17179_v12 = vadd.f32 %v17178_v48, %v17177_v7  ;;  %v17219_v46 = vadd.f32 %v17218_v13, %v17217_v33 }
 0xda7   :  { %v4967_v1 = vadd.f32 %v17216_v44, %v4902_v5  ;;  %v4905_v17 = vadd.f32 %v17179_v12, %v4840_v23 }
 0xda9   :  { %v22044_v15 = vadd.f32 %v17219_v46, %v4905_v17  ;;  %v17180_v16 = vpop.f32.mrb[140].mxu1  ;;  %v17220_v18 = vpop.f32.mrb[140].mxu0 }
 0xdaa   :  { %v17181_v43 = vpop.f32.mrb[141].mxu1  ;;  %v17221_v29 = vpop.f32.mrb[141].mxu0 }
 0xdab   :  { %v17182_v32 = vadd.f32 %v17181_v43, %v17180_v16  ;;  %v17222_v39 = vadd.f32 %v17221_v29, %v17220_v18  ;;  %v17183_v47 = vpop.f32.mrb[142].mxu1  ;;  %v17223_v38 = vpop.f32.mrb[142].mxu0 }
 0xdac   :  { %v17184_v19 = vpop.f32.mrb[143].mxu1  ;;  %v17224_v41 = vpop.f32.mrb[143].mxu0 }
 0xdad   :  { %v4910_v22 = vadd.f32 %v17182_v32, %v4845_v63  ;;  %v17185_v25 = vadd.f32 %v17184_v19, %v17183_v47  ;;  %v17225_v42 = vadd.f32 %v17224_v41, %v17223_v38 }
 0xdaf   :  { %v4975_v35 = vadd.f32 %v17222_v39, %v4910_v22  ;;  %v4913_v30 = vadd.f32 %v17185_v25, %v4848_v0 }
 0xdb1   :  { %v22046_v51 = vadd.f32 %v17225_v42, %v4913_v30  ;;  %v17242_v23 = vpop.f32.mrb[144].mxu1  ;;  %v17282_v58 = vpop.f32.mrb[144].mxu0 }
 0xdb2   :  { %v17243_v31 = vpop.f32.mrb[145].mxu1  ;;  %v17283_v45 = vpop.f32.mrb[145].mxu0 }
 0xdb3   :  { %v17244_v21 = vadd.f32 %v17243_v31, %v17242_v23  ;;  %v17284_v53 = vadd.f32 %v17283_v45, %v17282_v58  ;;  %v17245_v9 = vpop.f32.mrb[146].mxu1  ;;  %v17285_v62 = vpop.f32.mrb[146].mxu0 }
 0xdb4   :  { %v17246_v40 = vpop.f32.mrb[147].mxu1  ;;  %v17286_v20 = vpop.f32.mrb[147].mxu0 }
 0xdb5   :  { %v5016_v44 = vadd.f32 %v17244_v21, %v4951_v52  ;;  %v17247_v7 = vadd.f32 %v17246_v40, %v17245_v9  ;;  %v17287_v33 = vadd.f32 %v17286_v20, %v17285_v62 }
 0xdb7   :  { %v5081_v63 = vadd.f32 %v17284_v53, %v5016_v44  ;;  %v5019_v48 = vadd.f32 %v17247_v7, %v22039_v59 }
 0xdb9   :  { %v5084_v13 = vadd.f32 %v17287_v33, %v5019_v48  ;;  %v17248_v0 = vpop.f32.mrb[148].mxu1  ;;  %v17288_v5 = vpop.f32.mrb[148].mxu0 }
 0xdba   :  { %v17249_v12 = vpop.f32.mrb[149].mxu1  ;;  %v17289_v46 = vpop.f32.mrb[149].mxu0 }
 0xdbb   :  { %v17250_v17 = vadd.f32 %v17249_v12, %v17248_v0  ;;  %v17290_v16 = vadd.f32 %v17289_v46, %v17288_v5  ;;  %v17251_v18 = vpop.f32.mrb[150].mxu1  ;;  %v17291_v43 = vpop.f32.mrb[150].mxu0 }
 0xdbc   :  { %v17252_v29 = vpop.f32.mrb[151].mxu1  ;;  %v17292_v32 = vpop.f32.mrb[151].mxu0 }
 0xdbd   :  { %v5024_v39 = vadd.f32 %v17250_v17, %v4959_v55  ;;  %v17253_v47 = vadd.f32 %v17252_v29, %v17251_v18  ;;  %v17293_v38 = vadd.f32 %v17292_v32, %v17291_v43 }
 0xdbf   :  { %v22049_v52 = vadd.f32 %v17290_v16, %v5024_v39  ;;  %v5027_v19 = vadd.f32 %v17253_v47, %v22042_v57 }
 0xdc1   :  { %v22052_v41 = vadd.f32 %v17293_v38, %v5027_v19  ;;  %v17254_v59 = vpop.f32.mrb[152].mxu1  ;;  %v17294_v22 = vpop.f32.mrb[152].mxu0 }
 0xdc2   :  { %v17255_v25 = vpop.f32.mrb[153].mxu1  ;;  %v17295_v42 = vpop.f32.mrb[153].mxu0 }
 0xdc3   :  { %v17256_v30 = vadd.f32 %v17255_v25, %v17254_v59  ;;  %v17296_v23 = vadd.f32 %v17295_v42, %v17294_v22  ;;  %v17257_v58 = vpop.f32.mrb[154].mxu1  ;;  %v17297_v31 = vpop.f32.mrb[154].mxu0 }
 0xdc4   :  { %v17258_v45 = vpop.f32.mrb[155].mxu1  ;;  %v17298_v21 = vpop.f32.mrb[155].mxu0 }
 0xdc5   :  { %v5032_v53 = vadd.f32 %v17256_v30, %v4967_v1  ;;  %v17259_v55 = vadd.f32 %v17258_v45, %v17257_v58  ;;  %v17299_v9 = vadd.f32 %v17298_v21, %v17297_v31 }
 0xdc7   :  { %v22054_v62 = vadd.f32 %v17296_v23, %v5032_v53  ;;  %v5035_v40 = vadd.f32 %v17259_v55, %v22044_v15 }
 0xdc9   :  { %v22057_v57 = vadd.f32 %v17299_v9, %v5035_v40  ;;  %v17260_v20 = vpop.f32.mrb[156].mxu1  ;;  %v17300_v44 = vpop.f32.mrb[156].mxu0 }
 0xdca   :  { %v17261_v7 = vpop.f32.mrb[157].mxu1  ;;  %v17301_v33 = vpop.f32.mrb[157].mxu0 }
 0xdcb   :  { %v17262_v48 = vadd.f32 %v17261_v7, %v17260_v20  ;;  %v17302_v0 = vadd.f32 %v17301_v33, %v17300_v44  ;;  %v17263_v5 = vpop.f32.mrb[158].mxu1  ;;  %v17303_v12 = vpop.f32.mrb[158].mxu0 }
 0xdcc   :  { %v17264_v46 = vpop.f32.mrb[159].mxu1  ;;  %v17304_v17 = vpop.f32.mrb[159].mxu0 }
 0xdcd   :  { %v5040_v16 = vadd.f32 %v17262_v48, %v4975_v35  ;;  %v17265_v1 = vadd.f32 %v17264_v46, %v17263_v5  ;;  %v17305_v18 = vadd.f32 %v17304_v17, %v17303_v12 }
 0xdcf   :  { %v22059_v43 = vadd.f32 %v17302_v0, %v5040_v16  ;;  %v5043_v29 = vadd.f32 %v17265_v1, %v22046_v51 }
 0xdd1   :  { %v22062_v15 = vadd.f32 %v17305_v18, %v5043_v29  ;;  %v17322_v32 = vpop.f32.mrb[160].mxu1  ;;  %v17362_v39 = vpop.f32.mrb[160].mxu0 }
 0xdd2   :  { %v17323_v47 = vpop.f32.mrb[161].mxu1  ;;  %v17363_v38 = vpop.f32.mrb[161].mxu0 }
 0xdd3   :  { %v17324_v19 = vadd.f32 %v17323_v47, %v17322_v32  ;;  %v17364_v59 = vadd.f32 %v17363_v38, %v17362_v39  ;;  %v17325_v22 = vpop.f32.mrb[162].mxu1  ;;  %v17365_v25 = vpop.f32.mrb[162].mxu0 }
 0xdd4   :  { %v17326_v42 = vpop.f32.mrb[163].mxu1  ;;  %v17366_v30 = vpop.f32.mrb[163].mxu0 }
 0xdd5   :  { %v5146_v23 = vadd.f32 %v17324_v19, %v5081_v63  ;;  %v17327_v35 = vadd.f32 %v17326_v42, %v17325_v22  ;;  %v17367_v58 = vadd.f32 %v17366_v30, %v17365_v25 }
 0xdd7   :  { %v5149_v31 = vadd.f32 %v17327_v35, %v5084_v13  ;;  %v5211_v45 = vadd.f32 %v17364_v59, %v5146_v23 }
 0xdd9   :  { %v17328_v21 = vpop.f32.mrb[164].mxu1  ;;  %v17368_v53 = vpop.f32.mrb[164].mxu0  ;;  %v22065_v51 = vadd.f32 %v5211_v45, %v21204_v36  ;;  %v5214_v55 = vadd.f32 %v17367_v58, %v5149_v31 }
 0xdda   :  { %v17329_v9 = vpop.f32.mrb[165].mxu1  ;;  %v17369_v40 = vpop.f32.mrb[165].mxu0 }
 0xddb   :  { %v17330_v20 = vadd.f32 %v17329_v9, %v17328_v21  ;;  %v17370_v44 = vadd.f32 %v17369_v40, %v17368_v53  ;;  %v17331_v7 = vpop.f32.mrb[166].mxu1  ;;  %v17371_v33 = vpop.f32.mrb[166].mxu0  ;;  %v5251_v48 = vsel %vm187_vm2, %v22065_v51, 0.0  ;;  %v22070_v63 = vadd.f32 %v5214_v55, %v21197_v60 }
 0xddc   :  { %v17332_v13 = vpop.f32.mrb[167].mxu1  ;;  %v17372_v0 = vpop.f32.mrb[167].mxu0  ;;  %5252 = vadd.xlane.f32.xlu0 %v5251_v48 }
 0xddd   :  { %v5154_v5 = vadd.f32 %v17330_v20, %v22049_v52  ;;  %v17333_v36 = vadd.f32 %v17332_v13, %v17331_v7  ;;  %v17373_v12 = vadd.f32 %v17372_v0, %v17371_v33  ;;  %v5254_v46 = vsel %vm187_vm2, %v22070_v63, 0.0 }
 0xdde   :  { %5255 = vadd.xlane.f32.xlu1 %v5254_v46 }
 0xddf   :  { %v5157_v17 = vadd.f32 %v17333_v36, %v22052_v41  ;;  %v5219_v16 = vadd.f32 %v17370_v44, %v5154_v5 }
 0xde1   :  { %v17334_v1 = vpop.f32.mrb[168].mxu1  ;;  %v17374_v18 = vpop.f32.mrb[168].mxu0  ;;  %v22077_v29 = vadd.f32 %v5219_v16, %v21260_v2  ;;  %v5222_v60 = vadd.f32 %v17373_v12, %v5157_v17 }
 0xde2   :  { %v17335_v32 = vpop.f32.mrb[169].mxu1  ;;  %v17375_v39 = vpop.f32.mrb[169].mxu0 }
 0xde3   :  { %v17336_v47 = vadd.f32 %v17335_v32, %v17334_v1  ;;  %v17376_v38 = vadd.f32 %v17375_v39, %v17374_v18  ;;  %v17337_v52 = vpop.f32.mrb[170].mxu1  ;;  %v17377_v19 = vpop.f32.mrb[170].mxu0  ;;  %v5257_v59 = vsel %vm187_vm2, %v22077_v29, 0.0  ;;  %v5244_v22 = vadd.f32 %v5222_v60, %v21247_v56 }
 0xde4   :  { %v17338_v25 = vpop.f32.mrb[171].mxu1  ;;  %v17378_v41 = vpop.f32.mrb[171].mxu0  ;;  %5258 = vadd.xlane.f32.xlu0 %v5257_v59 }
 0xde5   :  { %v5162_v42 = vadd.f32 %v17336_v47, %v22054_v62  ;;  %v17339_v30 = vadd.f32 %v17338_v25, %v17337_v52  ;;  %v17379_v2 = vadd.f32 %v17378_v41, %v17377_v19  ;;  %v5260_v23 = vsel %vm187_vm2, %v5244_v22, 0.0 }
 0xde6   :  { %5261 = vadd.xlane.f32.xlu1 %v5260_v23 }
 0xde7   :  { %v5165_v35 = vadd.f32 %v17339_v30, %v22057_v57  ;;  %v5227_v58 = vadd.f32 %v17376_v38, %v5162_v42 }
 0xde9   :  { %v17340_v31 = vpop.f32.mrb[172].mxu1  ;;  %v17380_v45 = vpop.f32.mrb[172].mxu0  ;;  %v5245_v21 = vadd.f32 %v5227_v58, %v21282_v34  ;;  %v5230_v53 = vadd.f32 %v17379_v2, %v5165_v35 }
 0xdea   :  { %v17341_v55 = vpop.f32.mrb[173].mxu1  ;;  %v17381_v56 = vpop.f32.mrb[173].mxu0 }
 0xdeb   :  { %v17342_v9 = vadd.f32 %v17341_v55, %v17340_v31  ;;  %v17382_v40 = vadd.f32 %v17381_v56, %v17380_v45  ;;  %v17343_v20 = vpop.f32.mrb[174].mxu1  ;;  %v17383_v44 = vpop.f32.mrb[174].mxu0  ;;  %v5263_v62 = vsel %vm187_vm2, %v5245_v21, 0.0  ;;  %v5246_v7 = vadd.f32 %v5230_v53, %v21279_v4 }
 0xdec   :  { %v17344_v33 = vpop.f32.mrb[175].mxu1  ;;  %v17384_v48 = vpop.f32.mrb[175].mxu0  ;;  %5264 = vadd.xlane.f32.xlu0 %v5263_v62 }
 0xded   :  { %v5170_v57 = vadd.f32 %v17342_v9, %v22059_v43  ;;  %v17345_v13 = vadd.f32 %v17344_v33, %v17343_v20  ;;  %v17385_v0 = vadd.f32 %v17384_v48, %v17383_v44  ;;  %v5266_v34 = vsel %vm187_vm2, %v5246_v7, 0.0 }
 0xdee   :  { %5267 = vadd.xlane.f32.xlu1 %v5266_v34 }
 0xdef   :  { %v5173_v5 = vadd.f32 %v17345_v13, %v22062_v15  ;;  %v5235_v36 = vadd.f32 %v17382_v40, %v5170_v57  ;;  %v15597_v57 = vld [vmem:[%s25180_s29 + $0x40] sm:$0xff]  ;;  %v15598_v13 = vld [vmem:[%s25180_s29 + $0x48] sm:$0xff] }
 0xdf0   :  { %v19347_v34 = vpack.c.bf16 %v15598_v13, %v15597_v57 }
 0xdf1   :  { %v5247_v12 = vadd.f32 %v5235_v36, %v21302_v11  ;;  %v5238_v46 = vadd.f32 %v17385_v0, %v5173_v5  ;;  %v15625_v0 = vld [vmem:[%s25141_s12 + $0x40] sm:$0xff]  ;;  %v15626_v5 = vld [vmem:[%s25141_s12 + $0x48] sm:$0xff] }
 0xdf2   :  { %v19363_v36 = vpack.c.bf16 %v15626_v5, %v15625_v0  ;;  %19348 = vmatprep.subr.bf16.mxu1 %v19347_v34 }
 0xdf3   :  { %v5269_v17 = vsel %vm187_vm2, %v5247_v12, 0.0  ;;  %v5248_v4 = vadd.f32 %v5238_v46, %v21299_v10  ;;  %19350 = vmatpush3.bf16.msra.mxu1 %v19347_v34  ;;  %v15600_v46 = vld [vmem:[%s25180_s29 + $0x58] sm:$0xff] }
 0xdf4   :  { %5270 = vadd.xlane.f32.xlu0 %v5269_v17  ;;  %19364 = vmatprep.subr.bf16.mxu0 %v19363_v36  ;;  %v15627_v17 = vld [vmem:[%s25141_s12 + $0x50] sm:$0xff] }
 0xdf5   :  { %v5272_v16 = vsel %vm187_vm2, %v5248_v4, 0.0  ;;  %19366 = vmatpush3.bf16.msra.mxu0 %v19363_v36 }
 0xdf6   :  { %5273 = vadd.xlane.f32.xlu1 %v5272_v16  ;;  %v15628_v16 = vld [vmem:[%s25141_s12 + $0x58] sm:$0xff] }
 0xe69   :  { %v5253_v43 = vpop.xlane.xlu0 %5252 }
 0xe6a   :  { %v5275_v1 = vmul.f32 0.03125, %v5253_v43  ;;  %v19367_v43 = vpack.c.bf16 %v15628_v16, %v15627_v17 }
 0xe6b   :  { %v5256_v18 = vpop.xlane.xlu1 %5255 }
 0xe6c   :  { %v22096_v60 = vsub.f32 %v22065_v51, %v5275_v1  ;;  %v5276_v32 = vmul.f32 0.03125, %v5256_v18  ;;  %19368 = vmatprep.subr.bf16.mxu0 %v19367_v43  ;;  %v15611_v1 = vld [vmem:[%s25181_s7 + $0x40] sm:$0xff]  ;;  %v15612_v18 = vld [vmem:[%s25181_s7 + $0x48] sm:$0xff] }
 0xe6d   :  { %19370 = vmatpush3.bf16.msra.mxu0 %v19367_v43 }
 0xe6e   :  { %v22099_v15 = vsub.f32 %v22070_v63, %v5276_v32  ;;  %v5291_v11 = vmul.f32 %v22096_v60, %v22096_v60  ;;  %v19355_v32 = vpack.c.bf16 %v15612_v18, %v15611_v1 }
 0xe70   :  { %v5299_v39 = vsel %vm187_vm2, %v5291_v11, 0.0  ;;  %v5292_v10 = vmul.f32 %v22099_v15, %v22099_v15 }
 0xe71   :  { %v5259_v47 = vpop.xlane.xlu0 %5258  ;;  %5300 = vadd.xlane.f32.xlu0 %v5299_v39 }
 0xe72   :  { %v5277_v38 = vmul.f32 0.03125, %v5259_v47  ;;  %v5302_v52 = vsel %vm187_vm2, %v5292_v10, 0.0 }
 0xe73   :  { %v5262_v19 = vpop.xlane.xlu1 %5261  ;;  %5303 = vadd.xlane.f32.xlu1 %v5302_v52 }
 0xe74   :  { %v22108_v51 = vsub.f32 %v22077_v29, %v5277_v38  ;;  %v5278_v63 = vmul.f32 0.03125, %v5262_v19 }
 0xe76   :  { %v22110_v59 = vsub.f32 %v5244_v22, %v5278_v63  ;;  %v5293_v25 = vmul.f32 %v22108_v51, %v22108_v51 }
 0xe78   :  { %v5305_v41 = vsel %vm187_vm2, %v5293_v25, 0.0  ;;  %v5294_v42 = vmul.f32 %v22110_v59, %v22110_v59 }
 0xe79   :  { %v5265_v30 = vpop.xlane.xlu0 %5264  ;;  %5306 = vadd.xlane.f32.xlu0 %v5305_v41 }
 0xe7a   :  { %v5279_v2 = vmul.f32 0.03125, %v5265_v30  ;;  %v5308_v23 = vsel %vm187_vm2, %v5294_v42, 0.0 }
 0xe7b   :  { %v5268_v35 = vpop.xlane.xlu1 %5267  ;;  %5309 = vadd.xlane.f32.xlu1 %v5308_v23  ;;  %v22171_v23 = vld [vmem:[%s25151_s22] ss:$0 sm:$0xff] }
 0xe7c   :  { %v22118_v29 = vsub.f32 %v5245_v21, %v5279_v2  ;;  %v5280_v58 = vmul.f32 0.03125, %v5268_v35 }
 0xe7e   :  { %v22120_v22 = vsub.f32 %v5246_v7, %v5280_v58  ;;  %v5295_v31 = vmul.f32 %v22118_v29, %v22118_v29 }
 0xe80   :  { %v5311_v45 = vsel %vm187_vm2, %v5295_v31, 0.0  ;;  %v5296_v53 = vmul.f32 %v22120_v22, %v22120_v22 }
 0xe81   :  { %5312 = vadd.xlane.f32.xlu0 %v5311_v45  ;;  %v5271_v55 = vpop.xlane.xlu0 %5270  ;;  %v15596_v45 = vld [vmem:[%s25152_s23] ss:$0 sm:$0xff] }
 0xe82   :  { %v5281_v56 = vmul.f32 0.03125, %v5271_v55  ;;  %v5314_v9 = vsel %vm187_vm2, %v5296_v53, 0.0 }
 0xe83   :  { %5315 = vadd.xlane.f32.xlu1 %v5314_v9  ;;  %v5274_v40 = vpop.xlane.xlu1 %5273 }
 0xe84   :  { %v22128_v21 = vsub.f32 %v5247_v12, %v5281_v56  ;;  %v5282_v20 = vmul.f32 0.03125, %v5274_v40  ;;  %v15599_v12 = vld [vmem:[%s25180_s29 + $0x50] sm:$0xff] }
 0xe86   :  { %v22130_v44 = vsub.f32 %v5248_v4, %v5282_v20  ;;  %v5297_v62 = vmul.f32 %v22128_v21, %v22128_v21  ;;  %v19351_v4 = vpack.c.bf16 %v15600_v46, %v15599_v12 }
 0xe88   :  { %v5317_v7 = vsel %vm187_vm2, %v5297_v62, 0.0  ;;  %v5298_v33 = vmul.f32 %v22130_v44, %v22130_v44  ;;  %19352 = vmatprep.subr.bf16.mxu1 %v19351_v4  ;;  %v15613_v62 = vld [vmem:[%s25181_s7 + $0x50] sm:$0xff] }
 0xe89   :  { %5318 = vadd.xlane.f32.xlu0 %v5317_v7  ;;  %19354 = vmatpush3.bf16.msra.mxu1 %v19351_v4 }
 0xe8a   :  { %v5320_v48 = vsel %vm187_vm2, %v5298_v33, 0.0  ;;  %19356 = vmatprep.subr.bf16.mxu1 %v19355_v32 }
 0xe8b   :  { %5321 = vadd.xlane.f32.xlu1 %v5320_v48 }
 0xefe   :  { %v5301_v11 = vpop.xlane.xlu0 %5300 }
 0xeff   :  { %v5323_v39 = vmul.f32 0.03125, %v5301_v11 }
 0xf00   :  { %v5304_v10 = vpop.xlane.xlu1 %5303 }
 0xf01   :  { %v5331_v47 = vadd.f32 1e-05, %v5323_v39  ;;  %v5324_v38 = vmul.f32 0.03125, %v5304_v10 }
 0xf03   :  { %20127 = vrsqrt.f32 %v5331_v47  ;;  %v5332_v52 = vadd.f32 1e-05, %v5324_v38 }
 0xf05   :  { %20129 = vrsqrt.f32 %v5332_v52 }
 0xf06   :  { %v5307_v19 = vpop.xlane.xlu0 %5306 }
 0xf07   :  { %v5325_v63 = vmul.f32 0.03125, %v5307_v19 }
 0xf08   :  { %v5310_v25 = vpop.xlane.xlu1 %5309 }
 0xf09   :  { %v5333_v41 = vadd.f32 1e-05, %v5325_v63  ;;  %v5326_v42 = vmul.f32 0.03125, %v5310_v25 }
 0xf0b   :  { %20131 = vrsqrt.f32 %v5333_v41  ;;  %v5334_v30 = vadd.f32 1e-05, %v5326_v42 }
 0xf0d   :  { %v20128_v2 = vpop.eup %20127  ;;  %20133 = vrsqrt.f32 %v5334_v30 }
 0xf0e   :  { %v5347_v35 = vmul.f32 %v20128_v2, %v22096_v60  ;;  %v5313_v58 = vpop.xlane.xlu0 %5312  ;;  %v15614_v60 = vld [vmem:[%s25181_s7 + $0x58] sm:$0xff] }
 0xf0f   :  { %v20130_v31 = vpop.eup %20129  ;;  %v5327_v53 = vmul.f32 0.03125, %v5313_v58 }
 0xf10   :  { %v5361_v55 = vmul.f32 %v22171_v23, %v5347_v35  ;;  %v5348_v56 = vmul.f32 %v20130_v31, %v22099_v15  ;;  %v5316_v9 = vpop.xlane.xlu1 %5315  ;;  %v19359_v15 = vpack.c.bf16 %v15614_v60, %v15613_v62 }
 0xf11   :  { %v5335_v40 = vadd.f32 1e-05, %v5327_v53  ;;  %v5328_v20 = vmul.f32 0.03125, %v5316_v9 }
 0xf12   :  { %v22185_v7 = vadd.f32 %v15596_v45, %v5361_v55  ;;  %v5362_v33 = vmul.f32 %v22171_v23, %v5348_v56 }
 0xf13   :  { %20135 = vrsqrt.f32 %v5335_v40  ;;  %v5336_v48 = vadd.f32 1e-05, %v5328_v20 }
 0xf14   :  { %v22188_v57 = vadd.f32 %v15596_v45, %v5362_v33  ;;  %18656 = vmatprep.mubr.msk.f32.mxu1 %vm187_vm2, %v22185_v7  ;;  %18696 = vmatprep.mubr.msk.f32.mxu0 %vm187_vm2, %v22185_v7 }
 0xf15   :  { %v20132_v13 = vpop.eup %20131  ;;  %20137 = vrsqrt.f32 %v5336_v48 }
 0xf16   :  { %v5349_v0 = vmul.f32 %v20132_v13, %v22108_v51  ;;  %18657 = vmatmul.mubr.msk.f32.vlgmr.msra.gmra.mrb[46].mxu1 %vm187_vm2, %v22188_v57  ;;  %18697 = vmatmul.mubr.msk.f32.vlgmr.msra.gmra.mrb[176].mxu0 %vm187_vm2, %v22188_v57  ;;  %v5319_v34 = vpop.xlane.xlu0 %5318 }
 0xf17   :  { %v20134_v5 = vpop.eup %20133  ;;  %v5329_v36 = vmul.f32 0.03125, %v5319_v34  ;;  %19358 = vmatpush3.bf16.msra.mxu1 %v19355_v32 }
 0xf18   :  { %v5363_v12 = vmul.f32 %v22171_v23, %v5349_v0  ;;  %v5350_v46 = vmul.f32 %v20134_v5, %v22110_v59  ;;  %v5322_v17 = vpop.xlane.xlu1 %5321  ;;  %19360 = vmatprep.subr.bf16.mxu1 %v19359_v15 }
 0xf19   :  { %v5337_v4 = vadd.f32 1e-05, %v5329_v36  ;;  %v5330_v16 = vmul.f32 0.03125, %v5322_v17 }
 0xf1a   :  { %v22201_v43 = vadd.f32 %v15596_v45, %v5363_v12  ;;  %v5364_v51 = vmul.f32 %v22171_v23, %v5350_v46 }
 0xf1b   :  { %20139 = vrsqrt.f32 %v5337_v4  ;;  %v5338_v1 = vadd.f32 1e-05, %v5330_v16  ;;  %19362 = vmatpush3.bf16.msra.mxu1 %v19359_v15 }
 0xf1c   :  { %v22204_v18 = vadd.f32 %v15596_v45, %v5364_v51  ;;  %18659 = vmatprep.mubr.msk.f32.mxu1 %vm187_vm2, %v22201_v43  ;;  %18699 = vmatprep.mubr.msk.f32.mxu0 %vm187_vm2, %v22201_v43 }
 0xf1d   :  { %v20136_v59 = vpop.eup %20135  ;;  %20141 = vrsqrt.f32 %v5338_v1 }
 0xf1e   :  { %v5351_v32 = vmul.f32 %v20136_v59, %v22118_v29  ;;  %18660 = vmatmul.mubr.msk.f32.gmra.mrb[176].mxu1 %vm187_vm2, %v22204_v18  ;;  %18700 = vmatmul.mubr.msk.f32.gmra.mrb[178].mxu0 %vm187_vm2, %v22204_v18  ;;  %v15616_v59 = vld [vmem:[%s25140_s11 + $0x2] ss:$0 sm:$0xff] }
 0xf1f   :  { %v20138_v11 = vpop.eup %20137 }
 0xf20   :  { %v5365_v39 = vmul.f32 %v22171_v23, %v5351_v32  ;;  %v5352_v10 = vmul.f32 %v20138_v11, %v22120_v22 }
 0xf22   :  { %v22217_v47 = vadd.f32 %v15596_v45, %v5365_v39  ;;  %v5366_v38 = vmul.f32 %v22171_v23, %v5352_v10 }
 0xf24   :  { %v22220_v52 = vadd.f32 %v15596_v45, %v5366_v38  ;;  %18662 = vmatprep.mubr.msk.f32.mxu1 %vm187_vm2, %v22217_v47  ;;  %18702 = vmatprep.mubr.msk.f32.mxu0 %vm187_vm2, %v22217_v47 }
 0xf25   :  { %v20140_v29 = vpop.eup %20139 }
 0xf26   :  { %v5353_v19 = vmul.f32 %v20140_v29, %v22128_v21  ;;  %18663 = vmatmul.mubr.msk.f32.gmra.mrb[178].mxu1 %vm187_vm2, %v22220_v52  ;;  %18703 = vmatmul.mubr.msk.f32.gmra.mrb[180].mxu0 %vm187_vm2, %v22220_v52  ;;  %v15630_v21 = vld [vmem:[%s25142_s13 + $0x2] ss:$0 sm:$0xff] }
 0xf27   :  { %v20142_v22 = vpop.eup %20141 }
 0xf28   :  { %v5367_v63 = vmul.f32 %v22171_v23, %v5353_v19  ;;  %v5354_v25 = vmul.f32 %v20142_v22, %v22130_v44  ;;  %v22268_v44 = vld [vmem:[%s25184_s5 + $0x2] ss:$0 sm:$0xff] }
 0xf2a   :  { %v22233_v41 = vadd.f32 %v15596_v45, %v5367_v63  ;;  %v5368_v42 = vmul.f32 %v22171_v23, %v5354_v25 }
 0xf2c   :  { %v22236_v30 = vadd.f32 %v15596_v45, %v5368_v42  ;;  %18665 = vmatprep.mubr.msk.f32.mxu1 %vm187_vm2, %v22233_v41  ;;  %18705 = vmatprep.mubr.msk.f32.mxu0 %vm187_vm2, %v22233_v41 }
 0xf2e   :  { %18666 = vmatmul.mubr.msk.f32.gmra.mrb[180].mxu1 %vm187_vm2, %v22236_v30  ;;  %18706 = vmatmul.mubr.msk.f32.gmra.mrb[182].mxu0 %vm187_vm2, %v22236_v30 }
 0xf2f   :  { %18676 = vmatprep.mubr.msk.f32.mxu1 %vm187_vm2, %v22185_v7 }
 0xf32   :  { %18677 = vmatmul.mubr.msk.f32.vlgmr.msra.gmra.mrb[182].mxu1 %vm187_vm2, %v22188_v57 }
 0xf33   :  { %18679 = vmatprep.mubr.msk.f32.mxu1 %vm187_vm2, %v22201_v43 }
 0xf36   :  { %18680 = vmatmul.mubr.msk.f32.gmra.mrb[184].mxu1 %vm187_vm2, %v22204_v18 }
 0xf37   :  { %18682 = vmatprep.mubr.msk.f32.mxu1 %vm187_vm2, %v22217_v47 }
 0xf3a   :  { %18683 = vmatmul.mubr.msk.f32.gmra.mrb[186].mxu1 %vm187_vm2, %v22220_v52 }
 0xf3b   :  { %18685 = vmatprep.mubr.msk.f32.mxu1 %vm187_vm2, %v22233_v41 }
 0xf3e   :  { %18686 = vmatmul.mubr.msk.f32.gmra.mrb[188].mxu1 %vm187_vm2, %v22236_v30 }
 0xfe9   :  { %v22270_v2 = vpop.f32.mrb[46].mxu1  ;;  %v18698_v23 = vpop.f32.mrb[176].mxu0 }
 0xfea   :  { %v5728_v35 = vadd.f32 %v18698_v23, %v15630_v21  ;;  %v5486_v58 = vpop.f32.mrb[47].mxu1  ;;  %v5722_v31 = vpop.f32.mrb[177].mxu0 }
 0xfeb   :  { %v5487_v45 = vadd.f32 %v22268_v44, %v5486_v58  ;;  %v5723_v53 = vadd.f32 %v15630_v21, %v5722_v31 }
 0xfed   :  { %18716 = vmatprep.mubr.msk.f32.mxu1 %vm814_vm4, %v5487_v45  ;;  %v19395_v55 = vpack.c.bf16 %v5728_v35, %v5723_v53 }
 0xff1   :  { %v18661_v56 = vpop.f32.mrb[176].mxu1  ;;  %v18701_v9 = vpop.f32.mrb[178].mxu0 }
 0xff2   :  { %v5738_v40 = vadd.f32 %v18701_v9, %v15630_v21  ;;  %v5496_v20 = vpop.f32.mrb[177].mxu1  ;;  %v5732_v62 = vpop.f32.mrb[179].mxu0 }
 0xff3   :  { %v5733_v60 = vadd.f32 %v15630_v21, %v5732_v62 }
 0xff5   :  { %v19399_v33 = vpack.c.bf16 %v5738_v40, %v5733_v60  ;;  %v15665_v60 = vld [vmem:[%s25180_s29 + $0x60] sm:$0xff] }
 0xff9   :  { %v18664_v48 = vpop.f32.mrb[178].mxu1  ;;  %v18704_v15 = vpop.f32.mrb[180].mxu0 }
 0xffa   :  { %v5748_v13 = vadd.f32 %v18704_v15, %v15630_v21  ;;  %v5506_v0 = vpop.f32.mrb[179].mxu1  ;;  %v5742_v34 = vpop.f32.mrb[181].mxu0  ;;  %v15666_v15 = vld [vmem:[%s25180_s29 + $0x68] sm:$0xff] }
 0xffb   :  { %v5507_v5 = vadd.f32 %v22268_v44, %v5506_v0  ;;  %v5743_v36 = vadd.f32 %v15630_v21, %v5742_v34  ;;  %v19411_v0 = vpack.c.bf16 %v15666_v15, %v15665_v60  ;;  %v5497_v34 = vadd.f32 %v22268_v44, %v5496_v20 }
 0xffc   :  { %v5512_v20 = vadd.f32 %v18664_v48, %v22268_v44 }
 0xffd   :  { %18730 = vmatprep.mubr.msk.f32.mxu0 %vm814_vm4, %v5507_v5  ;;  %v22276_v12 = vpack.c.bf16 %v5748_v13, %v5743_v36  ;;  %v5492_v13 = vadd.f32 %v22270_v2, %v22268_v44  ;;  %v5502_v5 = vadd.f32 %v18661_v56, %v22268_v44  ;;  %v15667_v36 = vld [vmem:[%s25180_s29 + $0x70] sm:$0xff]  ;;  %v15668_v2 = vld [vmem:[%s25180_s29 + $0x78] sm:$0xff]  ;;  %v15694_v56 = vld [vmem:[%s25141_s12 + $0x68] sm:$0xff] }
0x1001   :  { %v18667_v46 = vpop.f32.mrb[180].mxu1  ;;  %v18707_v17 = vpop.f32.mrb[182].mxu0 }
0x1002   :  { %v5758_v4 = vadd.f32 %v18707_v17, %v15630_v21  ;;  %v5516_v16 = vpop.f32.mrb[181].mxu1  ;;  %v5752_v51 = vpop.f32.mrb[183].mxu0  ;;  %v19415_v17 = vpack.c.bf16 %v15668_v2, %v15667_v36 }
0x1003   :  { %v5753_v1 = vadd.f32 %v15630_v21, %v5752_v51  ;;  %v15696_v51 = vld [vmem:[%s25141_s12 + $0x78] sm:$0xff] }
0x1005   :  { %v18678_v32 = vpop.f32.mrb[182].mxu1  ;;  %v22281_v11 = vpack.c.bf16 %v5758_v4, %v5753_v1  ;;  %v5517_v4 = vadd.f32 %v22268_v44, %v5516_v16  ;;  %v15695_v16 = vld [vmem:[%s25141_s12 + $0x70] sm:$0xff] }
0x1006   :  { %v5610_v39 = vadd.f32 %v18678_v32, %v15616_v59  ;;  %v5604_v10 = vpop.f32.mrb[183].mxu1  ;;  %v19431_v1 = vpack.c.bf16 %v15696_v51, %v15695_v16 }
0x1007   :  { %v5605_v38 = vadd.f32 %v15616_v59, %v5604_v10 }
0x1009   :  { %v19371_v29 = vpack.c.bf16 %v5610_v39, %v5605_v38  ;;  %v18681_v19 = vpop.f32.mrb[184].mxu1 }
0x100a   :  { %v5620_v22 = vadd.f32 %v18681_v19, %v15616_v59  ;;  %v5614_v63 = vpop.f32.mrb[185].mxu1 }
0x100b   :  { %v5615_v25 = vadd.f32 %v15616_v59, %v5614_v63  ;;  %19373 = vmatprep.subr.msk.bf16.mxu1 %vm20719_vm5, %v19371_v29 }
0x100c   :  { %19376 = vmatpush3.bf16.xpose.msk.msra.mxu1 %vm20719_vm5, %v19371_v29 }
0x100d   :  { %v19377_v42 = vpack.c.bf16 %v5620_v22, %v5615_v25  ;;  %v18684_v21 = vpop.f32.mrb[186].mxu1 }
0x100e   :  { %v5630_v23 = vadd.f32 %v18684_v21, %v15616_v59  ;;  %v5624_v35 = vpop.f32.mrb[187].mxu1 }
0x100f   :  { %v5625_v58 = vadd.f32 %v15616_v59, %v5624_v35  ;;  %19379 = vmatprep.subr.msk.bf16.mxu1 %vm20719_vm5, %v19377_v42 }
0x1011   :  { %v19383_v31 = vpack.c.bf16 %v5630_v23, %v5625_v58  ;;  %v18687_v45 = vpop.f32.mrb[188].mxu1 }
0x1012   :  { %v5640_v53 = vadd.f32 %v18687_v45, %v15616_v59  ;;  %v5634_v9 = vpop.f32.mrb[189].mxu1 }
0x1013   :  { %v5635_v40 = vadd.f32 %v15616_v59, %v5634_v9  ;;  %19385 = vmatprep.subr.msk.bf16.mxu0 %vm20719_vm5, %v19383_v31 }
0x1014   :  { %19382 = vmatpush3.bf16.xpose.msk.msra.mxu1 %vm20719_vm5, %v19377_v42  ;;  %19388 = vmatpush3.bf16.xpose.msk.msra.mxu0 %vm20719_vm5, %v19383_v31 }
0x1015   :  { %v19389_v62 = vpack.c.bf16 %v5640_v53, %v5635_v40  ;;  %19396 = vmatprep.subr.bf16.mxu1 %v19395_v55 }
0x1017   :  { %19391 = vmatprep.subr.msk.bf16.mxu0 %vm20719_vm5, %v19389_v62 }
0x101b   :  { %18717 = vmatmul.mubr.msk.f32.vlgmr.msra.gmra.mrb[190].mxu1 %vm814_vm4, %v5492_v13 }
0x101c   :  { %18719 = vmatprep.mubr.msk.f32.mxu1 %vm814_vm4, %v5497_v34  ;;  %19394 = vmatpush3.bf16.xpose.msk.msra.mxu0 %vm20719_vm5, %v19389_v62 }
0x101d   :  { %19398 = vmatpush3.bf16.msra.mxu1 %v19395_v55  ;;  %19412 = vmatprep.subr.bf16.mxu0 %v19411_v0  ;;  %v15693_v55 = vld [vmem:[%s25141_s12 + $0x60] sm:$0xff] }
0x101e   :  { %19400 = vmatprep.subr.bf16.mxu1 %v19399_v33  ;;  %v19427_v48 = vpack.c.bf16 %v15694_v56, %v15693_v55 }
0x101f   :  { %18720 = vmatmul.mubr.msk.f32.gmra.mrb[192].mxu1 %vm814_vm4, %v5502_v5  ;;  %v15670_v5 = vld [vmem:[%s25184_s5 + $0x3] ss:$0 sm:$0xff] }
0x1021   :  { %19402 = vmatpush3.bf16.msra.mxu1 %v19399_v33  ;;  %v5522_v33 = vadd.f32 %v18667_v46, %v22268_v44 }
0x1022   :  { %19404 = vmatprep.subr.bf16.mxu1 %v22276_v12 }
0x1023   :  { %18731 = vmatmul.mubr.msk.f32.vlgmr.msra.gmra.mrb[184].mxu0 %vm814_vm4, %v5512_v20 }
0x1024   :  { %18733 = vmatprep.mubr.msk.f32.mxu0 %vm814_vm4, %v5517_v4  ;;  %19414 = vmatpush3.bf16.msra.mxu0 %v19411_v0 }
0x1025   :  { %19416 = vmatprep.subr.bf16.mxu0 %v19415_v17 }
0x1027   :  { %18734 = vmatmul.mubr.msk.f32.gmra.mrb[186].mxu0 %vm814_vm4, %v5522_v33 }
0x1028   :  { %19418 = vmatpush3.bf16.msra.mxu0 %v19415_v17  ;;  %18772 = vmatprep.mubr.msk.f32.mxu0 %vm187_vm2, %v22185_v7 }
0x1029   :  { %19428 = vmatprep.subr.bf16.mxu0 %v19427_v48 }
0x102b   :  { %18773 = vmatmul.mubr.msk.f32.vlgmr.msra.gmra.mrb[188].mxu0 %vm187_vm2, %v22188_v57 }
0x102c   :  { %18775 = vmatprep.mubr.msk.f32.mxu0 %vm187_vm2, %v22201_v43  ;;  %19430 = vmatpush3.bf16.msra.mxu0 %v19427_v48 }
0x102d   :  { %19432 = vmatprep.subr.bf16.mxu0 %v19431_v1 }
0x102f   :  { %18776 = vmatmul.mubr.msk.f32.gmra.mrb[190].mxu0 %vm187_vm2, %v22204_v18 }
0x1030   :  { %18778 = vmatprep.mubr.msk.f32.mxu0 %vm187_vm2, %v22217_v47  ;;  %19434 = vmatpush3.bf16.msra.mxu0 %v19431_v1 }
0x1033   :  { %18779 = vmatmul.mubr.msk.f32.gmra.mrb[192].mxu0 %vm187_vm2, %v22220_v52 }
0x1034   :  { %18781 = vmatprep.mubr.msk.f32.mxu0 %vm187_vm2, %v22233_v41 }
0x1037   :  { %18782 = vmatmul.mubr.msk.f32.gmra.mrb[194].mxu0 %vm187_vm2, %v22236_v30 }
0x1038   :  { %18812 = vmatprep.mubr.msk.f32.mxu0 %vm187_vm2, %v22185_v7 }
0x103b   :  { %18813 = vmatmul.mubr.msk.f32.vlgmr.msra.gmra.mrb[196].mxu0 %vm187_vm2, %v22188_v57 }
0x103c   :  { %18815 = vmatprep.mubr.msk.f32.mxu0 %vm187_vm2, %v22201_v43 }
0x103f   :  { %18816 = vmatmul.mubr.msk.f32.gmra.mrb[198].mxu0 %vm187_vm2, %v22204_v18 }
0x1040   :  { %18818 = vmatprep.mubr.msk.f32.mxu0 %vm187_vm2, %v22217_v47 }
0x1043   :  { %18819 = vmatmul.mubr.msk.f32.gmra.mrb[200].mxu0 %vm187_vm2, %v22220_v52 }
0x1044   :  { %18821 = vmatprep.mubr.msk.f32.mxu0 %vm187_vm2, %v22233_v41 }
0x1047   :  { %18822 = vmatmul.mubr.msk.f32.gmra.mrb[202].mxu0 %vm187_vm2, %v22236_v30 }
0x10ee   :  { %v18718_v44 = vpop.f32.mrb[190].mxu1 }
0x10ef   :  { %v5980_v46 = vmul.f32 0.25, %v18718_v44  ;;  %v5851_v59 = vpop.f32.mrb[191].mxu1 }
0x10f0   :  { %v5979_v32 = vmul.f32 0.25, %v5851_v59 }
0x10f1   :  { %v22370_v39 = vadd.f32 %v5980_v46, %v20818_v8 }
0x10f2   :  { %v18721_v10 = vpop.f32.mrb[192].mxu1  ;;  %v22373_v38 = vadd.f32 %v5979_v32, %v20818_v8 }
0x10f3   :  { %v5982_v29 = vmul.f32 0.25, %v18721_v10  ;;  %v5861_v19 = vpop.f32.mrb[193].mxu1  ;;  %v5998_v22 = vsel %vm187_vm2, %v22370_v39, -inf }
0x10f4   :  { %v5981_v63 = vmul.f32 0.25, %v5861_v19  ;;  %5999 = vmax.xlane.f32.xlu1 %v5998_v22  ;;  %v5995_v25 = vsel %vm187_vm2, %v22373_v38, -inf }
0x10f5   :  { %5996 = vmax.xlane.f32.xlu0 %v5995_v25  ;;  %v22380_v42 = vadd.f32 %v5982_v29, %v20818_v8 }
0x10f6   :  { %v18732_v21 = vpop.f32.mrb[184].mxu0  ;;  %v22383_v23 = vadd.f32 %v5981_v63, %v20818_v8  ;;  %v15698_v63 = vld [vmem:[%s25142_s13 + $0x3] ss:$0 sm:$0xff] }
0x10f7   :  { %v5984_v35 = vmul.f32 0.25, %v18732_v21  ;;  %v5960_v58 = vpop.f32.mrb[185].mxu0  ;;  %v6004_v31 = vsel %vm187_vm2, %v22380_v42, -inf }
0x10f8   :  { %v5983_v45 = vmul.f32 0.25, %v5960_v58  ;;  %6005 = vmax.xlane.f32.xlu1 %v6004_v31  ;;  %v6001_v53 = vsel %vm187_vm2, %v22383_v23, -inf }
0x10f9   :  { %6002 = vmax.xlane.f32.xlu0 %v6001_v53  ;;  %v22390_v9 = vadd.f32 %v5984_v35, %v20818_v8 }
0x10fa   :  { %v18735_v40 = vpop.f32.mrb[186].mxu0  ;;  %v22393_v62 = vadd.f32 %v5983_v45, %v20818_v8 }
0x10fb   :  { %v5986_v60 = vmul.f32 0.25, %v18735_v40  ;;  %v5970_v15 = vpop.f32.mrb[187].mxu0  ;;  %v6010_v13 = vsel %vm187_vm2, %v22390_v9, -inf }
0x10fc   :  { %v5985_v0 = vmul.f32 0.25, %v5970_v15  ;;  %6011 = vmax.xlane.f32.xlu1 %v6010_v13  ;;  %v6007_v34 = vsel %vm187_vm2, %v22393_v62, -inf }
0x10fd   :  { %6008 = vmax.xlane.f32.xlu0 %v6007_v34  ;;  %v22403_v36 = vadd.f32 %v5986_v60, %v20818_v8 }
0x10fe   :  { %v18774_v2 = vpop.f32.mrb[188].mxu0  ;;  %v22406_v20 = vadd.f32 %v5985_v0, %v20818_v8 }
0x10ff   :  { %v22408_v17 = vadd.f32 %v18774_v2, %v15670_v5  ;;  %v6359_v4 = vpop.f32.mrb[189].mxu0  ;;  %v6016_v55 = vsel %vm187_vm2, %v22403_v36, -inf }
0x1100   :  { %v22412_v56 = vadd.f32 %v15670_v5, %v6359_v4  ;;  %6017 = vmax.xlane.f32.xlu1 %v6016_v55  ;;  %v6013_v33 = vsel %vm187_vm2, %v22406_v20, -inf }
0x1101   :  { %6014 = vmax.xlane.f32.xlu0 %v6013_v33 }
0x1102   :  { %v18777_v48 = vpop.f32.mrb[190].mxu0 }
0x1103   :  { %v22416_v16 = vadd.f32 %v18777_v48, %v15670_v5  ;;  %v6369_v51 = vpop.f32.mrb[191].mxu0 }
0x1104   :  { %v22418_v1 = vadd.f32 %v15670_v5, %v6369_v51 }
0x1106   :  { %v18780_v44 = vpop.f32.mrb[192].mxu0 }
0x1107   :  { %v22420_v46 = vadd.f32 %v18780_v44, %v15670_v5  ;;  %v6379_v59 = vpop.f32.mrb[193].mxu0 }
0x1108   :  { %v6380_v32 = vadd.f32 %v15670_v5, %v6379_v59 }
0x110a   :  { %v18783_v10 = vpop.f32.mrb[194].mxu0  ;;  %18846 = vmatprep.mubr.msk.f32.mxu0 %vm814_vm4, %v6380_v32 }
0x110b   :  { %v22423_v29 = vadd.f32 %v18783_v10, %v15670_v5  ;;  %v6389_v19 = vpop.f32.mrb[195].mxu0 }
0x110c   :  { %v22425_v22 = vadd.f32 %v15670_v5, %v6389_v19 }
0x110e   :  { %v18814_v25 = vpop.f32.mrb[196].mxu0 }
0x110f   :  { %v6601_v21 = vadd.f32 %v18814_v25, %v15698_v63  ;;  %v6595_v35 = vpop.f32.mrb[197].mxu0 }
0x1110   :  { %v6596_v58 = vadd.f32 %v15698_v63, %v6595_v35 }
0x1112   :  { %v18817_v31 = vpop.f32.mrb[198].mxu0  ;;  %v22430_v45 = vpack.c.bf16 %v6601_v21, %v6596_v58 }
0x1113   :  { %v6611_v53 = vadd.f32 %v18817_v31, %v15698_v63  ;;  %v6605_v40 = vpop.f32.mrb[199].mxu0 }
0x1114   :  { %v6606_v60 = vadd.f32 %v15698_v63, %v6605_v40 }
0x1116   :  { %v18820_v15 = vpop.f32.mrb[200].mxu0  ;;  %v22432_v13 = vpack.c.bf16 %v6611_v53, %v6606_v60 }
0x1117   :  { %v6621_v0 = vadd.f32 %v18820_v15, %v15698_v63  ;;  %v6615_v34 = vpop.f32.mrb[201].mxu0 }
0x1118   :  { %v6616_v5 = vadd.f32 %v15698_v63, %v6615_v34 }
0x111a   :  { %v18823_v2 = vpop.f32.mrb[202].mxu0  ;;  %v22434_v4 = vpack.c.bf16 %v6621_v0, %v6616_v5 }
0x111b   :  { %v6631_v55 = vadd.f32 %v18823_v2, %v15698_v63  ;;  %v6625_v33 = vpop.f32.mrb[203].mxu0 }
0x111c   :  { %v6626_v48 = vadd.f32 %v15698_v63, %v6625_v33 }
0x111e   :  { %v22436_v51 = vpack.c.bf16 %v6631_v55, %v6626_v48 }
0x1181   :  { %v6000_v44 = vpop.xlane.xlu1 %5999 }
0x1182   :  { %v6020_v59 = vsub.f32 %v22370_v39, %v6000_v44  ;;  %v5997_v32 = vpop.xlane.xlu0 %5996 }
0x1183   :  { %v6019_v10 = vsub.f32 %v22373_v38, %v5997_v32 }
0x1184   :  { %v6029_v19 = vmul.f32 1.442695, %v6020_v59 }
0x1185   :  { %v6027_v25 = vmul.f32 1.442695, %v6019_v10  ;;  %v6006_v21 = vpop.xlane.xlu1 %6005 }
0x1186   :  { %20143 = vpow2.f32 %v6029_v19  ;;  %v6022_v35 = vsub.f32 %v22380_v42, %v6006_v21  ;;  %v6003_v58 = vpop.xlane.xlu0 %6002 }
0x1187   :  { %20145 = vpow2.f32 %v6027_v25  ;;  %v6021_v31 = vsub.f32 %v22383_v23, %v6003_v58 }
0x1188   :  { %v6033_v53 = vmul.f32 1.442695, %v6022_v35 }
0x1189   :  { %v6031_v63 = vmul.f32 1.442695, %v6021_v31  ;;  %v6012_v40 = vpop.xlane.xlu1 %6011 }
0x118a   :  { %20147 = vpow2.f32 %v6033_v53  ;;  %v6024_v60 = vsub.f32 %v22390_v9, %v6012_v40  ;;  %v6009_v39 = vpop.xlane.xlu0 %6008 }
0x118b   :  { %20149 = vpow2.f32 %v6031_v63  ;;  %v6023_v38 = vsub.f32 %v22393_v62, %v6009_v39 }
0x118c   :  { %v6037_v15 = vmul.f32 1.442695, %v6024_v60 }
0x118d   :  { %v6035_v0 = vmul.f32 1.442695, %v6023_v38  ;;  %v6018_v34 = vpop.xlane.xlu1 %6017 }
0x118e   :  { %20151 = vpow2.f32 %v6037_v15  ;;  %v6026_v42 = vsub.f32 %v22403_v36, %v6018_v34  ;;  %v6015_v5 = vpop.xlane.xlu0 %6014 }
0x118f   :  { %20153 = vpow2.f32 %v6035_v0  ;;  %v6025_v23 = vsub.f32 %v22406_v20, %v6015_v5 }
0x1190   :  { %v20144_v2 = vpop.eup %20143  ;;  %v6041_v55 = vmul.f32 1.442695, %v6026_v42 }
0x1191   :  { %v20146_v33 = vpop.eup %20145  ;;  %v6039_v48 = vmul.f32 1.442695, %v6025_v23  ;;  %v6046_v9 = vsel %vm187_vm2, %v20144_v2, 0.0 }
0x1192   :  { %20155 = vpow2.f32 %v6041_v55  ;;  %6047 = vadd.xlane.f32.xlu1 %v6046_v9  ;;  %v6043_v62 = vsel %vm187_vm2, %v20146_v33, 0.0  ;;  %v15680_v9 = vld [vmem:[%s25181_s7 + $0x68] sm:$0xff] }
0x1193   :  { %20157 = vpow2.f32 %v6039_v48  ;;  %6044 = vadd.xlane.f32.xlu0 %v6043_v62  ;;  %v15679_v48 = vld [vmem:[%s25181_s7 + $0x60] sm:$0xff] }
0x1194   :  { %v20148_v44 = vpop.eup %20147 }
0x1195   :  { %v20150_v59 = vpop.eup %20149  ;;  %v6052_v36 = vsel %vm187_vm2, %v20148_v44, 0.0 }
0x1196   :  { %6053 = vadd.xlane.f32.xlu1 %v6052_v36  ;;  %v6049_v32 = vsel %vm187_vm2, %v20150_v59, 0.0 }
0x1197   :  { %6050 = vadd.xlane.f32.xlu0 %v6049_v32 }
0x1198   :  { %v20152_v20 = vpop.eup %20151 }
0x1199   :  { %v20154_v10 = vpop.eup %20153  ;;  %v6058_v19 = vsel %vm187_vm2, %v20152_v20, 0.0 }
0x119a   :  { %6059 = vadd.xlane.f32.xlu1 %v6058_v19  ;;  %v6055_v25 = vsel %vm187_vm2, %v20154_v10, 0.0  ;;  %v15681_v19 = vld [vmem:[%s25181_s7 + $0x70] sm:$0xff] }
0x119b   :  { %6056 = vadd.xlane.f32.xlu0 %v6055_v25  ;;  %v15682_v25 = vld [vmem:[%s25181_s7 + $0x78] sm:$0xff] }
0x119c   :  { %v20156_v21 = vpop.eup %20155 }
0x119d   :  { %v20158_v35 = vpop.eup %20157  ;;  %v6064_v58 = vsel %vm187_vm2, %v20156_v21, 0.0 }
0x119e   :  { %6065 = vadd.xlane.f32.xlu1 %v6064_v58  ;;  %v6061_v31 = vsel %vm187_vm2, %v20158_v35, 0.0 }
0x119f   :  { %6062 = vadd.xlane.f32.xlu0 %v6061_v31 }
0x121f   :  { %v6048_v53 = vpop.xlane.xlu1 %6047 }
0x1220   :  { %20159 = vrcp.f32 %v6048_v53  ;;  %v6045_v63 = vpop.xlane.xlu0 %6044 }
0x1221   :  { %20161 = vrcp.f32 %v6045_v63 }
0x1223   :  { %v6054_v40 = vpop.xlane.xlu1 %6053 }
0x1224   :  { %20163 = vrcp.f32 %v6054_v40  ;;  %v6051_v60 = vpop.xlane.xlu0 %6050 }
0x1225   :  { %20165 = vrcp.f32 %v6051_v60 }
0x1227   :  { %v6060_v39 = vpop.xlane.xlu1 %6059 }
0x1228   :  { %20167 = vrcp.f32 %v6060_v39  ;;  %v6057_v38 = vpop.xlane.xlu0 %6056 }
0x1229   :  { %20169 = vrcp.f32 %v6057_v38 }
0x122a   :  { %v20160_v15 = vpop.eup %20159 }
0x122b   :  { %v20162_v0 = vpop.eup %20161  ;;  %v6066_v34 = vpop.xlane.xlu1 %6065  ;;  %v6076_v23 = vmul.f32 %v20160_v15, %v20144_v2 }
0x122c   :  { %20171 = vrcp.f32 %v6066_v34  ;;  %v6063_v42 = vpop.xlane.xlu0 %6062  ;;  %v6075_v5 = vmul.f32 %v20162_v0, %v20146_v33  ;;  %v19419_v33 = vpack.c.bf16 %v15680_v9, %v15679_v48 }
0x122d   :  { %20173 = vrcp.f32 %v6063_v42 }
0x122e   :  { %v20164_v55 = vpop.eup %20163  ;;  %18744 = vmatprep.mubr.msk.f32.mxu1 %vm187_vm2, %v6075_v5 }
0x122f   :  { %v20166_v62 = vpop.eup %20165  ;;  %18745 = vmatmul.mubr.msk.f32.vlgmr.msra.gmra.mrb[194].mxu1 %vm187_vm2, %v6076_v23  ;;  %v6078_v2 = vmul.f32 %v20164_v55, %v20148_v44  ;;  %v19423_v44 = vpack.c.bf16 %v15682_v25, %v15681_v19 }
0x1230   :  { %19406 = vmatpush3.bf16.msra.mxu1 %v22276_v12  ;;  %v6077_v36 = vmul.f32 %v20166_v62, %v20150_v59 }
0x1231   :  { %19408 = vmatprep.subr.bf16.mxu1 %v22281_v11 }
0x1232   :  { %v20168_v32 = vpop.eup %20167  ;;  %18747 = vmatprep.mubr.msk.f32.mxu1 %vm187_vm2, %v6077_v36 }
0x1233   :  { %v20170_v58 = vpop.eup %20169  ;;  %18748 = vmatmul.mubr.msk.f32.gmra.mrb[196].mxu1 %vm187_vm2, %v6078_v2  ;;  %v6080_v59 = vmul.f32 %v20168_v32, %v20152_v20 }
0x1234   :  { %19410 = vmatpush3.bf16.msra.mxu1 %v22281_v11  ;;  %v6079_v12 = vmul.f32 %v20170_v58, %v20154_v10 }
0x1235   :  { %19420 = vmatprep.subr.bf16.mxu1 %v19419_v33 }
0x1236   :  { %v20172_v31 = vpop.eup %20171  ;;  %18758 = vmatprep.mubr.msk.f32.mxu1 %vm187_vm2, %v6079_v12 }
0x1237   :  { %v20174_v53 = vpop.eup %20173  ;;  %18759 = vmatmul.mubr.msk.f32.vlgmr.msra.gmra.mrb[198].mxu1 %vm187_vm2, %v6080_v59  ;;  %v6082_v40 = vmul.f32 %v20172_v31, %v20156_v21 }
0x1238   :  { %19422 = vmatpush3.bf16.msra.mxu1 %v19419_v33  ;;  %v6081_v63 = vmul.f32 %v20174_v53, %v20158_v35 }
0x1239   :  { %19424 = vmatprep.subr.bf16.mxu1 %v19423_v44 }
0x123a   :  { %18761 = vmatprep.mubr.msk.f32.mxu1 %vm187_vm2, %v6081_v63 }
0x123b   :  { %18762 = vmatmul.mubr.msk.f32.gmra.mrb[200].mxu1 %vm187_vm2, %v6082_v40 }
0x123c   :  { %19426 = vmatpush3.bf16.msra.mxu1 %v19423_v44  ;;  %18792 = vmatprep.mubr.msk.f32.mxu1 %vm187_vm2, %v22185_v7 }
0x123f   :  { %18793 = vmatmul.mubr.msk.f32.vlgmr.msra.gmra.mrb[202].mxu1 %vm187_vm2, %v22188_v57 }
0x1240   :  { %18795 = vmatprep.mubr.msk.f32.mxu1 %vm187_vm2, %v22201_v43 }
0x1243   :  { %18796 = vmatmul.mubr.msk.f32.gmra.mrb[204].mxu1 %vm187_vm2, %v22204_v18 }
0x1244   :  { %18798 = vmatprep.mubr.msk.f32.mxu1 %vm187_vm2, %v22217_v47 }
0x1247   :  { %18799 = vmatmul.mubr.msk.f32.gmra.mrb[206].mxu1 %vm187_vm2, %v22220_v52 }
0x1248   :  { %18801 = vmatprep.mubr.msk.f32.mxu1 %vm187_vm2, %v22233_v41 }
0x124b   :  { %18802 = vmatmul.mubr.msk.f32.gmra.mrb[208].mxu1 %vm187_vm2, %v22236_v30 }
0x124c   :  { %18832 = vmatprep.mubr.msk.f32.mxu1 %vm814_vm4, %v22412_v56  ;;  %v15684_v56 = vld [vmem:[%s25140_s11 + $0x3] ss:$0 sm:$0xff] }
0x1302   :  { %v22495_v11 = vpop.f32.mrb[194].mxu1 }
0x1303   :  { %v22497_v20 = vpop.f32.mrb[195].mxu1 }
0x1306   :  { %v22499_v10 = vpop.f32.mrb[196].mxu1 }
0x1307   :  { %v22501_v21 = vpop.f32.mrb[197].mxu1 }
0x130a   :  { %v22503_v35 = vpop.f32.mrb[198].mxu1 }
0x130b   :  { %v22505_v60 = vpop.f32.mrb[199].mxu1 }
0x130e   :  { %v22507_v39 = vpop.f32.mrb[200].mxu1 }
0x130f   :  { %v22509_v38 = vpop.f32.mrb[201].mxu1 }
0x1312   :  { %v18794_v15 = vpop.f32.mrb[202].mxu1 }
0x1313   :  { %v6483_v0 = vadd.f32 %v18794_v15, %v15684_v56  ;;  %v6477_v34 = vpop.f32.mrb[203].mxu1 }
0x1314   :  { %v6478_v42 = vadd.f32 %v15684_v56, %v6477_v34 }
0x1316   :  { %v19435_v5 = vpack.c.bf16 %v6483_v0, %v6478_v42  ;;  %v18797_v23 = vpop.f32.mrb[204].mxu1 }
0x1317   :  { %v6493_v55 = vadd.f32 %v18797_v23, %v15684_v56  ;;  %v6487_v48 = vpop.f32.mrb[205].mxu1 }
0x1318   :  { %v6488_v9 = vadd.f32 %v15684_v56, %v6487_v48  ;;  %19437 = vmatprep.subr.msk.bf16.mxu1 %vm20719_vm5, %v19435_v5 }
0x1319   :  { %19440 = vmatpush3.bf16.xpose.msk.msra.mxu1 %vm20719_vm5, %v19435_v5 }
0x131a   :  { %v19441_v62 = vpack.c.bf16 %v6493_v55, %v6488_v9  ;;  %v18800_v36 = vpop.f32.mrb[206].mxu1 }
0x131b   :  { %v6503_v2 = vadd.f32 %v18800_v36, %v15684_v56  ;;  %v6497_v33 = vpop.f32.mrb[207].mxu1 }
0x131c   :  { %v6498_v32 = vadd.f32 %v15684_v56, %v6497_v33  ;;  %19443 = vmatprep.subr.msk.bf16.mxu1 %vm20719_vm5, %v19441_v62 }
0x131e   :  { %v19447_v19 = vpack.c.bf16 %v6503_v2, %v6498_v32  ;;  %v18803_v25 = vpop.f32.mrb[208].mxu1 }
0x131f   :  { %v6513_v58 = vadd.f32 %v18803_v25, %v15684_v56  ;;  %v6507_v12 = vpop.f32.mrb[209].mxu1 }
0x1320   :  { %v6508_v59 = vadd.f32 %v15684_v56, %v6507_v12  ;;  %19449 = vmatprep.subr.msk.bf16.mxu0 %vm20719_vm5, %v19447_v19 }
0x1321   :  { %19446 = vmatpush3.bf16.xpose.msk.msra.mxu1 %vm20719_vm5, %v19441_v62  ;;  %19452 = vmatpush3.bf16.xpose.msk.msra.mxu0 %vm20719_vm5, %v19447_v19 }
0x1322   :  { %v19453_v44 = vpack.c.bf16 %v6513_v58, %v6508_v59  ;;  %19460 = vmatprep.subr.bf16.mxu1 %v22430_v45 }
0x1324   :  { %19455 = vmatprep.subr.msk.bf16.mxu0 %vm20719_vm5, %v19453_v44 }
0x1328   :  { %18833 = vmatmul.mubr.msk.f32.vlgmr.msra.gmra.mrb[210].mxu1 %vm814_vm4, %v22408_v17 }
0x1329   :  { %18835 = vmatprep.mubr.msk.f32.mxu1 %vm814_vm4, %v22418_v1  ;;  %19458 = vmatpush3.bf16.xpose.msk.msra.mxu0 %vm20719_vm5, %v19453_v44 }
0x132a   :  { %19462 = vmatpush3.bf16.msra.mxu1 %v22430_v45 }
0x132b   :  { %19464 = vmatprep.subr.bf16.mxu1 %v22432_v13 }
0x132c   :  { %18836 = vmatmul.mubr.msk.f32.gmra.mrb[212].mxu1 %vm814_vm4, %v22416_v16 }
0x132e   :  { %19466 = vmatpush3.bf16.msra.mxu1 %v22432_v13 }
0x132f   :  { %19468 = vmatprep.subr.bf16.mxu1 %v22434_v4 }
0x1330   :  { %18847 = vmatmul.mubr.msk.f32.vlgmr.msra.gmra.mrb[204].mxu0 %vm814_vm4, %v22420_v46 }
0x1331   :  { %18849 = vmatprep.mubr.msk.f32.mxu0 %vm814_vm4, %v22425_v22 }
0x1334   :  { %18850 = vmatmul.mubr.msk.f32.gmra.mrb[206].mxu0 %vm814_vm4, %v22423_v29 }
0x13fb   :  { %v18834_v17 = vpop.f32.mrb[210].mxu1 }
0x13fc   :  { %v6853_v1 = vmul.f32 0.25, %v18834_v17  ;;  %v6724_v45 = vpop.f32.mrb[211].mxu1 }
0x13fd   :  { %v6852_v31 = vmul.f32 0.25, %v6724_v45 }
0x13fe   :  { %v6861_v53 = vadd.f32 %v6853_v1, %v20818_v8 }
0x13ff   :  { %v18837_v16 = vpop.f32.mrb[212].mxu1  ;;  %v6860_v13 = vadd.f32 %v6852_v31, %v20818_v8 }
0x1400   :  { %v6855_v63 = vmul.f32 0.25, %v18837_v16  ;;  %v6734_v40 = vpop.f32.mrb[213].mxu1  ;;  %v6871_v56 = vsel %vm187_vm2, %v6861_v53, -inf }
0x1401   :  { %v6854_v46 = vmul.f32 0.25, %v6734_v40  ;;  %6872 = vmax.xlane.f32.xlu1 %v6871_v56  ;;  %v6868_v22 = vsel %vm187_vm2, %v6860_v13, -inf }
0x1402   :  { %6869 = vmax.xlane.f32.xlu0 %v6868_v22  ;;  %v6863_v29 = vadd.f32 %v6855_v63, %v20818_v8 }
0x1403   :  { %v18848_v15 = vpop.f32.mrb[204].mxu0  ;;  %v6862_v0 = vadd.f32 %v6854_v46, %v20818_v8 }
0x1404   :  { %v6857_v34 = vmul.f32 0.25, %v18848_v15  ;;  %v6833_v42 = vpop.f32.mrb[205].mxu0  ;;  %v6877_v5 = vsel %vm187_vm2, %v6863_v29, -inf }
0x1405   :  { %v6856_v23 = vmul.f32 0.25, %v6833_v42  ;;  %6878 = vmax.xlane.f32.xlu1 %v6877_v5  ;;  %v6874_v55 = vsel %vm187_vm2, %v6862_v0, -inf }
0x1406   :  { %6875 = vmax.xlane.f32.xlu0 %v6874_v55  ;;  %v6865_v48 = vadd.f32 %v6857_v34, %v20818_v8 }
0x1407   :  { %v18851_v9 = vpop.f32.mrb[206].mxu0  ;;  %v6864_v62 = vadd.f32 %v6856_v23, %v20818_v8 }
0x1408   :  { %v6859_v36 = vmul.f32 0.25, %v18851_v9  ;;  %v6843_v2 = vpop.f32.mrb[207].mxu0  ;;  %v6883_v33 = vsel %vm187_vm2, %v6865_v48, -inf }
0x1409   :  { %v6858_v32 = vmul.f32 0.25, %v6843_v2  ;;  %6884 = vmax.xlane.f32.xlu1 %v6883_v33  ;;  %v6880_v19 = vsel %vm187_vm2, %v6864_v62, -inf }
0x140a   :  { %6881 = vmax.xlane.f32.xlu0 %v6880_v19  ;;  %v6867_v25 = vadd.f32 %v6859_v36, %v20818_v8 }
0x140b   :  { %v6866_v58 = vadd.f32 %v6858_v32, %v20818_v8 }
0x140c   :  { %v6889_v12 = vsel %vm187_vm2, %v6867_v25, -inf }
0x140d   :  { %6890 = vmax.xlane.f32.xlu1 %v6889_v12  ;;  %v6886_v59 = vsel %vm187_vm2, %v6866_v58, -inf }
0x140e   :  { %6887 = vmax.xlane.f32.xlu0 %v6886_v59 }
0x148e   :  { %v6873_v44 = vpop.xlane.xlu1 %6872 }
0x148f   :  { %v6893_v17 = vsub.f32 %v6861_v53, %v6873_v44  ;;  %v6870_v1 = vpop.xlane.xlu0 %6869 }
0x1490   :  { %v6892_v45 = vsub.f32 %v6860_v13, %v6870_v1 }
0x1491   :  { %v6902_v31 = vmul.f32 1.442695, %v6893_v17 }
0x1492   :  { %v6900_v16 = vmul.f32 1.442695, %v6892_v45  ;;  %v6879_v63 = vpop.xlane.xlu1 %6878 }
0x1493   :  { %20175 = vpow2.f32 %v6902_v31  ;;  %v6895_v40 = vsub.f32 %v6863_v29, %v6879_v63  ;;  %v6876_v56 = vpop.xlane.xlu0 %6875 }
0x1494   :  { %20177 = vpow2.f32 %v6900_v16  ;;  %v6894_v46 = vsub.f32 %v6862_v0, %v6876_v56  ;;  %v15732_v56 = vld [vmem:[%s25143_s14 + $0x38] sm:$0xff] }
0x1495   :  { %v6906_v22 = vmul.f32 1.442695, %v6895_v40  ;;  %v15731_v40 = vld [vmem:[%s25143_s14 + $0x30] sm:$0xff] }
0x1496   :  { %v6904_v15 = vmul.f32 1.442695, %v6894_v46  ;;  %v6885_v34 = vpop.xlane.xlu1 %6884  ;;  %v19475_v46 = vpack.c.bf16 %v15732_v56, %v15731_v40 }
0x1497   :  { %20179 = vpow2.f32 %v6906_v22  ;;  %v6897_v42 = vsub.f32 %v6865_v48, %v6885_v34  ;;  %v6882_v5 = vpop.xlane.xlu0 %6881 }
0x1498   :  { %20181 = vpow2.f32 %v6904_v15  ;;  %v6896_v23 = vsub.f32 %v6864_v62, %v6882_v5  ;;  %19476 = vmatprep.subr.bf16.mxu0 %v19475_v46 }
0x1499   :  { %v6910_v55 = vmul.f32 1.442695, %v6897_v42  ;;  %19478 = vmatpush3.bf16.msra.mxu0 %v19475_v46 }
0x149a   :  { %v6908_v53 = vmul.f32 1.442695, %v6896_v23  ;;  %v6891_v9 = vpop.xlane.xlu1 %6890 }
0x149b   :  { %20183 = vpow2.f32 %v6910_v55  ;;  %v6899_v13 = vsub.f32 %v6867_v25, %v6891_v9  ;;  %v6888_v36 = vpop.xlane.xlu0 %6887 }
0x149c   :  { %20185 = vpow2.f32 %v6908_v53  ;;  %v6898_v2 = vsub.f32 %v6866_v58, %v6888_v36 }
0x149d   :  { %v20176_v29 = vpop.eup %20175  ;;  %v6914_v33 = vmul.f32 1.442695, %v6899_v13 }
0x149e   :  { %v20178_v32 = vpop.eup %20177  ;;  %v6912_v0 = vmul.f32 1.442695, %v6898_v2  ;;  %v6919_v19 = vsel %vm187_vm2, %v20176_v29, 0.0 }
0x149f   :  { %20187 = vpow2.f32 %v6914_v33  ;;  %6920 = vadd.xlane.f32.xlu1 %v6919_v19  ;;  %v6916_v48 = vsel %vm187_vm2, %v20178_v32, 0.0 }
0x14a0   :  { %20189 = vpow2.f32 %v6912_v0  ;;  %6917 = vadd.xlane.f32.xlu0 %v6916_v48 }
0x14a1   :  { %v20180_v62 = vpop.eup %20179 }
0x14a2   :  { %v20182_v12 = vpop.eup %20181  ;;  %v6925_v59 = vsel %vm187_vm2, %v20180_v62, 0.0 }
0x14a3   :  { %6926 = vadd.xlane.f32.xlu1 %v6925_v59  ;;  %v6922_v25 = vsel %vm187_vm2, %v20182_v12, 0.0 }
0x14a4   :  { %6923 = vadd.xlane.f32.xlu0 %v6922_v25 }
0x14a5   :  { %v20184_v58 = vpop.eup %20183 }
0x14a6   :  { %v20186_v44 = vpop.eup %20185  ;;  %v6931_v17 = vsel %vm187_vm2, %v20184_v58, 0.0 }
0x14a7   :  { %6932 = vadd.xlane.f32.xlu1 %v6931_v17  ;;  %v6928_v1 = vsel %vm187_vm2, %v20186_v44, 0.0 }
0x14a8   :  { %6929 = vadd.xlane.f32.xlu0 %v6928_v1 }
0x14a9   :  { %v20188_v45 = vpop.eup %20187 }
0x14aa   :  { %v20190_v31 = vpop.eup %20189  ;;  %v6937_v16 = vsel %vm187_vm2, %v20188_v45, 0.0 }
0x14ab   :  { %6938 = vadd.xlane.f32.xlu1 %v6937_v16  ;;  %v6934_v63 = vsel %vm187_vm2, %v20190_v31, 0.0 }
0x14ac   :  { %6935 = vadd.xlane.f32.xlu0 %v6934_v63 }
0x152c   :  { %v6921_v22 = vpop.xlane.xlu1 %6920 }
0x152d   :  { %20191 = vrcp.f32 %v6921_v22  ;;  %v6918_v15 = vpop.xlane.xlu0 %6917 }
0x152e   :  { %20193 = vrcp.f32 %v6918_v15 }
0x1530   :  { %v6927_v34 = vpop.xlane.xlu1 %6926 }
0x1531   :  { %20195 = vrcp.f32 %v6927_v34  ;;  %v6924_v42 = vpop.xlane.xlu0 %6923 }
0x1532   :  { %20197 = vrcp.f32 %v6924_v42 }
0x1534   :  { %v6933_v5 = vpop.xlane.xlu1 %6932 }
0x1535   :  { %20199 = vrcp.f32 %v6933_v5  ;;  %v6930_v23 = vpop.xlane.xlu0 %6929 }
0x1536   :  { %20201 = vrcp.f32 %v6930_v23 }
0x1537   :  { %v20192_v55 = vpop.eup %20191 }
0x1538   :  { %v20194_v53 = vpop.eup %20193  ;;  %v6939_v9 = vpop.xlane.xlu1 %6938  ;;  %v6949_v2 = vmul.f32 %v20192_v55, %v20176_v29 }
0x1539   :  { %20203 = vrcp.f32 %v6939_v9  ;;  %v6936_v13 = vpop.xlane.xlu0 %6935  ;;  %v6948_v36 = vmul.f32 %v20194_v53, %v20178_v32 }
0x153a   :  { %20205 = vrcp.f32 %v6936_v13 }
0x153b   :  { %v20196_v33 = vpop.eup %20195  ;;  %18860 = vmatprep.mubr.msk.f32.mxu1 %vm187_vm2, %v6948_v36 }
0x153c   :  { %v20198_v0 = vpop.eup %20197  ;;  %18861 = vmatmul.mubr.msk.f32.vlgmr.msra.gmra.mrb[214].mxu1 %vm187_vm2, %v6949_v2  ;;  %v6951_v48 = vmul.f32 %v20196_v33, %v20180_v62  ;;  %v15664_v62 = vld [vmem:[%s25143_s14 + $0x28] sm:$0xff] }
0x153d   :  { %19470 = vmatpush3.bf16.msra.mxu1 %v22434_v4  ;;  %v6950_v19 = vmul.f32 %v20198_v0, %v20182_v12 }
0x153e   :  { %19472 = vmatprep.subr.bf16.mxu1 %v22436_v51 }
0x153f   :  { %v20200_v59 = vpop.eup %20199  ;;  %18863 = vmatprep.mubr.msk.f32.mxu1 %vm187_vm2, %v6950_v19 }
0x1540   :  { %v20202_v25 = vpop.eup %20201  ;;  %18864 = vmatmul.mubr.msk.f32.gmra.mrb[216].mxu1 %vm187_vm2, %v6951_v48  ;;  %v6953_v32 = vmul.f32 %v20200_v59, %v20184_v58 }
0x1541   :  { %19474 = vmatpush3.bf16.msra.mxu1 %v22436_v51  ;;  %v6952_v29 = vmul.f32 %v20202_v25, %v20186_v44  ;;  %v15663_v51 = vld [vmem:[%s25143_s14 + $0x20] sm:$0xff] }
0x1542   :  { %v19479_v58 = vpack.c.bf16 %v15664_v62, %v15663_v51 }
0x1543   :  { %v20204_v17 = vpop.eup %20203  ;;  %18874 = vmatprep.mubr.msk.f32.mxu1 %vm187_vm2, %v6952_v29 }
0x1544   :  { %v20206_v1 = vpop.eup %20205  ;;  %18875 = vmatmul.mubr.msk.f32.vlgmr.msra.gmra.mrb[218].mxu1 %vm187_vm2, %v6953_v32  ;;  %v6955_v12 = vmul.f32 %v20204_v17, %v20188_v45  ;;  %19480 = vmatprep.subr.bf16.mxu0 %v19479_v58 }
0x1545   :  { %v6954_v4 = vmul.f32 %v20206_v1, %v20190_v31 }
0x1547   :  { %18877 = vmatprep.mubr.msk.f32.mxu1 %vm187_vm2, %v6954_v4 }
0x1548   :  { %18878 = vmatmul.mubr.msk.f32.gmra.mrb[220].mxu1 %vm187_vm2, %v6955_v12 }
0x1549   :  { %7897 = vmatprep.mubr.bf16.mxu1 %v20359_v26 }
0x160f   :  { %v18862_v44 = vpop.f32.mrb[214].mxu1 }
0x1610   :  { %v7034_v16 = vpop.f32.mrb[215].mxu1 }
0x1611   :  { %18884 = vmatprep.mubr.msk.f32.mxu0 %vm814_vm4, %v7034_v16 }
0x1612   :  { %18885 = vmatmul.mubr.msk.f32.vlgmr.msra.gmra.mrb[208].mxu0 %vm814_vm4, %v18862_v44 }
0x1613   :  { %v18865_v45 = vpop.f32.mrb[216].mxu1  ;;  %19482 = vmatpush3.bf16.msra.mxu0 %v19479_v58 }
0x1614   :  { %v7044_v31 = vpop.f32.mrb[217].mxu1 }
0x1615   :  { %18887 = vmatprep.mubr.msk.f32.mxu0 %vm814_vm4, %v7044_v31 }
0x1616   :  { %18888 = vmatmul.mubr.msk.f32.gmra.mrb[210].mxu0 %vm814_vm4, %v18865_v45 }
0x1617   :  { %v18876_v63 = vpop.f32.mrb[218].mxu1 }
0x1618   :  { %v7131_v40 = vpop.f32.mrb[219].mxu1 }
0x1619   :  { %18890 = vmatprep.mubr.msk.f32.mxu0 %vm814_vm4, %v7131_v40 }
0x161a   :  { %18891 = vmatmul.mubr.msk.f32.gmra.mrb[212].mxu0 %vm814_vm4, %v18876_v63 }
0x161b   :  { %v18879_v56 = vpop.f32.mrb[220].mxu1 }
0x161c   :  { %v7141_v46 = vpop.f32.mrb[221].mxu1 }
0x161d   :  { %18893 = vmatprep.mubr.msk.f32.mxu0 %vm814_vm4, %v7141_v46 }
0x161e   :  { %18894 = vmatmul.mubr.msk.f32.gmra.mrb[214].mxu0 %vm814_vm4, %v18879_v56 }
0x161f   :  { %18900 = vmatprep.mubr.msk.f32.mxu0 %vm814_vm4, %v22497_v20 }
0x1622   :  { %18901 = vmatmul.mubr.msk.f32.vlgmr.msra.gmra.mrb[208].mxu0 %vm814_vm4, %v22495_v11  ;;  %v15750_v11 = vld [vmem:[%s25144_s15 + $0x1] ss:$0 sm:$0xff] }
0x1623   :  { %18903 = vmatprep.mubr.msk.f32.mxu0 %vm814_vm4, %v22501_v21 }
0x1626   :  { %18904 = vmatmul.mubr.msk.f32.gmra.mrb[210].mxu0 %vm814_vm4, %v22499_v10 }
0x1627   :  { %18906 = vmatprep.mubr.msk.f32.mxu0 %vm814_vm4, %v22505_v60 }
0x162a   :  { %18907 = vmatmul.mubr.msk.f32.gmra.mrb[212].mxu0 %vm814_vm4, %v22503_v35 }
0x162b   :  { %18909 = vmatprep.mubr.msk.f32.mxu0 %vm814_vm4, %v22509_v38 }
0x162e   :  { %18910 = vmatmul.mubr.msk.f32.gmra.mrb[214].mxu0 %vm814_vm4, %v22507_v39 }
0x162f   :  { %7970 = vmatprep.mubr.bf16.mxu0 %v20359_v26 }
0x16f5   :  { %v18902_v20 = vpop.f32.mrb[208].mxu0 }
0x16f6   :  { %v7420_v10 = vadd.f32 %v18902_v20, %v15750_v11  ;;  %v7372_v21 = vpop.f32.mrb[209].mxu0 }
0x16f7   :  { %v7419_v22 = vadd.f32 %v15750_v11, %v7372_v21 }
0x16f8   :  { %v7428_v60 = vadd.f32 %v7420_v10, %v22188_v57 }
0x16f9   :  { %v18905_v15 = vpop.f32.mrb[210].mxu0  ;;  %v7427_v35 = vadd.f32 %v7419_v22, %v22185_v7 }
0x16fa   :  { %v7422_v34 = vadd.f32 %v18905_v15, %v15750_v11  ;;  %v7382_v38 = vpop.f32.mrb[211].mxu0  ;;  %v7442_v42 = vsel %vm187_vm2, %v7428_v60, 0.0 }
0x16fb   :  { %v7421_v39 = vadd.f32 %v15750_v11, %v7382_v38  ;;  %7443 = vadd.xlane.f32.xlu1 %v7442_v42  ;;  %v7439_v5 = vsel %vm187_vm2, %v7427_v35, 0.0 }
0x16fc   :  { %7440 = vadd.xlane.f32.xlu0 %v7439_v5  ;;  %v7430_v23 = vadd.f32 %v7422_v34, %v22204_v18 }
0x16fd   :  { %v18908_v55 = vpop.f32.mrb[212].mxu0  ;;  %v7429_v53 = vadd.f32 %v7421_v39, %v22201_v43 }
0x16fe   :  { %v7424_v9 = vadd.f32 %v18908_v55, %v15750_v11  ;;  %v7392_v13 = vpop.f32.mrb[213].mxu0  ;;  %v7448_v57 = vsel %vm187_vm2, %v7430_v23, 0.0 }
0x16ff   :  { %v7423_v36 = vadd.f32 %v15750_v11, %v7392_v13  ;;  %7449 = vadd.xlane.f32.xlu1 %v7448_v57  ;;  %v7445_v7 = vsel %vm187_vm2, %v7429_v53, 0.0 }
0x1700   :  { %7446 = vadd.xlane.f32.xlu0 %v7445_v7  ;;  %v7432_v2 = vadd.f32 %v7424_v9, %v22220_v52 }
0x1701   :  { %v18911_v33 = vpop.f32.mrb[214].mxu0  ;;  %v7431_v0 = vadd.f32 %v7423_v36, %v22217_v47 }
0x1702   :  { %v7426_v19 = vadd.f32 %v18911_v33, %v15750_v11  ;;  %v7402_v48 = vpop.f32.mrb[215].mxu0  ;;  %v7454_v18 = vsel %vm187_vm2, %v7432_v2, 0.0  ;;  %v15756_v33 = vld [vmem:[%s25147_s18 + $0x108] sm:$0xff] }
0x1703   :  { %v7425_v59 = vadd.f32 %v15750_v11, %v7402_v48  ;;  %7455 = vadd.xlane.f32.xlu1 %v7454_v18  ;;  %v7451_v43 = vsel %vm187_vm2, %v7431_v0, 0.0  ;;  %v15763_v18 = vld [vmem:[%s25147_s18 + $0x140] sm:$0xff] }
0x1704   :  { %7452 = vadd.xlane.f32.xlu0 %v7451_v43  ;;  %v7434_v25 = vadd.f32 %v7426_v19, %v22236_v30  ;;  %v15755_v19 = vld [vmem:[%s25147_s18 + $0x100] sm:$0xff] }
0x1705   :  { %v7433_v29 = vadd.f32 %v7425_v59, %v22233_v41  ;;  %v15789_v43 = vcombine.low %v15755_v19, %v15763_v18 }
0x1706   :  { %v7460_v32 = vsel %vm187_vm2, %v7434_v25, 0.0 }
0x1707   :  { %7461 = vadd.xlane.f32.xlu1 %v7460_v32  ;;  %v7457_v52 = vsel %vm187_vm2, %v7433_v29, 0.0  ;;  %v15780_v32 = vld [vmem:[%s25147_s18 + $0x1c8] sm:$0xff] }
0x1708   :  { %7458 = vadd.xlane.f32.xlu0 %v7457_v52  ;;  %v15771_v52 = vld [vmem:[%s25147_s18 + $0x180] sm:$0xff] }
0x1788   :  { %v7444_v47 = vpop.xlane.xlu1 %7443 }
0x1789   :  { %v7464_v17 = vmul.f32 0.03125, %v7444_v47  ;;  %v7441_v1 = vpop.xlane.xlu0 %7440 }
0x178a   :  { %v7463_v4 = vmul.f32 0.03125, %v7441_v1 }
0x178b   :  { %v22639_v12 = vsub.f32 %v7428_v60, %v7464_v17  ;;  %v15779_v17 = vld [vmem:[%s25147_s18 + $0x1c0] sm:$0xff] }
0x178c   :  { %v22641_v51 = vsub.f32 %v7427_v35, %v7463_v4  ;;  %v7450_v62 = vpop.xlane.xlu1 %7449  ;;  %v15805_v4 = vcombine.low %v15771_v52, %v15779_v17 }
0x178d   :  { %v7466_v58 = vmul.f32 0.03125, %v7450_v62  ;;  %v7447_v44 = vpop.xlane.xlu0 %7446  ;;  %v7480_v41 = vmul.f32 %v22639_v12, %v22639_v12  ;;  %v15806_v62 = vcombine.high %v15771_v52, %v15779_v17 }
0x178e   :  { %v7465_v30 = vmul.f32 0.03125, %v7447_v44  ;;  %v7479_v16 = vmul.f32 %v22641_v51, %v22641_v51  ;;  %v22711_v44 = vld [vmem:[%s25147_s18 + $0x150] sm:$0xff] }
0x178f   :  { %v22647_v45 = vsub.f32 %v7430_v23, %v7466_v58  ;;  %v7490_v31 = vsel %vm187_vm2, %v7480_v41, 0.0  ;;  %v22706_v58 = vld [vmem:[%s25147_s18 + $0x110] sm:$0xff]  ;;  %v22716_v41 = vld [vmem:[%s25147_s18 + $0x118] sm:$0xff] }
0x1790   :  { %v22650_v63 = vsub.f32 %v7429_v53, %v7465_v30  ;;  %v7456_v40 = vpop.xlane.xlu1 %7455  ;;  %7491 = vadd.xlane.f32.xlu1 %v7490_v31  ;;  %v7487_v56 = vsel %vm187_vm2, %v7479_v16, 0.0  ;;  %v15793_v30 = vcombine.low %v22706_v58, %v22711_v44  ;;  %v15794_v16 = vcombine.high %v22706_v58, %v22711_v44  ;;  %v22725_v31 = vld [vmem:[%s25147_s18 + $0x158] sm:$0xff] }
0x1791   :  { %v7468_v46 = vmul.f32 0.03125, %v7456_v40  ;;  %v7453_v11 = vpop.xlane.xlu0 %7452  ;;  %7488 = vadd.xlane.f32.xlu0 %v7487_v56  ;;  %v7482_v20 = vmul.f32 %v22647_v45, %v22647_v45  ;;  %v15795_v40 = vcombine.low %v22716_v41, %v22725_v31  ;;  %v15796_v56 = vcombine.high %v22716_v41, %v22725_v31 }
0x1792   :  { %v7467_v10 = vmul.f32 0.03125, %v7453_v11  ;;  %v7481_v21 = vmul.f32 %v22650_v63, %v22650_v63 }
0x1793   :  { %v22657_v22 = vsub.f32 %v7432_v2, %v7468_v46  ;;  %v7496_v60 = vsel %vm187_vm2, %v7482_v20, 0.0 }
0x1794   :  { %v22660_v15 = vsub.f32 %v7431_v0, %v7467_v10  ;;  %7497 = vadd.xlane.f32.xlu1 %v7496_v60  ;;  %v7462_v35 = vpop.xlane.xlu1 %7461  ;;  %v7493_v34 = vsel %vm187_vm2, %v7481_v21, 0.0  ;;  %v15764_v0 = vld [vmem:[%s25147_s18 + $0x148] sm:$0xff] }
0x1795   :  { %v7470_v38 = vmul.f32 0.03125, %v7462_v35  ;;  %7494 = vadd.xlane.f32.xlu0 %v7493_v34  ;;  %v7459_v42 = vpop.xlane.xlu0 %7458  ;;  %v7484_v39 = vmul.f32 %v22657_v22, %v22657_v22  ;;  %v15792_v48 = vcombine.high %v15756_v33, %v15764_v0  ;;  %v15791_v59 = vcombine.low %v15756_v33, %v15764_v0 }
0x1796   :  { %v7469_v5 = vmul.f32 0.03125, %v7459_v42  ;;  %v7483_v23 = vmul.f32 %v22660_v15, %v22660_v15 }
0x1797   :  { %v22667_v55 = vsub.f32 %v7434_v25, %v7470_v38  ;;  %v7502_v53 = vsel %vm187_vm2, %v7484_v39, 0.0  ;;  %v15790_v25 = vcombine.high %v15755_v19, %v15763_v18  ;;  %7938 = vmatprep.subr.bf16.mxu0 %v15792_v48  ;;  %v22734_v18 = vld [vmem:[%s25145_s16 + $0x1] ss:$0 sm:$0xff] }
0x1798   :  { %v22670_v9 = vsub.f32 %v7433_v29, %v7469_v5  ;;  %7503 = vadd.xlane.f32.xlu1 %v7502_v53  ;;  %v7499_v13 = vsel %vm187_vm2, %v7483_v23, 0.0  ;;  %7939 = vmatpush1.bf16.msra.mxu0 %v15791_v59  ;;  %v15772_v29 = vld [vmem:[%s25147_s18 + $0x188] sm:$0xff] }
0x1799   :  { %7500 = vadd.xlane.f32.xlu0 %v7499_v13  ;;  %v7486_v57 = vmul.f32 %v22667_v55, %v22667_v55  ;;  %7865 = vmatprep.subr.bf16.mxu1 %v15790_v25  ;;  %v15808_v47 = vcombine.high %v15772_v29, %v15780_v32  ;;  %v15807_v1 = vcombine.low %v15772_v29, %v15780_v32  ;;  %v22740_v25 = vld [vmem:[%s25146_s17 + $0x1] ss:$0 sm:$0xff] }
0x179a   :  { %v7485_v36 = vmul.f32 %v22670_v9, %v22670_v9  ;;  %7866 = vmatpush1.bf16.msra.mxu1 %v15789_v43 }
0x179b   :  { %v7508_v7 = vsel %vm187_vm2, %v7486_v57, 0.0  ;;  %7940 = vmatprep.subr.bf16.mxu0 %v15808_v47  ;;  %7867 = vmatprep.subr.bf16.mxu1 %v15806_v62 }
0x179c   :  { %7509 = vadd.xlane.f32.xlu1 %v7508_v7  ;;  %v7505_v2 = vsel %vm187_vm2, %v7485_v36, 0.0  ;;  %7941 = vmatpush1.bf16.msra.mxu0 %v15807_v1 }
0x179d   :  { %7506 = vadd.xlane.f32.xlu0 %v7505_v2  ;;  %8084 = vmatprep.subr.bf16.mxu0 %v15796_v56 }
0x179e   :  { %7868 = vmatpush1.bf16.msra.mxu1 %v15805_v4 }
0x179f   :  { %8011 = vmatprep.subr.bf16.mxu1 %v15794_v16  ;;  %v15773_v16 = vld [vmem:[%s25147_s18 + $0x190] sm:$0xff] }
0x181d   :  { %v7492_v46 = vpop.xlane.xlu1 %7491 }
0x181e   :  { %v7512_v11 = vmul.f32 0.03125, %v7492_v46  ;;  %v7489_v20 = vpop.xlane.xlu0 %7488  ;;  %v15781_v46 = vld [vmem:[%s25147_s18 + $0x1d0] sm:$0xff] }
0x181f   :  { %v7511_v10 = vmul.f32 0.03125, %v7489_v20 }
0x1820   :  { %v7520_v21 = vadd.f32 1e-05, %v7512_v11  ;;  %v15774_v11 = vld [vmem:[%s25147_s18 + $0x198] sm:$0xff] }
0x1821   :  { %v7519_v60 = vadd.f32 1e-05, %v7511_v10  ;;  %v7498_v35 = vpop.xlane.xlu1 %7497 }
0x1822   :  { %20207 = vrsqrt.f32 %v7520_v21  ;;  %v7514_v34 = vmul.f32 0.03125, %v7498_v35  ;;  %v7495_v38 = vpop.xlane.xlu0 %7494  ;;  %v22779_v35 = vld [vmem:[%s25147_s18 + $0x160] sm:$0xff] }
0x1823   :  { %20209 = vrsqrt.f32 %v7519_v60  ;;  %v7513_v42 = vmul.f32 0.03125, %v7495_v38  ;;  %v22789_v38 = vld [vmem:[%s25147_s18 + $0x168] sm:$0xff] }
0x1824   :  { %v7522_v39 = vadd.f32 1e-05, %v7514_v34  ;;  %v22784_v34 = vld [vmem:[%s25147_s18 + $0x128] sm:$0xff] }
0x1825   :  { %v7521_v5 = vadd.f32 1e-05, %v7513_v42  ;;  %v7504_v23 = vpop.xlane.xlu1 %7503 }
0x1826   :  { %20211 = vrsqrt.f32 %v7522_v39  ;;  %v7516_v53 = vmul.f32 0.03125, %v7504_v23  ;;  %v7501_v13 = vpop.xlane.xlu0 %7500  ;;  %v15810_v39 = vcombine.high %v15773_v16, %v15781_v46  ;;  %v15809_v23 = vcombine.low %v15773_v16, %v15781_v46  ;;  %v15762_v16 = vld [vmem:[%s25147_s18 + $0x138] sm:$0xff] }
0x1827   :  { %20213 = vrsqrt.f32 %v7521_v5  ;;  %v7515_v57 = vmul.f32 0.03125, %v7501_v13 }
0x1828   :  { %v7524_v36 = vadd.f32 1e-05, %v7516_v53 }
0x1829   :  { %v7523_v7 = vadd.f32 1e-05, %v7515_v57  ;;  %v7510_v2 = vpop.xlane.xlu1 %7509 }
0x182a   :  { %20215 = vrsqrt.f32 %v7524_v36  ;;  %v7518_v33 = vmul.f32 0.03125, %v7510_v2  ;;  %v7507_v0 = vpop.xlane.xlu0 %7506  ;;  %v15800_v36 = vcombine.high %v22784_v34, %v22789_v38 }
0x182b   :  { %20217 = vrsqrt.f32 %v7523_v7  ;;  %v7517_v19 = vmul.f32 0.03125, %v7507_v0 }
0x182c   :  { %v20208_v48 = vpop.eup %20207  ;;  %v7526_v32 = vadd.f32 1e-05, %v7518_v33 }
0x182d   :  { %v20210_v59 = vpop.eup %20209  ;;  %v7536_v43 = vmul.f32 %v20208_v48, %v22639_v12  ;;  %v7525_v47 = vadd.f32 1e-05, %v7517_v19 }
0x182e   :  { %v7535_v29 = vmul.f32 %v20210_v59, %v22641_v51  ;;  %20219 = vrsqrt.f32 %v7526_v32  ;;  %v15784_v32 = vld [vmem:[%s25147_s18 + $0x1e8] sm:$0xff] }
0x182f   :  { %v7550_v52 = vmul.f32 %v22734_v18, %v7536_v43  ;;  %20221 = vrsqrt.f32 %v7525_v47  ;;  %v15799_v47 = vcombine.low %v22784_v34, %v22789_v38 }
0x1830   :  { %v20212_v17 = vpop.eup %20211  ;;  %v7549_v1 = vmul.f32 %v22734_v18, %v7535_v29  ;;  %v15776_v29 = vld [vmem:[%s25147_s18 + $0x1a8] sm:$0xff] }
0x1831   :  { %v20214_v4 = vpop.eup %20213  ;;  %v22746_v62 = vadd.f32 %v22740_v25, %v7550_v52  ;;  %v7538_v12 = vmul.f32 %v20212_v17, %v22647_v45  ;;  %v15782_v45 = vld [vmem:[%s25147_s18 + $0x1d8] sm:$0xff]  ;;  %v15761_v17 = vld [vmem:[%s25147_s18 + $0x130] sm:$0xff] }
0x1832   :  { %v22753_v56 = vadd.f32 %v22740_v25, %v7549_v1  ;;  %v7537_v51 = vmul.f32 %v20214_v4, %v22650_v63  ;;  %v22769_v63 = vld [vmem:[%s25147_s18 + $0x120] sm:$0xff]  ;;  %v15812_v5 = vcombine.high %v15774_v11, %v15782_v45  ;;  %v15811_v53 = vcombine.low %v15774_v11, %v15782_v45 }
0x1833   :  { %v7552_v20 = vmul.f32 %v22734_v18, %v7538_v12  ;;  %v15798_v57 = vcombine.high %v22769_v63, %v22779_v35  ;;  %v15797_v52 = vcombine.low %v22769_v63, %v22779_v35  ;;  %v15816_v4 = vcombine.high %v15776_v29, %v15784_v32  ;;  %v15769_v12 = vld [vmem:[%s25147_s18 + $0x170] sm:$0xff]  ;;  %v15786_v35 = vld [vmem:[%s25147_s18 + $0x1f8] sm:$0xff] }
0x1834   :  { %v20216_v10 = vpop.eup %20215  ;;  %v22773_v21 = vpack.c.bf16 %v22746_v62, %v22753_v56  ;;  %v7551_v60 = vmul.f32 %v22734_v18, %v7537_v51  ;;  %v15770_v51 = vld [vmem:[%s25147_s18 + $0x178] sm:$0xff]  ;;  %v15815_v11 = vcombine.low %v15776_v29, %v15784_v32  ;;  %v15802_v45 = vcombine.high %v15761_v17, %v15769_v12  ;;  %v15777_v63 = vld [vmem:[%s25147_s18 + $0x1b0] sm:$0xff]  ;;  %v19804_v29 = vld [vmem:[%s25149_s20 + $0x4e0] sm:$0xff]  }
0x1835   :  { %v20218_v42 = vpop.eup %20217  ;;  %v22796_v13 = vadd.f32 %v22740_v25, %v7552_v20  ;;  %v7540_v2 = vmul.f32 %v20216_v10, %v22657_v22  ;;  %v15804_v20 = vcombine.high %v15762_v16, %v15770_v51  ;;  %v15785_v10 = vld [vmem:[%s25147_s18 + $0x1f0] sm:$0xff]  ;;  %v15801_v34 = vcombine.low %v15761_v17, %v15769_v12  ;;  %v19805_v32 = vld [vmem:[%s25149_s20 + $0x420] sm:$0xff]   ;;  %v19808_v17 = vld [vmem:[%s25149_s20 + $0x4e8] sm:$0xff]  }
0x1836   :  { %15821 = vmatmul.mubr.msk.bf16.vlgmr.msra.gmra.mrb[224].mxu1 %vm187_vm2, %v22773_v21  ;;  %15825 = vmatmul.mubr.msk.bf16.vlgmr.msra.gmra.mrb[216].mxu0 %vm187_vm2, %v22773_v21  ;;  %v22809_v7 = vadd.f32 %v22740_v25, %v7551_v60  ;;  %v7539_v33 = vmul.f32 %v20218_v42, %v22660_v15  ;;  %v15778_v60 = vld [vmem:[%s25147_s18 + $0x1b8] sm:$0xff]  ;;  %v15803_v38 = vcombine.low %v15762_v16, %v15770_v51  ;;  %v19812_v12 = vld [vmem:[%s25149_s20 + $0x4f0] sm:$0xff]  }
0x1837   :  { %8012 = vmatpush1.bf16.msra.mxu1 %v15793_v30  ;;  %8085 = vmatpush1.bf16.msra.mxu0 %v15795_v40  ;;  %v7554_v41 = vmul.f32 %v22734_v18, %v7540_v2  ;;  %v15818_v42 = vcombine.high %v15777_v63, %v15785_v10  ;;  %v19790_v2 = vld [vmem:[%s25149_s20 + $0x480] sm:$0xff]   ;;  %v19813_v16 = vld [vmem:[%s25149_s20 + $0x430] sm:$0xff]  }
0x1838   :  { %7907 = vmatprep.mubr.bf16.mxu1 %v20359_v26  ;;  %7980 = vmatprep.mubr.bf16.mxu0 %v20359_v26  ;;  %v20220_v58 = vpop.eup %20219  ;;  %v22817_v44 = vpack.c.bf16 %v22796_v13, %v22809_v7  ;;  %v7553_v30 = vmul.f32 %v22734_v18, %v7539_v33  ;;  %v19791_v33 = vld [vmem:[%s25149_s20 + $0x448] sm:$0xff]   ;;  %v19814_v51 = vld [vmem:[%s25149_s20 + $0x4b0] sm:$0xff]  }
0x1839   :  { %8013 = vmatprep.subr.bf16.mxu1 %v15810_v39  ;;  %8086 = vmatprep.subr.bf16.mxu0 %v15812_v5  ;;  %v20222_v22 = vpop.eup %20221  ;;  %v22828_v15 = vadd.f32 %v22740_v25, %v7554_v41  ;;  %v7542_v40 = vmul.f32 %v20220_v58, %v22667_v55  ;;  %v15820_v39 = vcombine.high %v15778_v60, %v15786_v35  ;;  %v19792_v58 = vld [vmem:[%s25149_s20 + $0x4c8] sm:$0xff]  }
0x183a   :  { %v22831_v31 = vadd.f32 %v22740_v25, %v7553_v30  ;;  %v7541_v0 = vmul.f32 %v20222_v22, %v22670_v9  ;;  %v15817_v5 = vcombine.low %v15777_v63, %v15785_v10  ;;  %v19793_v41 = vld [vmem:[%s25149_s20 + $0x408] sm:$0xff]   ;;  %v19796_v22 = vld [vmem:[%s25149_s20 + $0x4d0] sm:$0xff]   ;;  %v19819_v63 = vld [vmem:[%s25149_s20 + $0x540] sm:$0xff]  }
0x183b   :  { %8014 = vmatpush1.bf16.msra.mxu1 %v15809_v23  ;;  %8087 = vmatpush1.bf16.msra.mxu0 %v15811_v53  ;;  %v7556_v48 = vmul.f32 %v22734_v18, %v7542_v40  ;;  %v15819_v23 = vcombine.low %v15778_v60, %v15786_v35  ;;  %v19787_v53 = vld [vmem:[%s25149_s20 + $0x440] sm:$0xff]   ;;  %v19794_v30 = vld [vmem:[%s25149_s20 + $0x488] sm:$0xff]   ;;  %v19797_v40 = vld [vmem:[%s25149_s20 + $0x410] sm:$0xff]  }
0x183c   :  { %8157 = vmatprep.subr.bf16.mxu1 %v15798_v57  ;;  %8230 = vmatprep.subr.bf16.mxu0 %v15800_v36  ;;  %v22837_v19 = vpack.c.bf16 %v22828_v15, %v22831_v31  ;;  %v7555_v59 = vmul.f32 %v22734_v18, %v7541_v0  ;;  %v15775_v18 = vld [vmem:[%s25147_s18 + $0x1a0] sm:$0xff]  ;;  %v19798_v0 = vld [vmem:[%s25149_s20 + $0x490] sm:$0xff]  }
0x183d   :  { %v22848_v55 = vadd.f32 %v22740_v25, %v7556_v48  ;;  %v19788_v57 = vld [vmem:[%s25149_s20 + $0x4c0] sm:$0xff]   ;;  %v19799_v48 = vld [vmem:[%s25149_s20 + $0x458] sm:$0xff]   ;;  %v23078_v10 = vld [vmem:[%s25148_s19 + $0x10] sm:$0xff] }
0x183e   :  { %15822 = vmatmul.mubr.msk.bf16.gmra.mrb[228].mxu1 %vm187_vm2, %v22817_v44  ;;  %15826 = vmatmul.mubr.msk.bf16.gmra.mrb[220].mxu0 %vm187_vm2, %v22817_v44  ;;  %v22851_v9 = vadd.f32 %v22740_v25, %v7555_v59  ;;  %v15783_v25 = vld [vmem:[%s25147_s18 + $0x1e0] sm:$0xff]  ;;  %v19800_v59 = vld [vmem:[%s25149_s20 + $0x4d8] sm:$0xff]   ;;  %v23082_v60 = vrot.slane %v23078_v10, %v20608_v14  ;;  %v23086_v35 = vrot.slane %v23078_v10, %v21527_v28 }
0x183f   :  { %7917 = vmatprep.mubr.bf16.mxu1 %v20359_v26  ;;  %7990 = vmatprep.mubr.bf16.mxu0 %v20359_v26  ;;  %v15814_v1 = vcombine.high %v15775_v18, %v15783_v25  ;;  %v15813_v46 = vcombine.low %v15775_v18, %v15783_v25  ;;  %v19789_v36 = vld [vmem:[%s25149_s20 + $0x400] sm:$0xff]   ;;  %v19801_v18 = vld [vmem:[%s25149_s20 + $0x418] sm:$0xff]  }
0x1840   :  { %v22855_v43 = vpack.c.bf16 %v22848_v55, %v22851_v9  ;;  %v19802_v25 = vld [vmem:[%s25149_s20 + $0x498] sm:$0xff]  }
0x1846   :  { %15823 = vmatmul.mubr.msk.bf16.gmra.mrb[232].mxu1 %vm187_vm2, %v22837_v19  ;;  %15827 = vmatmul.mubr.msk.bf16.gmra.mrb[224].mxu0 %vm187_vm2, %v22837_v19 }
0x1847   :  { %7927 = vmatprep.mubr.bf16.mxu1 %v20359_v26  ;;  %8000 = vmatprep.mubr.bf16.mxu0 %v20359_v26 }
0x184e   :  { %15824 = vmatmul.mubr.msk.bf16.gmra.mrb[236].mxu1 %vm187_vm2, %v22855_v43  ;;  %15828 = vmatmul.mubr.msk.bf16.gmra.mrb[228].mxu0 %vm187_vm2, %v22855_v43 }
0x184f   :  { %8043 = vmatprep.mubr.bf16.mxu1 %v20359_v26  ;;  %8116 = vmatprep.mubr.bf16.mxu0 %v20359_v26 }
0x1856   :  { %15829 = vmatmul.mubr.msk.bf16.vlgmr.msra.gmra.mrb[240].mxu1 %vm187_vm2, %v22773_v21  ;;  %15833 = vmatmul.mubr.msk.bf16.vlgmr.msra.gmra.mrb[232].mxu0 %vm187_vm2, %v22773_v21 }
0x1857   :  { %8158 = vmatpush1.bf16.msra.mxu1 %v15797_v52  ;;  %8231 = vmatpush1.bf16.msra.mxu0 %v15799_v47  ;;  %v19806_v52 = vld [vmem:[%s25149_s20 + $0x4a0] sm:$0xff]   ;;  %v19807_v47 = vld [vmem:[%s25149_s20 + $0x468] sm:$0xff]  }
0x1858   :  { %8053 = vmatprep.mubr.bf16.mxu1 %v20359_v26  ;;  %8126 = vmatprep.mubr.bf16.mxu0 %v20359_v26 }
0x1859   :  { %8159 = vmatprep.subr.bf16.mxu1 %v15814_v1  ;;  %8232 = vmatprep.subr.bf16.mxu0 %v15816_v4  ;;  %v19809_v1 = vld [vmem:[%s25149_s20 + $0x428] sm:$0xff]  }
0x185a   :  { %v19810_v4 = vld [vmem:[%s25149_s20 + $0x4a8] sm:$0xff]  }
0x185b   :  { %8160 = vmatpush1.bf16.msra.mxu1 %v15813_v46  ;;  %8233 = vmatpush1.bf16.msra.mxu0 %v15815_v11  ;;  %v19815_v46 = vld [vmem:[%s25149_s20 + $0x478] sm:$0xff]  }
0x185c   :  { %8303 = vmatprep.subr.bf16.mxu1 %v15802_v45  ;;  %8376 = vmatprep.subr.bf16.mxu0 %v15804_v20  ;;  %v19816_v11 = vld [vmem:[%s25149_s20 + $0x4f8] sm:$0xff]  }
0x185d   :  { %v19817_v45 = vld [vmem:[%s25149_s20 + $0x438] sm:$0xff]  }
0x185e   :  { %15830 = vmatmul.mubr.msk.bf16.gmra.mrb[244].mxu1 %vm187_vm2, %v22817_v44  ;;  %15834 = vmatmul.mubr.msk.bf16.gmra.mrb[236].mxu0 %vm187_vm2, %v22817_v44  ;;  %v19818_v20 = vld [vmem:[%s25149_s20 + $0x4b8] sm:$0xff]  }
0x185f   :  { %8063 = vmatprep.mubr.bf16.mxu1 %v20359_v26  ;;  %8136 = vmatprep.mubr.bf16.mxu0 %v20359_v26 }
0x1866   :  { %15831 = vmatmul.mubr.msk.bf16.gmra.mrb[248].mxu1 %vm187_vm2, %v22837_v19  ;;  %15835 = vmatmul.mubr.msk.bf16.gmra.mrb[240].mxu0 %vm187_vm2, %v22837_v19 }
0x1867   :  { %8073 = vmatprep.mubr.bf16.mxu1 %v20359_v26  ;;  %8146 = vmatprep.mubr.bf16.mxu0 %v20359_v26 }
0x186e   :  { %15832 = vmatmul.mubr.msk.bf16.gmra.mrb[252].mxu1 %vm187_vm2, %v22855_v43  ;;  %15836 = vmatmul.mubr.msk.bf16.gmra.mrb[244].mxu0 %vm187_vm2, %v22855_v43 }
0x186f   :  { %8189 = vmatprep.mubr.bf16.mxu1 %v20359_v26  ;;  %8262 = vmatprep.mubr.bf16.mxu0 %v20359_v26 }
0x1876   :  { %15837 = vmatmul.mubr.msk.bf16.vlgmr.msra.gmra.mrb[0].mxu1 %vm187_vm2, %v22773_v21  ;;  %15841 = vmatmul.mubr.msk.bf16.vlgmr.msra.gmra.mrb[248].mxu0 %vm187_vm2, %v22773_v21 }
0x1877   :  { %8304 = vmatpush1.bf16.msra.mxu1 %v15801_v34  ;;  %8377 = vmatpush1.bf16.msra.mxu0 %v15803_v38  ;;  %v23090_v34 = vrot.slane %v23078_v10, %v21535_v50  ;;  %v23094_v38 = vrot.slane %v23078_v10, %v21538_v61 }
0x1878   :  { %8199 = vmatprep.mubr.bf16.mxu1 %v20359_v26  ;;  %8272 = vmatprep.mubr.bf16.mxu0 %v20359_v26 }
0x1879   :  { %8305 = vmatprep.subr.bf16.mxu1 %v15818_v42  ;;  %8378 = vmatprep.subr.bf16.mxu0 %v15820_v39 }
0x187b   :  { %8306 = vmatpush1.bf16.msra.mxu1 %v15817_v5  ;;  %8379 = vmatpush1.bf16.msra.mxu0 %v15819_v23 }
0x187c   :  { %17542 = vmatprep.subr.bf16.mxu1 %v19787_v53  ;;  %17582 = vmatprep.subr.bf16.mxu0 %v19788_v57 }
0x187e   :  { %15838 = vmatmul.mubr.msk.bf16.gmra.mrb[4].mxu1 %vm187_vm2, %v22817_v44  ;;  %15842 = vmatmul.mubr.msk.bf16.gmra.mrb[252].mxu0 %vm187_vm2, %v22817_v44 }
0x187f   :  { %8209 = vmatprep.mubr.bf16.mxu1 %v20359_v26  ;;  %8282 = vmatprep.mubr.bf16.mxu0 %v20359_v26 }
0x1886   :  { %15839 = vmatmul.mubr.msk.bf16.gmra.mrb[8].mxu1 %vm187_vm2, %v22837_v19  ;;  %15843 = vmatmul.mubr.msk.bf16.gmra.mrb[0].mxu0 %vm187_vm2, %v22837_v19 }
0x1887   :  { %8219 = vmatprep.mubr.bf16.mxu1 %v20359_v26  ;;  %8292 = vmatprep.mubr.bf16.mxu0 %v20359_v26 }
0x188e   :  { %15840 = vmatmul.mubr.msk.bf16.gmra.mrb[12].mxu1 %vm187_vm2, %v22855_v43  ;;  %15844 = vmatmul.mubr.msk.bf16.gmra.mrb[4].mxu0 %vm187_vm2, %v22855_v43 }
0x188f   :  { %8335 = vmatprep.mubr.bf16.mxu1 %v20359_v26  ;;  %8408 = vmatprep.mubr.bf16.mxu0 %v20359_v26 }
0x1896   :  { %15845 = vmatmul.mubr.msk.bf16.vlgmr.msra.gmra.mrb[16].mxu1 %vm187_vm2, %v22773_v21  ;;  %15849 = vmatmul.mubr.msk.bf16.vlgmr.msra.gmra.mrb[8].mxu0 %vm187_vm2, %v22773_v21  ;;  %v19795_v21 = vld [vmem:[%s25149_s20 + $0x450] sm:$0xff]  }
0x1897   :  { %8345 = vmatprep.mubr.bf16.mxu1 %v20359_v26  ;;  %8418 = vmatprep.mubr.bf16.mxu0 %v20359_v26 }
0x1898   :  { %17543 = vmatpush3.bf16.msra.mxu1 %v19789_v36  ;;  %17583 = vmatpush3.bf16.msra.mxu0 %v19790_v2 }
0x1899   :  { %17544 = vmatprep.subr.bf16.mxu1 %v19791_v33  ;;  %17584 = vmatprep.subr.bf16.mxu0 %v19792_v58 }
0x189c   :  { %17545 = vmatpush3.bf16.msra.mxu1 %v19793_v41  ;;  %17585 = vmatpush3.bf16.msra.mxu0 %v19794_v30 }
0x189d   :  { %17546 = vmatprep.subr.bf16.mxu1 %v19795_v21  ;;  %17586 = vmatprep.subr.bf16.mxu0 %v19796_v22 }
0x189e   :  { %15846 = vmatmul.mubr.msk.bf16.gmra.mrb[20].mxu1 %vm187_vm2, %v22817_v44  ;;  %15850 = vmatmul.mubr.msk.bf16.gmra.mrb[12].mxu0 %vm187_vm2, %v22817_v44  ;;  %v19803_v44 = vld [vmem:[%s25149_s20 + $0x460] sm:$0xff]  }
0x189f   :  { %8355 = vmatprep.mubr.bf16.mxu1 %v20359_v26  ;;  %8428 = vmatprep.mubr.bf16.mxu0 %v20359_v26 }
0x18a0   :  { %17547 = vmatpush3.bf16.msra.mxu1 %v19797_v40  ;;  %17587 = vmatpush3.bf16.msra.mxu0 %v19798_v0 }
0x18a1   :  { %17548 = vmatprep.subr.bf16.mxu1 %v19799_v48  ;;  %17588 = vmatprep.subr.bf16.mxu0 %v19800_v59 }
0x18a4   :  { %17549 = vmatpush3.bf16.msra.mxu1 %v19801_v18  ;;  %17589 = vmatpush3.bf16.msra.mxu0 %v19802_v25 }
0x18a5   :  { %17550 = vmatprep.subr.bf16.mxu1 %v19803_v44  ;;  %17590 = vmatprep.subr.bf16.mxu0 %v19804_v29 }
0x18a6   :  { %15847 = vmatmul.mubr.msk.bf16.gmra.mrb[24].mxu1 %vm187_vm2, %v22837_v19  ;;  %15851 = vmatmul.mubr.msk.bf16.gmra.mrb[16].mxu0 %vm187_vm2, %v22837_v19  ;;  %v19811_v19 = vld [vmem:[%s25149_s20 + $0x470] sm:$0xff]  }
0x18a7   :  { %8365 = vmatprep.mubr.bf16.mxu1 %v20359_v26  ;;  %8438 = vmatprep.mubr.bf16.mxu0 %v20359_v26 }
0x18a8   :  { %17551 = vmatpush3.bf16.msra.mxu1 %v19805_v32  ;;  %17591 = vmatpush3.bf16.msra.mxu0 %v19806_v52 }
0x18a9   :  { %17552 = vmatprep.subr.bf16.mxu1 %v19807_v47  ;;  %17592 = vmatprep.subr.bf16.mxu0 %v19808_v17 }
0x18ac   :  { %17553 = vmatpush3.bf16.msra.mxu1 %v19809_v1  ;;  %17593 = vmatpush3.bf16.msra.mxu0 %v19810_v4 }
0x18ad   :  { %17554 = vmatprep.subr.bf16.mxu1 %v19811_v19  ;;  %17594 = vmatprep.subr.bf16.mxu0 %v19812_v12 }
0x18ae   :  { %15848 = vmatmul.mubr.msk.bf16.gmra.mrb[28].mxu1 %vm187_vm2, %v22855_v43  ;;  %15852 = vmatmul.mubr.msk.bf16.gmra.mrb[20].mxu0 %vm187_vm2, %v22855_v43  ;;  %v19820_v43 = vld [vmem:[%s25149_s20 + $0x5c0] sm:$0xff]  }
0x18b0   :  { %17555 = vmatpush3.bf16.msra.mxu1 %v19813_v16  ;;  %17595 = vmatpush3.bf16.msra.mxu0 %v19814_v51  ;;  %v19821_v16 = vld [vmem:[%s25149_s20 + $0x500] sm:$0xff]  }
0x18b1   :  { %17556 = vmatprep.subr.bf16.mxu1 %v19815_v46  ;;  %17596 = vmatprep.subr.bf16.mxu0 %v19816_v11  ;;  %v19822_v51 = vld [vmem:[%s25149_s20 + $0x580] sm:$0xff]  }
0x18b4   :  { %17557 = vmatpush3.bf16.msra.mxu1 %v19817_v45  ;;  %17597 = vmatpush3.bf16.msra.mxu0 %v19818_v20 }
0x18b5   :  { %17622 = vmatprep.subr.bf16.mxu1 %v19819_v63  ;;  %17662 = vmatprep.subr.bf16.mxu0 %v19820_v43  ;;  %v19823_v63 = vld [vmem:[%s25149_s20 + $0x548] sm:$0xff]  }
0x18b6   :  { %v19824_v43 = vld [vmem:[%s25149_s20 + $0x5c8] sm:$0xff]  }
0x1909   :  { %v7899_v42 = vpop.f32.mrb[224].mxu1  ;;  %v7972_v39 = vpop.f32.mrb[216].mxu0 }
0x190a   :  { %v7900_v5 = vadd.f32 %v7899_v42, %v23082_v60  ;;  %v7973_v23 = vadd.f32 %v7972_v39, %v23086_v35  ;;  %v7901_v53 = vpop.f32.mrb[225].mxu1  ;;  %v7974_v57 = vpop.f32.mrb[217].mxu0 }
0x190b   :  { %v7902_v36 = vadd.f32 %v7901_v53, %v23090_v34  ;;  %v7975_v2 = vadd.f32 %v7974_v57, %v23094_v38  ;;  %v7903_v33 = vpop.f32.mrb[226].mxu1  ;;  %v7976_v58 = vpop.f32.mrb[218].mxu0 }
0x190c   :  { %v7904_v41 = vadd.f32 %v7903_v33, %v23082_v60  ;;  %v7977_v30 = vadd.f32 %v7976_v58, %v23086_v35  ;;  %v7905_v21 = vpop.f32.mrb[227].mxu1  ;;  %v7978_v22 = vpop.f32.mrb[219].mxu0  ;;  %v8449_v48 = vmax.f32 %v7900_v5, 0.0  ;;  %v8451_v59 = vmax.f32 %v7973_v23, 0.0 }
0x190d   :  { %v7906_v40 = vadd.f32 %v7905_v21, %v23090_v34  ;;  %v7979_v0 = vadd.f32 %v7978_v22, %v23094_v38  ;;  %v8450_v44 = vmax.f32 %v7902_v36, 0.0  ;;  %v8452_v29 = vmax.f32 %v7975_v2, 0.0 }
0x190e   :  { %v8465_v18 = vmax.f32 %v7904_v41, 0.0  ;;  %v8467_v25 = vmax.f32 %v7977_v30, 0.0  ;;  %v19825_v41 = vld [vmem:[%s25149_s20 + $0x508] sm:$0xff]  }
0x190f   :  { %v8466_v32 = vmax.f32 %v7906_v40, 0.0  ;;  %v8468_v52 = vmax.f32 %v7979_v0, 0.0  ;;  %v19826_v30 = vld [vmem:[%s25149_s20 + $0x588] sm:$0xff]  }
0x1910   :  { %v8577_v47 = vpack.c.bf16 %v8465_v18, %v8449_v48  ;;  %v8579_v17 = vpack.c.bf16 %v8467_v25, %v8451_v59  ;;  %v19827_v48 = vld [vmem:[%s25149_s20 + $0x550] sm:$0xff]  }
0x1911   :  { %v7909_v1 = vpop.f32.mrb[228].mxu1  ;;  %v7982_v4 = vpop.f32.mrb[220].mxu0  ;;  %v8578_v19 = vpack.c.bf16 %v8466_v32, %v8450_v44  ;;  %v8580_v12 = vpack.c.bf16 %v8468_v52, %v8452_v29  ;;  %v19828_v59 = vld [vmem:[%s25149_s20 + $0x5d0] sm:$0xff]  }
0x1912   :  { %v7910_v46 = vadd.f32 %v7909_v1, %v23082_v60  ;;  %v7983_v11 = vadd.f32 %v7982_v4, %v23086_v35  ;;  %v7911_v45 = vpop.f32.mrb[229].mxu1  ;;  %v7984_v20 = vpop.f32.mrb[221].mxu0 }
0x1913   :  { %v7912_v42 = vadd.f32 %v7911_v45, %v23090_v34  ;;  %v7985_v39 = vadd.f32 %v7984_v20, %v23094_v38  ;;  %v7913_v5 = vpop.f32.mrb[230].mxu1  ;;  %v7986_v23 = vpop.f32.mrb[222].mxu0  ;;  %9706 = vmatprep.mubr.bf16.mxu1 %v8578_v19  ;;  %9771 = vmatprep.mubr.bf16.mxu0 %v8580_v12  ;;  %v19829_v19 = vld [vmem:[%s25149_s20 + $0x510] sm:$0xff]   ;;  %v19831_v45 = vld [vmem:[%s25149_s20 + $0x558] sm:$0xff]  }
0x1914   :  { %v7914_v53 = vadd.f32 %v7913_v5, %v23082_v60  ;;  %v7987_v57 = vadd.f32 %v7986_v23, %v23086_v35  ;;  %v7915_v36 = vpop.f32.mrb[231].mxu1  ;;  %v7988_v2 = vpop.f32.mrb[223].mxu0  ;;  %9707 = vmatmul.mubr.bf16.vlgmr.msra.gmra.mrb[32].mxu1 %v8577_v47  ;;  %9772 = vmatmul.mubr.bf16.vlgmr.msra.gmra.mrb[24].mxu0 %v8579_v17  ;;  %v8481_v21 = vmax.f32 %v7910_v46, 0.0  ;;  %v8483_v22 = vmax.f32 %v7983_v11, 0.0  ;;  %v19830_v12 = vld [vmem:[%s25149_s20 + $0x590] sm:$0xff]   ;;  %v19832_v20 = vld [vmem:[%s25149_s20 + $0x5d8] sm:$0xff]  }
0x1915   :  { %v7916_v33 = vadd.f32 %v7915_v36, %v23090_v34  ;;  %v7989_v58 = vadd.f32 %v7988_v2, %v23094_v38  ;;  %17623 = vmatpush3.bf16.msra.mxu1 %v19821_v16  ;;  %17663 = vmatpush3.bf16.msra.mxu0 %v19822_v51  ;;  %v8482_v18 = vmax.f32 %v7912_v42, 0.0  ;;  %v8484_v25 = vmax.f32 %v7985_v39, 0.0 }
0x1916   :  { %v8497_v40 = vmax.f32 %v7914_v53, 0.0  ;;  %v8499_v0 = vmax.f32 %v7987_v57, 0.0  ;;  %17624 = vmatprep.subr.bf16.mxu1 %v19823_v63  ;;  %17664 = vmatprep.subr.bf16.mxu0 %v19824_v43 }
0x1917   :  { %v8498_v44 = vmax.f32 %v7916_v33, 0.0  ;;  %v8500_v29 = vmax.f32 %v7989_v58, 0.0  ;;  %v19833_v33 = vld [vmem:[%s25149_s20 + $0x518] sm:$0xff]  }
0x1918   :  { %v8593_v32 = vpack.c.bf16 %v8497_v40, %v8481_v21  ;;  %v8595_v52 = vpack.c.bf16 %v8499_v0, %v8483_v22  ;;  %v19834_v58 = vld [vmem:[%s25149_s20 + $0x598] sm:$0xff]   ;;  %v19835_v40 = vld [vmem:[%s25149_s20 + $0x560] sm:$0xff]  }
0x1919   :  { %v7919_v47 = vpop.f32.mrb[232].mxu1  ;;  %v7992_v17 = vpop.f32.mrb[224].mxu0  ;;  %17625 = vmatpush3.bf16.msra.mxu1 %v19825_v41  ;;  %17665 = vmatpush3.bf16.msra.mxu0 %v19826_v30  ;;  %v8594_v1 = vpack.c.bf16 %v8498_v44, %v8482_v18  ;;  %v8596_v4 = vpack.c.bf16 %v8500_v29, %v8484_v25  ;;  %v19836_v0 = vld [vmem:[%s25149_s20 + $0x5e0] sm:$0xff]  }
0x191a   :  { %v7920_v16 = vadd.f32 %v7919_v47, %v23082_v60  ;;  %v7993_v51 = vadd.f32 %v7992_v17, %v23086_v35  ;;  %v7921_v46 = vpop.f32.mrb[233].mxu1  ;;  %v7994_v11 = vpop.f32.mrb[225].mxu0  ;;  %17626 = vmatprep.subr.bf16.mxu1 %v19827_v48  ;;  %17666 = vmatprep.subr.bf16.mxu0 %v19828_v59 }
0x191b   :  { %v7922_v63 = vadd.f32 %v7921_v46, %v23090_v34  ;;  %v7995_v43 = vadd.f32 %v7994_v11, %v23094_v38  ;;  %v7923_v42 = vpop.f32.mrb[234].mxu1  ;;  %v7996_v39 = vpop.f32.mrb[226].mxu0  ;;  %9714 = vmatprep.mubr.bf16.mxu1 %v8594_v1  ;;  %9779 = vmatprep.mubr.bf16.mxu0 %v8596_v4  ;;  %v19837_v1 = vld [vmem:[%s25149_s20 + $0x520] sm:$0xff]   ;;  %v19839_v46 = vld [vmem:[%s25149_s20 + $0x568] sm:$0xff]  }
0x191c   :  { %v7924_v5 = vadd.f32 %v7923_v42, %v23082_v60  ;;  %v7997_v23 = vadd.f32 %v7996_v39, %v23086_v35  ;;  %v7925_v53 = vpop.f32.mrb[235].mxu1  ;;  %v7998_v57 = vpop.f32.mrb[227].mxu0  ;;  %9715 = vmatmul.mubr.bf16.gmra.mrb[36].mxu1 %v8593_v32  ;;  %9780 = vmatmul.mubr.bf16.gmra.mrb[28].mxu0 %v8595_v52  ;;  %v8513_v41 = vmax.f32 %v7920_v16, 0.0  ;;  %v8515_v30 = vmax.f32 %v7993_v51, 0.0  ;;  %v19838_v4 = vld [vmem:[%s25149_s20 + $0x5a0] sm:$0xff]   ;;  %v19840_v11 = vld [vmem:[%s25149_s20 + $0x5e8] sm:$0xff]  }
0x191d   :  { %v7926_v36 = vadd.f32 %v7925_v53, %v23090_v34  ;;  %v7999_v2 = vadd.f32 %v7998_v57, %v23094_v38  ;;  %17627 = vmatpush3.bf16.msra.mxu1 %v19829_v19  ;;  %17667 = vmatpush3.bf16.msra.mxu0 %v19830_v12  ;;  %v8514_v48 = vmax.f32 %v7922_v63, 0.0  ;;  %v8516_v59 = vmax.f32 %v7995_v43, 0.0 }
0x191e   :  { %v8529_v21 = vmax.f32 %v7924_v5, 0.0  ;;  %v8531_v22 = vmax.f32 %v7997_v23, 0.0  ;;  %17628 = vmatprep.subr.bf16.mxu1 %v19831_v45  ;;  %17668 = vmatprep.subr.bf16.mxu0 %v19832_v20  ;;  %v23184_v45 = vrot.slane %v23078_v10, %v21623_v24  ;;  %v23190_v39 = vrot.slane %v23078_v10, %v21626_v27 }
0x191f   :  { %v8530_v18 = vmax.f32 %v7926_v36, 0.0  ;;  %v8532_v25 = vmax.f32 %v7999_v2, 0.0  ;;  %v23196_v36 = vrot.slane %v23078_v10, %v21635_v49 }
0x1920   :  { %v8609_v44 = vpack.c.bf16 %v8529_v21, %v8513_v41  ;;  %v8611_v29 = vpack.c.bf16 %v8531_v22, %v8515_v30  ;;  %v19844_v22 = vld [vmem:[%s25149_s20 + $0x5f0] sm:$0xff]  }
0x1921   :  { %v7929_v32 = vpop.f32.mrb[236].mxu1  ;;  %v8002_v52 = vpop.f32.mrb[228].mxu0  ;;  %17629 = vmatpush3.bf16.msra.mxu1 %v19833_v33  ;;  %17669 = vmatpush3.bf16.msra.mxu0 %v19834_v58  ;;  %v8610_v47 = vpack.c.bf16 %v8530_v18, %v8514_v48  ;;  %v8612_v17 = vpack.c.bf16 %v8532_v25, %v8516_v59  ;;  %v23208_v58 = vrot.slane %v23078_v10, %v21644_v37 }
0x1922   :  { %v7930_v19 = vadd.f32 %v7929_v32, %v23082_v60  ;;  %v8003_v12 = vadd.f32 %v8002_v52, %v23086_v35  ;;  %v7931_v16 = vpop.f32.mrb[237].mxu1  ;;  %v8004_v51 = vpop.f32.mrb[229].mxu0  ;;  %17630 = vmatprep.subr.bf16.mxu1 %v19835_v40  ;;  %17670 = vmatprep.subr.bf16.mxu0 %v19836_v0  ;;  %v19845_v52 = vld [vmem:[%s25149_s20 + $0x530] sm:$0xff]  }
0x1923   :  { %v7932_v20 = vadd.f32 %v7931_v16, %v23090_v34  ;;  %v8005_v63 = vadd.f32 %v8004_v51, %v23094_v38  ;;  %v7933_v43 = vpop.f32.mrb[238].mxu1  ;;  %v8006_v42 = vpop.f32.mrb[230].mxu0  ;;  %9722 = vmatprep.mubr.bf16.mxu1 %v8610_v47  ;;  %9787 = vmatprep.mubr.bf16.mxu0 %v8612_v17  ;;  %v19846_v47 = vld [vmem:[%s25149_s20 + $0x5b0] sm:$0xff]   ;;  %v19848_v16 = vld [vmem:[%s25149_s20 + $0x5f8] sm:$0xff]  }
0x1924   :  { %v7934_v5 = vadd.f32 %v7933_v43, %v23082_v60  ;;  %v8007_v23 = vadd.f32 %v8006_v42, %v23086_v35  ;;  %v7935_v53 = vpop.f32.mrb[239].mxu1  ;;  %v8008_v57 = vpop.f32.mrb[231].mxu0  ;;  %9723 = vmatmul.mubr.bf16.gmra.mrb[40].mxu1 %v8609_v44  ;;  %9788 = vmatmul.mubr.bf16.gmra.mrb[32].mxu0 %v8611_v29  ;;  %v19841_v60 = vld [vmem:[%s25149_s20 + $0x528] sm:$0xff]   ;;  %v8545_v41 = vmax.f32 %v7930_v19, 0.0  ;;  %v8547_v30 = vmax.f32 %v8003_v12, 0.0  ;;  %v19847_v12 = vld [vmem:[%s25149_s20 + $0x578] sm:$0xff]  }
0x1925   :  { %v7936_v2 = vadd.f32 %v7935_v53, %v23090_v34  ;;  %v8009_v33 = vadd.f32 %v8008_v57, %v23094_v38  ;;  %17631 = vmatpush3.bf16.msra.mxu1 %v19837_v1  ;;  %17671 = vmatpush3.bf16.msra.mxu0 %v19838_v4  ;;  %v19842_v35 = vld [vmem:[%s25149_s20 + $0x5a8] sm:$0xff]   ;;  %v19843_v38 = vld [vmem:[%s25149_s20 + $0x570] sm:$0xff]   ;;  %v8546_v40 = vmax.f32 %v7932_v20, 0.0  ;;  %v8548_v0 = vmax.f32 %v8005_v63, 0.0  ;;  %v19849_v57 = vld [vmem:[%s25149_s20 + $0x538] sm:$0xff]  }
0x1926   :  { %v8561_v21 = vmax.f32 %v7934_v5, 0.0  ;;  %v8563_v34 = vmax.f32 %v8007_v23, 0.0  ;;  %17632 = vmatprep.subr.bf16.mxu1 %v19839_v46  ;;  %17672 = vmatprep.subr.bf16.mxu0 %v19840_v11 }
0x1927   :  { %v8562_v48 = vmax.f32 %v7936_v2, 0.0  ;;  %v8564_v59 = vmax.f32 %v8009_v33, 0.0  ;;  %v19850_v2 = vld [vmem:[%s25149_s20 + $0x5b8] sm:$0xff]  }
0x1928   :  { %v8625_v10 = vpack.c.bf16 %v8561_v21, %v8545_v41  ;;  %v8627_v18 = vpack.c.bf16 %v8563_v34, %v8547_v30  ;;  %v19851_v30 = vld [vmem:[%s25149_s20 + $0x640] sm:$0xff]  }
0x1929   :  { %v8045_v25 = vpop.f32.mrb[240].mxu1  ;;  %v8118_v44 = vpop.f32.mrb[232].mxu0  ;;  %17633 = vmatpush3.bf16.msra.mxu1 %v19841_v60  ;;  %17673 = vmatpush3.bf16.msra.mxu0 %v19842_v35  ;;  %v8626_v29 = vpack.c.bf16 %v8562_v48, %v8546_v40  ;;  %v8628_v32 = vpack.c.bf16 %v8564_v59, %v8548_v0  ;;  %v19852_v21 = vld [vmem:[%s25149_s20 + $0x6c0] sm:$0xff]  }
0x192a   :  { %v8046_v17 = vadd.f32 %v8045_v25, %v23184_v45  ;;  %v8119_v1 = vadd.f32 %v8118_v44, %v23190_v39  ;;  %v8047_v4 = vpop.f32.mrb[241].mxu1  ;;  %v8120_v19 = vpop.f32.mrb[233].mxu0  ;;  %17634 = vmatprep.subr.bf16.mxu1 %v19843_v38  ;;  %17674 = vmatprep.subr.bf16.mxu0 %v19844_v22  ;;  %v19853_v44 = vld [vmem:[%s25149_s20 + $0x600] sm:$0xff]  }
0x192b   :  { %v8048_v51 = vadd.f32 %v8047_v4, %v23196_v36  ;;  %v8121_v46 = vadd.f32 %v8120_v19, %v23208_v58  ;;  %v8049_v11 = vpop.f32.mrb[242].mxu1  ;;  %v8122_v20 = vpop.f32.mrb[234].mxu0  ;;  %9730 = vmatprep.mubr.bf16.mxu1 %v8626_v29  ;;  %9795 = vmatprep.mubr.bf16.mxu0 %v8628_v32  ;;  %v19854_v29 = vld [vmem:[%s25149_s20 + $0x680] sm:$0xff]   ;;  %v19856_v4 = vld [vmem:[%s25149_s20 + $0x6c8] sm:$0xff]  }
0x192c   :  { %v8050_v63 = vadd.f32 %v8049_v11, %v23184_v45  ;;  %v8123_v43 = vadd.f32 %v8122_v20, %v23190_v39  ;;  %v8051_v42 = vpop.f32.mrb[243].mxu1  ;;  %v8124_v5 = vpop.f32.mrb[235].mxu0  ;;  %9731 = vmatmul.mubr.bf16.gmra.mrb[48].mxu1 %v8625_v10  ;;  %9796 = vmatmul.mubr.bf16.gmra.mrb[36].mxu0 %v8627_v18  ;;  %v8453_v33 = vmax.f32 %v8046_v17, 0.0  ;;  %v8455_v60 = vmax.f32 %v8119_v1, 0.0  ;;  %v19855_v1 = vld [vmem:[%s25149_s20 + $0x648] sm:$0xff]  }
0x192d   :  { %v8052_v23 = vadd.f32 %v8051_v42, %v23196_v36  ;;  %v8125_v53 = vadd.f32 %v8124_v5, %v23208_v58  ;;  %17635 = vmatpush3.bf16.msra.mxu1 %v19845_v52  ;;  %17675 = vmatpush3.bf16.msra.mxu0 %v19846_v47  ;;  %v8454_v34 = vmax.f32 %v8048_v51, 0.0  ;;  %v8456_v38 = vmax.f32 %v8121_v46, 0.0  ;;  %v19857_v5 = vld [vmem:[%s25149_s20 + $0x608] sm:$0xff]  }
0x192e   :  { %v8469_v35 = vmax.f32 %v8050_v63, 0.0  ;;  %v8471_v41 = vmax.f32 %v8123_v43, 0.0  ;;  %17636 = vmatprep.subr.bf16.mxu1 %v19847_v12  ;;  %17676 = vmatprep.subr.bf16.mxu0 %v19848_v16 }
0x192f   :  { %v8470_v22 = vmax.f32 %v8052_v23, 0.0  ;;  %v8472_v40 = vmax.f32 %v8125_v53, 0.0  ;;  %v19858_v23 = vld [vmem:[%s25149_s20 + $0x688] sm:$0xff]  }
0x1930   :  { %v8581_v0 = vpack.c.bf16 %v8469_v35, %v8453_v33  ;;  %v8583_v48 = vpack.c.bf16 %v8471_v41, %v8455_v60  ;;  %v19859_v60 = vld [vmem:[%s25149_s20 + $0x650] sm:$0xff]  }
0x1931   :  { %v8055_v59 = vpop.f32.mrb[244].mxu1  ;;  %v8128_v10 = vpop.f32.mrb[236].mxu0  ;;  %17637 = vmatpush3.bf16.msra.mxu1 %v19849_v57  ;;  %17677 = vmatpush3.bf16.msra.mxu0 %v19850_v2  ;;  %v8582_v18 = vpack.c.bf16 %v8470_v22, %v8454_v34  ;;  %v8584_v25 = vpack.c.bf16 %v8472_v40, %v8456_v38  ;;  %v19860_v35 = vld [vmem:[%s25149_s20 + $0x6d0] sm:$0xff]  }
0x1932   :  { %v8056_v32 = vadd.f32 %v8055_v59, %v23184_v45  ;;  %v8129_v52 = vadd.f32 %v8128_v10, %v23190_v39  ;;  %v8057_v47 = vpop.f32.mrb[245].mxu1  ;;  %v8130_v17 = vpop.f32.mrb[237].mxu0  ;;  %17702 = vmatprep.subr.bf16.mxu1 %v19851_v30  ;;  %17742 = vmatprep.subr.bf16.mxu0 %v19852_v21  ;;  %v19861_v10 = vld [vmem:[%s25149_s20 + $0x610] sm:$0xff]  }
0x1933   :  { %v8058_v19 = vadd.f32 %v8057_v47, %v23196_v36  ;;  %v8131_v12 = vadd.f32 %v8130_v17, %v23208_v58  ;;  %v8059_v16 = vpop.f32.mrb[246].mxu1  ;;  %v8132_v51 = vpop.f32.mrb[238].mxu0  ;;  %9836 = vmatprep.mubr.bf16.mxu1 %v8582_v18  ;;  %9901 = vmatprep.mubr.bf16.mxu0 %v8584_v25  ;;  %v19862_v18 = vld [vmem:[%s25149_s20 + $0x690] sm:$0xff]   ;;  %v19864_v47 = vld [vmem:[%s25149_s20 + $0x6d8] sm:$0xff]  }
0x1934   :  { %v8060_v46 = vadd.f32 %v8059_v16, %v23184_v45  ;;  %v8133_v11 = vadd.f32 %v8132_v51, %v23190_v39  ;;  %v8061_v20 = vpop.f32.mrb[247].mxu1  ;;  %v8134_v63 = vpop.f32.mrb[239].mxu0  ;;  %9837 = vmatmul.mubr.bf16.vlgmr.msra.gmra.mrb[52].mxu1 %v8581_v0  ;;  %9902 = vmatmul.mubr.bf16.vlgmr.msra.gmra.mrb[40].mxu0 %v8583_v48  ;;  %v8485_v53 = vmax.f32 %v8056_v32, 0.0  ;;  %v8487_v57 = vmax.f32 %v8129_v52, 0.0  ;;  %v19863_v52 = vld [vmem:[%s25149_s20 + $0x658] sm:$0xff]  }
0x1935   :  { %v8062_v43 = vadd.f32 %v8061_v20, %v23196_v36  ;;  %v8135_v42 = vadd.f32 %v8134_v63, %v23208_v58  ;;  %17703 = vmatpush3.bf16.msra.mxu1 %v19853_v44  ;;  %17743 = vmatpush3.bf16.msra.mxu0 %v19854_v29  ;;  %v8486_v41 = vmax.f32 %v8058_v19, 0.0  ;;  %v8488_v30 = vmax.f32 %v8131_v12, 0.0  ;;  %v19865_v63 = vld [vmem:[%s25149_s20 + $0x618] sm:$0xff]  }
0x1936   :  { %v8501_v2 = vmax.f32 %v8060_v46, 0.0  ;;  %v8503_v33 = vmax.f32 %v8133_v11, 0.0  ;;  %17704 = vmatprep.subr.bf16.mxu1 %v19855_v1  ;;  %17744 = vmatprep.subr.bf16.mxu0 %v19856_v4 }
0x1937   :  { %v8502_v21 = vmax.f32 %v8062_v43, 0.0  ;;  %v8504_v34 = vmax.f32 %v8135_v42, 0.0  ;;  %v19866_v43 = vld [vmem:[%s25149_s20 + $0x698] sm:$0xff]  }
0x1938   :  { %v8597_v38 = vpack.c.bf16 %v8501_v2, %v8485_v53  ;;  %v8599_v22 = vpack.c.bf16 %v8503_v33, %v8487_v57  ;;  %v19867_v57 = vld [vmem:[%s25149_s20 + $0x660] sm:$0xff]  }
0x1939   :  { %v8065_v40 = vpop.f32.mrb[248].mxu1  ;;  %v8138_v0 = vpop.f32.mrb[240].mxu0  ;;  %17705 = vmatpush3.bf16.msra.mxu1 %v19857_v5  ;;  %17745 = vmatpush3.bf16.msra.mxu0 %v19858_v23  ;;  %v8598_v48 = vpack.c.bf16 %v8502_v21, %v8486_v41  ;;  %v8600_v59 = vpack.c.bf16 %v8504_v34, %v8488_v30  ;;  %v19868_v2 = vld [vmem:[%s25149_s20 + $0x6e0] sm:$0xff]   ;;  %v23315_v30 = vld [vmem:[%s25148_s19 + $0x18] sm:$0xff] }
0x193a   :  { %v8066_v25 = vadd.f32 %v8065_v40, %v23184_v45  ;;  %v8139_v44 = vadd.f32 %v8138_v0, %v23190_v39  ;;  %v8067_v29 = vpop.f32.mrb[249].mxu1  ;;  %v8140_v32 = vpop.f32.mrb[241].mxu0  ;;  %17706 = vmatprep.subr.bf16.mxu1 %v19859_v60  ;;  %17746 = vmatprep.subr.bf16.mxu0 %v19860_v35 }
0x193b   :  { %v8068_v17 = vadd.f32 %v8067_v29, %v23196_v36  ;;  %v8141_v1 = vadd.f32 %v8140_v32, %v23208_v58  ;;  %v8069_v4 = vpop.f32.mrb[250].mxu1  ;;  %v8142_v19 = vpop.f32.mrb[242].mxu0  ;;  %9844 = vmatprep.mubr.bf16.mxu1 %v8598_v48  ;;  %9909 = vmatprep.mubr.bf16.mxu0 %v8600_v59  ;;  %v19869_v48 = vld [vmem:[%s25149_s20 + $0x620] sm:$0xff]   ;;  %v19871_v29 = vld [vmem:[%s25149_s20 + $0x668] sm:$0xff]  }
0x193c   :  { %v8070_v12 = vadd.f32 %v8069_v4, %v23184_v45  ;;  %v8143_v16 = vadd.f32 %v8142_v19, %v23190_v39  ;;  %v8071_v51 = vpop.f32.mrb[251].mxu1  ;;  %v8144_v46 = vpop.f32.mrb[243].mxu0  ;;  %9845 = vmatmul.mubr.bf16.gmra.mrb[56].mxu1 %v8597_v38  ;;  %9910 = vmatmul.mubr.bf16.gmra.mrb[44].mxu0 %v8599_v22  ;;  %v8517_v42 = vmax.f32 %v8066_v25, 0.0  ;;  %v8519_v5 = vmax.f32 %v8139_v44, 0.0  ;;  %v19870_v59 = vld [vmem:[%s25149_s20 + $0x6a0] sm:$0xff]   ;;  %v19872_v32 = vld [vmem:[%s25149_s20 + $0x6e8] sm:$0xff]  }
0x193d   :  { %v8072_v11 = vadd.f32 %v8071_v51, %v23196_v36  ;;  %v8145_v20 = vadd.f32 %v8144_v46, %v23208_v58  ;;  %17707 = vmatpush3.bf16.msra.mxu1 %v19861_v10  ;;  %17747 = vmatpush3.bf16.msra.mxu0 %v19862_v18  ;;  %v8518_v33 = vmax.f32 %v8068_v17, 0.0  ;;  %v8520_v60 = vmax.f32 %v8141_v1, 0.0 }
0x193e   :  { %v8533_v23 = vmax.f32 %v8070_v12, 0.0  ;;  %v8535_v53 = vmax.f32 %v8143_v16, 0.0  ;;  %17708 = vmatprep.subr.bf16.mxu1 %v19863_v52  ;;  %17748 = vmatprep.subr.bf16.mxu0 %v19864_v47  ;;  %v23333_v52 = vrot.slane %v23315_v30, %v20608_v14  ;;  %v23339_v19 = vrot.slane %v23315_v30, %v21527_v28 }
0x193f   :  { %v8534_v35 = vmax.f32 %v8072_v11, 0.0  ;;  %v8536_v41 = vmax.f32 %v8145_v20, 0.0  ;;  %v23345_v11 = vrot.slane %v23315_v30, %v21535_v50 }
0x1940   :  { %v8613_v21 = vpack.c.bf16 %v8533_v23, %v8517_v42  ;;  %v8615_v34 = vpack.c.bf16 %v8535_v53, %v8519_v5  ;;  %v19876_v53 = vld [vmem:[%s25149_s20 + $0x6f0] sm:$0xff]  }
0x1941   :  { %v8075_v38 = vpop.f32.mrb[252].mxu1  ;;  %v8148_v22 = vpop.f32.mrb[244].mxu0  ;;  %17709 = vmatpush3.bf16.msra.mxu1 %v19865_v63  ;;  %17749 = vmatpush3.bf16.msra.mxu0 %v19866_v43  ;;  %v8614_v40 = vpack.c.bf16 %v8534_v35, %v8518_v33  ;;  %v8616_v0 = vpack.c.bf16 %v8536_v41, %v8520_v60  ;;  %v23357_v43 = vrot.slane %v23315_v30, %v21538_v61 }
0x1942   :  { %v8076_v10 = vadd.f32 %v8075_v38, %v23184_v45  ;;  %v8149_v18 = vadd.f32 %v8148_v22, %v23190_v39  ;;  %v8077_v25 = vpop.f32.mrb[253].mxu1  ;;  %v8150_v44 = vpop.f32.mrb[245].mxu0  ;;  %17710 = vmatprep.subr.bf16.mxu1 %v19867_v57  ;;  %17750 = vmatprep.subr.bf16.mxu0 %v19868_v2 }
0x1943   :  { %v8078_v47 = vadd.f32 %v8077_v25, %v23196_v36  ;;  %v8151_v17 = vadd.f32 %v8150_v44, %v23208_v58  ;;  %v8079_v1 = vpop.f32.mrb[254].mxu1  ;;  %v8152_v4 = vpop.f32.mrb[246].mxu0  ;;  %9852 = vmatprep.mubr.bf16.mxu1 %v8614_v40  ;;  %9917 = vmatprep.mubr.bf16.mxu0 %v8616_v0  ;;  %v19877_v40 = vld [vmem:[%s25149_s20 + $0x630] sm:$0xff]   ;;  %v19879_v25 = vld [vmem:[%s25149_s20 + $0x678] sm:$0xff]  }
0x1944   :  { %v8080_v12 = vadd.f32 %v8079_v1, %v23184_v45  ;;  %v8153_v16 = vadd.f32 %v8152_v4, %v23190_v39  ;;  %v8081_v51 = vpop.f32.mrb[255].mxu1  ;;  %v8154_v46 = vpop.f32.mrb[247].mxu0  ;;  %9853 = vmatmul.mubr.bf16.gmra.mrb[60].mxu1 %v8613_v21  ;;  %9918 = vmatmul.mubr.bf16.gmra.mrb[48].mxu0 %v8615_v34  ;;  %v19873_v45 = vld [vmem:[%s25149_s20 + $0x628] sm:$0xff]   ;;  %v8549_v42 = vmax.f32 %v8076_v10, 0.0  ;;  %v8551_v5 = vmax.f32 %v8149_v18, 0.0  ;;  %v19878_v0 = vld [vmem:[%s25149_s20 + $0x6b0] sm:$0xff]  }
0x1945   :  { %v8082_v20 = vadd.f32 %v8081_v51, %v23196_v36  ;;  %v8155_v63 = vadd.f32 %v8154_v46, %v23208_v58  ;;  %17711 = vmatpush3.bf16.msra.mxu1 %v19869_v48  ;;  %17751 = vmatpush3.bf16.msra.mxu0 %v19870_v59  ;;  %v19874_v39 = vld [vmem:[%s25149_s20 + $0x6a8] sm:$0xff]   ;;  %v19875_v58 = vld [vmem:[%s25149_s20 + $0x670] sm:$0xff]   ;;  %v8550_v57 = vmax.f32 %v8078_v47, 0.0  ;;  %v8552_v2 = vmax.f32 %v8151_v17, 0.0  ;;  %v19880_v44 = vld [vmem:[%s25149_s20 + $0x6f8] sm:$0xff]  }
0x1946   :  { %v8565_v23 = vmax.f32 %v8080_v12, 0.0  ;;  %v8567_v36 = vmax.f32 %v8153_v16, 0.0  ;;  %17712 = vmatprep.subr.bf16.mxu1 %v19871_v29  ;;  %17752 = vmatprep.subr.bf16.mxu0 %v19872_v32 }
0x1947   :  { %v8566_v33 = vmax.f32 %v8082_v20, 0.0  ;;  %v8568_v60 = vmax.f32 %v8155_v63, 0.0  ;;  %v19881_v20 = vld [vmem:[%s25149_s20 + $0x638] sm:$0xff]  }
0x1948   :  { %v8629_v35 = vpack.c.bf16 %v8565_v23, %v8549_v42  ;;  %v8631_v41 = vpack.c.bf16 %v8567_v36, %v8551_v5  ;;  %v19882_v63 = vld [vmem:[%s25149_s20 + $0x6b8] sm:$0xff]   ;;  %v19883_v23 = vld [vmem:[%s25149_s20 + $0x740] sm:$0xff]  }
0x1949   :  { %v8191_v21 = vpop.f32.mrb[0].mxu1  ;;  %v8264_v34 = vpop.f32.mrb[248].mxu0  ;;  %17713 = vmatpush3.bf16.msra.mxu1 %v19873_v45  ;;  %17753 = vmatpush3.bf16.msra.mxu0 %v19874_v39  ;;  %v8630_v38 = vpack.c.bf16 %v8566_v33, %v8550_v57  ;;  %v8632_v22 = vpack.c.bf16 %v8568_v60, %v8552_v2  ;;  %v19884_v36 = vld [vmem:[%s25149_s20 + $0x7c0] sm:$0xff]  }
0x194a   :  { %v8192_v48 = vadd.f32 %v8191_v21, %v23333_v52  ;;  %v8265_v59 = vadd.f32 %v8264_v34, %v23339_v19  ;;  %v8193_v10 = vpop.f32.mrb[1].mxu1  ;;  %v8266_v18 = vpop.f32.mrb[249].mxu0  ;;  %17714 = vmatprep.subr.bf16.mxu1 %v19875_v58  ;;  %17754 = vmatprep.subr.bf16.mxu0 %v19876_v53 }
0x194b   :  { %v8194_v29 = vadd.f32 %v8193_v10, %v23345_v11  ;;  %v8267_v32 = vadd.f32 %v8266_v18, %v23357_v43  ;;  %v8195_v47 = vpop.f32.mrb[2].mxu1  ;;  %v8268_v17 = vpop.f32.mrb[250].mxu0  ;;  %9860 = vmatprep.mubr.bf16.mxu1 %v8630_v38  ;;  %9925 = vmatprep.mubr.bf16.mxu0 %v8632_v22  ;;  %v19885_v38 = vld [vmem:[%s25149_s20 + $0x700] sm:$0xff]   ;;  %v19887_v10 = vld [vmem:[%s25149_s20 + $0x748] sm:$0xff]  }
0x194c   :  { %v8196_v1 = vadd.f32 %v8195_v47, %v23333_v52  ;;  %v8269_v4 = vadd.f32 %v8268_v17, %v23339_v19  ;;  %v8197_v12 = vpop.f32.mrb[3].mxu1  ;;  %v8270_v16 = vpop.f32.mrb[251].mxu0  ;;  %9861 = vmatmul.mubr.bf16.gmra.mrb[64].mxu1 %v8629_v35  ;;  %9926 = vmatmul.mubr.bf16.gmra.mrb[52].mxu0 %v8631_v41  ;;  %v8457_v45 = vmax.f32 %v8192_v48, 0.0  ;;  %v8459_v39 = vmax.f32 %v8265_v59, 0.0  ;;  %v19886_v22 = vld [vmem:[%s25149_s20 + $0x780] sm:$0xff]   ;;  %v19888_v18 = vld [vmem:[%s25149_s20 + $0x7c8] sm:$0xff]  }
0x194d   :  { %v8198_v51 = vadd.f32 %v8197_v12, %v23345_v11  ;;  %v8271_v46 = vadd.f32 %v8270_v16, %v23357_v43  ;;  %17715 = vmatpush3.bf16.msra.mxu1 %v19877_v40  ;;  %17755 = vmatpush3.bf16.msra.mxu0 %v19878_v0  ;;  %v8458_v58 = vmax.f32 %v8194_v29, 0.0  ;;  %v8460_v53 = vmax.f32 %v8267_v32, 0.0 }
0x194e   :  { %v8473_v42 = vmax.f32 %v8196_v1, 0.0  ;;  %v8475_v5 = vmax.f32 %v8269_v4, 0.0  ;;  %17716 = vmatprep.subr.bf16.mxu1 %v19879_v25  ;;  %17756 = vmatprep.subr.bf16.mxu0 %v19880_v44 }
0x194f   :  { %v8474_v57 = vmax.f32 %v8198_v51, 0.0  ;;  %v8476_v2 = vmax.f32 %v8271_v46, 0.0  ;;  %v19889_v51 = vld [vmem:[%s25149_s20 + $0x708] sm:$0xff]  }
0x1950   :  { %v8585_v33 = vpack.c.bf16 %v8473_v42, %v8457_v45  ;;  %v8587_v60 = vpack.c.bf16 %v8475_v5, %v8459_v39  ;;  %v19890_v46 = vld [vmem:[%s25149_s20 + $0x788] sm:$0xff]   ;;  %v19891_v42 = vld [vmem:[%s25149_s20 + $0x750] sm:$0xff]  }
0x1951   :  { %v8201_v35 = vpop.f32.mrb[4].mxu1  ;;  %v8274_v41 = vpop.f32.mrb[252].mxu0  ;;  %17717 = vmatpush3.bf16.msra.mxu1 %v19881_v20  ;;  %17757 = vmatpush3.bf16.msra.mxu0 %v19882_v63  ;;  %v8586_v21 = vpack.c.bf16 %v8474_v57, %v8458_v58  ;;  %v8588_v34 = vpack.c.bf16 %v8476_v2, %v8460_v53  ;;  %v19892_v5 = vld [vmem:[%s25149_s20 + $0x7d0] sm:$0xff]  }
0x1952   :  { %v8202_v40 = vadd.f32 %v8201_v35, %v23333_v52  ;;  %v8275_v0 = vadd.f32 %v8274_v41, %v23339_v19  ;;  %v8203_v48 = vpop.f32.mrb[5].mxu1  ;;  %v8276_v59 = vpop.f32.mrb[253].mxu0  ;;  %17782 = vmatprep.subr.bf16.mxu1 %v19883_v23  ;;  %17822 = vmatprep.subr.bf16.mxu0 %v19884_v36 }
0x1953   :  { %v8204_v25 = vadd.f32 %v8203_v48, %v23345_v11  ;;  %v8277_v44 = vadd.f32 %v8276_v59, %v23357_v43  ;;  %v8205_v29 = vpop.f32.mrb[6].mxu1  ;;  %v8278_v32 = vpop.f32.mrb[254].mxu0  ;;  %9966 = vmatprep.mubr.bf16.mxu1 %v8586_v21  ;;  %10031 = vmatprep.mubr.bf16.mxu0 %v8588_v34  ;;  %v19893_v21 = vld [vmem:[%s25149_s20 + $0x710] sm:$0xff]   ;;  %v19895_v48 = vld [vmem:[%s25149_s20 + $0x758] sm:$0xff]  }
0x1954   :  { %v8206_v47 = vadd.f32 %v8205_v29, %v23333_v52  ;;  %v8279_v17 = vadd.f32 %v8278_v32, %v23339_v19  ;;  %v8207_v1 = vpop.f32.mrb[7].mxu1  ;;  %v8280_v4 = vpop.f32.mrb[255].mxu0  ;;  %9967 = vmatmul.mubr.bf16.vlgmr.msra.gmra.mrb[68].mxu1 %v8585_v33  ;;  %10032 = vmatmul.mubr.bf16.vlgmr.msra.gmra.mrb[56].mxu0 %v8587_v60  ;;  %v8489_v20 = vmax.f32 %v8202_v40, 0.0  ;;  %v8491_v63 = vmax.f32 %v8275_v0, 0.0  ;;  %v19894_v34 = vld [vmem:[%s25149_s20 + $0x790] sm:$0xff]   ;;  %v19896_v59 = vld [vmem:[%s25149_s20 + $0x7d8] sm:$0xff]  }
0x1955   :  { %v8208_v12 = vadd.f32 %v8207_v1, %v23345_v11  ;;  %v8281_v16 = vadd.f32 %v8280_v4, %v23357_v43  ;;  %17783 = vmatpush3.bf16.msra.mxu1 %v19885_v38  ;;  %17823 = vmatpush3.bf16.msra.mxu0 %v19886_v22  ;;  %v8490_v23 = vmax.f32 %v8204_v25, 0.0  ;;  %v8492_v36 = vmax.f32 %v8277_v44, 0.0 }
0x1956   :  { %v8505_v45 = vmax.f32 %v8206_v47, 0.0  ;;  %v8507_v39 = vmax.f32 %v8279_v17, 0.0  ;;  %17784 = vmatprep.subr.bf16.mxu1 %v19887_v10  ;;  %17824 = vmatprep.subr.bf16.mxu0 %v19888_v18 }
0x1957   :  { %v8506_v58 = vmax.f32 %v8208_v12, 0.0  ;;  %v8508_v53 = vmax.f32 %v8281_v16, 0.0  ;;  %v19897_v12 = vld [vmem:[%s25149_s20 + $0x718] sm:$0xff]  }
0x1958   :  { %v8601_v57 = vpack.c.bf16 %v8505_v45, %v8489_v20  ;;  %v8603_v2 = vpack.c.bf16 %v8507_v39, %v8491_v63  ;;  %v19898_v16 = vld [vmem:[%s25149_s20 + $0x798] sm:$0xff]   ;;  %v19899_v45 = vld [vmem:[%s25149_s20 + $0x760] sm:$0xff]  }
0x1959   :  { %v8211_v33 = vpop.f32.mrb[8].mxu1  ;;  %v8284_v60 = vpop.f32.mrb[0].mxu0  ;;  %17785 = vmatpush3.bf16.msra.mxu1 %v19889_v51  ;;  %17825 = vmatpush3.bf16.msra.mxu0 %v19890_v46  ;;  %v8602_v35 = vpack.c.bf16 %v8506_v58, %v8490_v23  ;;  %v8604_v41 = vpack.c.bf16 %v8508_v53, %v8492_v36  ;;  %v19900_v39 = vld [vmem:[%s25149_s20 + $0x7e0] sm:$0xff]  }
0x195a   :  { %v8212_v38 = vadd.f32 %v8211_v33, %v23333_v52  ;;  %v8285_v22 = vadd.f32 %v8284_v60, %v23339_v19  ;;  %v8213_v40 = vpop.f32.mrb[9].mxu1  ;;  %v8286_v0 = vpop.f32.mrb[1].mxu0  ;;  %17786 = vmatprep.subr.bf16.mxu1 %v19891_v42  ;;  %17826 = vmatprep.subr.bf16.mxu0 %v19892_v5 }
0x195b   :  { %v8214_v10 = vadd.f32 %v8213_v40, %v23345_v11  ;;  %v8287_v18 = vadd.f32 %v8286_v0, %v23357_v43  ;;  %v8215_v25 = vpop.f32.mrb[10].mxu1  ;;  %v8288_v44 = vpop.f32.mrb[2].mxu0  ;;  %9974 = vmatprep.mubr.bf16.mxu1 %v8602_v35  ;;  %10039 = vmatprep.mubr.bf16.mxu0 %v8604_v41  ;;  %v19901_v35 = vld [vmem:[%s25149_s20 + $0x720] sm:$0xff]   ;;  %v19903_v40 = vld [vmem:[%s25149_s20 + $0x768] sm:$0xff]  }
0x195c   :  { %v8216_v29 = vadd.f32 %v8215_v25, %v23333_v52  ;;  %v8289_v32 = vadd.f32 %v8288_v44, %v23339_v19  ;;  %v8217_v47 = vpop.f32.mrb[11].mxu1  ;;  %v8290_v17 = vpop.f32.mrb[3].mxu0  ;;  %9975 = vmatmul.mubr.bf16.gmra.mrb[72].mxu1 %v8601_v57  ;;  %10040 = vmatmul.mubr.bf16.gmra.mrb[60].mxu0 %v8603_v2  ;;  %v8521_v51 = vmax.f32 %v8212_v38, 0.0  ;;  %v8523_v46 = vmax.f32 %v8285_v22, 0.0  ;;  %v19902_v41 = vld [vmem:[%s25149_s20 + $0x7a0] sm:$0xff]   ;;  %v19904_v0 = vld [vmem:[%s25149_s20 + $0x7e8] sm:$0xff]  }
0x195d   :  { %v8218_v1 = vadd.f32 %v8217_v47, %v23345_v11  ;;  %v8291_v4 = vadd.f32 %v8290_v17, %v23357_v43  ;;  %17787 = vmatpush3.bf16.msra.mxu1 %v19893_v21  ;;  %17827 = vmatpush3.bf16.msra.mxu0 %v19894_v34  ;;  %v8522_v42 = vmax.f32 %v8214_v10, 0.0  ;;  %v8524_v5 = vmax.f32 %v8287_v18, 0.0 }
0x195e   :  { %v8537_v20 = vmax.f32 %v8216_v29, 0.0  ;;  %v8539_v63 = vmax.f32 %v8289_v32, 0.0  ;;  %17788 = vmatprep.subr.bf16.mxu1 %v19895_v48  ;;  %17828 = vmatprep.subr.bf16.mxu0 %v19896_v59  ;;  %v23477_v48 = vrot.slane %v23315_v30, %v21623_v24  ;;  %v23483_v44 = vrot.slane %v23315_v30, %v21626_v27 }
0x195f   :  { %v8538_v23 = vmax.f32 %v8218_v1, 0.0  ;;  %v8540_v36 = vmax.f32 %v8291_v4, 0.0  ;;  %v23489_v1 = vrot.slane %v23315_v30, %v21635_v49 }
0x1960   :  { %v8617_v58 = vpack.c.bf16 %v8537_v20, %v8521_v51  ;;  %v8619_v53 = vpack.c.bf16 %v8539_v63, %v8523_v46  ;;  %v19908_v63 = vld [vmem:[%s25149_s20 + $0x7f0] sm:$0xff]  }
0x1961   :  { %v8620_v57 = vpack.c.bf16 %v8540_v36, %v8524_v5  ;;  %v8221_v2 = vpop.f32.mrb[12].mxu1  ;;  %v8294_v33 = vpop.f32.mrb[4].mxu0  ;;  %17789 = vmatpush3.bf16.msra.mxu1 %v19897_v12  ;;  %17829 = vmatpush3.bf16.msra.mxu0 %v19898_v16  ;;  %v8618_v60 = vpack.c.bf16 %v8538_v23, %v8522_v42  ;;  %v23501_v16 = vrot.slane %v23315_v30, %v21644_v37 }
0x1962   :  { %v8222_v21 = vadd.f32 %v8221_v2, %v23333_v52  ;;  %v8295_v34 = vadd.f32 %v8294_v33, %v23339_v19  ;;  %v8223_v38 = vpop.f32.mrb[13].mxu1  ;;  %v8296_v22 = vpop.f32.mrb[5].mxu0  ;;  %17790 = vmatprep.subr.bf16.mxu1 %v19899_v45  ;;  %17830 = vmatprep.subr.bf16.mxu0 %v19900_v39  ;;  %v19909_v2 = vld [vmem:[%s25149_s20 + $0x730] sm:$0xff]  }
0x1963   :  { %v8224_v59 = vadd.f32 %v8223_v38, %v23345_v11  ;;  %v8297_v10 = vadd.f32 %v8296_v22, %v23357_v43  ;;  %v8225_v18 = vpop.f32.mrb[14].mxu1  ;;  %v8298_v25 = vpop.f32.mrb[6].mxu0  ;;  %9982 = vmatprep.mubr.bf16.mxu1 %v8618_v60  ;;  %10047 = vmatprep.mubr.bf16.mxu0 %v8620_v57  ;;  %v19910_v33 = vld [vmem:[%s25149_s20 + $0x7b0] sm:$0xff]   ;;  %v19912_v38 = vld [vmem:[%s25149_s20 + $0x7f8] sm:$0xff]  }
0x1964   :  { %v8226_v29 = vadd.f32 %v8225_v18, %v23333_v52  ;;  %v8299_v32 = vadd.f32 %v8298_v25, %v23339_v19  ;;  %v8227_v47 = vpop.f32.mrb[15].mxu1  ;;  %v8300_v17 = vpop.f32.mrb[7].mxu0  ;;  %9983 = vmatmul.mubr.bf16.gmra.mrb[76].mxu1 %v8617_v58  ;;  %10048 = vmatmul.mubr.bf16.gmra.mrb[64].mxu0 %v8619_v53  ;;  %v19905_v52 = vld [vmem:[%s25149_s20 + $0x728] sm:$0xff]   ;;  %v8553_v51 = vmax.f32 %v8222_v21, 0.0  ;;  %v8555_v46 = vmax.f32 %v8295_v34, 0.0  ;;  %v19911_v34 = vld [vmem:[%s25149_s20 + $0x778] sm:$0xff]  }
0x1965   :  { %v8228_v4 = vadd.f32 %v8227_v47, %v23345_v11  ;;  %v8301_v12 = vadd.f32 %v8300_v17, %v23357_v43  ;;  %17791 = vmatpush3.bf16.msra.mxu1 %v19901_v35  ;;  %17831 = vmatpush3.bf16.msra.mxu0 %v19902_v41  ;;  %v19906_v19 = vld [vmem:[%s25149_s20 + $0x7a8] sm:$0xff]   ;;  %v19907_v43 = vld [vmem:[%s25149_s20 + $0x770] sm:$0xff]   ;;  %v8554_v45 = vmax.f32 %v8224_v59, 0.0  ;;  %v8556_v39 = vmax.f32 %v8297_v10, 0.0  ;;  %v19913_v17 = vld [vmem:[%s25149_s20 + $0x738] sm:$0xff]  }
0x1966   :  { %v8569_v20 = vmax.f32 %v8226_v29, 0.0  ;;  %v8571_v11 = vmax.f32 %v8299_v32, 0.0  ;;  %17792 = vmatprep.subr.bf16.mxu1 %v19903_v40  ;;  %17832 = vmatprep.subr.bf16.mxu0 %v19904_v0 }
0x1967   :  { %v8570_v42 = vmax.f32 %v8228_v4, 0.0  ;;  %v8572_v5 = vmax.f32 %v8301_v12, 0.0  ;;  %v19914_v4 = vld [vmem:[%s25149_s20 + $0x7b8] sm:$0xff]  }
0x1968   :  { %v8633_v30 = vpack.c.bf16 %v8569_v20, %v8553_v51  ;;  %v8635_v23 = vpack.c.bf16 %v8571_v11, %v8555_v46 }
0x1969   :  { %v8636_v36 = vpack.c.bf16 %v8572_v5, %v8556_v39  ;;  %v8337_v58 = vpop.f32.mrb[16].mxu1  ;;  %v8410_v53 = vpop.f32.mrb[8].mxu0  ;;  %17793 = vmatpush3.bf16.msra.mxu1 %v19905_v52  ;;  %17833 = vmatpush3.bf16.msra.mxu0 %v19906_v19  ;;  %v8634_v57 = vpack.c.bf16 %v8570_v42, %v8554_v45 }
0x196a   :  { %v8338_v60 = vadd.f32 %v8337_v58, %v23477_v48  ;;  %v8411_v35 = vadd.f32 %v8410_v53, %v23483_v44  ;;  %v8339_v41 = vpop.f32.mrb[17].mxu1  ;;  %v8412_v21 = vpop.f32.mrb[9].mxu0  ;;  %17794 = vmatprep.subr.bf16.mxu1 %v19907_v43  ;;  %17834 = vmatprep.subr.bf16.mxu0 %v19908_v63 }
0x196b   :  { %v8340_v22 = vadd.f32 %v8339_v41, %v23489_v1  ;;  %v8413_v40 = vadd.f32 %v8412_v21, %v23501_v16  ;;  %v8341_v0 = vpop.f32.mrb[18].mxu1  ;;  %v8414_v59 = vpop.f32.mrb[10].mxu0  ;;  %9990 = vmatprep.mubr.bf16.mxu1 %v8634_v57  ;;  %10055 = vmatprep.mubr.bf16.mxu0 %v8636_v36 }
0x196c   :  { %v8342_v10 = vadd.f32 %v8341_v0, %v23477_v48  ;;  %v8415_v18 = vadd.f32 %v8414_v59, %v23483_v44  ;;  %v8343_v25 = vpop.f32.mrb[19].mxu1  ;;  %v8416_v29 = vpop.f32.mrb[11].mxu0  ;;  %9991 = vmatmul.mubr.bf16.gmra.mrb[80].mxu1 %v8633_v30  ;;  %10056 = vmatmul.mubr.bf16.gmra.mrb[68].mxu0 %v8635_v23  ;;  %v8461_v12 = vmax.f32 %v8338_v60, 0.0  ;;  %v8463_v52 = vmax.f32 %v8411_v35, 0.0 }
0x196d   :  { %v8344_v32 = vadd.f32 %v8343_v25, %v23489_v1  ;;  %v8417_v47 = vadd.f32 %v8416_v29, %v23501_v16  ;;  %17795 = vmatpush3.bf16.msra.mxu1 %v19909_v2  ;;  %17835 = vmatpush3.bf16.msra.mxu0 %v19910_v33  ;;  %v8462_v46 = vmax.f32 %v8340_v22, 0.0  ;;  %v8464_v20 = vmax.f32 %v8413_v40, 0.0 }
0x196e   :  { %v8477_v19 = vmax.f32 %v8342_v10, 0.0  ;;  %v8479_v51 = vmax.f32 %v8415_v18, 0.0  ;;  %17796 = vmatprep.subr.bf16.mxu1 %v19911_v34  ;;  %17836 = vmatprep.subr.bf16.mxu0 %v19912_v38 }
0x196f   :  { %v8478_v11 = vmax.f32 %v8344_v32, 0.0  ;;  %v8480_v43 = vmax.f32 %v8417_v47, 0.0 }
0x1970   :  { %v8589_v63 = vpack.c.bf16 %v8477_v19, %v8461_v12  ;;  %v8591_v45 = vpack.c.bf16 %v8479_v51, %v8463_v52 }
0x1971   :  { %v8592_v39 = vpack.c.bf16 %v8480_v43, %v8464_v20  ;;  %v8347_v42 = vpop.f32.mrb[20].mxu1  ;;  %v8420_v5 = vpop.f32.mrb[12].mxu0  ;;  %17797 = vmatpush3.bf16.msra.mxu1 %v19913_v17  ;;  %17837 = vmatpush3.bf16.msra.mxu0 %v19914_v4  ;;  %v8590_v30 = vpack.c.bf16 %v8478_v11, %v8462_v46 }
0x1972   :  { %v8348_v23 = vadd.f32 %v8347_v42, %v23477_v48  ;;  %v8421_v36 = vadd.f32 %v8420_v5, %v23483_v44  ;;  %v8349_v58 = vpop.f32.mrb[21].mxu1  ;;  %v8422_v53 = vpop.f32.mrb[13].mxu0 }
0x1973   :  { %v8350_v57 = vadd.f32 %v8349_v58, %v23489_v1  ;;  %v8423_v2 = vadd.f32 %v8422_v53, %v23501_v16  ;;  %v8351_v33 = vpop.f32.mrb[22].mxu1  ;;  %v8424_v60 = vpop.f32.mrb[14].mxu0  ;;  %10096 = vmatprep.mubr.bf16.mxu1 %v8590_v30  ;;  %10161 = vmatprep.mubr.bf16.mxu0 %v8592_v39 }
0x1974   :  { %v8352_v35 = vadd.f32 %v8351_v33, %v23477_v48  ;;  %v8425_v41 = vadd.f32 %v8424_v60, %v23483_v44  ;;  %v8353_v21 = vpop.f32.mrb[23].mxu1  ;;  %v8426_v34 = vpop.f32.mrb[15].mxu0  ;;  %10097 = vmatmul.mubr.bf16.vlgmr.msra.gmra.mrb[84].mxu1 %v8589_v63  ;;  %10162 = vmatmul.mubr.bf16.vlgmr.msra.gmra.mrb[72].mxu0 %v8591_v45  ;;  %v8493_v40 = vmax.f32 %v8348_v23, 0.0  ;;  %v8495_v0 = vmax.f32 %v8421_v36, 0.0 }
0x1975   :  { %v8354_v38 = vadd.f32 %v8353_v21, %v23489_v1  ;;  %v8427_v22 = vadd.f32 %v8426_v34, %v23501_v16  ;;  %v8494_v18 = vmax.f32 %v8350_v57, 0.0  ;;  %v8496_v25 = vmax.f32 %v8423_v2, 0.0 }
0x1976   :  { %v8509_v59 = vmax.f32 %v8352_v35, 0.0  ;;  %v8511_v10 = vmax.f32 %v8425_v41, 0.0 }
0x1977   :  { %v8510_v29 = vmax.f32 %v8354_v38, 0.0  ;;  %v8512_v32 = vmax.f32 %v8427_v22, 0.0 }
0x1978   :  { %v8605_v47 = vpack.c.bf16 %v8509_v59, %v8493_v40  ;;  %v8607_v17 = vpack.c.bf16 %v8511_v10, %v8495_v0 }
0x1979   :  { %v8606_v4 = vpack.c.bf16 %v8510_v29, %v8494_v18  ;;  %v8608_v12 = vpack.c.bf16 %v8512_v32, %v8496_v25  ;;  %v8357_v52 = vpop.f32.mrb[24].mxu1  ;;  %v8430_v19 = vpop.f32.mrb[16].mxu0 }
0x197a   :  { %v8358_v51 = vadd.f32 %v8357_v52, %v23477_v48  ;;  %v8431_v46 = vadd.f32 %v8430_v19, %v23483_v44  ;;  %v8359_v20 = vpop.f32.mrb[25].mxu1  ;;  %v8432_v11 = vpop.f32.mrb[17].mxu0 }
0x197b   :  { %v8360_v43 = vadd.f32 %v8359_v20, %v23489_v1  ;;  %v8433_v63 = vadd.f32 %v8432_v11, %v23501_v16  ;;  %v8361_v45 = vpop.f32.mrb[26].mxu1  ;;  %v8434_v39 = vpop.f32.mrb[18].mxu0  ;;  %10104 = vmatprep.mubr.bf16.mxu1 %v8606_v4  ;;  %10169 = vmatprep.mubr.bf16.mxu0 %v8608_v12 }
0x197c   :  { %v8362_v42 = vadd.f32 %v8361_v45, %v23477_v48  ;;  %v8435_v5 = vadd.f32 %v8434_v39, %v23483_v44  ;;  %v8363_v30 = vpop.f32.mrb[27].mxu1  ;;  %v8436_v23 = vpop.f32.mrb[19].mxu0  ;;  %10105 = vmatmul.mubr.bf16.gmra.mrb[88].mxu1 %v8605_v47  ;;  %10170 = vmatmul.mubr.bf16.gmra.mrb[76].mxu0 %v8607_v17  ;;  %v8525_v53 = vmax.f32 %v8358_v51, 0.0  ;;  %v8527_v57 = vmax.f32 %v8431_v46, 0.0 }
0x197d   :  { %v8364_v36 = vadd.f32 %v8363_v30, %v23489_v1  ;;  %v8437_v58 = vadd.f32 %v8436_v23, %v23501_v16  ;;  %v8526_v60 = vmax.f32 %v8360_v43, 0.0  ;;  %v8528_v35 = vmax.f32 %v8433_v63, 0.0 }
0x197e   :  { %v8541_v2 = vmax.f32 %v8362_v42, 0.0  ;;  %v8543_v33 = vmax.f32 %v8435_v5, 0.0 }
0x197f   :  { %v8542_v41 = vmax.f32 %v8364_v36, 0.0  ;;  %v8544_v21 = vmax.f32 %v8437_v58, 0.0 }
0x1980   :  { %v8621_v34 = vpack.c.bf16 %v8541_v2, %v8525_v53  ;;  %v8623_v38 = vpack.c.bf16 %v8543_v33, %v8527_v57 }
0x1981   :  { %v8622_v22 = vpack.c.bf16 %v8542_v41, %v8526_v60  ;;  %v8624_v40 = vpack.c.bf16 %v8544_v21, %v8528_v35  ;;  %v8367_v0 = vpop.f32.mrb[28].mxu1  ;;  %v8440_v59 = vpop.f32.mrb[20].mxu0 }
0x1982   :  { %v8368_v10 = vadd.f32 %v8367_v0, %v23477_v48  ;;  %v8441_v18 = vadd.f32 %v8440_v59, %v23483_v44  ;;  %v8369_v25 = vpop.f32.mrb[29].mxu1  ;;  %v8442_v29 = vpop.f32.mrb[21].mxu0 }
0x1983   :  { %v8370_v32 = vadd.f32 %v8369_v25, %v23489_v1  ;;  %v8443_v47 = vadd.f32 %v8442_v29, %v23501_v16  ;;  %v8371_v17 = vpop.f32.mrb[30].mxu1  ;;  %v8444_v4 = vpop.f32.mrb[22].mxu0  ;;  %10112 = vmatprep.mubr.bf16.mxu1 %v8622_v22  ;;  %10177 = vmatprep.mubr.bf16.mxu0 %v8624_v40 }
0x1984   :  { %v8372_v12 = vadd.f32 %v8371_v17, %v23477_v48  ;;  %v8445_v52 = vadd.f32 %v8444_v4, %v23483_v44  ;;  %v8373_v19 = vpop.f32.mrb[31].mxu1  ;;  %v8446_v51 = vpop.f32.mrb[23].mxu0  ;;  %10113 = vmatmul.mubr.bf16.gmra.mrb[92].mxu1 %v8621_v34  ;;  %10178 = vmatmul.mubr.bf16.gmra.mrb[80].mxu0 %v8623_v38  ;;  %v8557_v11 = vmax.f32 %v8368_v10, 0.0  ;;  %v8559_v43 = vmax.f32 %v8441_v18, 0.0 }
0x1985   :  { %v8374_v46 = vadd.f32 %v8373_v19, %v23489_v1  ;;  %v8447_v20 = vadd.f32 %v8446_v51, %v23501_v16  ;;  %v8558_v39 = vmax.f32 %v8370_v32, 0.0  ;;  %v8560_v42 = vmax.f32 %v8443_v47, 0.0  ;;  %v16110_v16 = vld [vmem:[%s25150_s21 + $0x1] ss:$0 sm:$0xff] }
0x1986   :  { %v8573_v63 = vmax.f32 %v8372_v12, 0.0  ;;  %v8575_v45 = vmax.f32 %v8445_v52, 0.0 }
0x1987   :  { %v8574_v5 = vmax.f32 %v8374_v46, 0.0  ;;  %v8576_v30 = vmax.f32 %v8447_v20, 0.0 }
0x1988   :  { %v8637_v23 = vpack.c.bf16 %v8573_v63, %v8557_v11  ;;  %v8639_v48 = vpack.c.bf16 %v8575_v45, %v8559_v43 }
0x1989   :  { %v8638_v36 = vpack.c.bf16 %v8574_v5, %v8558_v39  ;;  %v8640_v44 = vpack.c.bf16 %v8576_v30, %v8560_v42 }
0x198b   :  { %10120 = vmatprep.mubr.bf16.mxu1 %v8638_v36  ;;  %10185 = vmatprep.mubr.bf16.mxu0 %v8640_v44 }
0x198c   :  { %10121 = vmatmul.mubr.bf16.gmra.mrb[96].mxu1 %v8637_v23  ;;  %10186 = vmatmul.mubr.bf16.gmra.mrb[84].mxu0 %v8639_v48 }
0x19e7   :  { %v17558_v58 = vpop.f32.mrb[32].mxu1  ;;  %v17598_v1 = vpop.f32.mrb[24].mxu0 }
0x19e8   :  { %v17559_v53 = vpop.f32.mrb[33].mxu1  ;;  %v17599_v57 = vpop.f32.mrb[25].mxu0 }
0x19e9   :  { %v17560_v2 = vadd.f32 %v17559_v53, %v17558_v58  ;;  %v17600_v33 = vadd.f32 %v17599_v57, %v17598_v1  ;;  %v17561_v60 = vpop.f32.mrb[34].mxu1  ;;  %v17601_v35 = vpop.f32.mrb[26].mxu0 }
0x19ea   :  { %v17562_v41 = vpop.f32.mrb[35].mxu1  ;;  %v17602_v21 = vpop.f32.mrb[27].mxu0 }
0x19eb   :  { %v9709_v34 = vadd.f32 %v17560_v2, %v16110_v16  ;;  %v17563_v38 = vadd.f32 %v17562_v41, %v17561_v60  ;;  %v17603_v22 = vadd.f32 %v17602_v21, %v17601_v35 }
0x19ed   :  { %v9774_v40 = vadd.f32 %v17600_v33, %v9709_v34  ;;  %v9712_v0 = vadd.f32 %v17563_v38, %v16110_v16 }
0x19ef   :  { %v23562_v59 = vadd.f32 %v17603_v22, %v9712_v0  ;;  %v17564_v10 = vpop.f32.mrb[36].mxu1  ;;  %v17604_v18 = vpop.f32.mrb[28].mxu0 }
0x19f0   :  { %v17565_v25 = vpop.f32.mrb[37].mxu1  ;;  %v17605_v29 = vpop.f32.mrb[29].mxu0 }
0x19f1   :  { %v17566_v32 = vadd.f32 %v17565_v25, %v17564_v10  ;;  %v17606_v47 = vadd.f32 %v17605_v29, %v17604_v18  ;;  %v17567_v17 = vpop.f32.mrb[38].mxu1  ;;  %v17607_v4 = vpop.f32.mrb[30].mxu0 }
0x19f2   :  { %v17568_v12 = vpop.f32.mrb[39].mxu1  ;;  %v17608_v52 = vpop.f32.mrb[31].mxu0 }
0x19f3   :  { %v9717_v19 = vadd.f32 %v17566_v32, %v16110_v16  ;;  %v17569_v51 = vadd.f32 %v17568_v12, %v17567_v17  ;;  %v17609_v46 = vadd.f32 %v17608_v52, %v17607_v4 }
0x19f5   :  { %v9782_v20 = vadd.f32 %v17606_v47, %v9717_v19  ;;  %v9720_v11 = vadd.f32 %v17569_v51, %v16110_v16 }
0x19f7   :  { %v23564_v43 = vadd.f32 %v17609_v46, %v9720_v11  ;;  %v17570_v63 = vpop.f32.mrb[40].mxu1  ;;  %v17610_v45 = vpop.f32.mrb[32].mxu0 }
0x19f8   :  { %v17571_v39 = vpop.f32.mrb[41].mxu1  ;;  %v17611_v42 = vpop.f32.mrb[33].mxu0 }
0x19f9   :  { %v17572_v5 = vadd.f32 %v17571_v39, %v17570_v63  ;;  %v17612_v30 = vadd.f32 %v17611_v42, %v17610_v45  ;;  %v17573_v23 = vpop.f32.mrb[42].mxu1  ;;  %v17613_v48 = vpop.f32.mrb[34].mxu0 }
0x19fa   :  { %v17574_v36 = vpop.f32.mrb[43].mxu1  ;;  %v17614_v44 = vpop.f32.mrb[35].mxu0 }
0x19fb   :  { %v9725_v58 = vadd.f32 %v17572_v5, %v16110_v16  ;;  %v17575_v1 = vadd.f32 %v17574_v36, %v17573_v23  ;;  %v17615_v53 = vadd.f32 %v17614_v44, %v17613_v48 }
0x19fd   :  { %v9790_v57 = vadd.f32 %v17612_v30, %v9725_v58  ;;  %v9728_v2 = vadd.f32 %v17575_v1, %v16110_v16 }
0x19ff   :  { %v23566_v33 = vadd.f32 %v17615_v53, %v9728_v2  ;;  %v17576_v60 = vpop.f32.mrb[48].mxu1  ;;  %v17616_v35 = vpop.f32.mrb[36].mxu0 }
0x1a00   :  { %v17577_v41 = vpop.f32.mrb[49].mxu1  ;;  %v17617_v21 = vpop.f32.mrb[37].mxu0 }
0x1a01   :  { %v17578_v34 = vadd.f32 %v17577_v41, %v17576_v60  ;;  %v17618_v38 = vadd.f32 %v17617_v21, %v17616_v35  ;;  %v17579_v22 = vpop.f32.mrb[50].mxu1  ;;  %v17619_v0 = vpop.f32.mrb[38].mxu0 }
0x1a02   :  { %v17580_v10 = vpop.f32.mrb[51].mxu1  ;;  %v17620_v18 = vpop.f32.mrb[39].mxu0 }
0x1a03   :  { %v9733_v25 = vadd.f32 %v17578_v34, %v16110_v16  ;;  %v17581_v29 = vadd.f32 %v17580_v10, %v17579_v22  ;;  %v17621_v32 = vadd.f32 %v17620_v18, %v17619_v0 }
0x1a05   :  { %v9798_v47 = vadd.f32 %v17618_v38, %v9733_v25  ;;  %v9736_v17 = vadd.f32 %v17581_v29, %v16110_v16 }
0x1a07   :  { %v23568_v4 = vadd.f32 %v17621_v32, %v9736_v17  ;;  %v17638_v12 = vpop.f32.mrb[52].mxu1  ;;  %v17678_v52 = vpop.f32.mrb[40].mxu0 }
0x1a08   :  { %v17639_v19 = vpop.f32.mrb[53].mxu1  ;;  %v17679_v51 = vpop.f32.mrb[41].mxu0 }
0x1a09   :  { %v17640_v46 = vadd.f32 %v17639_v19, %v17638_v12  ;;  %v17680_v11 = vadd.f32 %v17679_v51, %v17678_v52  ;;  %v17641_v63 = vpop.f32.mrb[54].mxu1  ;;  %v17681_v45 = vpop.f32.mrb[42].mxu0 }
0x1a0a   :  { %v17642_v39 = vpop.f32.mrb[55].mxu1  ;;  %v17682_v42 = vpop.f32.mrb[43].mxu0 }
0x1a0b   :  { %v9839_v5 = vadd.f32 %v17640_v46, %v9774_v40  ;;  %v17643_v30 = vadd.f32 %v17642_v39, %v17641_v63  ;;  %v17683_v23 = vadd.f32 %v17682_v42, %v17681_v45 }
0x1a0d   :  { %v9904_v48 = vadd.f32 %v17680_v11, %v9839_v5  ;;  %v9842_v36 = vadd.f32 %v17643_v30, %v23562_v59 }
0x1a0f   :  { %v23571_v44 = vadd.f32 %v17683_v23, %v9842_v36  ;;  %v17644_v16 = vpop.f32.mrb[56].mxu1  ;;  %v17684_v58 = vpop.f32.mrb[44].mxu0 }
0x1a10   :  { %v17645_v1 = vpop.f32.mrb[57].mxu1  ;;  %v17685_v53 = vpop.f32.mrb[45].mxu0 }
0x1a11   :  { %v17646_v2 = vadd.f32 %v17645_v1, %v17644_v16  ;;  %v17686_v60 = vadd.f32 %v17685_v53, %v17684_v58  ;;  %v17647_v35 = vpop.f32.mrb[58].mxu1  ;;  %v17687_v41 = vpop.f32.mrb[46].mxu0 }
0x1a12   :  { %v17648_v21 = vpop.f32.mrb[59].mxu1  ;;  %v17688_v34 = vpop.f32.mrb[47].mxu0 }
0x1a13   :  { %v9847_v38 = vadd.f32 %v17646_v2, %v9782_v20  ;;  %v17649_v22 = vadd.f32 %v17648_v21, %v17647_v35  ;;  %v17689_v40 = vadd.f32 %v17688_v34, %v17687_v41 }
0x1a15   :  { %v9912_v0 = vadd.f32 %v17686_v60, %v9847_v38  ;;  %v9850_v10 = vadd.f32 %v17649_v22, %v23564_v43 }
0x1a17   :  { %v23574_v18 = vadd.f32 %v17689_v40, %v9850_v10  ;;  %v17650_v59 = vpop.f32.mrb[60].mxu1  ;;  %v17690_v25 = vpop.f32.mrb[48].mxu0 }
0x1a18   :  { %v17651_v29 = vpop.f32.mrb[61].mxu1  ;;  %v17691_v32 = vpop.f32.mrb[49].mxu0 }
0x1a19   :  { %v17652_v17 = vadd.f32 %v17651_v29, %v17650_v59  ;;  %v17692_v12 = vadd.f32 %v17691_v32, %v17690_v25  ;;  %v17653_v52 = vpop.f32.mrb[62].mxu1  ;;  %v17693_v19 = vpop.f32.mrb[50].mxu0 }
0x1a1a   :  { %v17654_v51 = vpop.f32.mrb[63].mxu1  ;;  %v17694_v46 = vpop.f32.mrb[51].mxu0 }
0x1a1b   :  { %v9855_v11 = vadd.f32 %v17652_v17, %v9790_v57  ;;  %v17655_v63 = vadd.f32 %v17654_v51, %v17653_v52  ;;  %v17695_v20 = vadd.f32 %v17694_v46, %v17693_v19 }
0x1a1d   :  { %v9920_v45 = vadd.f32 %v17692_v12, %v9855_v11  ;;  %v9858_v39 = vadd.f32 %v17655_v63, %v23566_v33 }
0x1a1f   :  { %v23577_v42 = vadd.f32 %v17695_v20, %v9858_v39  ;;  %v17656_v43 = vpop.f32.mrb[64].mxu1  ;;  %v17696_v5 = vpop.f32.mrb[52].mxu0 }
0x1a20   :  { %v17657_v30 = vpop.f32.mrb[65].mxu1  ;;  %v17697_v23 = vpop.f32.mrb[53].mxu0 }
0x1a21   :  { %v17658_v36 = vadd.f32 %v17657_v30, %v17656_v43  ;;  %v17698_v16 = vadd.f32 %v17697_v23, %v17696_v5  ;;  %v17659_v58 = vpop.f32.mrb[66].mxu1  ;;  %v17699_v1 = vpop.f32.mrb[54].mxu0 }
0x1a22   :  { %v17660_v53 = vpop.f32.mrb[67].mxu1  ;;  %v17700_v2 = vpop.f32.mrb[55].mxu0 }
0x1a23   :  { %v9863_v60 = vadd.f32 %v17658_v36, %v9798_v47  ;;  %v17661_v35 = vadd.f32 %v17660_v53, %v17659_v58  ;;  %v17701_v57 = vadd.f32 %v17700_v2, %v17699_v1 }
0x1a25   :  { %v9928_v41 = vadd.f32 %v17698_v16, %v9863_v60  ;;  %v9866_v21 = vadd.f32 %v17661_v35, %v23568_v4 }
0x1a27   :  { %v23580_v34 = vadd.f32 %v17701_v57, %v9866_v21  ;;  %v17718_v33 = vpop.f32.mrb[68].mxu1  ;;  %v17758_v38 = vpop.f32.mrb[56].mxu0 }
0x1a28   :  { %v17719_v22 = vpop.f32.mrb[69].mxu1  ;;  %v17759_v40 = vpop.f32.mrb[57].mxu0 }
0x1a29   :  { %v17720_v10 = vadd.f32 %v17719_v22, %v17718_v33  ;;  %v17760_v59 = vadd.f32 %v17759_v40, %v17758_v38  ;;  %v17721_v25 = vpop.f32.mrb[70].mxu1  ;;  %v17761_v29 = vpop.f32.mrb[58].mxu0 }
0x1a2a   :  { %v17722_v32 = vpop.f32.mrb[71].mxu1  ;;  %v17762_v17 = vpop.f32.mrb[59].mxu0 }
0x1a2b   :  { %v9969_v12 = vadd.f32 %v17720_v10, %v9904_v48  ;;  %v17723_v52 = vadd.f32 %v17722_v32, %v17721_v25  ;;  %v17763_v47 = vadd.f32 %v17762_v17, %v17761_v29 }
0x1a2d   :  { %v10034_v19 = vadd.f32 %v17760_v59, %v9969_v12  ;;  %v9972_v51 = vadd.f32 %v17723_v52, %v23571_v44 }
0x1a2f   :  { %v23583_v46 = vadd.f32 %v17763_v47, %v9972_v51  ;;  %v17724_v4 = vpop.f32.mrb[72].mxu1  ;;  %v17764_v11 = vpop.f32.mrb[60].mxu0 }
0x1a30   :  { %v17725_v63 = vpop.f32.mrb[73].mxu1  ;;  %v17765_v20 = vpop.f32.mrb[61].mxu0 }
0x1a31   :  { %v17726_v39 = vadd.f32 %v17725_v63, %v17724_v4  ;;  %v17766_v43 = vadd.f32 %v17765_v20, %v17764_v11  ;;  %v17727_v5 = vpop.f32.mrb[74].mxu1  ;;  %v17767_v30 = vpop.f32.mrb[62].mxu0 }
0x1a32   :  { %v17728_v23 = vpop.f32.mrb[75].mxu1  ;;  %v17768_v36 = vpop.f32.mrb[63].mxu0 }
0x1a33   :  { %v9977_v16 = vadd.f32 %v17726_v39, %v9912_v0  ;;  %v17729_v58 = vadd.f32 %v17728_v23, %v17727_v5  ;;  %v17769_v48 = vadd.f32 %v17768_v36, %v17767_v30 }
0x1a35   :  { %v23585_v1 = vadd.f32 %v17766_v43, %v9977_v16  ;;  %v9980_v53 = vadd.f32 %v17729_v58, %v23574_v18 }
0x1a37   :  { %v23588_v44 = vadd.f32 %v17769_v48, %v9980_v53  ;;  %v17730_v2 = vpop.f32.mrb[76].mxu1  ;;  %v17770_v60 = vpop.f32.mrb[64].mxu0 }
0x1a38   :  { %v17731_v35 = vpop.f32.mrb[77].mxu1  ;;  %v17771_v57 = vpop.f32.mrb[65].mxu0 }
0x1a39   :  { %v17732_v21 = vadd.f32 %v17731_v35, %v17730_v2  ;;  %v17772_v33 = vadd.f32 %v17771_v57, %v17770_v60  ;;  %v17733_v38 = vpop.f32.mrb[78].mxu1  ;;  %v17773_v22 = vpop.f32.mrb[66].mxu0 }
0x1a3a   :  { %v17734_v40 = vpop.f32.mrb[79].mxu1  ;;  %v17774_v10 = vpop.f32.mrb[67].mxu0 }
0x1a3b   :  { %v9985_v59 = vadd.f32 %v17732_v21, %v9920_v45  ;;  %v17735_v0 = vadd.f32 %v17734_v40, %v17733_v38  ;;  %v17775_v25 = vadd.f32 %v17774_v10, %v17773_v22 }
0x1a3d   :  { %v23590_v29 = vadd.f32 %v17772_v33, %v9985_v59  ;;  %v9988_v32 = vadd.f32 %v17735_v0, %v23577_v42 }
0x1a3f   :  { %v23593_v18 = vadd.f32 %v17775_v25, %v9988_v32  ;;  %v17736_v17 = vpop.f32.mrb[80].mxu1  ;;  %v17776_v12 = vpop.f32.mrb[68].mxu0 }
0x1a40   :  { %v17737_v52 = vpop.f32.mrb[81].mxu1  ;;  %v17777_v47 = vpop.f32.mrb[69].mxu0 }
0x1a41   :  { %v17738_v51 = vadd.f32 %v17737_v52, %v17736_v17  ;;  %v17778_v4 = vadd.f32 %v17777_v47, %v17776_v12  ;;  %v17739_v11 = vpop.f32.mrb[82].mxu1  ;;  %v17779_v63 = vpop.f32.mrb[70].mxu0 }
0x1a42   :  { %v17740_v20 = vpop.f32.mrb[83].mxu1  ;;  %v17780_v39 = vpop.f32.mrb[71].mxu0 }
0x1a43   :  { %v9993_v43 = vadd.f32 %v17738_v51, %v9928_v41  ;;  %v17741_v45 = vadd.f32 %v17740_v20, %v17739_v11  ;;  %v17781_v5 = vadd.f32 %v17780_v39, %v17779_v63 }
0x1a45   :  { %v23595_v30 = vadd.f32 %v17778_v4, %v9993_v43  ;;  %v9996_v23 = vadd.f32 %v17741_v45, %v23580_v34 }
0x1a47   :  { %v23598_v42 = vadd.f32 %v17781_v5, %v9996_v23  ;;  %v17798_v36 = vpop.f32.mrb[84].mxu1  ;;  %v17838_v16 = vpop.f32.mrb[72].mxu0 }
0x1a48   :  { %v17799_v58 = vpop.f32.mrb[85].mxu1  ;;  %v17839_v48 = vpop.f32.mrb[73].mxu0 }
0x1a49   :  { %v17800_v53 = vadd.f32 %v17799_v58, %v17798_v36  ;;  %v17840_v2 = vadd.f32 %v17839_v48, %v17838_v16  ;;  %v17801_v60 = vpop.f32.mrb[86].mxu1  ;;  %v17841_v35 = vpop.f32.mrb[74].mxu0 }
0x1a4a   :  { %v17802_v57 = vpop.f32.mrb[87].mxu1  ;;  %v17842_v21 = vpop.f32.mrb[75].mxu0 }
0x1a4b   :  { %v10099_v33 = vadd.f32 %v17800_v53, %v10034_v19  ;;  %v17803_v41 = vadd.f32 %v17802_v57, %v17801_v60  ;;  %v17843_v38 = vadd.f32 %v17842_v21, %v17841_v35 }
0x1a4d   :  { %v10164_v22 = vadd.f32 %v17840_v2, %v10099_v33  ;;  %v10102_v40 = vadd.f32 %v17803_v41, %v23583_v46 }
0x1a4f   :  { %v10167_v10 = vadd.f32 %v17843_v38, %v10102_v40  ;;  %v17804_v34 = vpop.f32.mrb[88].mxu1  ;;  %v17844_v59 = vpop.f32.mrb[76].mxu0  ;;  %v23602_v0 = vadd.f32 %v10164_v22, %v22753_v56 }
0x1a50   :  { %v17805_v25 = vpop.f32.mrb[89].mxu1  ;;  %v17845_v32 = vpop.f32.mrb[77].mxu0 }
0x1a51   :  { %v17806_v17 = vadd.f32 %v17805_v25, %v17804_v34  ;;  %v17846_v12 = vadd.f32 %v17845_v32, %v17844_v59  ;;  %v17807_v52 = vpop.f32.mrb[90].mxu1  ;;  %v17847_v47 = vpop.f32.mrb[78].mxu0  ;;  %v10206_v19 = vsel %vm187_vm2, %v23602_v0, 0.0  ;;  %v23607_v51 = vadd.f32 %v10167_v10, %v22746_v62 }
0x1a52   :  { %v17808_v4 = vpop.f32.mrb[91].mxu1  ;;  %v17848_v46 = vpop.f32.mrb[79].mxu0  ;;  %10207 = vadd.xlane.f32.xlu0 %v10206_v19 }
0x1a53   :  { %v10107_v11 = vadd.f32 %v17806_v17, %v23585_v1  ;;  %v17809_v63 = vadd.f32 %v17808_v4, %v17807_v52  ;;  %v17849_v56 = vadd.f32 %v17848_v46, %v17847_v47  ;;  %v10209_v20 = vsel %vm187_vm2, %v23607_v51, 0.0 }
0x1a54   :  { %10210 = vadd.xlane.f32.xlu1 %v10209_v20 }
0x1a55   :  { %v10172_v39 = vadd.f32 %v17846_v12, %v10107_v11  ;;  %v10110_v43 = vadd.f32 %v17809_v63, %v23588_v44 }
0x1a57   :  { %v10175_v45 = vadd.f32 %v17849_v56, %v10110_v43  ;;  %v17810_v5 = vpop.f32.mrb[92].mxu1  ;;  %v17850_v23 = vpop.f32.mrb[80].mxu0  ;;  %v23614_v62 = vadd.f32 %v10172_v39, %v22809_v7 }
0x1a58   :  { %v17811_v36 = vpop.f32.mrb[93].mxu1  ;;  %v17851_v16 = vpop.f32.mrb[81].mxu0 }
0x1a59   :  { %v17812_v58 = vadd.f32 %v17811_v36, %v17810_v5  ;;  %v17852_v48 = vadd.f32 %v17851_v16, %v17850_v23  ;;  %v17813_v1 = vpop.f32.mrb[94].mxu1  ;;  %v17853_v53 = vpop.f32.mrb[82].mxu0  ;;  %v10212_v2 = vsel %vm187_vm2, %v23614_v62, 0.0  ;;  %v10197_v60 = vadd.f32 %v10175_v45, %v22796_v13 }
0x1a5a   :  { %v17814_v35 = vpop.f32.mrb[95].mxu1  ;;  %v17854_v57 = vpop.f32.mrb[83].mxu0  ;;  %10213 = vadd.xlane.f32.xlu0 %v10212_v2 }
0x1a5b   :  { %v10115_v44 = vadd.f32 %v17812_v58, %v23590_v29  ;;  %v17815_v21 = vadd.f32 %v17814_v35, %v17813_v1  ;;  %v17855_v33 = vadd.f32 %v17854_v57, %v17853_v53  ;;  %v10215_v7 = vsel %vm187_vm2, %v10197_v60, 0.0 }
0x1a5c   :  { %10216 = vadd.xlane.f32.xlu1 %v10215_v7 }
0x1a5d   :  { %v10180_v41 = vadd.f32 %v17852_v48, %v10115_v44  ;;  %v10118_v38 = vadd.f32 %v17815_v21, %v23593_v18 }
0x1a5f   :  { %v10183_v22 = vadd.f32 %v17855_v33, %v10118_v38  ;;  %v17816_v40 = vpop.f32.mrb[96].mxu1  ;;  %v17856_v10 = vpop.f32.mrb[84].mxu0  ;;  %v10198_v34 = vadd.f32 %v10180_v41, %v22831_v31 }
0x1a60   :  { %v17817_v59 = vpop.f32.mrb[97].mxu1  ;;  %v17857_v13 = vpop.f32.mrb[85].mxu0 }
0x1a61   :  { %v17818_v25 = vadd.f32 %v17817_v59, %v17816_v40  ;;  %v17858_v32 = vadd.f32 %v17857_v13, %v17856_v10  ;;  %v17819_v17 = vpop.f32.mrb[98].mxu1  ;;  %v17859_v12 = vpop.f32.mrb[86].mxu0  ;;  %v10218_v29 = vsel %vm187_vm2, %v10198_v34, 0.0  ;;  %v10199_v52 = vadd.f32 %v10183_v22, %v22828_v15 }
0x1a62   :  { %v17820_v47 = vpop.f32.mrb[99].mxu1  ;;  %v17860_v19 = vpop.f32.mrb[87].mxu0  ;;  %10219 = vadd.xlane.f32.xlu0 %v10218_v29 }
0x1a63   :  { %v10123_v18 = vadd.f32 %v17818_v25, %v23595_v30  ;;  %v17821_v4 = vadd.f32 %v17820_v47, %v17819_v17  ;;  %v17861_v46 = vadd.f32 %v17860_v19, %v17859_v12  ;;  %v10221_v11 = vsel %vm187_vm2, %v10199_v52, 0.0 }
0x1a64   :  { %10222 = vadd.xlane.f32.xlu1 %v10221_v11 }
0x1a65   :  { %v10188_v31 = vadd.f32 %v17858_v32, %v10123_v18  ;;  %v10126_v63 = vadd.f32 %v17821_v4, %v23598_v42  ;;  %v16243_v18 = vld [vmem:[%s25180_s29 + $0x80] sm:$0xff]  ;;  %v16244_v4 = vld [vmem:[%s25180_s29 + $0x88] sm:$0xff] }
0x1a66   :  { %v19483_v11 = vpack.c.bf16 %v16244_v4, %v16243_v18 }
0x1a67   :  { %v10191_v56 = vadd.f32 %v17861_v46, %v10126_v63  ;;  %v10200_v20 = vadd.f32 %v10188_v31, %v22851_v9  ;;  %v16271_v46 = vld [vmem:[%s25141_s12 + $0x80] sm:$0xff]  ;;  %v16272_v31 = vld [vmem:[%s25141_s12 + $0x88] sm:$0xff] }
0x1a68   :  { %v19499_v63 = vpack.c.bf16 %v16272_v31, %v16271_v46  ;;  %19484 = vmatprep.subr.bf16.mxu1 %v19483_v11 }
0x1a69   :  { %v10224_v39 = vsel %vm187_vm2, %v10200_v20, 0.0  ;;  %v10201_v15 = vadd.f32 %v10191_v56, %v22848_v55  ;;  %19486 = vmatpush3.bf16.msra.mxu1 %v19483_v11  ;;  %v16245_v56 = vld [vmem:[%s25180_s29 + $0x90] sm:$0xff] }
0x1a6a   :  { %10225 = vadd.xlane.f32.xlu0 %v10224_v39  ;;  %19500 = vmatprep.subr.bf16.mxu0 %v19499_v63  ;;  %v16273_v39 = vld [vmem:[%s25141_s12 + $0x90] sm:$0xff] }
0x1a6b   :  { %v10227_v43 = vsel %vm187_vm2, %v10201_v15, 0.0  ;;  %19502 = vmatpush3.bf16.msra.mxu0 %v19499_v63 }
0x1a6c   :  { %10228 = vadd.xlane.f32.xlu1 %v10227_v43  ;;  %v16274_v43 = vld [vmem:[%s25141_s12 + $0x98] sm:$0xff] }
0x1adf   :  { %v10208_v30 = vpop.xlane.xlu0 %10207 }
0x1ae0   :  { %v10230_v45 = vmul.f32 0.03125, %v10208_v30  ;;  %v19503_v30 = vpack.c.bf16 %v16274_v43, %v16273_v39 }
0x1ae1   :  { %v10211_v5 = vpop.xlane.xlu1 %10210 }
0x1ae2   :  { %v23633_v23 = vsub.f32 %v23602_v0, %v10230_v45  ;;  %v10231_v36 = vmul.f32 0.03125, %v10211_v5  ;;  %19504 = vmatprep.subr.bf16.mxu0 %v19503_v30  ;;  %v16257_v45 = vld [vmem:[%s25181_s7 + $0x80] sm:$0xff]  ;;  %v16258_v5 = vld [vmem:[%s25181_s7 + $0x88] sm:$0xff] }
0x1ae3   :  { %19506 = vmatpush3.bf16.msra.mxu0 %v19503_v30 }
0x1ae4   :  { %v23636_v42 = vsub.f32 %v23607_v51, %v10231_v36  ;;  %v10246_v9 = vmul.f32 %v23633_v23, %v23633_v23  ;;  %v19491_v36 = vpack.c.bf16 %v16258_v5, %v16257_v45 }
0x1ae6   :  { %v10254_v16 = vsel %vm187_vm2, %v10246_v9, 0.0  ;;  %v10247_v55 = vmul.f32 %v23636_v42, %v23636_v42 }
0x1ae7   :  { %v10214_v58 = vpop.xlane.xlu0 %10213  ;;  %10255 = vadd.xlane.f32.xlu0 %v10254_v16 }
0x1ae8   :  { %v10232_v48 = vmul.f32 0.03125, %v10214_v58  ;;  %v10257_v1 = vsel %vm187_vm2, %v10247_v55, 0.0 }
0x1ae9   :  { %v10217_v53 = vpop.xlane.xlu1 %10216  ;;  %10258 = vadd.xlane.f32.xlu1 %v10257_v1 }
0x1aea   :  { %v23645_v0 = vsub.f32 %v23614_v62, %v10232_v48  ;;  %v10233_v51 = vmul.f32 0.03125, %v10217_v53 }
0x1aec   :  { %v23647_v2 = vsub.f32 %v10197_v60, %v10233_v51  ;;  %v10248_v35 = vmul.f32 %v23645_v0, %v23645_v0 }
0x1aee   :  { %v10260_v57 = vsel %vm187_vm2, %v10248_v35, 0.0  ;;  %v10249_v44 = vmul.f32 %v23647_v2, %v23647_v2 }
0x1aef   :  { %v10220_v21 = vpop.xlane.xlu0 %10219  ;;  %10261 = vadd.xlane.f32.xlu0 %v10260_v57 }
0x1af0   :  { %v10234_v33 = vmul.f32 0.03125, %v10220_v21  ;;  %v10263_v7 = vsel %vm187_vm2, %v10249_v44, 0.0 }
0x1af1   :  { %v10223_v41 = vpop.xlane.xlu1 %10222  ;;  %10264 = vadd.xlane.f32.xlu1 %v10263_v7  ;;  %v23708_v7 = vld [vmem:[%s25151_s22 + $0x1] ss:$0 sm:$0xff] }
0x1af2   :  { %v23655_v62 = vsub.f32 %v10198_v34, %v10234_v33  ;;  %v10235_v38 = vmul.f32 0.03125, %v10223_v41 }
0x1af4   :  { %v23657_v60 = vsub.f32 %v10199_v52, %v10235_v38  ;;  %v10250_v22 = vmul.f32 %v23655_v62, %v23655_v62 }
0x1af6   :  { %v10266_v40 = vsel %vm187_vm2, %v10250_v22, 0.0  ;;  %v10251_v10 = vmul.f32 %v23657_v60, %v23657_v60 }
0x1af7   :  { %10267 = vadd.xlane.f32.xlu0 %v10266_v40  ;;  %v10226_v59 = vpop.xlane.xlu0 %10225  ;;  %v16242_v40 = vld [vmem:[%s25152_s23 + $0x1] ss:$0 sm:$0xff] }
0x1af8   :  { %v10236_v13 = vmul.f32 0.03125, %v10226_v59  ;;  %v10269_v25 = vsel %vm187_vm2, %v10251_v10, 0.0 }
0x1af9   :  { %10270 = vadd.xlane.f32.xlu1 %v10269_v25  ;;  %v10229_v32 = vpop.xlane.xlu1 %10228 }
0x1afa   :  { %v23665_v34 = vsub.f32 %v10200_v20, %v10236_v13  ;;  %v10237_v17 = vmul.f32 0.03125, %v10229_v32  ;;  %v16246_v20 = vld [vmem:[%s25180_s29 + $0x98] sm:$0xff] }
0x1afc   :  { %v23667_v12 = vsub.f32 %v10201_v15, %v10237_v17  ;;  %v10252_v29 = vmul.f32 %v23665_v34, %v23665_v34  ;;  %v19487_v15 = vpack.c.bf16 %v16246_v20, %v16245_v56 }
0x1afe   :  { %v10272_v52 = vsel %vm187_vm2, %v10252_v29, 0.0  ;;  %v10253_v47 = vmul.f32 %v23667_v12, %v23667_v12  ;;  %19488 = vmatprep.subr.bf16.mxu1 %v19487_v15  ;;  %v16259_v29 = vld [vmem:[%s25181_s7 + $0x90] sm:$0xff] }
0x1aff   :  { %10273 = vadd.xlane.f32.xlu0 %v10272_v52  ;;  %19490 = vmatpush3.bf16.msra.mxu1 %v19487_v15 }
0x1b00   :  { %v10275_v19 = vsel %vm187_vm2, %v10253_v47, 0.0  ;;  %19492 = vmatprep.subr.bf16.mxu1 %v19491_v36 }
0x1b01   :  { %10276 = vadd.xlane.f32.xlu1 %v10275_v19 }
0x1b74   :  { %v10256_v9 = vpop.xlane.xlu0 %10255 }
0x1b75   :  { %v10278_v16 = vmul.f32 0.03125, %v10256_v9 }
0x1b76   :  { %v10259_v55 = vpop.xlane.xlu1 %10258 }
0x1b77   :  { %v10286_v58 = vadd.f32 1e-05, %v10278_v16  ;;  %v10279_v48 = vmul.f32 0.03125, %v10259_v55 }
0x1b79   :  { %20223 = vrsqrt.f32 %v10286_v58  ;;  %v10287_v1 = vadd.f32 1e-05, %v10279_v48 }
0x1b7b   :  { %20225 = vrsqrt.f32 %v10287_v1 }
0x1b7c   :  { %v10262_v53 = vpop.xlane.xlu0 %10261 }
0x1b7d   :  { %v10280_v51 = vmul.f32 0.03125, %v10262_v53 }
0x1b7e   :  { %v10265_v35 = vpop.xlane.xlu1 %10264 }
0x1b7f   :  { %v10288_v57 = vadd.f32 1e-05, %v10280_v51  ;;  %v10281_v44 = vmul.f32 0.03125, %v10265_v35 }
0x1b81   :  { %20227 = vrsqrt.f32 %v10288_v57  ;;  %v10289_v21 = vadd.f32 1e-05, %v10281_v44 }
0x1b83   :  { %v20224_v33 = vpop.eup %20223  ;;  %20229 = vrsqrt.f32 %v10289_v21 }
0x1b84   :  { %v10302_v41 = vmul.f32 %v20224_v33, %v23633_v23  ;;  %v10268_v38 = vpop.xlane.xlu0 %10267  ;;  %v16260_v23 = vld [vmem:[%s25181_s7 + $0x98] sm:$0xff] }
0x1b85   :  { %v20226_v22 = vpop.eup %20225  ;;  %v10282_v10 = vmul.f32 0.03125, %v10268_v38 }
0x1b86   :  { %v10316_v59 = vmul.f32 %v23708_v7, %v10302_v41  ;;  %v10303_v13 = vmul.f32 %v20226_v22, %v23636_v42  ;;  %v10271_v25 = vpop.xlane.xlu1 %10270  ;;  %v19495_v42 = vpack.c.bf16 %v16260_v23, %v16259_v29 }
0x1b87   :  { %v10290_v32 = vadd.f32 1e-05, %v10282_v10  ;;  %v10283_v17 = vmul.f32 0.03125, %v10271_v25 }
0x1b88   :  { %v23722_v52 = vadd.f32 %v16242_v40, %v10316_v59  ;;  %v10317_v47 = vmul.f32 %v23708_v7, %v10303_v13 }
0x1b89   :  { %20231 = vrsqrt.f32 %v10290_v32  ;;  %v10291_v19 = vadd.f32 1e-05, %v10283_v17 }
0x1b8a   :  { %v23725_v18 = vadd.f32 %v16242_v40, %v10317_v47  ;;  %18920 = vmatprep.mubr.msk.f32.mxu1 %vm187_vm2, %v23722_v52  ;;  %18960 = vmatprep.mubr.msk.f32.mxu0 %vm187_vm2, %v23722_v52 }
0x1b8b   :  { %v20228_v4 = vpop.eup %20227  ;;  %20233 = vrsqrt.f32 %v10291_v19 }
0x1b8c   :  { %v10304_v46 = vmul.f32 %v20228_v4, %v23645_v0  ;;  %18921 = vmatmul.mubr.msk.f32.vlgmr.msra.gmra.mrb[222].mxu1 %vm187_vm2, %v23725_v18  ;;  %18961 = vmatmul.mubr.msk.f32.vlgmr.msra.gmra.mrb[88].mxu0 %vm187_vm2, %v23725_v18  ;;  %v10274_v11 = vpop.xlane.xlu0 %10273 }
0x1b8d   :  { %v20230_v31 = vpop.eup %20229  ;;  %v10284_v63 = vmul.f32 0.03125, %v10274_v11  ;;  %19494 = vmatpush3.bf16.msra.mxu1 %v19491_v36 }
0x1b8e   :  { %v10318_v56 = vmul.f32 %v23708_v7, %v10304_v46  ;;  %v10305_v20 = vmul.f32 %v20230_v31, %v23647_v2  ;;  %v10277_v39 = vpop.xlane.xlu1 %10276  ;;  %19496 = vmatprep.subr.bf16.mxu1 %v19495_v42 }
0x1b8f   :  { %v10292_v15 = vadd.f32 1e-05, %v10284_v63  ;;  %v10285_v43 = vmul.f32 0.03125, %v10277_v39 }
0x1b90   :  { %v23738_v30 = vadd.f32 %v16242_v40, %v10318_v56  ;;  %v10319_v0 = vmul.f32 %v23708_v7, %v10305_v20 }
0x1b91   :  { %20235 = vrsqrt.f32 %v10292_v15  ;;  %v10293_v45 = vadd.f32 1e-05, %v10285_v43  ;;  %19498 = vmatpush3.bf16.msra.mxu1 %v19495_v42 }
0x1b92   :  { %v23741_v5 = vadd.f32 %v16242_v40, %v10319_v0  ;;  %18923 = vmatprep.mubr.msk.f32.mxu1 %vm187_vm2, %v23738_v30  ;;  %18963 = vmatprep.mubr.msk.f32.mxu0 %vm187_vm2, %v23738_v30 }
0x1b93   :  { %v20232_v2 = vpop.eup %20231  ;;  %20237 = vrsqrt.f32 %v10293_v45 }
0x1b94   :  { %v10306_v36 = vmul.f32 %v20232_v2, %v23655_v62  ;;  %18924 = vmatmul.mubr.msk.f32.gmra.mrb[44].mxu1 %vm187_vm2, %v23741_v5  ;;  %18964 = vmatmul.mubr.msk.f32.gmra.mrb[90].mxu0 %vm187_vm2, %v23741_v5  ;;  %v16262_v2 = vld [vmem:[%s25140_s11 + $0x4] ss:$0 sm:$0xff] }
0x1b95   :  { %v20234_v9 = vpop.eup %20233 }
0x1b96   :  { %v10320_v16 = vmul.f32 %v23708_v7, %v10306_v36  ;;  %v10307_v55 = vmul.f32 %v20234_v9, %v23657_v60 }
0x1b98   :  { %v23754_v58 = vadd.f32 %v16242_v40, %v10320_v16  ;;  %v10321_v48 = vmul.f32 %v23708_v7, %v10307_v55 }
0x1b9a   :  { %v23757_v1 = vadd.f32 %v16242_v40, %v10321_v48  ;;  %18926 = vmatprep.mubr.msk.f32.mxu1 %vm187_vm2, %v23754_v58  ;;  %18966 = vmatprep.mubr.msk.f32.mxu0 %vm187_vm2, %v23754_v58 }
0x1b9b   :  { %v20236_v62 = vpop.eup %20235 }
0x1b9c   :  { %v10308_v53 = vmul.f32 %v20236_v62, %v23665_v34  ;;  %18927 = vmatmul.mubr.msk.f32.gmra.mrb[100].mxu1 %vm187_vm2, %v23757_v1  ;;  %18967 = vmatmul.mubr.msk.f32.gmra.mrb[92].mxu0 %vm187_vm2, %v23757_v1  ;;  %v16276_v34 = vld [vmem:[%s25142_s13 + $0x4] ss:$0 sm:$0xff] }
0x1b9d   :  { %v20238_v60 = vpop.eup %20237 }
0x1b9e   :  { %v10322_v51 = vmul.f32 %v23708_v7, %v10308_v53  ;;  %v10309_v35 = vmul.f32 %v20238_v60, %v23667_v12  ;;  %v23805_v12 = vld [vmem:[%s25184_s5 + $0x4] ss:$0 sm:$0xff] }
0x1ba0   :  { %v23770_v57 = vadd.f32 %v16242_v40, %v10322_v51  ;;  %v10323_v44 = vmul.f32 %v23708_v7, %v10309_v35 }
0x1ba2   :  { %v23773_v21 = vadd.f32 %v16242_v40, %v10323_v44  ;;  %18929 = vmatprep.mubr.msk.f32.mxu1 %vm187_vm2, %v23770_v57  ;;  %18969 = vmatprep.mubr.msk.f32.mxu0 %vm187_vm2, %v23770_v57 }
0x1ba4   :  { %18930 = vmatmul.mubr.msk.f32.gmra.mrb[102].mxu1 %vm187_vm2, %v23773_v21  ;;  %18970 = vmatmul.mubr.msk.f32.gmra.mrb[94].mxu0 %vm187_vm2, %v23773_v21 }
0x1ba5   :  { %18940 = vmatprep.mubr.msk.f32.mxu1 %vm187_vm2, %v23722_v52 }
0x1ba8   :  { %18941 = vmatmul.mubr.msk.f32.vlgmr.msra.gmra.mrb[104].mxu1 %vm187_vm2, %v23725_v18 }
0x1ba9   :  { %18943 = vmatprep.mubr.msk.f32.mxu1 %vm187_vm2, %v23738_v30 }
0x1bac   :  { %18944 = vmatmul.mubr.msk.f32.gmra.mrb[106].mxu1 %vm187_vm2, %v23741_v5 }
0x1bad   :  { %18946 = vmatprep.mubr.msk.f32.mxu1 %vm187_vm2, %v23754_v58 }
0x1bb0   :  { %18947 = vmatmul.mubr.msk.f32.gmra.mrb[108].mxu1 %vm187_vm2, %v23757_v1 }
0x1bb1   :  { %18949 = vmatprep.mubr.msk.f32.mxu1 %vm187_vm2, %v23770_v57 }
0x1bb4   :  { %18950 = vmatmul.mubr.msk.f32.gmra.mrb[110].mxu1 %vm187_vm2, %v23773_v21 }
0x1c5f   :  { %v23807_v33 = vpop.f32.mrb[222].mxu1  ;;  %v18962_v7 = vpop.f32.mrb[88].mxu0 }
0x1c60   :  { %v10683_v41 = vadd.f32 %v18962_v7, %v16276_v34  ;;  %v10441_v38 = vpop.f32.mrb[223].mxu1  ;;  %v10677_v22 = vpop.f32.mrb[89].mxu0 }
0x1c61   :  { %v10442_v40 = vadd.f32 %v23805_v12, %v10441_v38  ;;  %v10678_v10 = vadd.f32 %v16276_v34, %v10677_v22 }
0x1c63   :  { %v23810_v59 = vpack.c.bf16 %v10683_v41, %v10678_v10  ;;  %18980 = vmatprep.mubr.msk.f32.mxu1 %vm814_vm4, %v10442_v40 }
0x1c67   :  { %v18925_v13 = vpop.f32.mrb[44].mxu1  ;;  %v18965_v25 = vpop.f32.mrb[90].mxu0 }
0x1c68   :  { %v10693_v32 = vadd.f32 %v18965_v25, %v16276_v34  ;;  %v10451_v17 = vpop.f32.mrb[45].mxu1  ;;  %v10687_v29 = vpop.f32.mrb[91].mxu0 }
0x1c69   :  { %v10688_v23 = vadd.f32 %v16276_v34, %v10687_v29 }
0x1c6b   :  { %v19535_v47 = vpack.c.bf16 %v10693_v32, %v10688_v23  ;;  %v16311_v23 = vld [vmem:[%s25180_s29 + $0xa0] sm:$0xff] }
0x1c6f   :  { %v18928_v19 = vpop.f32.mrb[100].mxu1  ;;  %v18968_v42 = vpop.f32.mrb[92].mxu0 }
0x1c70   :  { %v10703_v4 = vadd.f32 %v18968_v42, %v16276_v34  ;;  %v10461_v46 = vpop.f32.mrb[101].mxu1  ;;  %v10697_v11 = vpop.f32.mrb[93].mxu0  ;;  %v16312_v42 = vld [vmem:[%s25180_s29 + $0xa8] sm:$0xff] }
0x1c71   :  { %v10462_v31 = vadd.f32 %v23805_v12, %v10461_v46  ;;  %v10698_v63 = vadd.f32 %v16276_v34, %v10697_v11  ;;  %v19547_v46 = vpack.c.bf16 %v16312_v42, %v16311_v23  ;;  %v10452_v11 = vadd.f32 %v23805_v12, %v10451_v17  ;;  %v16314_v17 = vld [vmem:[%s25180_s29 + $0xb8] sm:$0xff] }
0x1c73   :  { %v23814_v56 = vpack.c.bf16 %v10703_v4, %v10698_v63  ;;  %18994 = vmatprep.mubr.msk.f32.mxu0 %vm814_vm4, %v10462_v31  ;;  %v10447_v4 = vadd.f32 %v23807_v33, %v23805_v12  ;;  %v10457_v31 = vadd.f32 %v18925_v13, %v23805_v12  ;;  %v16313_v33 = vld [vmem:[%s25180_s29 + $0xb0] sm:$0xff]  ;;  %v10467_v63 = vadd.f32 %v18928_v19, %v23805_v12 }
0x1c77   :  { %v18931_v20 = vpop.f32.mrb[102].mxu1  ;;  %v18971_v39 = vpop.f32.mrb[94].mxu0 }
0x1c78   :  { %v10713_v15 = vadd.f32 %v18971_v39, %v16276_v34  ;;  %v10471_v43 = vpop.f32.mrb[103].mxu1  ;;  %v10707_v0 = vpop.f32.mrb[95].mxu0  ;;  %v19551_v39 = vpack.c.bf16 %v16314_v17, %v16313_v33 }
0x1c79   :  { %v10708_v45 = vadd.f32 %v16276_v34, %v10707_v0  ;;  %v10472_v13 = vadd.f32 %v23805_v12, %v10471_v43  ;;  %v16341_v43 = vld [vmem:[%s25141_s12 + $0xb0] sm:$0xff]  ;;  %v16342_v0 = vld [vmem:[%s25141_s12 + $0xb8] sm:$0xff] }
0x1c7b   :  { %v23820_v36 = vpack.c.bf16 %v10713_v15, %v10708_v45  ;;  %v18942_v9 = vpop.f32.mrb[104].mxu1  ;;  %v16340_v15 = vld [vmem:[%s25141_s12 + $0xa8] sm:$0xff]  ;;  %v19567_v45 = vpack.c.bf16 %v16342_v0, %v16341_v43 }
0x1c7c   :  { %v10565_v16 = vadd.f32 %v18942_v9, %v16262_v2  ;;  %v10559_v55 = vpop.f32.mrb[105].mxu1 }
0x1c7d   :  { %v10560_v48 = vadd.f32 %v16262_v2, %v10559_v55 }
0x1c7f   :  { %v19507_v62 = vpack.c.bf16 %v10565_v16, %v10560_v48  ;;  %v18945_v53 = vpop.f32.mrb[106].mxu1 }
0x1c80   :  { %v10575_v60 = vadd.f32 %v18945_v53, %v16262_v2  ;;  %v10569_v51 = vpop.f32.mrb[107].mxu1 }
0x1c81   :  { %v10570_v35 = vadd.f32 %v16262_v2, %v10569_v51  ;;  %19509 = vmatprep.subr.msk.bf16.mxu1 %vm20719_vm5, %v19507_v62 }
0x1c82   :  { %19512 = vmatpush3.bf16.xpose.msk.msra.mxu1 %vm20719_vm5, %v19507_v62 }
0x1c83   :  { %v19513_v44 = vpack.c.bf16 %v10575_v60, %v10570_v35  ;;  %v18948_v34 = vpop.f32.mrb[108].mxu1 }
0x1c84   :  { %v10585_v7 = vadd.f32 %v18948_v34, %v16262_v2  ;;  %v10579_v41 = vpop.f32.mrb[109].mxu1 }
0x1c85   :  { %v10580_v38 = vadd.f32 %v16262_v2, %v10579_v41  ;;  %19515 = vmatprep.subr.msk.bf16.mxu1 %vm20719_vm5, %v19513_v44 }
0x1c87   :  { %v19519_v22 = vpack.c.bf16 %v10585_v7, %v10580_v38  ;;  %v18951_v40 = vpop.f32.mrb[110].mxu1 }
0x1c88   :  { %v10595_v10 = vadd.f32 %v18951_v40, %v16262_v2  ;;  %v10589_v25 = vpop.f32.mrb[111].mxu1 }
0x1c89   :  { %v10590_v32 = vadd.f32 %v16262_v2, %v10589_v25  ;;  %19521 = vmatprep.subr.msk.bf16.mxu0 %vm20719_vm5, %v19519_v22 }
0x1c8a   :  { %19518 = vmatpush3.bf16.xpose.msk.msra.mxu1 %vm20719_vm5, %v19513_v44  ;;  %19524 = vmatpush3.bf16.xpose.msk.msra.mxu0 %vm20719_vm5, %v19519_v22 }
0x1c8b   :  { %v19525_v29 = vpack.c.bf16 %v10595_v10, %v10590_v32  ;;  %19532 = vmatprep.subr.bf16.mxu1 %v23810_v59 }
0x1c8d   :  { %19527 = vmatprep.subr.msk.bf16.mxu0 %vm20719_vm5, %v19525_v29 }
0x1c91   :  { %18981 = vmatmul.mubr.msk.f32.vlgmr.msra.gmra.mrb[112].mxu1 %vm814_vm4, %v10447_v4 }
0x1c92   :  { %18983 = vmatprep.mubr.msk.f32.mxu1 %vm814_vm4, %v10452_v11  ;;  %19530 = vmatpush3.bf16.xpose.msk.msra.mxu0 %vm20719_vm5, %v19525_v29 }
0x1c93   :  { %19534 = vmatpush3.bf16.msra.mxu1 %v23810_v59  ;;  %19548 = vmatprep.subr.bf16.mxu0 %v19547_v46  ;;  %v16339_v59 = vld [vmem:[%s25141_s12 + $0xa0] sm:$0xff] }
0x1c94   :  { %19536 = vmatprep.subr.bf16.mxu1 %v19535_v47  ;;  %v19563_v19 = vpack.c.bf16 %v16340_v15, %v16339_v59 }
0x1c95   :  { %18984 = vmatmul.mubr.msk.f32.gmra.mrb[114].mxu1 %vm814_vm4, %v10457_v31  ;;  %v16316_v31 = vld [vmem:[%s25184_s5 + $0x5] ss:$0 sm:$0xff] }
0x1c97   :  { %19538 = vmatpush3.bf16.msra.mxu1 %v19535_v47  ;;  %v10477_v47 = vadd.f32 %v18931_v20, %v23805_v12 }
0x1c98   :  { %19540 = vmatprep.subr.bf16.mxu1 %v23814_v56 }
0x1c99   :  { %18995 = vmatmul.mubr.msk.f32.vlgmr.msra.gmra.mrb[96].mxu0 %vm814_vm4, %v10467_v63 }
0x1c9a   :  { %18997 = vmatprep.mubr.msk.f32.mxu0 %vm814_vm4, %v10472_v13  ;;  %19550 = vmatpush3.bf16.msra.mxu0 %v19547_v46 }
0x1c9b   :  { %19552 = vmatprep.subr.bf16.mxu0 %v19551_v39 }
0x1c9d   :  { %18998 = vmatmul.mubr.msk.f32.gmra.mrb[98].mxu0 %vm814_vm4, %v10477_v47 }
0x1c9e   :  { %19554 = vmatpush3.bf16.msra.mxu0 %v19551_v39  ;;  %19036 = vmatprep.mubr.msk.f32.mxu0 %vm187_vm2, %v23722_v52 }
0x1c9f   :  { %19564 = vmatprep.subr.bf16.mxu0 %v19563_v19 }
0x1ca1   :  { %19037 = vmatmul.mubr.msk.f32.vlgmr.msra.gmra.mrb[100].mxu0 %vm187_vm2, %v23725_v18 }
0x1ca2   :  { %19039 = vmatprep.mubr.msk.f32.mxu0 %vm187_vm2, %v23738_v30  ;;  %19566 = vmatpush3.bf16.msra.mxu0 %v19563_v19 }
0x1ca3   :  { %19568 = vmatprep.subr.bf16.mxu0 %v19567_v45 }
0x1ca5   :  { %19040 = vmatmul.mubr.msk.f32.gmra.mrb[102].mxu0 %vm187_vm2, %v23741_v5 }
0x1ca6   :  { %19042 = vmatprep.mubr.msk.f32.mxu0 %vm187_vm2, %v23754_v58  ;;  %19570 = vmatpush3.bf16.msra.mxu0 %v19567_v45 }
0x1ca9   :  { %19043 = vmatmul.mubr.msk.f32.gmra.mrb[104].mxu0 %vm187_vm2, %v23757_v1 }
0x1caa   :  { %19045 = vmatprep.mubr.msk.f32.mxu0 %vm187_vm2, %v23770_v57 }
0x1cad   :  { %19046 = vmatmul.mubr.msk.f32.gmra.mrb[106].mxu0 %vm187_vm2, %v23773_v21 }
0x1cae   :  { %19076 = vmatprep.mubr.msk.f32.mxu0 %vm187_vm2, %v23722_v52 }
0x1cb1   :  { %19077 = vmatmul.mubr.msk.f32.vlgmr.msra.gmra.mrb[108].mxu0 %vm187_vm2, %v23725_v18 }
0x1cb2   :  { %19079 = vmatprep.mubr.msk.f32.mxu0 %vm187_vm2, %v23738_v30 }
0x1cb5   :  { %19080 = vmatmul.mubr.msk.f32.gmra.mrb[110].mxu0 %vm187_vm2, %v23741_v5 }
0x1cb6   :  { %19082 = vmatprep.mubr.msk.f32.mxu0 %vm187_vm2, %v23754_v58 }
0x1cb9   :  { %19083 = vmatmul.mubr.msk.f32.gmra.mrb[112].mxu0 %vm187_vm2, %v23757_v1 }
0x1cba   :  { %19085 = vmatprep.mubr.msk.f32.mxu0 %vm187_vm2, %v23770_v57 }
0x1cbd   :  { %19086 = vmatmul.mubr.msk.f32.gmra.mrb[114].mxu0 %vm187_vm2, %v23773_v21 }
0x1d64   :  { %v18982_v12 = vpop.f32.mrb[112].mxu1 }
0x1d65   :  { %v10935_v20 = vmul.f32 0.25, %v18982_v12  ;;  %v10806_v2 = vpop.f32.mrb[113].mxu1 }
0x1d66   :  { %v10934_v9 = vmul.f32 0.25, %v10806_v2 }
0x1d67   :  { %v23911_v16 = vadd.f32 %v10935_v20, %v20818_v8 }
0x1d68   :  { %v23914_v55 = vadd.f32 %v10934_v9, %v20818_v8  ;;  %v18985_v48 = vpop.f32.mrb[114].mxu1 }
0x1d69   :  { %v10937_v62 = vmul.f32 0.25, %v18985_v48  ;;  %v10816_v53 = vpop.f32.mrb[115].mxu1  ;;  %v10953_v60 = vsel %vm187_vm2, %v23911_v16, -inf }
0x1d6a   :  { %v10936_v51 = vmul.f32 0.25, %v10816_v53  ;;  %10954 = vmax.xlane.f32.xlu1 %v10953_v60  ;;  %v10950_v35 = vsel %vm187_vm2, %v23914_v55, -inf }
0x1d6b   :  { %v23921_v44 = vadd.f32 %v10937_v62, %v20818_v8  ;;  %10951 = vmax.xlane.f32.xlu0 %v10950_v35 }
0x1d6c   :  { %v23924_v34 = vadd.f32 %v10936_v51, %v20818_v8  ;;  %v18996_v7 = vpop.f32.mrb[96].mxu0  ;;  %v16344_v51 = vld [vmem:[%s25142_s13 + $0x5] ss:$0 sm:$0xff] }
0x1d6d   :  { %v10939_v41 = vmul.f32 0.25, %v18996_v7  ;;  %v10915_v38 = vpop.f32.mrb[97].mxu0  ;;  %v10959_v22 = vsel %vm187_vm2, %v23921_v44, -inf }
0x1d6e   :  { %v10938_v40 = vmul.f32 0.25, %v10915_v38  ;;  %10960 = vmax.xlane.f32.xlu1 %v10959_v22  ;;  %v10956_v10 = vsel %vm187_vm2, %v23924_v34, -inf }
0x1d6f   :  { %v23931_v25 = vadd.f32 %v10939_v41, %v20818_v8  ;;  %10957 = vmax.xlane.f32.xlu0 %v10956_v10 }
0x1d70   :  { %v23934_v32 = vadd.f32 %v10938_v40, %v20818_v8  ;;  %v18999_v29 = vpop.f32.mrb[98].mxu0 }
0x1d71   :  { %v10941_v23 = vmul.f32 0.25, %v18999_v29  ;;  %v10925_v42 = vpop.f32.mrb[99].mxu0  ;;  %v10965_v4 = vsel %vm187_vm2, %v23931_v25, -inf }
0x1d72   :  { %v10940_v46 = vmul.f32 0.25, %v10925_v42  ;;  %10966 = vmax.xlane.f32.xlu1 %v10965_v4  ;;  %v10962_v11 = vsel %vm187_vm2, %v23934_v32, -inf }
0x1d73   :  { %v23944_v33 = vadd.f32 %v10941_v23, %v20818_v8  ;;  %10963 = vmax.xlane.f32.xlu0 %v10962_v11 }
0x1d74   :  { %v23947_v17 = vadd.f32 %v10940_v46, %v20818_v8  ;;  %v19038_v63 = vpop.f32.mrb[100].mxu0 }
0x1d75   :  { %v23949_v39 = vadd.f32 %v19038_v63, %v16316_v31  ;;  %v11314_v13 = vpop.f32.mrb[101].mxu0  ;;  %v10971_v59 = vsel %vm187_vm2, %v23944_v33, -inf }
0x1d76   :  { %v23953_v15 = vadd.f32 %v16316_v31, %v11314_v13  ;;  %10972 = vmax.xlane.f32.xlu1 %v10971_v59  ;;  %v10968_v47 = vsel %vm187_vm2, %v23947_v17, -inf }
0x1d77   :  { %10969 = vmax.xlane.f32.xlu0 %v10968_v47 }
0x1d78   :  { %v19041_v19 = vpop.f32.mrb[102].mxu0 }
0x1d79   :  { %v23957_v43 = vadd.f32 %v19041_v19, %v16316_v31  ;;  %v11324_v0 = vpop.f32.mrb[103].mxu0 }
0x1d7a   :  { %v23959_v45 = vadd.f32 %v16316_v31, %v11324_v0 }
0x1d7c   :  { %v19044_v12 = vpop.f32.mrb[104].mxu0 }
0x1d7d   :  { %v23961_v20 = vadd.f32 %v19044_v12, %v16316_v31  ;;  %v11334_v2 = vpop.f32.mrb[105].mxu0 }
0x1d7e   :  { %v11335_v9 = vadd.f32 %v16316_v31, %v11334_v2 }
0x1d80   :  { %v19047_v48 = vpop.f32.mrb[106].mxu0  ;;  %19110 = vmatprep.mubr.msk.f32.mxu0 %vm814_vm4, %v11335_v9 }
0x1d81   :  { %v23964_v62 = vadd.f32 %v19047_v48, %v16316_v31  ;;  %v11344_v53 = vpop.f32.mrb[107].mxu0 }
0x1d82   :  { %v23966_v60 = vadd.f32 %v16316_v31, %v11344_v53 }
0x1d84   :  { %v19078_v35 = vpop.f32.mrb[108].mxu0 }
0x1d85   :  { %v11556_v7 = vadd.f32 %v19078_v35, %v16344_v51  ;;  %v11550_v41 = vpop.f32.mrb[109].mxu0 }
0x1d86   :  { %v11551_v38 = vadd.f32 %v16344_v51, %v11550_v41 }
0x1d88   :  { %v23971_v22 = vpack.c.bf16 %v11556_v7, %v11551_v38  ;;  %v19081_v40 = vpop.f32.mrb[110].mxu0 }
0x1d89   :  { %v11566_v10 = vadd.f32 %v19081_v40, %v16344_v51  ;;  %v11560_v29 = vpop.f32.mrb[111].mxu0 }
0x1d8a   :  { %v11561_v23 = vadd.f32 %v16344_v51, %v11560_v29 }
0x1d8c   :  { %v23973_v42 = vpack.c.bf16 %v11566_v10, %v11561_v23  ;;  %v19084_v4 = vpop.f32.mrb[112].mxu0 }
0x1d8d   :  { %v11576_v46 = vadd.f32 %v19084_v4, %v16344_v51  ;;  %v11570_v11 = vpop.f32.mrb[113].mxu0 }
0x1d8e   :  { %v11571_v31 = vadd.f32 %v16344_v51, %v11570_v11 }
0x1d90   :  { %v23975_v63 = vpack.c.bf16 %v11576_v46, %v11571_v31  ;;  %v19087_v13 = vpop.f32.mrb[114].mxu0 }
0x1d91   :  { %v11586_v59 = vadd.f32 %v19087_v13, %v16344_v51  ;;  %v11580_v47 = vpop.f32.mrb[115].mxu0 }
0x1d92   :  { %v11581_v19 = vadd.f32 %v16344_v51, %v11580_v47 }
0x1d94   :  { %v23977_v0 = vpack.c.bf16 %v11586_v59, %v11581_v19 }
0x1df7   :  { %v10955_v12 = vpop.xlane.xlu1 %10954 }
0x1df8   :  { %v10975_v2 = vsub.f32 %v23911_v16, %v10955_v12  ;;  %v10952_v9 = vpop.xlane.xlu0 %10951 }
0x1df9   :  { %v10974_v48 = vsub.f32 %v23914_v55, %v10952_v9 }
0x1dfa   :  { %v10984_v53 = vmul.f32 1.442695, %v10975_v2 }
0x1dfb   :  { %v10982_v35 = vmul.f32 1.442695, %v10974_v48  ;;  %v10961_v7 = vpop.xlane.xlu1 %10960 }
0x1dfc   :  { %20239 = vpow2.f32 %v10984_v53  ;;  %v10977_v41 = vsub.f32 %v23921_v44, %v10961_v7  ;;  %v10958_v38 = vpop.xlane.xlu0 %10957 }
0x1dfd   :  { %20241 = vpow2.f32 %v10982_v35  ;;  %v10976_v40 = vsub.f32 %v23924_v34, %v10958_v38 }
0x1dfe   :  { %v10988_v10 = vmul.f32 1.442695, %v10977_v41 }
0x1dff   :  { %v10986_v51 = vmul.f32 1.442695, %v10976_v40  ;;  %v10967_v29 = vpop.xlane.xlu1 %10966 }
0x1e00   :  { %20243 = vpow2.f32 %v10988_v10  ;;  %v10979_v23 = vsub.f32 %v23931_v25, %v10967_v29  ;;  %v10964_v16 = vpop.xlane.xlu0 %10963 }
0x1e01   :  { %20245 = vpow2.f32 %v10986_v51  ;;  %v10978_v55 = vsub.f32 %v23934_v32, %v10964_v16 }
0x1e02   :  { %v10992_v4 = vmul.f32 1.442695, %v10979_v23 }
0x1e03   :  { %v10990_v46 = vmul.f32 1.442695, %v10978_v55  ;;  %v10973_v11 = vpop.xlane.xlu1 %10972 }
0x1e04   :  { %20247 = vpow2.f32 %v10992_v4  ;;  %v10981_v44 = vsub.f32 %v23944_v33, %v10973_v11  ;;  %v10970_v31 = vpop.xlane.xlu0 %10969 }
0x1e05   :  { %20249 = vpow2.f32 %v10990_v46  ;;  %v10980_v34 = vsub.f32 %v23947_v17, %v10970_v31 }
0x1e06   :  { %v20240_v13 = vpop.eup %20239  ;;  %v10996_v59 = vmul.f32 1.442695, %v10981_v44 }
0x1e07   :  { %v20242_v47 = vpop.eup %20241  ;;  %v10994_v19 = vmul.f32 1.442695, %v10980_v34  ;;  %v11001_v25 = vsel %vm187_vm2, %v20240_v13, 0.0 }
0x1e08   :  { %20251 = vpow2.f32 %v10996_v59  ;;  %11002 = vadd.xlane.f32.xlu1 %v11001_v25  ;;  %v10998_v32 = vsel %vm187_vm2, %v20242_v47, 0.0  ;;  %v16326_v25 = vld [vmem:[%s25181_s7 + $0xa8] sm:$0xff] }
0x1e09   :  { %20253 = vpow2.f32 %v10994_v19  ;;  %10999 = vadd.xlane.f32.xlu0 %v10998_v32  ;;  %v16325_v19 = vld [vmem:[%s25181_s7 + $0xa0] sm:$0xff] }
0x1e0a   :  { %v20244_v12 = vpop.eup %20243 }
0x1e0b   :  { %v20246_v2 = vpop.eup %20245  ;;  %v11007_v33 = vsel %vm187_vm2, %v20244_v12, 0.0 }
0x1e0c   :  { %11008 = vadd.xlane.f32.xlu1 %v11007_v33  ;;  %v11004_v9 = vsel %vm187_vm2, %v20246_v2, 0.0 }
0x1e0d   :  { %11005 = vadd.xlane.f32.xlu0 %v11004_v9 }
0x1e0e   :  { %v20248_v17 = vpop.eup %20247 }
0x1e0f   :  { %v20250_v48 = vpop.eup %20249  ;;  %v11013_v53 = vsel %vm187_vm2, %v20248_v17, 0.0 }
0x1e10   :  { %11014 = vadd.xlane.f32.xlu1 %v11013_v53  ;;  %v11010_v35 = vsel %vm187_vm2, %v20250_v48, 0.0  ;;  %v16327_v53 = vld [vmem:[%s25181_s7 + $0xb0] sm:$0xff] }
0x1e11   :  { %11011 = vadd.xlane.f32.xlu0 %v11010_v35  ;;  %v16328_v35 = vld [vmem:[%s25181_s7 + $0xb8] sm:$0xff] }
0x1e12   :  { %v20252_v7 = vpop.eup %20251 }
0x1e13   :  { %v20254_v41 = vpop.eup %20253  ;;  %v11019_v38 = vsel %vm187_vm2, %v20252_v7, 0.0 }
0x1e14   :  { %11020 = vadd.xlane.f32.xlu1 %v11019_v38  ;;  %v11016_v40 = vsel %vm187_vm2, %v20254_v41, 0.0 }
0x1e15   :  { %11017 = vadd.xlane.f32.xlu0 %v11016_v40 }
0x1e95   :  { %v11003_v10 = vpop.xlane.xlu1 %11002 }
0x1e96   :  { %20255 = vrcp.f32 %v11003_v10  ;;  %v11000_v51 = vpop.xlane.xlu0 %10999 }
0x1e97   :  { %20257 = vrcp.f32 %v11000_v51 }
0x1e99   :  { %v11009_v29 = vpop.xlane.xlu1 %11008 }
0x1e9a   :  { %20259 = vrcp.f32 %v11009_v29  ;;  %v11006_v23 = vpop.xlane.xlu0 %11005 }
0x1e9b   :  { %20261 = vrcp.f32 %v11006_v23 }
0x1e9d   :  { %v11015_v16 = vpop.xlane.xlu1 %11014 }
0x1e9e   :  { %20263 = vrcp.f32 %v11015_v16  ;;  %v11012_v55 = vpop.xlane.xlu0 %11011 }
0x1e9f   :  { %20265 = vrcp.f32 %v11012_v55 }
0x1ea0   :  { %v20256_v4 = vpop.eup %20255 }
0x1ea1   :  { %v20258_v46 = vpop.eup %20257  ;;  %v11021_v11 = vpop.xlane.xlu1 %11020  ;;  %v11031_v34 = vmul.f32 %v20256_v4, %v20240_v13  ;;  %v19555_v13 = vpack.c.bf16 %v16326_v25, %v16325_v19 }
0x1ea2   :  { %20267 = vrcp.f32 %v11021_v11  ;;  %v11018_v44 = vpop.xlane.xlu0 %11017  ;;  %v11030_v31 = vmul.f32 %v20258_v46, %v20242_v47 }
0x1ea3   :  { %20269 = vrcp.f32 %v11018_v44 }
0x1ea4   :  { %v20260_v59 = vpop.eup %20259  ;;  %19008 = vmatprep.mubr.msk.f32.mxu1 %vm187_vm2, %v11030_v31 }
0x1ea5   :  { %v20262_v32 = vpop.eup %20261  ;;  %19009 = vmatmul.mubr.msk.f32.vlgmr.msra.gmra.mrb[116].mxu1 %vm187_vm2, %v11031_v34  ;;  %v11033_v47 = vmul.f32 %v20260_v59, %v20244_v12 }
0x1ea6   :  { %19542 = vmatpush3.bf16.msra.mxu1 %v23814_v56  ;;  %v11032_v33 = vmul.f32 %v20262_v32, %v20246_v2  ;;  %v19559_v2 = vpack.c.bf16 %v16328_v35, %v16327_v53 }
0x1ea7   :  { %19544 = vmatprep.subr.bf16.mxu1 %v23820_v36 }
0x1ea8   :  { %v20264_v9 = vpop.eup %20263  ;;  %19011 = vmatprep.mubr.msk.f32.mxu1 %vm187_vm2, %v11032_v33 }
0x1ea9   :  { %v20266_v38 = vpop.eup %20265  ;;  %19012 = vmatmul.mubr.msk.f32.gmra.mrb[118].mxu1 %vm187_vm2, %v11033_v47  ;;  %v11035_v12 = vmul.f32 %v20264_v9, %v20248_v17 }
0x1eaa   :  { %19546 = vmatpush3.bf16.msra.mxu1 %v23820_v36  ;;  %v11034_v56 = vmul.f32 %v20266_v38, %v20250_v48 }
0x1eab   :  { %19556 = vmatprep.subr.bf16.mxu1 %v19555_v13 }
0x1eac   :  { %v20268_v40 = vpop.eup %20267  ;;  %19022 = vmatprep.mubr.msk.f32.mxu1 %vm187_vm2, %v11034_v56 }
0x1ead   :  { %v20270_v10 = vpop.eup %20269  ;;  %19023 = vmatmul.mubr.msk.f32.vlgmr.msra.gmra.mrb[120].mxu1 %vm187_vm2, %v11035_v12  ;;  %v11037_v29 = vmul.f32 %v20268_v40, %v20252_v7 }
0x1eae   :  { %19558 = vmatpush3.bf16.msra.mxu1 %v19555_v13  ;;  %v11036_v51 = vmul.f32 %v20270_v10, %v20254_v41 }
0x1eaf   :  { %19560 = vmatprep.subr.bf16.mxu1 %v19559_v2 }
0x1eb0   :  { %19025 = vmatprep.mubr.msk.f32.mxu1 %vm187_vm2, %v11036_v51 }
0x1eb1   :  { %19026 = vmatmul.mubr.msk.f32.gmra.mrb[122].mxu1 %vm187_vm2, %v11037_v29 }
0x1eb2   :  { %19562 = vmatpush3.bf16.msra.mxu1 %v19559_v2  ;;  %19056 = vmatprep.mubr.msk.f32.mxu1 %vm187_vm2, %v23722_v52 }
0x1eb5   :  { %19057 = vmatmul.mubr.msk.f32.vlgmr.msra.gmra.mrb[124].mxu1 %vm187_vm2, %v23725_v18 }
0x1eb6   :  { %19059 = vmatprep.mubr.msk.f32.mxu1 %vm187_vm2, %v23738_v30 }
0x1eb9   :  { %19060 = vmatmul.mubr.msk.f32.gmra.mrb[126].mxu1 %vm187_vm2, %v23741_v5 }
0x1eba   :  { %19062 = vmatprep.mubr.msk.f32.mxu1 %vm187_vm2, %v23754_v58 }
0x1ebd   :  { %19063 = vmatmul.mubr.msk.f32.gmra.mrb[128].mxu1 %vm187_vm2, %v23757_v1 }
0x1ebe   :  { %19065 = vmatprep.mubr.msk.f32.mxu1 %vm187_vm2, %v23770_v57 }
0x1ec1   :  { %19066 = vmatmul.mubr.msk.f32.gmra.mrb[130].mxu1 %vm187_vm2, %v23773_v21 }
0x1ec2   :  { %19096 = vmatprep.mubr.msk.f32.mxu1 %vm814_vm4, %v23953_v15  ;;  %v16330_v15 = vld [vmem:[%s25140_s11 + $0x5] ss:$0 sm:$0xff] }
0x1f78   :  { %v24036_v36 = vpop.f32.mrb[116].mxu1 }
0x1f79   :  { %v24038_v17 = vpop.f32.mrb[117].mxu1 }
0x1f7c   :  { %v24040_v48 = vpop.f32.mrb[118].mxu1 }
0x1f7d   :  { %v24042_v7 = vpop.f32.mrb[119].mxu1 }
0x1f80   :  { %v24044_v41 = vpop.f32.mrb[120].mxu1 }
0x1f81   :  { %v24046_v23 = vpop.f32.mrb[121].mxu1 }
0x1f84   :  { %v24048_v16 = vpop.f32.mrb[122].mxu1 }
0x1f85   :  { %v24050_v55 = vpop.f32.mrb[123].mxu1 }
0x1f88   :  { %v19058_v4 = vpop.f32.mrb[124].mxu1 }
0x1f89   :  { %v11438_v46 = vadd.f32 %v19058_v4, %v16330_v15  ;;  %v11432_v11 = vpop.f32.mrb[125].mxu1 }
0x1f8a   :  { %v11433_v44 = vadd.f32 %v16330_v15, %v11432_v11 }
0x1f8c   :  { %v19571_v31 = vpack.c.bf16 %v11438_v46, %v11433_v44  ;;  %v19061_v34 = vpop.f32.mrb[126].mxu1 }
0x1f8d   :  { %v11448_v59 = vadd.f32 %v19061_v34, %v16330_v15  ;;  %v11442_v19 = vpop.f32.mrb[127].mxu1 }
0x1f8e   :  { %v11443_v25 = vadd.f32 %v16330_v15, %v11442_v19  ;;  %19573 = vmatprep.subr.msk.bf16.mxu1 %vm20719_vm5, %v19571_v31 }
0x1f8f   :  { %19576 = vmatpush3.bf16.xpose.msk.msra.mxu1 %vm20719_vm5, %v19571_v31 }
0x1f90   :  { %v19577_v32 = vpack.c.bf16 %v11448_v59, %v11443_v25  ;;  %v19064_v33 = vpop.f32.mrb[128].mxu1 }
0x1f91   :  { %v11458_v47 = vadd.f32 %v19064_v33, %v16330_v15  ;;  %v11452_v13 = vpop.f32.mrb[129].mxu1 }
0x1f92   :  { %v11453_v9 = vadd.f32 %v16330_v15, %v11452_v13  ;;  %19579 = vmatprep.subr.msk.bf16.mxu1 %vm20719_vm5, %v19577_v32 }
0x1f94   :  { %v19583_v53 = vpack.c.bf16 %v11458_v47, %v11453_v9  ;;  %v19067_v35 = vpop.f32.mrb[130].mxu1 }
0x1f95   :  { %v11468_v38 = vadd.f32 %v19067_v35, %v16330_v15  ;;  %v11462_v56 = vpop.f32.mrb[131].mxu1 }
0x1f96   :  { %v11463_v12 = vadd.f32 %v16330_v15, %v11462_v56  ;;  %19585 = vmatprep.subr.msk.bf16.mxu0 %vm20719_vm5, %v19583_v53 }
0x1f97   :  { %19582 = vmatpush3.bf16.xpose.msk.msra.mxu1 %vm20719_vm5, %v19577_v32  ;;  %19588 = vmatpush3.bf16.xpose.msk.msra.mxu0 %vm20719_vm5, %v19583_v53 }
0x1f98   :  { %v19589_v2 = vpack.c.bf16 %v11468_v38, %v11463_v12  ;;  %19596 = vmatprep.subr.bf16.mxu1 %v23971_v22 }
0x1f9a   :  { %19591 = vmatprep.subr.msk.bf16.mxu0 %vm20719_vm5, %v19589_v2 }
0x1f9e   :  { %19097 = vmatmul.mubr.msk.f32.vlgmr.msra.gmra.mrb[132].mxu1 %vm814_vm4, %v23949_v39 }
0x1f9f   :  { %19099 = vmatprep.mubr.msk.f32.mxu1 %vm814_vm4, %v23959_v45  ;;  %19594 = vmatpush3.bf16.xpose.msk.msra.mxu0 %vm20719_vm5, %v19589_v2 }
0x1fa0   :  { %19598 = vmatpush3.bf16.msra.mxu1 %v23971_v22 }
0x1fa1   :  { %19600 = vmatprep.subr.bf16.mxu1 %v23973_v42 }
0x1fa2   :  { %19100 = vmatmul.mubr.msk.f32.gmra.mrb[134].mxu1 %vm814_vm4, %v23957_v43 }
0x1fa4   :  { %19602 = vmatpush3.bf16.msra.mxu1 %v23973_v42 }
0x1fa5   :  { %19604 = vmatprep.subr.bf16.mxu1 %v23975_v63 }
0x1fa6   :  { %19111 = vmatmul.mubr.msk.f32.vlgmr.msra.gmra.mrb[116].mxu0 %vm814_vm4, %v23961_v20 }
0x1fa7   :  { %19113 = vmatprep.mubr.msk.f32.mxu0 %vm814_vm4, %v23966_v60 }
0x1faa   :  { %19114 = vmatmul.mubr.msk.f32.gmra.mrb[118].mxu0 %vm814_vm4, %v23964_v62 }
0x2071   :  { %v19098_v54 = vpop.f32.mrb[132].mxu1 }
0x2072   :  { %v11808_v39 = vmul.f32 0.25, %v19098_v54  ;;  %v11679_v45 = vpop.f32.mrb[133].mxu1 }
0x2073   :  { %v11807_v22 = vmul.f32 0.25, %v11679_v45 }
0x2074   :  { %v11816_v40 = vadd.f32 %v11808_v39, %v20818_v8 }
0x2075   :  { %v11815_v43 = vadd.f32 %v11807_v22, %v20818_v8  ;;  %v19101_v42 = vpop.f32.mrb[134].mxu1 }
0x2076   :  { %v11810_v10 = vmul.f32 0.25, %v19101_v42  ;;  %v11689_v51 = vpop.f32.mrb[135].mxu1  ;;  %v11826_v29 = vsel %vm187_vm2, %v11816_v40, -inf }
0x2077   :  { %v11809_v20 = vmul.f32 0.25, %v11689_v51  ;;  %11827 = vmax.xlane.f32.xlu1 %v11826_v29  ;;  %v11823_v60 = vsel %vm187_vm2, %v11815_v43, -inf }
0x2078   :  { %v11818_v15 = vadd.f32 %v11810_v10, %v20818_v8  ;;  %11824 = vmax.xlane.f32.xlu0 %v11823_v60 }
0x2079   :  { %v11817_v62 = vadd.f32 %v11809_v20, %v20818_v8  ;;  %v19112_v4 = vpop.f32.mrb[116].mxu0 }
0x207a   :  { %v11812_v46 = vmul.f32 0.25, %v19112_v4  ;;  %v11788_v11 = vpop.f32.mrb[117].mxu0  ;;  %v11832_v44 = vsel %vm187_vm2, %v11818_v15, -inf }
0x207b   :  { %v11811_v31 = vmul.f32 0.25, %v11788_v11  ;;  %11833 = vmax.xlane.f32.xlu1 %v11832_v44  ;;  %v11829_v34 = vsel %vm187_vm2, %v11817_v62, -inf }
0x207c   :  { %v11820_v59 = vadd.f32 %v11812_v46, %v20818_v8  ;;  %11830 = vmax.xlane.f32.xlu0 %v11829_v34 }
0x207d   :  { %v11819_v19 = vadd.f32 %v11811_v31, %v20818_v8  ;;  %v19115_v25 = vpop.f32.mrb[118].mxu0 }
0x207e   :  { %v11814_v32 = vmul.f32 0.25, %v19115_v25  ;;  %v11798_v33 = vpop.f32.mrb[119].mxu0  ;;  %v11838_v47 = vsel %vm187_vm2, %v11820_v59, -inf }
0x207f   :  { %v11813_v13 = vmul.f32 0.25, %v11798_v33  ;;  %11839 = vmax.xlane.f32.xlu1 %v11838_v47  ;;  %v11835_v9 = vsel %vm187_vm2, %v11819_v19, -inf }
0x2080   :  { %v11822_v53 = vadd.f32 %v11814_v32, %v20818_v8  ;;  %11836 = vmax.xlane.f32.xlu0 %v11835_v9 }
0x2081   :  { %v11821_v35 = vadd.f32 %v11813_v13, %v20818_v8 }
0x2082   :  { %v11844_v38 = vsel %vm187_vm2, %v11822_v53, -inf }
0x2083   :  { %11845 = vmax.xlane.f32.xlu1 %v11844_v38  ;;  %v11841_v56 = vsel %vm187_vm2, %v11821_v35, -inf }
0x2084   :  { %11842 = vmax.xlane.f32.xlu0 %v11841_v56 }
0x2104   :  { %v11828_v12 = vpop.xlane.xlu1 %11827 }
0x2105   :  { %v11848_v2 = vsub.f32 %v11816_v40, %v11828_v12  ;;  %v11825_v54 = vpop.xlane.xlu0 %11824 }
0x2106   :  { %v11847_v39 = vsub.f32 %v11815_v43, %v11825_v54 }
0x2107   :  { %v11857_v45 = vmul.f32 1.442695, %v11848_v2 }
0x2108   :  { %v11855_v22 = vmul.f32 1.442695, %v11847_v39  ;;  %v11834_v42 = vpop.xlane.xlu1 %11833 }
0x2109   :  { %20271 = vpow2.f32 %v11857_v45  ;;  %v11850_v10 = vsub.f32 %v11818_v15, %v11834_v42  ;;  %v11831_v51 = vpop.xlane.xlu0 %11830  ;;  %v16378_v42 = vld [vmem:[%s25143_s14 + $0x58] sm:$0xff] }
0x210a   :  { %20273 = vpow2.f32 %v11855_v22  ;;  %v11849_v29 = vsub.f32 %v11817_v62, %v11831_v51  ;;  %v16377_v22 = vld [vmem:[%s25143_s14 + $0x50] sm:$0xff] }
0x210b   :  { %v11861_v20 = vmul.f32 1.442695, %v11850_v10  ;;  %v19611_v10 = vpack.c.bf16 %v16378_v42, %v16377_v22 }
0x210c   :  { %v11859_v8 = vmul.f32 1.442695, %v11849_v29  ;;  %v11840_v60 = vpop.xlane.xlu1 %11839 }
0x210d   :  { %20275 = vpow2.f32 %v11861_v20  ;;  %v11852_v4 = vsub.f32 %v11820_v59, %v11840_v60  ;;  %v11837_v46 = vpop.xlane.xlu0 %11836  ;;  %19612 = vmatprep.subr.bf16.mxu0 %v19611_v10 }
0x210e   :  { %20277 = vpow2.f32 %v11859_v8  ;;  %v11851_v11 = vsub.f32 %v11819_v19, %v11837_v46  ;;  %19614 = vmatpush3.bf16.msra.mxu0 %v19611_v10 }
0x210f   :  { %v11865_v44 = vmul.f32 1.442695, %v11852_v4 }
0x2110   :  { %v11863_v40 = vmul.f32 1.442695, %v11851_v11  ;;  %v11846_v31 = vpop.xlane.xlu1 %11845 }
0x2111   :  { %20279 = vpow2.f32 %v11865_v44  ;;  %v11854_v43 = vsub.f32 %v11822_v53, %v11846_v31  ;;  %v11843_v34 = vpop.xlane.xlu0 %11842 }
0x2112   :  { %20281 = vpow2.f32 %v11863_v40  ;;  %v11853_v25 = vsub.f32 %v11821_v35, %v11843_v34 }
0x2113   :  { %v20272_v15 = vpop.eup %20271  ;;  %v11869_v32 = vmul.f32 1.442695, %v11854_v43 }
0x2114   :  { %v20274_v33 = vpop.eup %20273  ;;  %v11867_v62 = vmul.f32 1.442695, %v11853_v25  ;;  %v11874_v47 = vsel %vm187_vm2, %v20272_v15, 0.0 }
0x2115   :  { %20283 = vpow2.f32 %v11869_v32  ;;  %11875 = vadd.xlane.f32.xlu1 %v11874_v47  ;;  %v11871_v59 = vsel %vm187_vm2, %v20274_v33, 0.0 }
0x2116   :  { %20285 = vpow2.f32 %v11867_v62  ;;  %11872 = vadd.xlane.f32.xlu0 %v11871_v59 }
0x2117   :  { %v20276_v19 = vpop.eup %20275 }
0x2118   :  { %v20278_v13 = vpop.eup %20277  ;;  %v11880_v9 = vsel %vm187_vm2, %v20276_v19, 0.0 }
0x2119   :  { %11881 = vadd.xlane.f32.xlu1 %v11880_v9  ;;  %v11877_v53 = vsel %vm187_vm2, %v20278_v13, 0.0 }
0x211a   :  { %11878 = vadd.xlane.f32.xlu0 %v11877_v53 }
0x211b   :  { %v20280_v35 = vpop.eup %20279 }
0x211c   :  { %v20282_v38 = vpop.eup %20281  ;;  %v11886_v56 = vsel %vm187_vm2, %v20280_v35, 0.0 }
0x211d   :  { %11887 = vadd.xlane.f32.xlu1 %v11886_v56  ;;  %v11883_v12 = vsel %vm187_vm2, %v20282_v38, 0.0 }
0x211e   :  { %11884 = vadd.xlane.f32.xlu0 %v11883_v12 }
0x211f   :  { %v20284_v2 = vpop.eup %20283 }
0x2120   :  { %v20286_v54 = vpop.eup %20285  ;;  %v11892_v39 = vsel %vm187_vm2, %v20284_v2, 0.0 }
0x2121   :  { %11893 = vadd.xlane.f32.xlu1 %v11892_v39  ;;  %v11889_v45 = vsel %vm187_vm2, %v20286_v54, 0.0 }
0x2122   :  { %11890 = vadd.xlane.f32.xlu0 %v11889_v45 }
0x21a2   :  { %v11876_v51 = vpop.xlane.xlu1 %11875 }
0x21a3   :  { %20287 = vrcp.f32 %v11876_v51  ;;  %v11873_v29 = vpop.xlane.xlu0 %11872 }
0x21a4   :  { %20289 = vrcp.f32 %v11873_v29 }
0x21a6   :  { %v11882_v20 = vpop.xlane.xlu1 %11881 }
0x21a7   :  { %20291 = vrcp.f32 %v11882_v20  ;;  %v11879_v8 = vpop.xlane.xlu0 %11878 }
0x21a8   :  { %20293 = vrcp.f32 %v11879_v8 }
0x21aa   :  { %v11888_v60 = vpop.xlane.xlu1 %11887 }
0x21ab   :  { %20295 = vrcp.f32 %v11888_v60  ;;  %v11885_v4 = vpop.xlane.xlu0 %11884 }
0x21ac   :  { %20297 = vrcp.f32 %v11885_v4 }
0x21ad   :  { %v20288_v46 = vpop.eup %20287 }
0x21ae   :  { %v20290_v11 = vpop.eup %20289  ;;  %v11894_v44 = vpop.xlane.xlu1 %11893  ;;  %v11904_v43 = vmul.f32 %v20288_v46, %v20272_v15 }
0x21af   :  { %20299 = vrcp.f32 %v11894_v44  ;;  %v11891_v40 = vpop.xlane.xlu0 %11890  ;;  %v11903_v31 = vmul.f32 %v20290_v11, %v20274_v33 }
0x21b0   :  { %20301 = vrcp.f32 %v11891_v40 }
0x21b1   :  { %v20292_v34 = vpop.eup %20291  ;;  %19124 = vmatprep.mubr.msk.f32.mxu1 %vm187_vm2, %v11903_v31 }
0x21b2   :  { %v20294_v25 = vpop.eup %20293  ;;  %19125 = vmatmul.mubr.msk.f32.vlgmr.msra.gmra.mrb[136].mxu1 %vm187_vm2, %v11904_v43  ;;  %v11906_v62 = vmul.f32 %v20292_v34, %v20276_v19 }
0x21b3   :  { %19606 = vmatpush3.bf16.msra.mxu1 %v23975_v63  ;;  %v11905_v32 = vmul.f32 %v20294_v25, %v20278_v13  ;;  %v16310_v13 = vld [vmem:[%s25143_s14 + $0x48] sm:$0xff] }
0x21b4   :  { %19608 = vmatprep.subr.bf16.mxu1 %v23977_v0 }
0x21b5   :  { %v20296_v47 = vpop.eup %20295  ;;  %19127 = vmatprep.mubr.msk.f32.mxu1 %vm187_vm2, %v11905_v32 }
0x21b6   :  { %v20298_v59 = vpop.eup %20297  ;;  %19128 = vmatmul.mubr.msk.f32.gmra.mrb[138].mxu1 %vm187_vm2, %v11906_v62  ;;  %v11908_v33 = vmul.f32 %v20296_v47, %v20280_v35 }
0x21b7   :  { %19610 = vmatpush3.bf16.msra.mxu1 %v23977_v0  ;;  %v11907_v15 = vmul.f32 %v20298_v59, %v20282_v38  ;;  %v16309_v0 = vld [vmem:[%s25143_s14 + $0x40] sm:$0xff] }
0x21b8   :  { %v19615_v35 = vpack.c.bf16 %v16310_v13, %v16309_v0 }
0x21b9   :  { %v20300_v9 = vpop.eup %20299  ;;  %19138 = vmatprep.mubr.msk.f32.mxu1 %vm187_vm2, %v11907_v15 }
0x21ba   :  { %v20302_v53 = vpop.eup %20301  ;;  %19139 = vmatmul.mubr.msk.f32.vlgmr.msra.gmra.mrb[140].mxu1 %vm187_vm2, %v11908_v33  ;;  %v11910_v19 = vmul.f32 %v20300_v9, %v20284_v2  ;;  %19616 = vmatprep.subr.bf16.mxu0 %v19615_v35 }
0x21bb   :  { %v11909_v63 = vmul.f32 %v20302_v53, %v20286_v54 }
0x21bd   :  { %19141 = vmatprep.mubr.msk.f32.mxu1 %vm187_vm2, %v11909_v63 }
0x21be   :  { %19142 = vmatmul.mubr.msk.f32.gmra.mrb[142].mxu1 %vm187_vm2, %v11910_v19 }
0x21bf   :  { %12852 = vmatprep.mubr.bf16.mxu1 %v20359_v26 }
0x2285   :  { %v19126_v38 = vpop.f32.mrb[136].mxu1 }
0x2286   :  { %v11989_v56 = vpop.f32.mrb[137].mxu1 }
0x2287   :  { %19148 = vmatprep.mubr.msk.f32.mxu0 %vm814_vm4, %v11989_v56 }
0x2288   :  { %19149 = vmatmul.mubr.msk.f32.vlgmr.msra.gmra.mrb[120].mxu0 %vm814_vm4, %v19126_v38 }
0x2289   :  { %v19129_v12 = vpop.f32.mrb[138].mxu1  ;;  %19618 = vmatpush3.bf16.msra.mxu0 %v19615_v35 }
0x228a   :  { %v11999_v2 = vpop.f32.mrb[139].mxu1 }
0x228b   :  { %19151 = vmatprep.mubr.msk.f32.mxu0 %vm814_vm4, %v11999_v2 }
0x228c   :  { %19152 = vmatmul.mubr.msk.f32.gmra.mrb[122].mxu0 %vm814_vm4, %v19129_v12 }
0x228d   :  { %v19140_v54 = vpop.f32.mrb[140].mxu1 }
0x228e   :  { %v12086_v39 = vpop.f32.mrb[141].mxu1 }
0x228f   :  { %19154 = vmatprep.mubr.msk.f32.mxu0 %vm814_vm4, %v12086_v39 }
0x2290   :  { %19155 = vmatmul.mubr.msk.f32.gmra.mrb[124].mxu0 %vm814_vm4, %v19140_v54 }
0x2291   :  { %v19143_v45 = vpop.f32.mrb[142].mxu1 }
0x2292   :  { %v12096_v22 = vpop.f32.mrb[143].mxu1 }
0x2293   :  { %19157 = vmatprep.mubr.msk.f32.mxu0 %vm814_vm4, %v12096_v22 }
0x2294   :  { %19158 = vmatmul.mubr.msk.f32.gmra.mrb[126].mxu0 %vm814_vm4, %v19143_v45 }
0x2295   :  { %19164 = vmatprep.mubr.msk.f32.mxu0 %vm814_vm4, %v24038_v17 }
0x2298   :  { %19165 = vmatmul.mubr.msk.f32.vlgmr.msra.gmra.mrb[120].mxu0 %vm814_vm4, %v24036_v36  ;;  %v16396_v36 = vld [vmem:[%s25144_s15 + $0x2] ss:$0 sm:$0xff] }
0x2299   :  { %19167 = vmatprep.mubr.msk.f32.mxu0 %vm814_vm4, %v24042_v7 }
0x229c   :  { %19168 = vmatmul.mubr.msk.f32.gmra.mrb[122].mxu0 %vm814_vm4, %v24040_v48 }
0x229d   :  { %19170 = vmatprep.mubr.msk.f32.mxu0 %vm814_vm4, %v24046_v23 }
0x22a0   :  { %19171 = vmatmul.mubr.msk.f32.gmra.mrb[124].mxu0 %vm814_vm4, %v24044_v41 }
0x22a1   :  { %19173 = vmatprep.mubr.msk.f32.mxu0 %vm814_vm4, %v24050_v55 }
0x22a4   :  { %19174 = vmatmul.mubr.msk.f32.gmra.mrb[126].mxu0 %vm814_vm4, %v24048_v16 }
0x22a5   :  { %12925 = vmatprep.mubr.bf16.mxu0 %v20359_v26 }
0x236b   :  { %v19166_v17 = vpop.f32.mrb[120].mxu0 }
0x236c   :  { %v12375_v48 = vadd.f32 %v19166_v17, %v16396_v36  ;;  %v12327_v7 = vpop.f32.mrb[121].mxu0 }
0x236d   :  { %v12374_v42 = vadd.f32 %v16396_v36, %v12327_v7 }
0x236e   :  { %v12383_v23 = vadd.f32 %v12375_v48, %v23725_v18 }
0x236f   :  { %v12382_v41 = vadd.f32 %v12374_v42, %v23722_v52  ;;  %v19169_v10 = vpop.f32.mrb[122].mxu0 }
0x2370   :  { %v12377_v51 = vadd.f32 %v19169_v10, %v16396_v36  ;;  %v12337_v55 = vpop.f32.mrb[123].mxu0  ;;  %v12397_v29 = vsel %vm187_vm2, %v12383_v23, 0.0 }
0x2371   :  { %v12376_v16 = vadd.f32 %v16396_v36, %v12337_v55  ;;  %12398 = vadd.xlane.f32.xlu1 %v12397_v29  ;;  %v12394_v20 = vsel %vm187_vm2, %v12382_v41, 0.0 }
0x2372   :  { %v12385_v8 = vadd.f32 %v12377_v51, %v23741_v5  ;;  %12395 = vadd.xlane.f32.xlu0 %v12394_v20 }
0x2373   :  { %v12384_v60 = vadd.f32 %v12376_v16, %v23738_v30  ;;  %v19172_v4 = vpop.f32.mrb[124].mxu0 }
0x2374   :  { %v12379_v46 = vadd.f32 %v19172_v4, %v16396_v36  ;;  %v12347_v11 = vpop.f32.mrb[125].mxu0  ;;  %v12403_v18 = vsel %vm187_vm2, %v12385_v8, 0.0 }
0x2375   :  { %v12378_v52 = vadd.f32 %v16396_v36, %v12347_v11  ;;  %12404 = vadd.xlane.f32.xlu1 %v12403_v18  ;;  %v12400_v44 = vsel %vm187_vm2, %v12384_v60, 0.0 }
0x2376   :  { %v12387_v40 = vadd.f32 %v12379_v46, %v23757_v1  ;;  %12401 = vadd.xlane.f32.xlu0 %v12400_v44  ;;  %v16402_v44 = vld [vmem:[%s25147_s18 + $0x208] sm:$0xff] }
0x2377   :  { %v12386_v31 = vadd.f32 %v12378_v52, %v23754_v58  ;;  %v19175_v43 = vpop.f32.mrb[126].mxu0 }
0x2378   :  { %v12381_v34 = vadd.f32 %v19175_v43, %v16396_v36  ;;  %v12357_v5 = vpop.f32.mrb[127].mxu0  ;;  %v12409_v25 = vsel %vm187_vm2, %v12387_v40, 0.0 }
0x2379   :  { %v12380_v30 = vadd.f32 %v16396_v36, %v12357_v5  ;;  %12410 = vadd.xlane.f32.xlu1 %v12409_v25  ;;  %v12406_v32 = vsel %vm187_vm2, %v12386_v31, 0.0 }
0x237a   :  { %v12389_v62 = vadd.f32 %v12381_v34, %v23773_v21  ;;  %12407 = vadd.xlane.f32.xlu0 %v12406_v32  ;;  %v16409_v34 = vld [vmem:[%s25147_s18 + $0x240] sm:$0xff]  ;;  %v16418_v32 = vld [vmem:[%s25147_s18 + $0x288] sm:$0xff] }
0x237b   :  { %v12388_v47 = vadd.f32 %v12380_v30, %v23770_v57 }
0x237c   :  { %v12415_v59 = vsel %vm187_vm2, %v12389_v62, 0.0 }
0x237d   :  { %12416 = vadd.xlane.f32.xlu1 %v12415_v59  ;;  %v12412_v1 = vsel %vm187_vm2, %v12388_v47, 0.0 }
0x237e   :  { %12413 = vadd.xlane.f32.xlu0 %v12412_v1  ;;  %v16425_v1 = vld [vmem:[%s25147_s18 + $0x2c0] sm:$0xff] }
0x23fe   :  { %v12399_v58 = vpop.xlane.xlu1 %12398 }
0x23ff   :  { %v12419_v15 = vmul.f32 0.03125, %v12399_v58  ;;  %v12396_v33 = vpop.xlane.xlu0 %12395 }
0x2400   :  { %v12418_v9 = vmul.f32 0.03125, %v12396_v33 }
0x2401   :  { %v24180_v53 = vsub.f32 %v12383_v23, %v12419_v15 }
0x2402   :  { %v24182_v63 = vsub.f32 %v12382_v41, %v12418_v9  ;;  %v12405_v19 = vpop.xlane.xlu1 %12404  ;;  %v24247_v9 = vld [vmem:[%s25147_s18 + $0x210] sm:$0xff] }
0x2403   :  { %v12421_v0 = vmul.f32 0.03125, %v12405_v19  ;;  %v12402_v21 = vpop.xlane.xlu0 %12401  ;;  %v12435_v57 = vmul.f32 %v24180_v53, %v24180_v53  ;;  %v24252_v19 = vld [vmem:[%s25147_s18 + $0x250] sm:$0xff] }
0x2404   :  { %v12420_v13 = vmul.f32 0.03125, %v12402_v21  ;;  %v12434_v35 = vmul.f32 %v24182_v63, %v24182_v63  ;;  %v16439_v21 = vcombine.low %v24247_v9, %v24252_v19 }
0x2405   :  { %v24188_v38 = vsub.f32 %v12385_v8, %v12421_v0  ;;  %v12445_v56 = vsel %vm187_vm2, %v12435_v57, 0.0  ;;  %v24257_v0 = vld [vmem:[%s25147_s18 + $0x218] sm:$0xff]  ;;  %v16440_v57 = vcombine.high %v24247_v9, %v24252_v19 }
0x2406   :  { %v24191_v12 = vsub.f32 %v12384_v60, %v12420_v13  ;;  %v12411_v2 = vpop.xlane.xlu1 %12410  ;;  %12446 = vadd.xlane.f32.xlu1 %v12445_v56  ;;  %v12442_v54 = vsel %vm187_vm2, %v12434_v35, 0.0  ;;  %v24266_v13 = vld [vmem:[%s25147_s18 + $0x258] sm:$0xff] }
0x2407   :  { %v12423_v39 = vmul.f32 0.03125, %v12411_v2  ;;  %v12408_v45 = vpop.xlane.xlu0 %12407  ;;  %12443 = vadd.xlane.f32.xlu0 %v12442_v54  ;;  %v12437_v22 = vmul.f32 %v24188_v38, %v24188_v38  ;;  %v16441_v35 = vcombine.low %v24257_v0, %v24266_v13  ;;  %v16442_v56 = vcombine.high %v24257_v0, %v24266_v13 }
0x2408   :  { %v12422_v36 = vmul.f32 0.03125, %v12408_v45  ;;  %v12436_v17 = vmul.f32 %v24191_v12, %v24191_v12 }
0x2409   :  { %v24198_v48 = vsub.f32 %v12387_v40, %v12423_v39  ;;  %v12451_v7 = vsel %vm187_vm2, %v12437_v22, 0.0  ;;  %v16410_v40 = vld [vmem:[%s25147_s18 + $0x248] sm:$0xff] }
0x240a   :  { %v24201_v42 = vsub.f32 %v12386_v31, %v12422_v36  ;;  %12452 = vadd.xlane.f32.xlu1 %v12451_v7  ;;  %v12417_v23 = vpop.xlane.xlu1 %12416  ;;  %v12448_v41 = vsel %vm187_vm2, %v12436_v17, 0.0  ;;  %v16401_v31 = vld [vmem:[%s25147_s18 + $0x200] sm:$0xff]  ;;  %v16438_v43 = vcombine.high %v16402_v44, %v16410_v40  ;;  %v16437_v5 = vcombine.low %v16402_v44, %v16410_v40 }
0x240b   :  { %v12425_v10 = vmul.f32 0.03125, %v12417_v23  ;;  %12449 = vadd.xlane.f32.xlu0 %v12448_v41  ;;  %v12414_v51 = vpop.xlane.xlu0 %12413  ;;  %v12439_v55 = vmul.f32 %v24198_v48, %v24198_v48  ;;  %v16435_v25 = vcombine.low %v16401_v31, %v16409_v34  ;;  %v16436_v30 = vcombine.high %v16401_v31, %v16409_v34  ;;  %v24275_v31 = vld [vmem:[%s25145_s16 + $0x2] ss:$0 sm:$0xff] }
0x240c   :  { %v12424_v29 = vmul.f32 0.03125, %v12414_v51  ;;  %v12438_v16 = vmul.f32 %v24201_v42, %v24201_v42  ;;  %12893 = vmatprep.subr.bf16.mxu0 %v16438_v43 }
0x240d   :  { %v24208_v20 = vsub.f32 %v12389_v62, %v12425_v10  ;;  %v12457_v8 = vsel %vm187_vm2, %v12439_v55, 0.0  ;;  %12894 = vmatpush1.bf16.msra.mxu0 %v16437_v5  ;;  %12820 = vmatprep.subr.bf16.mxu1 %v16436_v30  ;;  %v16426_v62 = vld [vmem:[%s25147_s18 + $0x2c8] sm:$0xff]  ;;  %v24281_v5 = vld [vmem:[%s25146_s17 + $0x2] ss:$0 sm:$0xff] }
0x240e   :  { %v24211_v60 = vsub.f32 %v12388_v47, %v12424_v29  ;;  %12458 = vadd.xlane.f32.xlu1 %v12457_v8  ;;  %v12454_v4 = vsel %vm187_vm2, %v12438_v16, 0.0  ;;  %v16417_v47 = vld [vmem:[%s25147_s18 + $0x280] sm:$0xff]  ;;  %12821 = vmatpush1.bf16.msra.mxu1 %v16435_v25  ;;  %v16454_v59 = vcombine.high %v16418_v32, %v16426_v62  ;;  %v16453_v58 = vcombine.low %v16418_v32, %v16426_v62 }
0x240f   :  { %12455 = vadd.xlane.f32.xlu0 %v12454_v4  ;;  %v12441_v46 = vmul.f32 %v24208_v20, %v24208_v20  ;;  %v16451_v15 = vcombine.low %v16417_v47, %v16425_v1  ;;  %v16452_v33 = vcombine.high %v16417_v47, %v16425_v1 }
0x2410   :  { %v12440_v11 = vmul.f32 %v24211_v60, %v24211_v60  ;;  %12895 = vmatprep.subr.bf16.mxu0 %v16454_v59 }
0x2411   :  { %v12463_v18 = vsel %vm187_vm2, %v12441_v46, 0.0  ;;  %12896 = vmatpush1.bf16.msra.mxu0 %v16453_v58  ;;  %12822 = vmatprep.subr.bf16.mxu1 %v16452_v33 }
0x2412   :  { %12464 = vadd.xlane.f32.xlu1 %v12463_v18  ;;  %v12460_v52 = vsel %vm187_vm2, %v12440_v11, 0.0  ;;  %12823 = vmatpush1.bf16.msra.mxu1 %v16451_v15 }
0x2413   :  { %12461 = vadd.xlane.f32.xlu0 %v12460_v52  ;;  %12966 = vmatprep.subr.bf16.mxu1 %v16440_v57  ;;  %v16427_v57 = vld [vmem:[%s25147_s18 + $0x2d0] sm:$0xff] }
0x2414   :  { %13039 = vmatprep.subr.bf16.mxu0 %v16442_v56  ;;  %v16420_v56 = vld [vmem:[%s25147_s18 + $0x298] sm:$0xff] }
0x2493   :  { %v12447_v2 = vpop.xlane.xlu1 %12446 }
0x2494   :  { %v12467_v54 = vmul.f32 0.03125, %v12447_v2  ;;  %v12444_v39 = vpop.xlane.xlu0 %12443 }
0x2495   :  { %v12466_v45 = vmul.f32 0.03125, %v12444_v39 }
0x2496   :  { %v12475_v22 = vadd.f32 1e-05, %v12467_v54 }
0x2497   :  { %v12474_v36 = vadd.f32 1e-05, %v12466_v45  ;;  %v12453_v17 = vpop.xlane.xlu1 %12452 }
0x2498   :  { %20303 = vrsqrt.f32 %v12475_v22  ;;  %v12469_v7 = vmul.f32 0.03125, %v12453_v17  ;;  %v12450_v23 = vpop.xlane.xlu0 %12449  ;;  %v24317_v22 = vld [vmem:[%s25147_s18 + $0x260] sm:$0xff]  ;;  %v24327_v17 = vld [vmem:[%s25147_s18 + $0x268] sm:$0xff] }
0x2499   :  { %20305 = vrsqrt.f32 %v12474_v36  ;;  %v12468_v41 = vmul.f32 0.03125, %v12450_v23  ;;  %v24322_v36 = vld [vmem:[%s25147_s18 + $0x228] sm:$0xff] }
0x249a   :  { %v12477_v10 = vadd.f32 1e-05, %v12469_v7 }
0x249b   :  { %v12476_v51 = vadd.f32 1e-05, %v12468_v41  ;;  %v12459_v55 = vpop.xlane.xlu1 %12458 }
0x249c   :  { %20307 = vrsqrt.f32 %v12477_v10  ;;  %v12471_v29 = vmul.f32 0.03125, %v12459_v55  ;;  %v12456_v16 = vpop.xlane.xlu0 %12455 }
0x249d   :  { %20309 = vrsqrt.f32 %v12476_v51  ;;  %v12470_v8 = vmul.f32 0.03125, %v12456_v16  ;;  %v16446_v16 = vcombine.high %v24322_v36, %v24327_v17 }
0x249e   :  { %v12479_v4 = vadd.f32 1e-05, %v12471_v29 }
0x249f   :  { %v12478_v46 = vadd.f32 1e-05, %v12470_v8  ;;  %v12465_v11 = vpop.xlane.xlu1 %12464 }
0x24a0   :  { %20311 = vrsqrt.f32 %v12479_v4  ;;  %v12473_v18 = vmul.f32 0.03125, %v12465_v11  ;;  %v12462_v52 = vpop.xlane.xlu0 %12461 }
0x24a1   :  { %20313 = vrsqrt.f32 %v12478_v46  ;;  %v12472_v44 = vmul.f32 0.03125, %v12462_v52 }
0x24a2   :  { %v20304_v40 = vpop.eup %20303  ;;  %v12481_v30 = vadd.f32 1e-05, %v12473_v18 }
0x24a3   :  { %v20306_v43 = vpop.eup %20305  ;;  %v12491_v34 = vmul.f32 %v20304_v40, %v24180_v53  ;;  %v12480_v62 = vadd.f32 1e-05, %v12472_v44  ;;  %v16419_v53 = vld [vmem:[%s25147_s18 + $0x290] sm:$0xff] }
0x24a4   :  { %v12490_v25 = vmul.f32 %v20306_v43, %v24182_v63  ;;  %20315 = vrsqrt.f32 %v12481_v30  ;;  %v16456_v23 = vcombine.high %v16419_v53, %v16427_v57  ;;  %v16455_v10 = vcombine.low %v16419_v53, %v16427_v57  ;;  %v16429_v43 = vld [vmem:[%s25147_s18 + $0x2e0] sm:$0xff] }
0x24a5   :  { %v12505_v32 = vmul.f32 %v24275_v31, %v12491_v34  ;;  %20317 = vrsqrt.f32 %v12480_v62  ;;  %v16422_v34 = vld [vmem:[%s25147_s18 + $0x2a8] sm:$0xff]  ;;  %v16445_v30 = vcombine.low %v24322_v36, %v24327_v17 }
0x24a6   :  { %v20308_v47 = vpop.eup %20307  ;;  %v12504_v59 = vmul.f32 %v24275_v31, %v12490_v25 }
0x24a7   :  { %v20310_v1 = vpop.eup %20309  ;;  %v12519_v58 = vadd.f32 %v24281_v5, %v12505_v32  ;;  %v12493_v15 = vmul.f32 %v20308_v47, %v24188_v38  ;;  %v16428_v38 = vld [vmem:[%s25147_s18 + $0x2d8] sm:$0xff]  ;;  %v16407_v32 = vld [vmem:[%s25147_s18 + $0x230] sm:$0xff] }
0x24a8   :  { %v24292_v33 = vadd.f32 %v24281_v5, %v12504_v59  ;;  %v12492_v63 = vmul.f32 %v20310_v1, %v24191_v12  ;;  %v24308_v12 = vld [vmem:[%s25147_s18 + $0x220] sm:$0xff]  ;;  %v16458_v41 = vcombine.high %v16420_v56, %v16428_v38  ;;  %v16457_v51 = vcombine.low %v16420_v56, %v16428_v38  ;;  %v16415_v59 = vld [vmem:[%s25147_s18 + $0x270] sm:$0xff]  ;;  %v16408_v1 = vld [vmem:[%s25147_s18 + $0x238] sm:$0xff] }
0x24a9   :  { %v12507_v2 = vmul.f32 %v24275_v31, %v12493_v15  ;;  %v16444_v29 = vcombine.high %v24308_v12, %v24317_v22  ;;  %v16443_v25 = vcombine.low %v24308_v12, %v24317_v22  ;;  %v16423_v56 = vld [vmem:[%s25147_s18 + $0x2b0] sm:$0xff]  ;;  %v16432_v12 = vld [vmem:[%s25147_s18 + $0x2f8] sm:$0xff] }
0x24aa   :  { %v20312_v54 = vpop.eup %20311  ;;  %v24311_v39 = vpack.c.bf16 %v12519_v58, %v24292_v33  ;;  %v12506_v45 = vmul.f32 %v24275_v31, %v12492_v63  ;;  %v16416_v58 = vld [vmem:[%s25147_s18 + $0x278] sm:$0xff]  ;;  %v16448_v63 = vcombine.high %v16407_v32, %v16415_v59  ;;  %v16431_v38 = vld [vmem:[%s25147_s18 + $0x2f0] sm:$0xff] }
0x24ab   :  { %v20314_v7 = vpop.eup %20313  ;;  %v12521_v55 = vadd.f32 %v24281_v5, %v12507_v2  ;;  %v12495_v4 = vmul.f32 %v20312_v54, %v24198_v48  ;;  %v16450_v57 = vcombine.high %v16408_v1, %v16416_v58  ;;  %v16424_v2 = vld [vmem:[%s25147_s18 + $0x2b8] sm:$0xff]  ;;  %v16447_v54 = vcombine.low %v16407_v32, %v16415_v59 }
0x24ac   :  { %16467 = vmatmul.mubr.msk.bf16.vlgmr.msra.gmra.mrb[144].mxu1 %vm187_vm2, %v24311_v39  ;;  %16471 = vmatmul.mubr.msk.bf16.vlgmr.msra.gmra.mrb[128].mxu0 %vm187_vm2, %v24311_v39  ;;  %v12520_v8 = vadd.f32 %v24281_v5, %v12506_v45  ;;  %v12494_v46 = vmul.f32 %v20314_v7, %v24201_v42  ;;  %v16449_v45 = vcombine.low %v16408_v1, %v16416_v58  ;;  %v19946_v32 = vld [vmem:[%s25149_s20 + $0x8b8] sm:$0xff]  }
0x24ad   :  { %12967 = vmatpush1.bf16.msra.mxu1 %v16439_v21  ;;  %13040 = vmatpush1.bf16.msra.mxu0 %v16441_v35  ;;  %v12509_v0 = vmul.f32 %v24275_v31, %v12495_v4  ;;  %v16464_v22 = vcombine.high %v16423_v56, %v16431_v38  ;;  %v16466_v36 = vcombine.high %v16424_v2, %v16432_v12  ;;  %v19924_v4 = vld [vmem:[%s25149_s20 + $0x8d0] sm:$0xff]  }
0x24ae   :  { %12862 = vmatprep.mubr.bf16.mxu1 %v20359_v26  ;;  %12935 = vmatprep.mubr.bf16.mxu0 %v20359_v26  ;;  %v20316_v9 = vpop.eup %20315  ;;  %v24349_v19 = vpack.c.bf16 %v12521_v55, %v12520_v8  ;;  %v12508_v21 = vmul.f32 %v24275_v31, %v12494_v46  ;;  %v16463_v17 = vcombine.low %v16423_v56, %v16431_v38  ;;  %v19919_v55 = vld [vmem:[%s25149_s20 + $0x848] sm:$0xff]   ;;  %v19925_v46 = vld [vmem:[%s25149_s20 + $0x810] sm:$0xff]  }
0x24af   :  { %12968 = vmatprep.subr.bf16.mxu1 %v16456_v23  ;;  %13041 = vmatprep.subr.bf16.mxu0 %v16458_v41  ;;  %v20318_v48 = vpop.eup %20317  ;;  %v12523_v42 = vadd.f32 %v24281_v5, %v12509_v0  ;;  %v12497_v35 = vmul.f32 %v20316_v9, %v24208_v20  ;;  %v16465_v7 = vcombine.low %v16424_v2, %v16432_v12  ;;  %v19915_v23 = vld [vmem:[%s25149_s20 + $0x840] sm:$0xff]   ;;  %v19922_v8 = vld [vmem:[%s25149_s20 + $0x888] sm:$0xff]   ;;  %v19926_v9 = vld [vmem:[%s25149_s20 + $0x890] sm:$0xff]  }
0x24b0   :  { %v24361_v13 = vadd.f32 %v24281_v5, %v12508_v21  ;;  %v12496_v11 = vmul.f32 %v20318_v48, %v24211_v60  ;;  %v19916_v41 = vld [vmem:[%s25149_s20 + $0x8c0] sm:$0xff]   ;;  %v19927_v0 = vld [vmem:[%s25149_s20 + $0x858] sm:$0xff]  }
0x24b1   :  { %12969 = vmatpush1.bf16.msra.mxu1 %v16455_v10  ;;  %13042 = vmatpush1.bf16.msra.mxu0 %v16457_v51  ;;  %v12511_v52 = vmul.f32 %v24275_v31, %v12497_v35  ;;  %v19917_v10 = vld [vmem:[%s25149_s20 + $0x800] sm:$0xff]   ;;  %v19928_v21 = vld [vmem:[%s25149_s20 + $0x8d8] sm:$0xff]  }
0x24b2   :  { %13112 = vmatprep.subr.bf16.mxu1 %v16444_v29  ;;  %13185 = vmatprep.subr.bf16.mxu0 %v16446_v16  ;;  %v24366_v18 = vpack.c.bf16 %v12523_v42, %v24361_v13  ;;  %v12510_v44 = vmul.f32 %v24275_v31, %v12496_v11  ;;  %v16421_v31 = vld [vmem:[%s25147_s18 + $0x2a0] sm:$0xff]  ;;  %v19920_v29 = vld [vmem:[%s25149_s20 + $0x8c8] sm:$0xff]   ;;  %v19929_v48 = vld [vmem:[%s25149_s20 + $0x818] sm:$0xff]  }
0x24b3   :  { %v12525_v20 = vadd.f32 %v24281_v5, %v12511_v52  ;;  %v16460_v62 = vcombine.high %v16421_v31, %v16429_v43  ;;  %v16459_v15 = vcombine.low %v16421_v31, %v16429_v43  ;;  %v19918_v51 = vld [vmem:[%s25149_s20 + $0x880] sm:$0xff]   ;;  %v19921_v16 = vld [vmem:[%s25149_s20 + $0x808] sm:$0xff]   ;;  %v19930_v42 = vld [vmem:[%s25149_s20 + $0x898] sm:$0xff]  }
0x24b4   :  { %16468 = vmatmul.mubr.msk.bf16.gmra.mrb[148].mxu1 %vm187_vm2, %v24349_v19  ;;  %16472 = vmatmul.mubr.msk.bf16.gmra.mrb[132].mxu0 %vm187_vm2, %v24349_v19  ;;  %v12524_v60 = vadd.f32 %v24281_v5, %v12510_v44  ;;  %v16430_v5 = vld [vmem:[%s25147_s18 + $0x2e8] sm:$0xff]  ;;  %v19932_v35 = vld [vmem:[%s25149_s20 + $0x8e0] sm:$0xff]   ;;  %v19941_v43 = vld [vmem:[%s25149_s20 + $0x830] sm:$0xff]  }
0x24b5   :  { %12872 = vmatprep.mubr.bf16.mxu1 %v20359_v26  ;;  %12945 = vmatprep.mubr.bf16.mxu0 %v20359_v26  ;;  %v16462_v47 = vcombine.high %v16422_v34, %v16430_v5  ;;  %v16461_v53 = vcombine.low %v16422_v34, %v16430_v5  ;;  %v19933_v11 = vld [vmem:[%s25149_s20 + $0x820] sm:$0xff]   ;;  %v19935_v44 = vld [vmem:[%s25149_s20 + $0x868] sm:$0xff]   ;;  %v19942_v34 = vld [vmem:[%s25149_s20 + $0x8b0] sm:$0xff]  }
0x24b6   :  { %v24378_v40 = vpack.c.bf16 %v12525_v20, %v12524_v60  ;;  %v19934_v52 = vld [vmem:[%s25149_s20 + $0x8a0] sm:$0xff]   ;;  %v19936_v20 = vld [vmem:[%s25149_s20 + $0x8e8] sm:$0xff]   ;;  %v19943_v5 = vld [vmem:[%s25149_s20 + $0x878] sm:$0xff]  }
0x24b7   :  { %v19937_v60 = vld [vmem:[%s25149_s20 + $0x828] sm:$0xff]  }
0x24b8   :  { %v19938_v31 = vld [vmem:[%s25149_s20 + $0x8a8] sm:$0xff]  }
0x24bc   :  { %16469 = vmatmul.mubr.msk.bf16.gmra.mrb[152].mxu1 %vm187_vm2, %v24366_v18  ;;  %16473 = vmatmul.mubr.msk.bf16.gmra.mrb[136].mxu0 %vm187_vm2, %v24366_v18 }
0x24bd   :  { %12882 = vmatprep.mubr.bf16.mxu1 %v20359_v26  ;;  %12955 = vmatprep.mubr.bf16.mxu0 %v20359_v26 }
0x24c4   :  { %16470 = vmatmul.mubr.msk.bf16.gmra.mrb[156].mxu1 %vm187_vm2, %v24378_v40  ;;  %16474 = vmatmul.mubr.msk.bf16.gmra.mrb[140].mxu0 %vm187_vm2, %v24378_v40 }
0x24c5   :  { %12998 = vmatprep.mubr.bf16.mxu1 %v20359_v26  ;;  %13071 = vmatprep.mubr.bf16.mxu0 %v20359_v26 }
0x24cc   :  { %16475 = vmatmul.mubr.msk.bf16.vlgmr.msra.gmra.mrb[160].mxu1 %vm187_vm2, %v24311_v39  ;;  %16479 = vmatmul.mubr.msk.bf16.vlgmr.msra.gmra.mrb[144].mxu0 %vm187_vm2, %v24311_v39 }
0x24cd   :  { %13113 = vmatpush1.bf16.msra.mxu1 %v16443_v25  ;;  %13186 = vmatpush1.bf16.msra.mxu0 %v16445_v30  ;;  %v19944_v25 = vld [vmem:[%s25149_s20 + $0x8f8] sm:$0xff]  }
0x24ce   :  { %13008 = vmatprep.mubr.bf16.mxu1 %v20359_v26  ;;  %13081 = vmatprep.mubr.bf16.mxu0 %v20359_v26  ;;  %v19945_v30 = vld [vmem:[%s25149_s20 + $0x838] sm:$0xff]  }
0x24cf   :  { %13114 = vmatprep.subr.bf16.mxu1 %v16460_v62  ;;  %13187 = vmatprep.subr.bf16.mxu0 %v16462_v47  ;;  %v19947_v62 = vld [vmem:[%s25149_s20 + $0x940] sm:$0xff]  }
0x24d0   :  { %v24601_v47 = vld [vmem:[%s25148_s19 + $0x20] sm:$0xff] }
0x24d1   :  { %13115 = vmatpush1.bf16.msra.mxu1 %v16459_v15  ;;  %13188 = vmatpush1.bf16.msra.mxu0 %v16461_v53  ;;  %v24605_v59 = vrot.slane %v24601_v47, %v20608_v14  ;;  %v24609_v1 = vrot.slane %v24601_v47, %v21527_v28  ;;  %v24613_v58 = vrot.slane %v24601_v47, %v21535_v50 }
0x24d2   :  { %13258 = vmatprep.subr.bf16.mxu1 %v16448_v63  ;;  %13331 = vmatprep.subr.bf16.mxu0 %v16450_v57  ;;  %v24617_v15 = vrot.slane %v24601_v47, %v21538_v61 }
0x24d4   :  { %16476 = vmatmul.mubr.msk.bf16.gmra.mrb[164].mxu1 %vm187_vm2, %v24349_v19  ;;  %16480 = vmatmul.mubr.msk.bf16.gmra.mrb[148].mxu0 %vm187_vm2, %v24349_v19 }
0x24d5   :  { %13018 = vmatprep.mubr.bf16.mxu1 %v20359_v26  ;;  %13091 = vmatprep.mubr.bf16.mxu0 %v20359_v26 }
0x24dc   :  { %16477 = vmatmul.mubr.msk.bf16.gmra.mrb[168].mxu1 %vm187_vm2, %v24366_v18  ;;  %16481 = vmatmul.mubr.msk.bf16.gmra.mrb[152].mxu0 %vm187_vm2, %v24366_v18 }
0x24dd   :  { %13028 = vmatprep.mubr.bf16.mxu1 %v20359_v26  ;;  %13101 = vmatprep.mubr.bf16.mxu0 %v20359_v26 }
0x24e4   :  { %16478 = vmatmul.mubr.msk.bf16.gmra.mrb[172].mxu1 %vm187_vm2, %v24378_v40  ;;  %16482 = vmatmul.mubr.msk.bf16.gmra.mrb[156].mxu0 %vm187_vm2, %v24378_v40 }
0x24e5   :  { %13144 = vmatprep.mubr.bf16.mxu1 %v20359_v26  ;;  %13217 = vmatprep.mubr.bf16.mxu0 %v20359_v26 }
0x24ec   :  { %16483 = vmatmul.mubr.msk.bf16.vlgmr.msra.gmra.mrb[176].mxu1 %vm187_vm2, %v24311_v39  ;;  %16487 = vmatmul.mubr.msk.bf16.vlgmr.msra.gmra.mrb[160].mxu0 %vm187_vm2, %v24311_v39 }
0x24ed   :  { %13259 = vmatpush1.bf16.msra.mxu1 %v16447_v54  ;;  %13332 = vmatpush1.bf16.msra.mxu0 %v16449_v45 }
0x24ee   :  { %13154 = vmatprep.mubr.bf16.mxu1 %v20359_v26  ;;  %13227 = vmatprep.mubr.bf16.mxu0 %v20359_v26 }
0x24ef   :  { %13260 = vmatprep.subr.bf16.mxu1 %v16464_v22  ;;  %13333 = vmatprep.subr.bf16.mxu0 %v16466_v36 }
0x24f1   :  { %13261 = vmatpush1.bf16.msra.mxu1 %v16463_v17  ;;  %13334 = vmatpush1.bf16.msra.mxu0 %v16465_v7 }
0x24f2   :  { %18018 = vmatprep.subr.bf16.mxu1 %v19915_v23  ;;  %18058 = vmatprep.subr.bf16.mxu0 %v19916_v41 }
0x24f4   :  { %16484 = vmatmul.mubr.msk.bf16.gmra.mrb[180].mxu1 %vm187_vm2, %v24349_v19  ;;  %16488 = vmatmul.mubr.msk.bf16.gmra.mrb[164].mxu0 %vm187_vm2, %v24349_v19 }
0x24f5   :  { %13164 = vmatprep.mubr.bf16.mxu1 %v20359_v26  ;;  %13237 = vmatprep.mubr.bf16.mxu0 %v20359_v26 }
0x24fc   :  { %16485 = vmatmul.mubr.msk.bf16.gmra.mrb[184].mxu1 %vm187_vm2, %v24366_v18  ;;  %16489 = vmatmul.mubr.msk.bf16.gmra.mrb[168].mxu0 %vm187_vm2, %v24366_v18 }
0x24fd   :  { %13174 = vmatprep.mubr.bf16.mxu1 %v20359_v26  ;;  %13247 = vmatprep.mubr.bf16.mxu0 %v20359_v26 }
0x2504   :  { %16486 = vmatmul.mubr.msk.bf16.gmra.mrb[188].mxu1 %vm187_vm2, %v24378_v40  ;;  %16490 = vmatmul.mubr.msk.bf16.gmra.mrb[172].mxu0 %vm187_vm2, %v24378_v40 }
0x2505   :  { %13290 = vmatprep.mubr.bf16.mxu1 %v20359_v26  ;;  %13363 = vmatprep.mubr.bf16.mxu0 %v20359_v26 }
0x250c   :  { %16491 = vmatmul.mubr.msk.bf16.vlgmr.msra.gmra.mrb[192].mxu1 %vm187_vm2, %v24311_v39  ;;  %16495 = vmatmul.mubr.msk.bf16.vlgmr.msra.gmra.mrb[176].mxu0 %vm187_vm2, %v24311_v39  ;;  %v19923_v39 = vld [vmem:[%s25149_s20 + $0x850] sm:$0xff]  }
0x250d   :  { %13300 = vmatprep.mubr.bf16.mxu1 %v20359_v26  ;;  %13373 = vmatprep.mubr.bf16.mxu0 %v20359_v26 }
0x250e   :  { %18019 = vmatpush3.bf16.msra.mxu1 %v19917_v10  ;;  %18059 = vmatpush3.bf16.msra.mxu0 %v19918_v51 }
0x250f   :  { %18020 = vmatprep.subr.bf16.mxu1 %v19919_v55  ;;  %18060 = vmatprep.subr.bf16.mxu0 %v19920_v29 }
0x2512   :  { %18021 = vmatpush3.bf16.msra.mxu1 %v19921_v16  ;;  %18061 = vmatpush3.bf16.msra.mxu0 %v19922_v8 }
0x2513   :  { %18022 = vmatprep.subr.bf16.mxu1 %v19923_v39  ;;  %18062 = vmatprep.subr.bf16.mxu0 %v19924_v4 }
0x2514   :  { %16492 = vmatmul.mubr.msk.bf16.gmra.mrb[196].mxu1 %vm187_vm2, %v24349_v19  ;;  %16496 = vmatmul.mubr.msk.bf16.gmra.mrb[180].mxu0 %vm187_vm2, %v24349_v19  ;;  %v19931_v19 = vld [vmem:[%s25149_s20 + $0x860] sm:$0xff]  }
0x2515   :  { %13310 = vmatprep.mubr.bf16.mxu1 %v20359_v26  ;;  %13383 = vmatprep.mubr.bf16.mxu0 %v20359_v26 }
0x2516   :  { %18023 = vmatpush3.bf16.msra.mxu1 %v19925_v46  ;;  %18063 = vmatpush3.bf16.msra.mxu0 %v19926_v9 }
0x2517   :  { %18024 = vmatprep.subr.bf16.mxu1 %v19927_v0  ;;  %18064 = vmatprep.subr.bf16.mxu0 %v19928_v21 }
0x251a   :  { %18025 = vmatpush3.bf16.msra.mxu1 %v19929_v48  ;;  %18065 = vmatpush3.bf16.msra.mxu0 %v19930_v42 }
0x251b   :  { %18026 = vmatprep.subr.bf16.mxu1 %v19931_v19  ;;  %18066 = vmatprep.subr.bf16.mxu0 %v19932_v35  ;;  %v19949_v35 = vld [vmem:[%s25149_s20 + $0x900] sm:$0xff]  }
0x251c   :  { %16493 = vmatmul.mubr.msk.bf16.gmra.mrb[200].mxu1 %vm187_vm2, %v24366_v18  ;;  %16497 = vmatmul.mubr.msk.bf16.gmra.mrb[184].mxu0 %vm187_vm2, %v24366_v18  ;;  %v19939_v18 = vld [vmem:[%s25149_s20 + $0x870] sm:$0xff]  }
0x251d   :  { %13320 = vmatprep.mubr.bf16.mxu1 %v20359_v26  ;;  %13393 = vmatprep.mubr.bf16.mxu0 %v20359_v26  ;;  %v19940_v26 = vld [vmem:[%s25149_s20 + $0x8f0] sm:$0xff]  }
0x251e   :  { %18027 = vmatpush3.bf16.msra.mxu1 %v19933_v11  ;;  %18067 = vmatpush3.bf16.msra.mxu0 %v19934_v52  ;;  %v19950_v11 = vld [vmem:[%s25149_s20 + $0x980] sm:$0xff]  }
0x251f   :  { %18028 = vmatprep.subr.bf16.mxu1 %v19935_v44  ;;  %18068 = vmatprep.subr.bf16.mxu0 %v19936_v20 }
0x2522   :  { %18029 = vmatpush3.bf16.msra.mxu1 %v19937_v60  ;;  %18069 = vmatpush3.bf16.msra.mxu0 %v19938_v31  ;;  %v19951_v31 = vld [vmem:[%s25149_s20 + $0x948] sm:$0xff]  }
0x2523   :  { %18030 = vmatprep.subr.bf16.mxu1 %v19939_v18  ;;  %18070 = vmatprep.subr.bf16.mxu0 %v19940_v26  ;;  %v19952_v18 = vld [vmem:[%s25149_s20 + $0x9c8] sm:$0xff]  }
0x2524   :  { %16494 = vmatmul.mubr.msk.bf16.gmra.mrb[204].mxu1 %vm187_vm2, %v24378_v40  ;;  %16498 = vmatmul.mubr.msk.bf16.gmra.mrb[188].mxu0 %vm187_vm2, %v24378_v40  ;;  %v19948_v40 = vld [vmem:[%s25149_s20 + $0x9c0] sm:$0xff]  }
0x2526   :  { %18031 = vmatpush3.bf16.msra.mxu1 %v19941_v43  ;;  %18071 = vmatpush3.bf16.msra.mxu0 %v19942_v34 }
0x2527   :  { %18032 = vmatprep.subr.bf16.mxu1 %v19943_v5  ;;  %18072 = vmatprep.subr.bf16.mxu0 %v19944_v25 }
0x252a   :  { %18033 = vmatpush3.bf16.msra.mxu1 %v19945_v30  ;;  %18073 = vmatpush3.bf16.msra.mxu0 %v19946_v32 }
0x252b   :  { %18098 = vmatprep.subr.bf16.mxu1 %v19947_v62  ;;  %18138 = vmatprep.subr.bf16.mxu0 %v19948_v40 }
0x257f   :  { %v12854_v53 = vpop.f32.mrb[144].mxu1  ;;  %v12927_v63 = vpop.f32.mrb[128].mxu0 }
0x2580   :  { %v12855_v57 = vadd.f32 %v12854_v53, %v24605_v59  ;;  %v12928_v56 = vadd.f32 %v12927_v63, %v24609_v1  ;;  %v12856_v38 = vpop.f32.mrb[145].mxu1  ;;  %v12929_v2 = vpop.f32.mrb[129].mxu0  ;;  %v19953_v63 = vld [vmem:[%s25149_s20 + $0x908] sm:$0xff]  }
0x2581   :  { %v12857_v12 = vadd.f32 %v12856_v38, %v24613_v58  ;;  %v12930_v54 = vadd.f32 %v12929_v2, %v24617_v15  ;;  %v12858_v45 = vpop.f32.mrb[146].mxu1  ;;  %v12931_v22 = vpop.f32.mrb[130].mxu0 }
0x2582   :  { %v12859_v36 = vadd.f32 %v12858_v45, %v24605_v59  ;;  %v12932_v17 = vadd.f32 %v12931_v22, %v24609_v1  ;;  %v12860_v7 = vpop.f32.mrb[147].mxu1  ;;  %v12933_v23 = vpop.f32.mrb[131].mxu0  ;;  %v13404_v51 = vmax.f32 %v12855_v57, 0.0  ;;  %v13406_v55 = vmax.f32 %v12928_v56, 0.0  ;;  %v19954_v57 = vld [vmem:[%s25149_s20 + $0x988] sm:$0xff]   ;;  %v19956_v45 = vld [vmem:[%s25149_s20 + $0x9d0] sm:$0xff]  }
0x2583   :  { %v12861_v41 = vadd.f32 %v12860_v7, %v24613_v58  ;;  %v12934_v10 = vadd.f32 %v12933_v23, %v24617_v15  ;;  %v13405_v8 = vmax.f32 %v12857_v12, 0.0  ;;  %v13407_v39 = vmax.f32 %v12930_v54, 0.0  ;;  %v19955_v54 = vld [vmem:[%s25149_s20 + $0x950] sm:$0xff]  }
0x2584   :  { %v13420_v29 = vmax.f32 %v12859_v36, 0.0  ;;  %v13422_v16 = vmax.f32 %v12932_v17, 0.0 }
0x2585   :  { %v13421_v4 = vmax.f32 %v12861_v41, 0.0  ;;  %v13423_v46 = vmax.f32 %v12934_v10, 0.0 }
0x2586   :  { %v13532_v9 = vpack.c.bf16 %v13420_v29, %v13404_v51  ;;  %v13534_v0 = vpack.c.bf16 %v13422_v16, %v13406_v55  ;;  %v19957_v16 = vld [vmem:[%s25149_s20 + $0x910] sm:$0xff]  }
0x2587   :  { %v13533_v21 = vpack.c.bf16 %v13421_v4, %v13405_v8  ;;  %v13535_v48 = vpack.c.bf16 %v13423_v46, %v13407_v39  ;;  %v12864_v42 = vpop.f32.mrb[148].mxu1  ;;  %v12937_v19 = vpop.f32.mrb[132].mxu0  ;;  %v19958_v8 = vld [vmem:[%s25149_s20 + $0x990] sm:$0xff]  }
0x2588   :  { %v12865_v52 = vadd.f32 %v12864_v42, %v24605_v59  ;;  %v12938_v44 = vadd.f32 %v12937_v19, %v24609_v1  ;;  %v12866_v20 = vpop.f32.mrb[149].mxu1  ;;  %v12939_v60 = vpop.f32.mrb[133].mxu0 }
0x2589   :  { %v12867_v26 = vadd.f32 %v12866_v20, %v24613_v58  ;;  %v12940_v43 = vadd.f32 %v12939_v60, %v24617_v15  ;;  %v12868_v34 = vpop.f32.mrb[150].mxu1  ;;  %v12941_v5 = vpop.f32.mrb[134].mxu0  ;;  %14661 = vmatprep.mubr.bf16.mxu1 %v13533_v21  ;;  %14720 = vmatprep.mubr.bf16.mxu0 %v13535_v48  ;;  %v19960_v21 = vld [vmem:[%s25149_s20 + $0x9d8] sm:$0xff]  }
0x258a   :  { %v12869_v25 = vadd.f32 %v12868_v34, %v24605_v59  ;;  %v12942_v30 = vadd.f32 %v12941_v5, %v24609_v1  ;;  %v12870_v32 = vpop.f32.mrb[151].mxu1  ;;  %v12943_v62 = vpop.f32.mrb[135].mxu0  ;;  %14662 = vmatmul.mubr.bf16.vlgmr.msra.gmra.mrb[208].mxu1 %v13532_v9  ;;  %14721 = vmatmul.mubr.bf16.vlgmr.msra.gmra.mrb[192].mxu0 %v13534_v0  ;;  %v13436_v56 = vmax.f32 %v12865_v52, 0.0  ;;  %v13438_v38 = vmax.f32 %v12938_v44, 0.0  ;;  %v19959_v0 = vld [vmem:[%s25149_s20 + $0x958] sm:$0xff]  }
0x258b   :  { %v12871_v40 = vadd.f32 %v12870_v32, %v24613_v58  ;;  %v12944_v53 = vadd.f32 %v12943_v62, %v24617_v15  ;;  %18099 = vmatpush3.bf16.msra.mxu1 %v19949_v35  ;;  %18139 = vmatpush3.bf16.msra.mxu0 %v19950_v11  ;;  %v13437_v22 = vmax.f32 %v12867_v26, 0.0  ;;  %v13439_v36 = vmax.f32 %v12940_v43, 0.0  ;;  %v19962_v26 = vld [vmem:[%s25149_s20 + $0x998] sm:$0xff]   ;;  %v19964_v32 = vld [vmem:[%s25149_s20 + $0x9e0] sm:$0xff]  }
0x258c   :  { %v13452_v2 = vmax.f32 %v12869_v25, 0.0  ;;  %v13454_v12 = vmax.f32 %v12942_v30, 0.0  ;;  %18100 = vmatprep.subr.bf16.mxu1 %v19951_v31  ;;  %18140 = vmatprep.subr.bf16.mxu0 %v19952_v18  ;;  %v19961_v18 = vld [vmem:[%s25149_s20 + $0x918] sm:$0xff]   ;;  %v19963_v30 = vld [vmem:[%s25149_s20 + $0x960] sm:$0xff]  }
0x258d   :  { %v13453_v17 = vmax.f32 %v12871_v40, 0.0  ;;  %v13455_v7 = vmax.f32 %v12944_v53, 0.0 }
0x258e   :  { %v13548_v23 = vpack.c.bf16 %v13452_v2, %v13436_v56  ;;  %v13550_v41 = vpack.c.bf16 %v13454_v12, %v13438_v38 }
0x258f   :  { %v13549_v10 = vpack.c.bf16 %v13453_v17, %v13437_v22  ;;  %v13551_v51 = vpack.c.bf16 %v13455_v7, %v13439_v36  ;;  %v12874_v55 = vpop.f32.mrb[152].mxu1  ;;  %v12947_v29 = vpop.f32.mrb[136].mxu0  ;;  %18101 = vmatpush3.bf16.msra.mxu1 %v19953_v63  ;;  %18141 = vmatpush3.bf16.msra.mxu0 %v19954_v57  ;;  %v19966_v22 = vld [vmem:[%s25149_s20 + $0x9a0] sm:$0xff]  }
0x2590   :  { %v12875_v39 = vadd.f32 %v12874_v55, %v24605_v59  ;;  %v12948_v4 = vadd.f32 %v12947_v29, %v24609_v1  ;;  %v12876_v46 = vpop.f32.mrb[153].mxu1  ;;  %v12949_v9 = vpop.f32.mrb[137].mxu0  ;;  %18102 = vmatprep.subr.bf16.mxu1 %v19955_v54  ;;  %18142 = vmatprep.subr.bf16.mxu0 %v19956_v45  ;;  %v19965_v45 = vld [vmem:[%s25149_s20 + $0x920] sm:$0xff]  }
0x2591   :  { %v12877_v48 = vadd.f32 %v12876_v46, %v24613_v58  ;;  %v12950_v42 = vadd.f32 %v12949_v9, %v24617_v15  ;;  %v12878_v19 = vpop.f32.mrb[154].mxu1  ;;  %v12951_v35 = vpop.f32.mrb[138].mxu0  ;;  %14668 = vmatprep.mubr.bf16.mxu1 %v13549_v10  ;;  %14727 = vmatprep.mubr.bf16.mxu0 %v13551_v51  ;;  %v19968_v10 = vld [vmem:[%s25149_s20 + $0x9e8] sm:$0xff]   ;;  %v24707_v51 = vrot.slane %v24601_v47, %v21623_v24 }
0x2592   :  { %v12879_v11 = vadd.f32 %v12878_v19, %v24605_v59  ;;  %v12952_v52 = vadd.f32 %v12951_v35, %v24609_v1  ;;  %v12880_v44 = vpop.f32.mrb[155].mxu1  ;;  %v12953_v20 = vpop.f32.mrb[139].mxu0  ;;  %14669 = vmatmul.mubr.bf16.gmra.mrb[212].mxu1 %v13548_v23  ;;  %14728 = vmatmul.mubr.bf16.gmra.mrb[196].mxu0 %v13550_v41  ;;  %v13468_v43 = vmax.f32 %v12875_v39, 0.0  ;;  %v13470_v34 = vmax.f32 %v12948_v4, 0.0  ;;  %v19967_v41 = vld [vmem:[%s25149_s20 + $0x968] sm:$0xff]  }
0x2593   :  { %v12881_v60 = vadd.f32 %v12880_v44, %v24613_v58  ;;  %v12954_v31 = vadd.f32 %v12953_v20, %v24617_v15  ;;  %18103 = vmatpush3.bf16.msra.mxu1 %v19957_v16  ;;  %18143 = vmatpush3.bf16.msra.mxu0 %v19958_v8  ;;  %v13469_v62 = vmax.f32 %v12877_v48, 0.0  ;;  %v13471_v40 = vmax.f32 %v12950_v42, 0.0  ;;  %v19972_v44 = vld [vmem:[%s25149_s20 + $0x9f0] sm:$0xff]  }
0x2594   :  { %v13484_v5 = vmax.f32 %v12879_v11, 0.0  ;;  %v13486_v25 = vmax.f32 %v12952_v52, 0.0  ;;  %18104 = vmatprep.subr.bf16.mxu1 %v19959_v0  ;;  %18144 = vmatprep.subr.bf16.mxu0 %v19960_v21  ;;  %v24713_v39 = vrot.slane %v24601_v47, %v21626_v27  ;;  %v24719_v21 = vrot.slane %v24601_v47, %v21635_v49 }
0x2595   :  { %v13485_v53 = vmax.f32 %v12881_v60, 0.0  ;;  %v13487_v63 = vmax.f32 %v12954_v31, 0.0  ;;  %v24731_v19 = vrot.slane %v24601_v47, %v21644_v37 }
0x2596   :  { %v13564_v57 = vpack.c.bf16 %v13484_v5, %v13468_v43  ;;  %v13566_v56 = vpack.c.bf16 %v13486_v25, %v13470_v34 }
0x2597   :  { %v13565_v38 = vpack.c.bf16 %v13485_v53, %v13469_v62  ;;  %v13567_v2 = vpack.c.bf16 %v13487_v63, %v13471_v40  ;;  %v12884_v12 = vpop.f32.mrb[156].mxu1  ;;  %v12957_v54 = vpop.f32.mrb[140].mxu0  ;;  %18105 = vmatpush3.bf16.msra.mxu1 %v19961_v18  ;;  %18145 = vmatpush3.bf16.msra.mxu0 %v19962_v26 }
0x2598   :  { %v12885_v36 = vadd.f32 %v12884_v12, %v24605_v59  ;;  %v12958_v17 = vadd.f32 %v12957_v54, %v24609_v1  ;;  %v12886_v7 = vpop.f32.mrb[157].mxu1  ;;  %v12959_v23 = vpop.f32.mrb[141].mxu0  ;;  %18106 = vmatprep.subr.bf16.mxu1 %v19963_v30  ;;  %18146 = vmatprep.subr.bf16.mxu0 %v19964_v32  ;;  %v19973_v30 = vld [vmem:[%s25149_s20 + $0x930] sm:$0xff]  }
0x2599   :  { %v12887_v55 = vadd.f32 %v12886_v7, %v24613_v58  ;;  %v12960_v29 = vadd.f32 %v12959_v23, %v24617_v15  ;;  %v12888_v16 = vpop.f32.mrb[158].mxu1  ;;  %v12961_v8 = vpop.f32.mrb[142].mxu0  ;;  %14674 = vmatprep.mubr.bf16.mxu1 %v13565_v38  ;;  %14733 = vmatprep.mubr.bf16.mxu0 %v13567_v2  ;;  %v19974_v32 = vld [vmem:[%s25149_s20 + $0x9b0] sm:$0xff]  }
0x259a   :  { %v12889_v4 = vadd.f32 %v12888_v16, %v24605_v59  ;;  %v12962_v46 = vadd.f32 %v12961_v8, %v24609_v1  ;;  %v12890_v9 = vpop.f32.mrb[159].mxu1  ;;  %v12963_v0 = vpop.f32.mrb[143].mxu0  ;;  %14675 = vmatmul.mubr.bf16.gmra.mrb[216].mxu1 %v13564_v57  ;;  %14734 = vmatmul.mubr.bf16.gmra.mrb[200].mxu0 %v13566_v56  ;;  %v19969_v59 = vld [vmem:[%s25149_s20 + $0x928] sm:$0xff]   ;;  %v13500_v35 = vmax.f32 %v12885_v36, 0.0  ;;  %v13502_v11 = vmax.f32 %v12958_v17, 0.0  ;;  %v19975_v57 = vld [vmem:[%s25149_s20 + $0x978] sm:$0xff]  }
0x259b   :  { %v12891_v48 = vadd.f32 %v12890_v9, %v24613_v58  ;;  %v12964_v42 = vadd.f32 %v12963_v0, %v24617_v15  ;;  %18107 = vmatpush3.bf16.msra.mxu1 %v19965_v45  ;;  %18147 = vmatpush3.bf16.msra.mxu0 %v19966_v22  ;;  %v19970_v1 = vld [vmem:[%s25149_s20 + $0x9a8] sm:$0xff]   ;;  %v19971_v15 = vld [vmem:[%s25149_s20 + $0x970] sm:$0xff]   ;;  %v13501_v20 = vmax.f32 %v12887_v55, 0.0  ;;  %v13503_v60 = vmax.f32 %v12960_v29, 0.0  ;;  %v19976_v56 = vld [vmem:[%s25149_s20 + $0x9f8] sm:$0xff]  }
0x259c   :  { %v13516_v52 = vmax.f32 %v12889_v4, 0.0  ;;  %v13518_v58 = vmax.f32 %v12962_v46, 0.0  ;;  %18108 = vmatprep.subr.bf16.mxu1 %v19967_v41  ;;  %18148 = vmatprep.subr.bf16.mxu0 %v19968_v10  ;;  %v19977_v41 = vld [vmem:[%s25149_s20 + $0x938] sm:$0xff]   ;;  %v19979_v4 = vld [vmem:[%s25149_s20 + $0xa40] sm:$0xff]  }
0x259d   :  { %v13517_v31 = vmax.f32 %v12891_v48, 0.0  ;;  %v13519_v18 = vmax.f32 %v12964_v42, 0.0  ;;  %v19978_v10 = vld [vmem:[%s25149_s20 + $0x9b8] sm:$0xff]   ;;  %v19980_v46 = vld [vmem:[%s25149_s20 + $0xac0] sm:$0xff]  }
0x259e   :  { %v13580_v47 = vpack.c.bf16 %v13516_v52, %v13500_v35  ;;  %v13582_v26 = vpack.c.bf16 %v13518_v58, %v13502_v11 }
0x259f   :  { %v13581_v43 = vpack.c.bf16 %v13517_v31, %v13501_v20  ;;  %v13583_v34 = vpack.c.bf16 %v13519_v18, %v13503_v60  ;;  %v13000_v5 = vpop.f32.mrb[160].mxu1  ;;  %v13073_v25 = vpop.f32.mrb[144].mxu0  ;;  %18109 = vmatpush3.bf16.msra.mxu1 %v19969_v59  ;;  %18149 = vmatpush3.bf16.msra.mxu0 %v19970_v1 }
0x25a0   :  { %v13001_v62 = vadd.f32 %v13000_v5, %v24707_v51  ;;  %v13074_v40 = vadd.f32 %v13073_v25, %v24713_v39  ;;  %v13002_v53 = vpop.f32.mrb[161].mxu1  ;;  %v13075_v63 = vpop.f32.mrb[145].mxu0  ;;  %18110 = vmatprep.subr.bf16.mxu1 %v19971_v15  ;;  %18150 = vmatprep.subr.bf16.mxu0 %v19972_v44  ;;  %v19981_v15 = vld [vmem:[%s25149_s20 + $0xa00] sm:$0xff]  }
0x25a1   :  { %v13003_v38 = vadd.f32 %v13002_v53, %v24719_v21  ;;  %v13076_v2 = vadd.f32 %v13075_v63, %v24731_v19  ;;  %v13004_v12 = vpop.f32.mrb[162].mxu1  ;;  %v13077_v54 = vpop.f32.mrb[146].mxu0  ;;  %14681 = vmatprep.mubr.bf16.mxu1 %v13581_v43  ;;  %14740 = vmatprep.mubr.bf16.mxu0 %v13583_v34  ;;  %v19982_v44 = vld [vmem:[%s25149_s20 + $0xa80] sm:$0xff]  }
0x25a2   :  { %v13005_v45 = vadd.f32 %v13004_v12, %v24707_v51  ;;  %v13078_v22 = vadd.f32 %v13077_v54, %v24713_v39  ;;  %v13006_v36 = vpop.f32.mrb[163].mxu1  ;;  %v13079_v17 = vpop.f32.mrb[147].mxu0  ;;  %14682 = vmatmul.mubr.bf16.gmra.mrb[224].mxu1 %v13580_v47  ;;  %14741 = vmatmul.mubr.bf16.gmra.mrb[204].mxu0 %v13582_v26  ;;  %v13408_v55 = vmax.f32 %v13001_v62, 0.0  ;;  %v13410_v29 = vmax.f32 %v13074_v40, 0.0  ;;  %v19983_v47 = vld [vmem:[%s25149_s20 + $0xa48] sm:$0xff]  }
0x25a3   :  { %v13007_v7 = vadd.f32 %v13006_v36, %v24719_v21  ;;  %v13080_v23 = vadd.f32 %v13079_v17, %v24731_v19  ;;  %18111 = vmatpush3.bf16.msra.mxu1 %v19973_v30  ;;  %18151 = vmatpush3.bf16.msra.mxu0 %v19974_v32  ;;  %v13409_v9 = vmax.f32 %v13003_v38, 0.0  ;;  %v13411_v0 = vmax.f32 %v13076_v2, 0.0  ;;  %v19984_v26 = vld [vmem:[%s25149_s20 + $0xac8] sm:$0xff]  }
0x25a4   :  { %v13424_v16 = vmax.f32 %v13005_v45, 0.0  ;;  %v13426_v8 = vmax.f32 %v13078_v22, 0.0  ;;  %18112 = vmatprep.subr.bf16.mxu1 %v19975_v57  ;;  %18152 = vmatprep.subr.bf16.mxu0 %v19976_v56  ;;  %v19985_v57 = vld [vmem:[%s25149_s20 + $0xa08] sm:$0xff]   ;;  %v19987_v45 = vld [vmem:[%s25149_s20 + $0xa50] sm:$0xff]  }
0x25a5   :  { %v13425_v48 = vmax.f32 %v13007_v7, 0.0  ;;  %v13427_v42 = vmax.f32 %v13080_v23, 0.0  ;;  %v19986_v56 = vld [vmem:[%s25149_s20 + $0xa88] sm:$0xff]   ;;  %v19988_v22 = vld [vmem:[%s25149_s20 + $0xad0] sm:$0xff]  }
0x25a6   :  { %v13536_v59 = vpack.c.bf16 %v13424_v16, %v13408_v55  ;;  %v13538_v1 = vpack.c.bf16 %v13426_v8, %v13410_v29 }
0x25a7   :  { %v13537_v35 = vpack.c.bf16 %v13425_v48, %v13409_v9  ;;  %v13539_v11 = vpack.c.bf16 %v13427_v42, %v13411_v0  ;;  %v13010_v52 = vpop.f32.mrb[164].mxu1  ;;  %v13083_v58 = vpop.f32.mrb[148].mxu0  ;;  %18113 = vmatpush3.bf16.msra.mxu1 %v19977_v41  ;;  %18153 = vmatpush3.bf16.msra.mxu0 %v19978_v10 }
0x25a8   :  { %v13011_v20 = vadd.f32 %v13010_v52, %v24707_v51  ;;  %v13084_v60 = vadd.f32 %v13083_v58, %v24713_v39  ;;  %v13012_v31 = vpop.f32.mrb[165].mxu1  ;;  %v13085_v18 = vpop.f32.mrb[149].mxu0  ;;  %18178 = vmatprep.subr.bf16.mxu1 %v19979_v4  ;;  %18218 = vmatprep.subr.bf16.mxu0 %v19980_v46  ;;  %v19989_v4 = vld [vmem:[%s25149_s20 + $0xa10] sm:$0xff]  }
0x25a9   :  { %v13013_v43 = vadd.f32 %v13012_v31, %v24719_v21  ;;  %v13086_v34 = vadd.f32 %v13085_v18, %v24731_v19  ;;  %v13014_v5 = vpop.f32.mrb[166].mxu1  ;;  %v13087_v25 = vpop.f32.mrb[150].mxu0  ;;  %14779 = vmatprep.mubr.bf16.mxu1 %v13537_v35  ;;  %14838 = vmatprep.mubr.bf16.mxu0 %v13539_v11  ;;  %v19990_v46 = vld [vmem:[%s25149_s20 + $0xa90] sm:$0xff]  }
0x25aa   :  { %v13015_v30 = vadd.f32 %v13014_v5, %v24707_v51  ;;  %v13088_v32 = vadd.f32 %v13087_v25, %v24713_v39  ;;  %v13016_v62 = vpop.f32.mrb[167].mxu1  ;;  %v13089_v40 = vpop.f32.mrb[151].mxu0  ;;  %14780 = vmatmul.mubr.bf16.vlgmr.msra.gmra.mrb[228].mxu1 %v13536_v59  ;;  %14839 = vmatmul.mubr.bf16.vlgmr.msra.gmra.mrb[208].mxu0 %v13538_v1  ;;  %v13440_v38 = vmax.f32 %v13011_v20, 0.0  ;;  %v13442_v2 = vmax.f32 %v13084_v60, 0.0  ;;  %v19991_v59 = vld [vmem:[%s25149_s20 + $0xa58] sm:$0xff]  }
0x25ab   :  { %v13017_v53 = vadd.f32 %v13016_v62, %v24719_v21  ;;  %v13090_v63 = vadd.f32 %v13089_v40, %v24731_v19  ;;  %18179 = vmatpush3.bf16.msra.mxu1 %v19981_v15  ;;  %18219 = vmatpush3.bf16.msra.mxu0 %v19982_v44  ;;  %v13441_v36 = vmax.f32 %v13013_v43, 0.0  ;;  %v13443_v17 = vmax.f32 %v13086_v34, 0.0  ;;  %v19992_v1 = vld [vmem:[%s25149_s20 + $0xad8] sm:$0xff]  }
0x25ac   :  { %v13456_v12 = vmax.f32 %v13015_v30, 0.0  ;;  %v13458_v54 = vmax.f32 %v13088_v32, 0.0  ;;  %18180 = vmatprep.subr.bf16.mxu1 %v19983_v47  ;;  %18220 = vmatprep.subr.bf16.mxu0 %v19984_v26  ;;  %v19993_v47 = vld [vmem:[%s25149_s20 + $0xa18] sm:$0xff]   ;;  %v19995_v30 = vld [vmem:[%s25149_s20 + $0xa60] sm:$0xff]  }
0x25ad   :  { %v13457_v7 = vmax.f32 %v13017_v53, 0.0  ;;  %v13459_v23 = vmax.f32 %v13090_v63, 0.0  ;;  %v19994_v26 = vld [vmem:[%s25149_s20 + $0xa98] sm:$0xff]   ;;  %v19996_v32 = vld [vmem:[%s25149_s20 + $0xae0] sm:$0xff]  }
0x25ae   :  { %v13552_v41 = vpack.c.bf16 %v13456_v12, %v13440_v38  ;;  %v13554_v10 = vpack.c.bf16 %v13458_v54, %v13442_v2 }
0x25af   :  { %v13553_v55 = vpack.c.bf16 %v13457_v7, %v13441_v36  ;;  %v13555_v29 = vpack.c.bf16 %v13459_v23, %v13443_v17  ;;  %v13020_v16 = vpop.f32.mrb[168].mxu1  ;;  %v13093_v8 = vpop.f32.mrb[152].mxu0  ;;  %18181 = vmatpush3.bf16.msra.mxu1 %v19985_v57  ;;  %18221 = vmatpush3.bf16.msra.mxu0 %v19986_v56  ;;  %v24838_v57 = vld [vmem:[%s25148_s19 + $0x28] sm:$0xff]  ;;  %v19998_v36 = vld [vmem:[%s25149_s20 + $0xaa0] sm:$0xff]  }
0x25b0   :  { %v13021_v9 = vadd.f32 %v13020_v16, %v24707_v51  ;;  %v13094_v0 = vadd.f32 %v13093_v8, %v24713_v39  ;;  %v13022_v48 = vpop.f32.mrb[169].mxu1  ;;  %v13095_v42 = vpop.f32.mrb[153].mxu0  ;;  %18182 = vmatprep.subr.bf16.mxu1 %v19987_v45  ;;  %18222 = vmatprep.subr.bf16.mxu0 %v19988_v22  ;;  %v19997_v22 = vld [vmem:[%s25149_s20 + $0xa20] sm:$0xff]  }
0x25b1   :  { %v13023_v35 = vadd.f32 %v13022_v48, %v24719_v21  ;;  %v13096_v11 = vadd.f32 %v13095_v42, %v24731_v19  ;;  %v13024_v52 = vpop.f32.mrb[170].mxu1  ;;  %v13097_v58 = vpop.f32.mrb[154].mxu0  ;;  %14786 = vmatprep.mubr.bf16.mxu1 %v13553_v55  ;;  %14845 = vmatprep.mubr.bf16.mxu0 %v13555_v29  ;;  %v20000_v55 = vld [vmem:[%s25149_s20 + $0xae8] sm:$0xff]   ;;  %v24856_v29 = vrot.slane %v24838_v57, %v20608_v14 }
0x25b2   :  { %v13025_v15 = vadd.f32 %v13024_v52, %v24707_v51  ;;  %v13098_v44 = vadd.f32 %v13097_v58, %v24713_v39  ;;  %v13026_v20 = vpop.f32.mrb[171].mxu1  ;;  %v13099_v60 = vpop.f32.mrb[155].mxu0  ;;  %14787 = vmatmul.mubr.bf16.gmra.mrb[232].mxu1 %v13552_v41  ;;  %14846 = vmatmul.mubr.bf16.gmra.mrb[212].mxu0 %v13554_v10  ;;  %v13472_v43 = vmax.f32 %v13021_v9, 0.0  ;;  %v13474_v34 = vmax.f32 %v13094_v0, 0.0  ;;  %v19999_v10 = vld [vmem:[%s25149_s20 + $0xa68] sm:$0xff]   ;;  %v20004_v58 = vld [vmem:[%s25149_s20 + $0xaf0] sm:$0xff]  }
0x25b3   :  { %v13027_v31 = vadd.f32 %v13026_v20, %v24719_v21  ;;  %v13100_v18 = vadd.f32 %v13099_v60, %v24731_v19  ;;  %18183 = vmatpush3.bf16.msra.mxu1 %v19989_v4  ;;  %18223 = vmatpush3.bf16.msra.mxu0 %v19990_v46  ;;  %v13473_v62 = vmax.f32 %v13023_v35, 0.0  ;;  %v13475_v40 = vmax.f32 %v13096_v11, 0.0 }
0x25b4   :  { %v13488_v5 = vmax.f32 %v13025_v15, 0.0  ;;  %v13490_v25 = vmax.f32 %v13098_v44, 0.0  ;;  %18184 = vmatprep.subr.bf16.mxu1 %v19991_v59  ;;  %18224 = vmatprep.subr.bf16.mxu0 %v19992_v1  ;;  %v24862_v9 = vrot.slane %v24838_v57, %v21527_v28  ;;  %v24868_v14 = vrot.slane %v24838_v57, %v21535_v50  ;;  %v20001_v28 = vld [vmem:[%s25149_s20 + $0xa28] sm:$0xff]  }
0x25b5   :  { %v13489_v53 = vmax.f32 %v13027_v31, 0.0  ;;  %v13491_v63 = vmax.f32 %v13100_v18, 0.0 }
0x25b6   :  { %v13568_v56 = vpack.c.bf16 %v13488_v5, %v13472_v43  ;;  %v13570_v38 = vpack.c.bf16 %v13490_v25, %v13474_v34  ;;  %v20005_v34 = vld [vmem:[%s25149_s20 + $0xa30] sm:$0xff]  }
0x25b7   :  { %v13569_v2 = vpack.c.bf16 %v13489_v53, %v13473_v62  ;;  %v13571_v12 = vpack.c.bf16 %v13491_v63, %v13475_v40  ;;  %v13030_v54 = vpop.f32.mrb[172].mxu1  ;;  %v13103_v45 = vpop.f32.mrb[156].mxu0  ;;  %18185 = vmatpush3.bf16.msra.mxu1 %v19993_v47  ;;  %18225 = vmatpush3.bf16.msra.mxu0 %v19994_v26  ;;  %v20006_v5 = vld [vmem:[%s25149_s20 + $0xab0] sm:$0xff]   ;;  %v20007_v40 = vld [vmem:[%s25149_s20 + $0xa78] sm:$0xff]  }
0x25b8   :  { %v13031_v17 = vadd.f32 %v13030_v54, %v24707_v51  ;;  %v13104_v7 = vadd.f32 %v13103_v45, %v24713_v39  ;;  %v13032_v23 = vpop.f32.mrb[173].mxu1  ;;  %v13105_v41 = vpop.f32.mrb[157].mxu0  ;;  %18186 = vmatprep.subr.bf16.mxu1 %v19995_v30  ;;  %18226 = vmatprep.subr.bf16.mxu0 %v19996_v32  ;;  %v20008_v53 = vld [vmem:[%s25149_s20 + $0xaf8] sm:$0xff]  }
0x25b9   :  { %v13033_v16 = vadd.f32 %v13032_v23, %v24719_v21  ;;  %v13106_v8 = vadd.f32 %v13105_v41, %v24731_v19  ;;  %v13034_v4 = vpop.f32.mrb[174].mxu1  ;;  %v13107_v46 = vpop.f32.mrb[158].mxu0  ;;  %14792 = vmatprep.mubr.bf16.mxu1 %v13569_v2  ;;  %14851 = vmatprep.mubr.bf16.mxu0 %v13571_v12  ;;  %v20010_v23 = vld [vmem:[%s25149_s20 + $0xab8] sm:$0xff]  }
0x25ba   :  { %v13035_v0 = vadd.f32 %v13034_v4, %v24707_v51  ;;  %v13108_v48 = vadd.f32 %v13107_v46, %v24713_v39  ;;  %v13036_v42 = vpop.f32.mrb[175].mxu1  ;;  %v13109_v59 = vpop.f32.mrb[159].mxu0  ;;  %14793 = vmatmul.mubr.bf16.gmra.mrb[236].mxu1 %v13568_v56  ;;  %14852 = vmatmul.mubr.bf16.gmra.mrb[216].mxu0 %v13570_v38  ;;  %v20002_v51 = vld [vmem:[%s25149_s20 + $0xaa8] sm:$0xff]   ;;  %v24880_v39 = vrot.slane %v24838_v57, %v21538_v61  ;;  %v13504_v50 = vmax.f32 %v13031_v17, 0.0  ;;  %v20012_v4 = vld [vmem:[%s25149_s20 + $0xbc0] sm:$0xff]  }
0x25bb   :  { %v13037_v1 = vadd.f32 %v13036_v42, %v24719_v21  ;;  %v13110_v35 = vadd.f32 %v13109_v59, %v24731_v19  ;;  %18187 = vmatpush3.bf16.msra.mxu1 %v19997_v22  ;;  %18227 = vmatpush3.bf16.msra.mxu0 %v19998_v36  ;;  %v13506_v11 = vmax.f32 %v13104_v7, 0.0  ;;  %v20003_v19 = vld [vmem:[%s25149_s20 + $0xa70] sm:$0xff]   ;;  %v13505_v15 = vmax.f32 %v13033_v16, 0.0  ;;  %v20009_v7 = vld [vmem:[%s25149_s20 + $0xa38] sm:$0xff]  }
0x25bc   :  { %v13520_v52 = vmax.f32 %v13035_v0, 0.0  ;;  %v13522_v21 = vmax.f32 %v13108_v48, 0.0  ;;  %18188 = vmatprep.subr.bf16.mxu1 %v19999_v10  ;;  %18228 = vmatprep.subr.bf16.mxu0 %v20000_v55  ;;  %v13507_v44 = vmax.f32 %v13106_v8, 0.0  ;;  %v20011_v8 = vld [vmem:[%s25149_s20 + $0xb40] sm:$0xff]  }
0x25bd   :  { %v13521_v20 = vmax.f32 %v13037_v1, 0.0  ;;  %v13523_v60 = vmax.f32 %v13110_v35, 0.0 }
0x25be   :  { %v13584_v61 = vpack.c.bf16 %v13520_v52, %v13504_v50  ;;  %v13586_v31 = vpack.c.bf16 %v13522_v21, %v13506_v11  ;;  %v20013_v11 = vld [vmem:[%s25149_s20 + $0xb00] sm:$0xff]  }
0x25bf   :  { %v13585_v18 = vpack.c.bf16 %v13521_v20, %v13505_v15  ;;  %v13587_v47 = vpack.c.bf16 %v13523_v60, %v13507_v44  ;;  %v13146_v26 = vpop.f32.mrb[176].mxu1  ;;  %v13219_v43 = vpop.f32.mrb[160].mxu0  ;;  %18189 = vmatpush3.bf16.msra.mxu1 %v20001_v28  ;;  %18229 = vmatpush3.bf16.msra.mxu0 %v20002_v51  ;;  %v20014_v52 = vld [vmem:[%s25149_s20 + $0xb80] sm:$0xff]   ;;  %v20015_v44 = vld [vmem:[%s25149_s20 + $0xb48] sm:$0xff]  }
0x25c0   :  { %v13147_v25 = vadd.f32 %v13146_v26, %v24856_v29  ;;  %v13220_v30 = vadd.f32 %v13219_v43, %v24862_v9  ;;  %v13148_v32 = vpop.f32.mrb[177].mxu1  ;;  %v13221_v62 = vpop.f32.mrb[161].mxu0  ;;  %18190 = vmatprep.subr.bf16.mxu1 %v20003_v19  ;;  %18230 = vmatprep.subr.bf16.mxu0 %v20004_v58  ;;  %v20016_v20 = vld [vmem:[%s25149_s20 + $0xbc8] sm:$0xff]  }
0x25c1   :  { %v13149_v63 = vadd.f32 %v13148_v32, %v24868_v14  ;;  %v13222_v56 = vadd.f32 %v13221_v62, %v24880_v39  ;;  %v13150_v38 = vpop.f32.mrb[178].mxu1  ;;  %v13223_v2 = vpop.f32.mrb[162].mxu0  ;;  %14799 = vmatprep.mubr.bf16.mxu1 %v13585_v18  ;;  %14858 = vmatprep.mubr.bf16.mxu0 %v13587_v47  ;;  %v20018_v32 = vld [vmem:[%s25149_s20 + $0xb88] sm:$0xff]  }
0x25c2   :  { %v13151_v12 = vadd.f32 %v13150_v38, %v24856_v29  ;;  %v13224_v54 = vadd.f32 %v13223_v2, %v24862_v9  ;;  %v13152_v45 = vpop.f32.mrb[179].mxu1  ;;  %v13225_v22 = vpop.f32.mrb[163].mxu0  ;;  %14800 = vmatmul.mubr.bf16.gmra.mrb[240].mxu1 %v13584_v61  ;;  %14859 = vmatmul.mubr.bf16.gmra.mrb[220].mxu0 %v13586_v31  ;;  %v13412_v41 = vmax.f32 %v13147_v25, 0.0  ;;  %v13414_v10 = vmax.f32 %v13220_v30, 0.0  ;;  %v20017_v30 = vld [vmem:[%s25149_s20 + $0xb08] sm:$0xff]   ;;  %v20020_v38 = vld [vmem:[%s25149_s20 + $0xbd0] sm:$0xff]  }
0x25c3   :  { %v13153_v36 = vadd.f32 %v13152_v45, %v24868_v14  ;;  %v13226_v17 = vadd.f32 %v13225_v22, %v24880_v39  ;;  %18191 = vmatpush3.bf16.msra.mxu1 %v20005_v34  ;;  %18231 = vmatpush3.bf16.msra.mxu0 %v20006_v5  ;;  %v13413_v46 = vmax.f32 %v13149_v63, 0.0  ;;  %v13415_v0 = vmax.f32 %v13222_v56, 0.0  ;;  %v20019_v56 = vld [vmem:[%s25149_s20 + $0xb50] sm:$0xff]  }
0x25c4   :  { %v13428_v55 = vmax.f32 %v13151_v12, 0.0  ;;  %v13430_v16 = vmax.f32 %v13224_v54, 0.0  ;;  %18192 = vmatprep.subr.bf16.mxu1 %v20007_v40  ;;  %18232 = vmatprep.subr.bf16.mxu0 %v20008_v53 }
0x25c5   :  { %v13429_v48 = vmax.f32 %v13153_v36, 0.0  ;;  %v13431_v42 = vmax.f32 %v13226_v17, 0.0 }
0x25c6   :  { %v13540_v59 = vpack.c.bf16 %v13428_v55, %v13412_v41  ;;  %v13542_v1 = vpack.c.bf16 %v13430_v16, %v13414_v10  ;;  %v20021_v10 = vld [vmem:[%s25149_s20 + $0xb10] sm:$0xff]  }
0x25c7   :  { %v13541_v35 = vpack.c.bf16 %v13429_v48, %v13413_v46  ;;  %v13543_v28 = vpack.c.bf16 %v13431_v42, %v13415_v0  ;;  %v13156_v51 = vpop.f32.mrb[180].mxu1  ;;  %v13229_v50 = vpop.f32.mrb[164].mxu0  ;;  %18193 = vmatpush3.bf16.msra.mxu1 %v20009_v7  ;;  %18233 = vmatpush3.bf16.msra.mxu0 %v20010_v23  ;;  %v20022_v55 = vld [vmem:[%s25149_s20 + $0xb90] sm:$0xff]   ;;  %v20023_v0 = vld [vmem:[%s25149_s20 + $0xb58] sm:$0xff]  }
0x25c8   :  { %v13157_v21 = vadd.f32 %v13156_v51, %v24856_v29  ;;  %v13230_v19 = vadd.f32 %v13229_v50, %v24862_v9  ;;  %v13158_v58 = vpop.f32.mrb[181].mxu1  ;;  %v13231_v15 = vpop.f32.mrb[165].mxu0  ;;  %18258 = vmatprep.subr.bf16.mxu1 %v20011_v8  ;;  %18298 = vmatprep.subr.bf16.mxu0 %v20012_v4  ;;  %v20024_v48 = vld [vmem:[%s25149_s20 + $0xbd8] sm:$0xff]  }
0x25c9   :  { %v13159_v60 = vadd.f32 %v13158_v58, %v24868_v14  ;;  %v13232_v61 = vadd.f32 %v13231_v15, %v24880_v39  ;;  %v13160_v31 = vpop.f32.mrb[182].mxu1  ;;  %v13233_v18 = vpop.f32.mrb[166].mxu0  ;;  %14897 = vmatprep.mubr.bf16.mxu1 %v13541_v35  ;;  %14956 = vmatprep.mubr.bf16.mxu0 %v13543_v28  ;;  %v20026_v58 = vld [vmem:[%s25149_s20 + $0xb98] sm:$0xff]  }
0x25ca   :  { %v13161_v47 = vadd.f32 %v13160_v31, %v24856_v29  ;;  %v13234_v26 = vadd.f32 %v13233_v18, %v24862_v9  ;;  %v13162_v43 = vpop.f32.mrb[183].mxu1  ;;  %v13235_v34 = vpop.f32.mrb[167].mxu0  ;;  %14898 = vmatmul.mubr.bf16.vlgmr.msra.gmra.mrb[244].mxu1 %v13540_v59  ;;  %14957 = vmatmul.mubr.bf16.vlgmr.msra.gmra.mrb[224].mxu0 %v13542_v1  ;;  %v13444_v62 = vmax.f32 %v13157_v21, 0.0  ;;  %v13446_v40 = vmax.f32 %v13230_v19, 0.0  ;;  %v20025_v19 = vld [vmem:[%s25149_s20 + $0xb18] sm:$0xff]   ;;  %v20028_v31 = vld [vmem:[%s25149_s20 + $0xbe0] sm:$0xff]  }
0x25cb   :  { %v13163_v5 = vadd.f32 %v13162_v43, %v24868_v14  ;;  %v13236_v25 = vadd.f32 %v13235_v34, %v24880_v39  ;;  %18259 = vmatpush3.bf16.msra.mxu1 %v20013_v11  ;;  %18299 = vmatpush3.bf16.msra.mxu0 %v20014_v52  ;;  %v13445_v2 = vmax.f32 %v13159_v60, 0.0  ;;  %v13447_v12 = vmax.f32 %v13232_v61, 0.0  ;;  %v20027_v61 = vld [vmem:[%s25149_s20 + $0xb60] sm:$0xff]  }
0x25cc   :  { %v13460_v53 = vmax.f32 %v13161_v47, 0.0  ;;  %v13462_v63 = vmax.f32 %v13234_v26, 0.0  ;;  %18260 = vmatprep.subr.bf16.mxu1 %v20015_v44  ;;  %18300 = vmatprep.subr.bf16.mxu0 %v20016_v20 }
0x25cd   :  { %v13461_v54 = vmax.f32 %v13163_v5, 0.0  ;;  %v13463_v45 = vmax.f32 %v13236_v25, 0.0 }
0x25ce   :  { %v13556_v22 = vpack.c.bf16 %v13460_v53, %v13444_v62  ;;  %v13558_v36 = vpack.c.bf16 %v13462_v63, %v13446_v40  ;;  %v20029_v40 = vld [vmem:[%s25149_s20 + $0xb20] sm:$0xff]  }
0x25cf   :  { %v13557_v17 = vpack.c.bf16 %v13461_v54, %v13445_v2  ;;  %v13559_v7 = vpack.c.bf16 %v13463_v45, %v13447_v12  ;;  %v13166_v23 = vpop.f32.mrb[184].mxu1  ;;  %v13239_v41 = vpop.f32.mrb[168].mxu0  ;;  %18261 = vmatpush3.bf16.msra.mxu1 %v20017_v30  ;;  %18301 = vmatpush3.bf16.msra.mxu0 %v20018_v32  ;;  %v20030_v53 = vld [vmem:[%s25149_s20 + $0xba0] sm:$0xff]   ;;  %v20031_v12 = vld [vmem:[%s25149_s20 + $0xb68] sm:$0xff]   ;;  %v25000_v45 = vrot.slane %v24838_v57, %v21623_v24 }
0x25d0   :  { %v13167_v16 = vadd.f32 %v13166_v23, %v24856_v29  ;;  %v13240_v8 = vadd.f32 %v13239_v41, %v24862_v9  ;;  %v13168_v4 = vpop.f32.mrb[185].mxu1  ;;  %v13241_v46 = vpop.f32.mrb[169].mxu0  ;;  %18262 = vmatprep.subr.bf16.mxu1 %v20019_v56  ;;  %18302 = vmatprep.subr.bf16.mxu0 %v20020_v38  ;;  %v20032_v54 = vld [vmem:[%s25149_s20 + $0xbe8] sm:$0xff]   ;;  %v25006_v23 = vrot.slane %v24838_v57, %v21626_v27 }
0x25d1   :  { %v13169_v42 = vadd.f32 %v13168_v4, %v24868_v14  ;;  %v13242_v59 = vadd.f32 %v13241_v46, %v24880_v39  ;;  %v13170_v1 = vpop.f32.mrb[186].mxu1  ;;  %v13243_v35 = vpop.f32.mrb[170].mxu0  ;;  %14904 = vmatprep.mubr.bf16.mxu1 %v13557_v17  ;;  %14963 = vmatprep.mubr.bf16.mxu0 %v13559_v7  ;;  %v25012_v24 = vrot.slane %v24838_v57, %v21635_v49  ;;  %v20033_v27 = vld [vmem:[%s25149_s20 + $0xb28] sm:$0xff]  }
0x25d2   :  { %v13171_v28 = vadd.f32 %v13170_v1, %v24856_v29  ;;  %v13244_v51 = vadd.f32 %v13243_v35, %v24862_v9  ;;  %v13172_v50 = vpop.f32.mrb[187].mxu1  ;;  %v13245_v11 = vpop.f32.mrb[171].mxu0  ;;  %14905 = vmatmul.mubr.bf16.gmra.mrb[248].mxu1 %v13556_v22  ;;  %14964 = vmatmul.mubr.bf16.gmra.mrb[228].mxu0 %v13558_v36  ;;  %v13476_v15 = vmax.f32 %v13167_v16, 0.0  ;;  %v13478_v44 = vmax.f32 %v13240_v8, 0.0 }
0x25d3   :  { %v13173_v52 = vadd.f32 %v13172_v50, %v24868_v14  ;;  %v13246_v21 = vadd.f32 %v13245_v11, %v24880_v39  ;;  %18263 = vmatpush3.bf16.msra.mxu1 %v20021_v10  ;;  %18303 = vmatpush3.bf16.msra.mxu0 %v20022_v55  ;;  %v13477_v18 = vmax.f32 %v13169_v42, 0.0  ;;  %v13479_v47 = vmax.f32 %v13242_v59, 0.0 }
0x25d4   :  { %v13492_v20 = vmax.f32 %v13171_v28, 0.0  ;;  %v13494_v60 = vmax.f32 %v13244_v51, 0.0  ;;  %18264 = vmatprep.subr.bf16.mxu1 %v20023_v0  ;;  %18304 = vmatprep.subr.bf16.mxu0 %v20024_v48  ;;  %v20036_v48 = vld [vmem:[%s25149_s20 + $0xbf0] sm:$0xff]  }
0x25d5   :  { %v13493_v26 = vmax.f32 %v13173_v52, 0.0  ;;  %v13495_v43 = vmax.f32 %v13246_v21, 0.0  ;;  %v20037_v52 = vld [vmem:[%s25149_s20 + $0xb30] sm:$0xff]  }
0x25d6   :  { %v13572_v34 = vpack.c.bf16 %v13492_v20, %v13476_v15  ;;  %v13574_v5 = vpack.c.bf16 %v13494_v60, %v13478_v44  ;;  %v20038_v21 = vld [vmem:[%s25149_s20 + $0xbb0] sm:$0xff]   ;;  %v20039_v20 = vld [vmem:[%s25149_s20 + $0xb78] sm:$0xff]  }
0x25d7   :  { %v13573_v25 = vpack.c.bf16 %v13493_v26, %v13477_v18  ;;  %v13575_v30 = vpack.c.bf16 %v13495_v43, %v13479_v47  ;;  %v13176_v32 = vpop.f32.mrb[188].mxu1  ;;  %v13249_v62 = vpop.f32.mrb[172].mxu0  ;;  %18265 = vmatpush3.bf16.msra.mxu1 %v20025_v19  ;;  %18305 = vmatpush3.bf16.msra.mxu0 %v20026_v58  ;;  %v20040_v60 = vld [vmem:[%s25149_s20 + $0xbf8] sm:$0xff]  }
0x25d8   :  { %v13177_v63 = vadd.f32 %v13176_v32, %v24856_v29  ;;  %v13250_v56 = vadd.f32 %v13249_v62, %v24862_v9  ;;  %v13178_v38 = vpop.f32.mrb[189].mxu1  ;;  %v13251_v2 = vpop.f32.mrb[173].mxu0  ;;  %18266 = vmatprep.subr.bf16.mxu1 %v20027_v61  ;;  %18306 = vmatprep.subr.bf16.mxu0 %v20028_v31  ;;  %v20041_v32 = vld [vmem:[%s25149_s20 + $0xb38] sm:$0xff]  }
0x25d9   :  { %v13179_v22 = vadd.f32 %v13178_v38, %v24868_v14  ;;  %v13252_v36 = vadd.f32 %v13251_v2, %v24880_v39  ;;  %v13180_v17 = vpop.f32.mrb[190].mxu1  ;;  %v13253_v7 = vpop.f32.mrb[174].mxu0  ;;  %14910 = vmatprep.mubr.bf16.mxu1 %v13573_v25  ;;  %14969 = vmatprep.mubr.bf16.mxu0 %v13575_v30  ;;  %v20042_v62 = vld [vmem:[%s25149_s20 + $0xbb8] sm:$0xff]  }
0x25da   :  { %v13181_v41 = vadd.f32 %v13180_v17, %v24856_v29  ;;  %v13254_v10 = vadd.f32 %v13253_v7, %v24862_v9  ;;  %v13182_v55 = vpop.f32.mrb[191].mxu1  ;;  %v13255_v16 = vpop.f32.mrb[175].mxu0  ;;  %14911 = vmatmul.mubr.bf16.gmra.mrb[252].mxu1 %v13572_v34  ;;  %14970 = vmatmul.mubr.bf16.gmra.mrb[232].mxu0 %v13574_v5  ;;  %v20034_v29 = vld [vmem:[%s25149_s20 + $0xba8] sm:$0xff]   ;;  %v25024_v9 = vrot.slane %v24838_v57, %v21644_v37  ;;  %v13508_v49 = vmax.f32 %v13177_v63, 0.0 }
0x25db   :  { %v13183_v8 = vadd.f32 %v13182_v55, %v24868_v14  ;;  %v13256_v4 = vadd.f32 %v13255_v16, %v24880_v39  ;;  %18267 = vmatpush3.bf16.msra.mxu1 %v20029_v40  ;;  %18307 = vmatpush3.bf16.msra.mxu0 %v20030_v53  ;;  %v13510_v46 = vmax.f32 %v13250_v56, 0.0  ;;  %v20035_v39 = vld [vmem:[%s25149_s20 + $0xb70] sm:$0xff]   ;;  %v13509_v42 = vmax.f32 %v13179_v22, 0.0 }
0x25dc   :  { %v13524_v0 = vmax.f32 %v13181_v41, 0.0  ;;  %v13526_v14 = vmax.f32 %v13254_v10, 0.0  ;;  %18268 = vmatprep.subr.bf16.mxu1 %v20031_v12  ;;  %18308 = vmatprep.subr.bf16.mxu0 %v20032_v54  ;;  %v13511_v59 = vmax.f32 %v13252_v36, 0.0 }
0x25dd   :  { %v13525_v1 = vmax.f32 %v13183_v8, 0.0  ;;  %v13527_v35 = vmax.f32 %v13256_v4, 0.0 }
0x25de   :  { %v13588_v37 = vpack.c.bf16 %v13524_v0, %v13508_v49  ;;  %v13590_v57 = vpack.c.bf16 %v13526_v14, %v13510_v46 }
0x25df   :  { %v13589_v28 = vpack.c.bf16 %v13525_v1, %v13509_v42  ;;  %v13591_v51 = vpack.c.bf16 %v13527_v35, %v13511_v59  ;;  %v13292_v50 = vpop.f32.mrb[192].mxu1  ;;  %v13365_v11 = vpop.f32.mrb[176].mxu0  ;;  %18269 = vmatpush3.bf16.msra.mxu1 %v20033_v27  ;;  %18309 = vmatpush3.bf16.msra.mxu0 %v20034_v29 }
0x25e0   :  { %v13293_v19 = vadd.f32 %v13292_v50, %v25000_v45  ;;  %v13366_v58 = vadd.f32 %v13365_v11, %v25006_v23  ;;  %v13294_v15 = vpop.f32.mrb[193].mxu1  ;;  %v13367_v44 = vpop.f32.mrb[177].mxu0  ;;  %18270 = vmatprep.subr.bf16.mxu1 %v20035_v39  ;;  %18310 = vmatprep.subr.bf16.mxu0 %v20036_v48 }
0x25e1   :  { %v13295_v61 = vadd.f32 %v13294_v15, %v25012_v24  ;;  %v13368_v31 = vadd.f32 %v13367_v44, %v25024_v9  ;;  %v13296_v18 = vpop.f32.mrb[194].mxu1  ;;  %v13369_v47 = vpop.f32.mrb[178].mxu0  ;;  %14917 = vmatprep.mubr.bf16.mxu1 %v13589_v28  ;;  %14976 = vmatprep.mubr.bf16.mxu0 %v13591_v51 }
0x25e2   :  { %v13297_v26 = vadd.f32 %v13296_v18, %v25000_v45  ;;  %v13370_v43 = vadd.f32 %v13369_v47, %v25006_v23  ;;  %v13298_v34 = vpop.f32.mrb[195].mxu1  ;;  %v13371_v5 = vpop.f32.mrb[179].mxu0  ;;  %14918 = vmatmul.mubr.bf16.gmra.mrb[0].mxu1 %v13588_v37  ;;  %14977 = vmatmul.mubr.bf16.gmra.mrb[236].mxu0 %v13590_v57  ;;  %v13416_v40 = vmax.f32 %v13293_v19, 0.0  ;;  %v13418_v53 = vmax.f32 %v13366_v58, 0.0 }
0x25e3   :  { %v13299_v25 = vadd.f32 %v13298_v34, %v25012_v24  ;;  %v13372_v30 = vadd.f32 %v13371_v5, %v25024_v9  ;;  %18271 = vmatpush3.bf16.msra.mxu1 %v20037_v52  ;;  %18311 = vmatpush3.bf16.msra.mxu0 %v20038_v21  ;;  %v13417_v38 = vmax.f32 %v13295_v61, 0.0  ;;  %v13419_v2 = vmax.f32 %v13368_v31, 0.0 }
0x25e4   :  { %v13432_v63 = vmax.f32 %v13297_v26, 0.0  ;;  %v13434_v56 = vmax.f32 %v13370_v43, 0.0  ;;  %18272 = vmatprep.subr.bf16.mxu1 %v20039_v20  ;;  %18312 = vmatprep.subr.bf16.mxu0 %v20040_v60 }
0x25e5   :  { %v13433_v12 = vmax.f32 %v13299_v25, 0.0  ;;  %v13435_v54 = vmax.f32 %v13372_v30, 0.0 }
0x25e6   :  { %v13544_v22 = vpack.c.bf16 %v13432_v63, %v13416_v40  ;;  %v13546_v36 = vpack.c.bf16 %v13434_v56, %v13418_v53 }
0x25e7   :  { %v13545_v17 = vpack.c.bf16 %v13433_v12, %v13417_v38  ;;  %v13547_v7 = vpack.c.bf16 %v13435_v54, %v13419_v2  ;;  %v13302_v41 = vpop.f32.mrb[196].mxu1  ;;  %v13375_v10 = vpop.f32.mrb[180].mxu0  ;;  %18273 = vmatpush3.bf16.msra.mxu1 %v20041_v32  ;;  %18313 = vmatpush3.bf16.msra.mxu0 %v20042_v62 }
0x25e8   :  { %v13303_v55 = vadd.f32 %v13302_v41, %v25000_v45  ;;  %v13376_v16 = vadd.f32 %v13375_v10, %v25006_v23  ;;  %v13304_v8 = vpop.f32.mrb[197].mxu1  ;;  %v13377_v4 = vpop.f32.mrb[181].mxu0  ;;  %19619 = vmatprep.subr.bf16.mxu1 %v20351_v3 }
0x25e9   :  { %v13305_v27 = vadd.f32 %v13304_v8, %v25012_v24  ;;  %v13378_v29 = vadd.f32 %v13377_v4, %v25024_v9  ;;  %v13306_v49 = vpop.f32.mrb[198].mxu1  ;;  %v13379_v46 = vpop.f32.mrb[182].mxu0  ;;  %15015 = vmatprep.mubr.bf16.mxu1 %v13545_v17  ;;  %15074 = vmatprep.mubr.bf16.mxu0 %v13547_v7 }
0x25ea   :  { %v13307_v0 = vadd.f32 %v13306_v49, %v25000_v45  ;;  %v13380_v14 = vadd.f32 %v13379_v46, %v25006_v23  ;;  %v13308_v39 = vpop.f32.mrb[199].mxu1  ;;  %v13381_v48 = vpop.f32.mrb[183].mxu0  ;;  %15016 = vmatmul.mubr.bf16.vlgmr.msra.gmra.mrb[4].mxu1 %v13544_v22  ;;  %15075 = vmatmul.mubr.bf16.vlgmr.msra.gmra.mrb[240].mxu0 %v13546_v36  ;;  %v13448_v1 = vmax.f32 %v13303_v55, 0.0  ;;  %v13450_v35 = vmax.f32 %v13376_v16, 0.0 }
0x25eb   :  { %v13309_v42 = vadd.f32 %v13308_v39, %v25012_v24  ;;  %v13382_v59 = vadd.f32 %v13381_v48, %v25024_v9  ;;  %v13449_v28 = vmax.f32 %v13305_v27, 0.0  ;;  %v13451_v51 = vmax.f32 %v13378_v29, 0.0 }
0x25ec   :  { %v13464_v37 = vmax.f32 %v13307_v0, 0.0  ;;  %v13466_v57 = vmax.f32 %v13380_v14, 0.0 }
0x25ed   :  { %v13465_v50 = vmax.f32 %v13309_v42, 0.0  ;;  %v13467_v11 = vmax.f32 %v13382_v59, 0.0 }
0x25ee   :  { %v13560_v52 = vpack.c.bf16 %v13464_v37, %v13448_v1  ;;  %v13562_v21 = vpack.c.bf16 %v13466_v57, %v13450_v35 }
0x25ef   :  { %v13561_v19 = vpack.c.bf16 %v13465_v50, %v13449_v28  ;;  %v13563_v58 = vpack.c.bf16 %v13467_v11, %v13451_v51  ;;  %v13312_v15 = vpop.f32.mrb[200].mxu1  ;;  %v13385_v44 = vpop.f32.mrb[184].mxu0 }
0x25f0   :  { %v13313_v20 = vadd.f32 %v13312_v15, %v25000_v45  ;;  %v13386_v60 = vadd.f32 %v13385_v44, %v25006_v23  ;;  %v13314_v61 = vpop.f32.mrb[201].mxu1  ;;  %v13387_v31 = vpop.f32.mrb[185].mxu0 }
0x25f1   :  { %v13315_v18 = vadd.f32 %v13314_v61, %v25012_v24  ;;  %v13388_v47 = vadd.f32 %v13387_v31, %v25024_v9  ;;  %v13316_v26 = vpop.f32.mrb[202].mxu1  ;;  %v13389_v43 = vpop.f32.mrb[186].mxu0  ;;  %15022 = vmatprep.mubr.bf16.mxu1 %v13561_v19  ;;  %15081 = vmatprep.mubr.bf16.mxu0 %v13563_v58  ;;  %v16756_v19 = vld [vmem:[%s25150_s21 + $0x2] ss:$0 sm:$0xff] }
0x25f2   :  { %v13317_v34 = vadd.f32 %v13316_v26, %v25000_v45  ;;  %v13390_v5 = vadd.f32 %v13389_v43, %v25006_v23  ;;  %v13318_v25 = vpop.f32.mrb[203].mxu1  ;;  %v13391_v30 = vpop.f32.mrb[187].mxu0  ;;  %15023 = vmatmul.mubr.bf16.gmra.mrb[8].mxu1 %v13560_v52  ;;  %15082 = vmatmul.mubr.bf16.gmra.mrb[244].mxu0 %v13562_v21  ;;  %v13480_v40 = vmax.f32 %v13313_v20, 0.0  ;;  %v13482_v53 = vmax.f32 %v13386_v60, 0.0 }
0x25f3   :  { %v13319_v32 = vadd.f32 %v13318_v25, %v25012_v24  ;;  %v13392_v62 = vadd.f32 %v13391_v30, %v25024_v9  ;;  %v13481_v38 = vmax.f32 %v13315_v18, 0.0  ;;  %v13483_v2 = vmax.f32 %v13388_v47, 0.0 }
0x25f4   :  { %v13496_v63 = vmax.f32 %v13317_v34, 0.0  ;;  %v13498_v56 = vmax.f32 %v13390_v5, 0.0 }
0x25f5   :  { %v13497_v12 = vmax.f32 %v13319_v32, 0.0  ;;  %v13499_v54 = vmax.f32 %v13392_v62, 0.0 }
0x25f6   :  { %v13576_v22 = vpack.c.bf16 %v13496_v63, %v13480_v40  ;;  %v13578_v36 = vpack.c.bf16 %v13498_v56, %v13482_v53 }
0x25f7   :  { %v13577_v17 = vpack.c.bf16 %v13497_v12, %v13481_v38  ;;  %v13579_v7 = vpack.c.bf16 %v13499_v54, %v13483_v2  ;;  %v13322_v41 = vpop.f32.mrb[204].mxu1  ;;  %v13395_v10 = vpop.f32.mrb[188].mxu0 }
0x25f8   :  { %v13323_v55 = vadd.f32 %v13322_v41, %v25000_v45  ;;  %v13396_v16 = vadd.f32 %v13395_v10, %v25006_v23  ;;  %v13324_v8 = vpop.f32.mrb[205].mxu1  ;;  %v13397_v4 = vpop.f32.mrb[189].mxu0 }
0x25f9   :  { %v13325_v27 = vadd.f32 %v13324_v8, %v25012_v24  ;;  %v13398_v29 = vadd.f32 %v13397_v4, %v25024_v9  ;;  %v13326_v49 = vpop.f32.mrb[206].mxu1  ;;  %v13399_v46 = vpop.f32.mrb[190].mxu0  ;;  %15028 = vmatprep.mubr.bf16.mxu1 %v13577_v17  ;;  %15087 = vmatprep.mubr.bf16.mxu0 %v13579_v7 }
0x25fa   :  { %v13327_v0 = vadd.f32 %v13326_v49, %v25000_v45  ;;  %v13400_v14 = vadd.f32 %v13399_v46, %v25006_v23  ;;  %v13328_v39 = vpop.f32.mrb[207].mxu1  ;;  %v13401_v48 = vpop.f32.mrb[191].mxu0  ;;  %15029 = vmatmul.mubr.bf16.gmra.mrb[12].mxu1 %v13576_v22  ;;  %15088 = vmatmul.mubr.bf16.gmra.mrb[248].mxu0 %v13578_v36  ;;  %v13512_v1 = vmax.f32 %v13323_v55, 0.0  ;;  %v13514_v35 = vmax.f32 %v13396_v16, 0.0 }
0x25fb   :  { %v13329_v42 = vadd.f32 %v13328_v39, %v25012_v24  ;;  %v13402_v59 = vadd.f32 %v13401_v48, %v25024_v9  ;;  %v13513_v28 = vmax.f32 %v13325_v27, 0.0  ;;  %v13515_v51 = vmax.f32 %v13398_v29, 0.0 }
0x25fc   :  { %v13528_v37 = vmax.f32 %v13327_v0, 0.0  ;;  %v13530_v57 = vmax.f32 %v13400_v14, 0.0 }
0x25fd   :  { %v13529_v50 = vmax.f32 %v13329_v42, 0.0  ;;  %v13531_v11 = vmax.f32 %v13402_v59, 0.0 }
0x25fe   :  { %v13592_v52 = vpack.c.bf16 %v13528_v37, %v13512_v1  ;;  %v13594_v45 = vpack.c.bf16 %v13530_v57, %v13514_v35 }
0x25ff   :  { %v13593_v21 = vpack.c.bf16 %v13529_v50, %v13513_v28  ;;  %v13595_v23 = vpack.c.bf16 %v13531_v11, %v13515_v51 }
0x2601   :  { %15035 = vmatprep.mubr.bf16.mxu1 %v13593_v21  ;;  %15094 = vmatprep.mubr.bf16.mxu0 %v13595_v23 }
0x2602   :  { %15036 = vmatmul.mubr.bf16.gmra.mrb[16].mxu1 %v13592_v52  ;;  %15095 = vmatmul.mubr.bf16.gmra.mrb[252].mxu0 %v13594_v45 }
0x2603   :  { %19184 = vmatprep.mubr.msk.f32.mxu1 %vm20352_vm0, %v20353_v6 }
0x265d   :  { %v18034_v24 = vpop.f32.mrb[208].mxu1  ;;  %v18074_v9 = vpop.f32.mrb[192].mxu0 }
0x265e   :  { %v18035_v58 = vpop.f32.mrb[209].mxu1  ;;  %v18075_v15 = vpop.f32.mrb[193].mxu0 }
0x265f   :  { %v18036_v44 = vadd.f32 %v18035_v58, %v18034_v24  ;;  %v18076_v20 = vadd.f32 %v18075_v15, %v18074_v9  ;;  %v18037_v60 = vpop.f32.mrb[210].mxu1  ;;  %v18077_v61 = vpop.f32.mrb[194].mxu0 }
0x2660   :  { %v18038_v31 = vpop.f32.mrb[211].mxu1  ;;  %v18078_v18 = vpop.f32.mrb[195].mxu0 }
0x2661   :  { %v14664_v47 = vadd.f32 %v18036_v44, %v16756_v19 }
0x2663   :  { %v14723_v26 = vadd.f32 %v18076_v20, %v14664_v47 }
0x2665   :  { %v18040_v43 = vpop.f32.mrb[212].mxu1  ;;  %v18080_v34 = vpop.f32.mrb[196].mxu0 }
0x2666   :  { %v18041_v5 = vpop.f32.mrb[213].mxu1  ;;  %v18081_v6 = vpop.f32.mrb[197].mxu0 }
0x2667   :  { %v18043_v25 = vpop.f32.mrb[214].mxu1  ;;  %v18083_v30 = vpop.f32.mrb[198].mxu0 }
0x2668   :  { %v18044_v32 = vpop.f32.mrb[215].mxu1  ;;  %v18084_v62 = vpop.f32.mrb[199].mxu0 }
0x266d   :  { %v18046_v40 = vpop.f32.mrb[216].mxu1  ;;  %v18086_v53 = vpop.f32.mrb[200].mxu0 }
0x266e   :  { %v18047_v63 = vpop.f32.mrb[217].mxu1  ;;  %v18087_v56 = vpop.f32.mrb[201].mxu0 }
0x266f   :  { %v18048_v38 = vadd.f32 %v18047_v63, %v18046_v40  ;;  %v18088_v2 = vadd.f32 %v18087_v56, %v18086_v53  ;;  %v18049_v12 = vpop.f32.mrb[218].mxu1  ;;  %v18089_v54 = vpop.f32.mrb[202].mxu0 }
0x2670   :  { %v18050_v22 = vpop.f32.mrb[219].mxu1  ;;  %v18090_v36 = vpop.f32.mrb[203].mxu0 }
0x2671   :  { %v14677_v17 = vadd.f32 %v18048_v38, %v16756_v19 }
0x2673   :  { %v14736_v7 = vadd.f32 %v18088_v2, %v14677_v17 }
0x2675   :  { %v18052_v41 = vpop.f32.mrb[224].mxu1  ;;  %v18092_v10 = vpop.f32.mrb[204].mxu0 }
0x2676   :  { %v18053_v55 = vpop.f32.mrb[225].mxu1  ;;  %v18093_v16 = vpop.f32.mrb[205].mxu0 }
0x2677   :  { %v18055_v8 = vpop.f32.mrb[226].mxu1  ;;  %v18095_v4 = vpop.f32.mrb[206].mxu0 }
0x2678   :  { %v18056_v27 = vpop.f32.mrb[227].mxu1  ;;  %v18096_v29 = vpop.f32.mrb[207].mxu0 }
0x267d   :  { %v18114_v49 = vpop.f32.mrb[228].mxu1  ;;  %v18154_v46 = vpop.f32.mrb[208].mxu0 }
0x267e   :  { %v18115_v0 = vpop.f32.mrb[229].mxu1  ;;  %v18155_v14 = vpop.f32.mrb[209].mxu0 }
0x267f   :  { %v18116_v39 = vadd.f32 %v18115_v0, %v18114_v49  ;;  %v18156_v48 = vadd.f32 %v18155_v14, %v18154_v46  ;;  %v18117_v42 = vpop.f32.mrb[230].mxu1  ;;  %v18157_v59 = vpop.f32.mrb[210].mxu0 }
0x2680   :  { %v18118_v1 = vpop.f32.mrb[231].mxu1  ;;  %v18158_v35 = vpop.f32.mrb[211].mxu0 }
0x2681   :  { %v14782_v37 = vadd.f32 %v18116_v39, %v14723_v26 }
0x2683   :  { %v14841_v57 = vadd.f32 %v18156_v48, %v14782_v37 }
0x2685   :  { %v18120_v28 = vpop.f32.mrb[232].mxu1  ;;  %v18160_v51 = vpop.f32.mrb[212].mxu0 }
0x2686   :  { %v18121_v50 = vpop.f32.mrb[233].mxu1  ;;  %v18161_v11 = vpop.f32.mrb[213].mxu0 }
0x2687   :  { %v18123_v52 = vpop.f32.mrb[234].mxu1  ;;  %v18163_v45 = vpop.f32.mrb[214].mxu0 }
0x2688   :  { %v18124_v21 = vpop.f32.mrb[235].mxu1  ;;  %v18164_v23 = vpop.f32.mrb[215].mxu0 }
0x268d   :  { %v18126_v24 = vpop.f32.mrb[236].mxu1  ;;  %v18166_v9 = vpop.f32.mrb[216].mxu0 }
0x268e   :  { %v18127_v19 = vpop.f32.mrb[237].mxu1  ;;  %v18167_v58 = vpop.f32.mrb[217].mxu0 }
0x268f   :  { %v18128_v15 = vadd.f32 %v18127_v19, %v18126_v24  ;;  %v18168_v44 = vadd.f32 %v18167_v58, %v18166_v9  ;;  %v18129_v20 = vpop.f32.mrb[238].mxu1  ;;  %v18169_v60 = vpop.f32.mrb[218].mxu0 }
0x2690   :  { %v18130_v61 = vpop.f32.mrb[239].mxu1  ;;  %v18170_v31 = vpop.f32.mrb[219].mxu0 }
0x2691   :  { %v14795_v18 = vadd.f32 %v18128_v15, %v14736_v7 }
0x2693   :  { %v14854_v47 = vadd.f32 %v18168_v44, %v14795_v18 }
0x2695   :  { %v18132_v26 = vpop.f32.mrb[240].mxu1  ;;  %v18172_v43 = vpop.f32.mrb[220].mxu0 }
0x2696   :  { %v18133_v34 = vpop.f32.mrb[241].mxu1  ;;  %v18173_v5 = vpop.f32.mrb[221].mxu0 }
0x2697   :  { %v18135_v6 = vpop.f32.mrb[242].mxu1  ;;  %v18175_v25 = vpop.f32.mrb[222].mxu0 }
0x2698   :  { %v18136_v30 = vpop.f32.mrb[243].mxu1  ;;  %v18176_v32 = vpop.f32.mrb[223].mxu0 }
0x269d   :  { %v18194_v62 = vpop.f32.mrb[244].mxu1  ;;  %v18234_v40 = vpop.f32.mrb[224].mxu0 }
0x269e   :  { %v18195_v53 = vpop.f32.mrb[245].mxu1  ;;  %v18235_v63 = vpop.f32.mrb[225].mxu0 }
0x269f   :  { %v18196_v56 = vadd.f32 %v18195_v53, %v18194_v62  ;;  %v18236_v38 = vadd.f32 %v18235_v63, %v18234_v40  ;;  %v18197_v2 = vpop.f32.mrb[246].mxu1  ;;  %v18237_v12 = vpop.f32.mrb[226].mxu0 }
0x26a0   :  { %v18198_v54 = vpop.f32.mrb[247].mxu1  ;;  %v18238_v22 = vpop.f32.mrb[227].mxu0 }
0x26a1   :  { %v14900_v36 = vadd.f32 %v18196_v56, %v14841_v57 }
0x26a3   :  { %v14959_v17 = vadd.f32 %v18236_v38, %v14900_v36 }
0x26a5   :  { %v18200_v7 = vpop.f32.mrb[248].mxu1  ;;  %v18240_v41 = vpop.f32.mrb[228].mxu0 }
0x26a6   :  { %v18201_v10 = vpop.f32.mrb[249].mxu1  ;;  %v18241_v55 = vpop.f32.mrb[229].mxu0 }
0x26a7   :  { %v18203_v16 = vpop.f32.mrb[250].mxu1  ;;  %v18243_v8 = vpop.f32.mrb[230].mxu0 }
0x26a8   :  { %v18204_v4 = vpop.f32.mrb[251].mxu1  ;;  %v18244_v27 = vpop.f32.mrb[231].mxu0 }
0x26ad   :  { %v18206_v29 = vpop.f32.mrb[252].mxu1  ;;  %v18246_v49 = vpop.f32.mrb[232].mxu0 }
0x26ae   :  { %v18207_v46 = vpop.f32.mrb[253].mxu1  ;;  %v18247_v0 = vpop.f32.mrb[233].mxu0 }
0x26af   :  { %v18208_v14 = vadd.f32 %v18207_v46, %v18206_v29  ;;  %v18248_v39 = vadd.f32 %v18247_v0, %v18246_v49  ;;  %v18209_v48 = vpop.f32.mrb[254].mxu1  ;;  %v18249_v42 = vpop.f32.mrb[234].mxu0 }
0x26b0   :  { %v18210_v59 = vpop.f32.mrb[255].mxu1  ;;  %v18250_v1 = vpop.f32.mrb[235].mxu0 }
0x26b1   :  { %v14913_v35 = vadd.f32 %v18208_v14, %v14854_v47 }
0x26b3   :  { %v14972_v37 = vadd.f32 %v18248_v39, %v14913_v35 }
0x26b5   :  { %v18212_v57 = vpop.f32.mrb[0].mxu1  ;;  %v18252_v28 = vpop.f32.mrb[236].mxu0 }
0x26b6   :  { %v18213_v51 = vpop.f32.mrb[1].mxu1  ;;  %v18253_v50 = vpop.f32.mrb[237].mxu0  ;;  %v15150_v57 = vld [vmem:[%s25153_s24 + $0x8] sm:$0xff] }
0x26b7   :  { %v18215_v11 = vpop.f32.mrb[2].mxu1  ;;  %v18255_v52 = vpop.f32.mrb[238].mxu0  ;;  %v15151_v51 = vld [vmem:[%s25153_s24 + $0x10] sm:$0xff]  ;;  %v15152_v50 = vld [vmem:[%s25153_s24 + $0x18] sm:$0xff] }
0x26b8   :  { %v18216_v45 = vpop.f32.mrb[3].mxu1  ;;  %v18256_v21 = vpop.f32.mrb[239].mxu0  ;;  %v19623_v11 = vpack.c.bf16 %v15152_v50, %v15151_v51 }
0x26bd   :  { %v18274_v23 = vpop.f32.mrb[4].mxu1  ;;  %v18314_v24 = vpop.f32.mrb[240].mxu0 }
0x26be   :  { %v18275_v9 = vpop.f32.mrb[5].mxu1  ;;  %v18315_v19 = vpop.f32.mrb[241].mxu0 }
0x26bf   :  { %v18276_v58 = vadd.f32 %v18275_v9, %v18274_v23  ;;  %v18316_v15 = vadd.f32 %v18315_v19, %v18314_v24  ;;  %v18277_v44 = vpop.f32.mrb[6].mxu1  ;;  %v18317_v20 = vpop.f32.mrb[242].mxu0 }
0x26c0   :  { %v18278_v60 = vpop.f32.mrb[7].mxu1  ;;  %v18318_v61 = vpop.f32.mrb[243].mxu0 }
0x26c1   :  { %v15018_v31 = vadd.f32 %v18276_v58, %v14959_v17  ;;  %v16888_v61 = vld [vmem:[%s25152_s23 + $0x2] ss:$0 sm:$0xff] }
0x26c3   :  { %v15077_v18 = vadd.f32 %v18316_v15, %v15018_v31  ;;  %v16887_v15 = vld [vmem:[%s25151_s22 + $0x2] ss:$0 sm:$0xff]  ;;  %s20360_s22 = smov [#allocation2]  }
0x26c4   :  { %s15250_s23 = sshll.u32 %s20360_s22, 4  ;;  %s15251_s23 = int_to_ptr.vmem [resolvable:$true] %s15250_s23 }
0x26c5   :  { %v18280_v47 = vpop.f32.mrb[8].mxu1  ;;  %v18320_v26 = vpop.f32.mrb[244].mxu0  ;;  %v15101_v43 = vadd.f32 %v15077_v18, %v24292_v33  ;;  %s20327_s5 = scalar_lea.vmem %s15251_s23, 32  ;;  %p20332_p1 = scmp.lt.s32.totalorder %s15251_s23, %s15251_s23 }
0x26c6   :  { %v18281_v34 = vpop.f32.mrb[9].mxu1  ;;  %v18321_v5 = vpop.f32.mrb[245].mxu0  ;;  %p20328_p0 = scmp.ne.s32.totalorder %s15251_s23, %s20327_s5  ;;  %p20333_p2 = scmp.lt.s32.totalorder %s20327_s5, %s20327_s5 }
0x26c7   :  { %v18283_v6 = vpop.f32.mrb[10].mxu1  ;;  %v18323_v25 = vpop.f32.mrb[246].mxu0  ;;  %v15107_v30 = vsel %vm187_vm2, %v15101_v43, 0.0 }
0x26c8   :  { %v18284_v32 = vpop.f32.mrb[11].mxu1  ;;  %v18324_v62 = vpop.f32.mrb[247].mxu0  ;;  %15108 = vadd.xlane.f32.xlu1 %v15107_v30  ;;  %p20334_p3 = por %p20333_p2, %p20332_p1 }
0x26ca   :  { %p20335_p4 = pnand %p20334_p3, %p20328_p0 }
0x26cd   :  { %v18286_v40 = vpop.f32.mrb[12].mxu1  ;;  %v18326_v53 = vpop.f32.mrb[248].mxu0 }
0x26ce   :  { %v18287_v63 = vpop.f32.mrb[13].mxu1  ;;  %v18327_v56 = vpop.f32.mrb[249].mxu0 }
0x26cf   :  { %v18288_v38 = vadd.f32 %v18287_v63, %v18286_v40  ;;  %v18328_v2 = vadd.f32 %v18327_v56, %v18326_v53  ;;  %v18289_v12 = vpop.f32.mrb[14].mxu1  ;;  %v18329_v54 = vpop.f32.mrb[250].mxu0 }
0x26d0   :  { %v18290_v22 = vpop.f32.mrb[15].mxu1  ;;  %v18330_v36 = vpop.f32.mrb[251].mxu0 }
0x26d1   :  { %v15031_v33 = vadd.f32 %v18288_v38, %v14972_v37  ;;  %v15149_v37 = vld [vmem:[%s25153_s24] sm:$0xff] }
0x26d2   :  { %v19620_v28 = vpack.c.bf16 %v15150_v57, %v15149_v37 }
0x26d3   :  { %v15090_v17 = vadd.f32 %v18328_v2, %v15031_v33 }
0x26d4   :  { %19621 = vmatpush3.bf16.msra.mxu1 %v19620_v28 }
0x26d5   :  { %v18292_v7 = vpop.f32.mrb[16].mxu1  ;;  %v18332_v41 = vpop.f32.mrb[252].mxu0  ;;  %v15102_v10 = vadd.f32 %v15090_v17, %v24361_v13  ;;  %19622 = vmatprep.subr.bf16.mxu1 %v20351_v3 }
0x26d6   :  { %v18293_v55 = vpop.f32.mrb[17].mxu1  ;;  %v18333_v16 = vpop.f32.mrb[253].mxu0 }
0x26d7   :  { %v18295_v8 = vpop.f32.mrb[18].mxu1  ;;  %v18335_v4 = vpop.f32.mrb[254].mxu0  ;;  %v15110_v27 = vsel %vm187_vm2, %v15102_v10, 0.0 }
0x26d8   :  { %v18296_v29 = vpop.f32.mrb[19].mxu1  ;;  %v18336_v49 = vpop.f32.mrb[255].mxu0  ;;  %15111 = vadd.xlane.f32.xlu0 %v15110_v27  ;;  %19624 = vmatpush3.bf16.msra.mxu1 %v19623_v11 }
0x2755   :  { %v15109_v46 = vpop.xlane.xlu1 %15108 }
0x2756   :  { %v15113_v0 = vmul.f32 0.03125, %v15109_v46 }
0x2758   :  { %v15115_v14 = vsub.f32 %v15101_v43, %v15113_v0  ;;  %v16889_v43 = vld [vmem:[%s25154_s25] ss:$0 sm:$0xff] }
0x275a   :  { %v15117_v39 = vmul.f32 %v15115_v14, %v15115_v14 }
0x275c   :  { %v15119_v48 = vsel %vm187_vm2, %v15117_v39, 0.0 }
0x275d   :  { %15120 = vadd.xlane.f32.xlu1 %v15119_v48 }
0x2765   :  { %v15112_v42 = vpop.xlane.xlu0 %15111 }
0x2766   :  { %v15114_v59 = vmul.f32 0.03125, %v15112_v42 }
0x2768   :  { %v15116_v1 = vsub.f32 %v15102_v10, %v15114_v59 }
0x276a   :  { %v15118_v13 = vmul.f32 %v15116_v1, %v15116_v1 }
0x276c   :  { %v15122_v35 = vsel %vm187_vm2, %v15118_v13, 0.0 }
0x276d   :  { %15123 = vadd.xlane.f32.xlu0 %v15122_v35 }
0x27ea   :  { %v15121_v52 = vpop.xlane.xlu1 %15120 }
0x27eb   :  { %v15125_v45 = vmul.f32 0.03125, %v15121_v52 }
0x27ed   :  { %v15127_v21 = vadd.f32 1e-05, %v15125_v45 }
0x27ef   :  { %20319 = vrsqrt.f32 %v15127_v21 }
0x27f9   :  { %v20320_v19 = vpop.eup %20319 }
0x27fa   :  { %v15124_v23 = vpop.xlane.xlu0 %15123  ;;  %v15131_v3 = vmul.f32 %v20320_v19, %v15115_v14 }
0x27fb   :  { %v15126_v24 = vmul.f32 0.03125, %v15124_v23 }
0x27fc   :  { %v15139_v20 = vmul.f32 %v16887_v15, %v15131_v3 }
0x27fd   :  { %v15128_v9 = vadd.f32 1e-05, %v15126_v24 }
0x27fe   :  { %v15147_v18 = vadd.f32 %v16888_v61, %v15139_v20 }
0x27ff   :  { %20321 = vrsqrt.f32 %v15128_v9 }
0x2809   :  { %v20322_v58 = vpop.eup %20321 }
0x280a   :  { %v15132_v44 = vmul.f32 %v20322_v58, %v15116_v1 }
0x280c   :  { %v15140_v60 = vmul.f32 %v16887_v15, %v15132_v44 }
0x280e   :  { %v15148_v31 = vadd.f32 %v16888_v61, %v15140_v60 }
0x2810   :  { %v15162_v47 = vrot.slane %v15148_v31, 7 }
0x2812   :  { %v15164_v26 = vsel %vm15163_vm7, %v15162_v47, %v15147_v18 }
0x2813   :  { %19185 = vmatmul.mubr.msk.f32.vlgmr.msra.gmra.mrb[46].mxu1 %vm187_vm2, %v15164_v26 }
0x28e6   :  { %v15233_v34 = vpop.f32.mrb[46].mxu1 }
0x28e7   :  { %v15234_v5 = vadd.f32 %v16889_v43, %v15233_v34  ;;  %v19186_v6 = vpop.f32.mrb[47].mxu1 }
0x28e9   :  { %v15237_v25 = vsub.f32 0.0, %v15234_v5 }
0x28eb   :  { %v15238_v30 = vmul.f32 1.442695, %v15237_v25 }
0x28ed   :  { %20323 = vpow2.f32 %v15238_v30 }
0x28f7   :  { %v20324_v32 = vpop.eup %20323 }
0x28f8   :  { %v15240_v62 = vadd.f32 1.0, %v20324_v32 }
0x28fa   :  { %20325 = vrcp.f32 %v15240_v62 }
0x2904   :  { %v20326_v40 = vpop.eup %20325 }
0x2905   :  { %15243 = vst.msk [vmem:[#allocation2] sm:$0x3] %vm15242_vm8, %v20326_v40 }
0x2906   :  { %20338 = shalt.err (!%p20335_p4)
}
0x2907   :  { %s20339_s14 = scalar_lea.hbm %s25155_s26, 32 }
0x2908   :  { %p20340_p5 = scmp.ne.s32.totalorder %s25155_s26, %s20339_s14  ;;  %p20343_p6 = scmp.lt.u32.totalorder %s20339_s14, %s25155_s26 }
0x290a   :  { %p20345_p7 = pnand %p20343_p6, %p20340_p5 }
0x290c   :  { %20348 = shalt.err (!%p20345_p7)
}
0x290d   :  { %15253 = dma.vmem_to_hbm [thread:$0]  %s15251_s23, 32, %s25155_s26, [#allocation3]  }
0x290e   :  { %20349 = dma.done.wait [#allocation3], 32  }
0x290f   :  { %20350 = vsyncadd [#allocation3], 4294967264 }
0x2910   :  { %15257 = vsyncpa [#allocation3], 1 }

</bundles_post_ra>
